<compile_context>
chip_gen: v6e
topology: v6e:2x2x1
jax: 0.10.0
libtpu: 0.0.40
codegen_flags: <defaults>
</compile_context>

<pallas_src>
import functools

import jax
import jax.numpy as jnp
from jax import lax
from jax.experimental import pallas as pl
from jax.experimental.pallas import tpu as pltpu

VMEM = pltpu.MemorySpace.VMEM
MXU_DTYPE = jnp.bfloat16          # matmul-operand dtype (f32 accumulation)


def _mm(a, b):
    """MXU matmul: bf16 operands, f32 accumulate."""
    return jnp.dot(a.astype(MXU_DTYPE), b.astype(MXU_DTYPE),
                   preferred_element_type=jnp.float32)


# ------------------------------ fused kernel ---------------------------------

def wtftp_kernel(x_ref, we1_ref, we2_ref, wih_enc_ref, whh_enc_ref,
                 wc1_ref, wc2r_ref, wa1t_ref, wa2t_ref, wconv_ref,
                 wih_dec_ref, whh_dec_ref, gamma_ref, beta_ref,
                 wout_ref, bout_ref,
                 scores_ref, coef_ref,
                 enc_seq, xp_buf, work_seq,
                 *, Bp, T, T_out, stride, pad, levels):
    """Everything is time-major flat: row = t*Bp + b (Bp = batch padded to 8).

    x: (T*Bp, n_inp); wih/whh: (.., Din, 4H) gate cols i|f|o|g;
    wc2r: (levels, 1, D/2) = comp[2] weight row; wa1t/wa2t: activate weights,
    transposed; wconv[lvl, k, ci, co] = torch conv weight[co, ci, k];
    wout: (levels, D, 128) lane-padded.
    Outputs: scores (levels, Bp, T) = E batch-major; coef (levels, T_out*Bp, 128).
    Scratch: enc_seq (T*Bp, D), xp_buf (T*Bp, 4D), work_seq (T*Bp, D)."""
    D = we2_ref.shape[1]
    H = D
    L = wih_enc_ref.shape[0]
    de_layers = wih_dec_ref.shape[1]
    K = wconv_ref.shape[1]

    def lstm_cell(gates, c_prev):
        # gate columns are i|f|o|g: one sigmoid over 3H lanes, one tanh over H.
        sig = jax.nn.sigmoid(gates[:, :3 * H])
        g_new = jnp.tanh(gates[:, 3 * H:])
        c_new = sig[:, H:2 * H] * c_prev + sig[:, :H] * g_new
        h_new = sig[:, 2 * H:3 * H] * jnp.tanh(c_new)
        return h_new, c_new

    # --- input embedding: Linear(n_inp->D/2) ReLU Linear(D/2->D) ReLU (no bias) ---
    h1 = jnp.maximum(_mm(x_ref[...], we1_ref[...]), 0.0)
    enc_seq[...] = jnp.maximum(_mm(h1, we2_ref[...]), 0.0)          # (T*Bp, D)

    # --- encoder LSTM (en_layers, bias=False), zero initial states -----------
    c = jnp.zeros((Bp, H), jnp.float32)
    for l in range(L):
        xp_buf[...] = _mm(enc_seq[...], wih_enc_ref[l])             # hoisted proj
        whh_l = whh_enc_ref[l]                                      # staged once
        h = jnp.zeros((Bp, H), jnp.float32)
        c = jnp.zeros((Bp, H), jnp.float32)
        for t in range(T):
            r = t * Bp
            h, c = lstm_cell(xp_buf[r:r + Bp, :] + _mm(h, whh_l), c)
            enc_seq[r:r + Bp, :] = h                                # layer output slab
    c_en = c                                                        # last layer final cell

    # --- per wavelet level: SE + conv attention + decoder + LN + out ---------
    for lvl in range(levels):
        en = enc_seq[...]                                           # (T*Bp, D)

        # EnhancedBlock comp: Linear(D->D/2,ReLU) -> Linear(D/2->1) (no bias)
        hc = jnp.maximum(_mm(en, wc1_ref[lvl]), 0.0)                # (T*Bp, D/2)
        s_col = jnp.sum(hc * wc2r_ref[lvl], axis=-1, keepdims=True)  # (T*Bp, 1) f32

        # EnhancedBlock activate, batch-major (Bp rows, time in lanes), exact f32.
        wa1t = wa1t_ref[lvl]                                        # (T, T/2)
        wa2t = wa2t_ref[lvl]                                        # (T/2, T)
        a_bm = jnp.zeros((Bp, T // 2), jnp.float32)
        for t in range(T):
            a_bm = a_bm + s_col[t * Bp:(t + 1) * Bp, :] * wa1t[t:t + 1, :]
        a_bm = jnp.maximum(a_bm, 0.0)
        e_lin = jnp.zeros((Bp, T), jnp.float32)
        for j in range(T // 2):
            e_lin = e_lin + a_bm[:, j:j + 1] * wa2t[j:j + 1, :]
        e_bm = jax.nn.sigmoid(e_lin)                                # (Bp, T) == E
        scores_ref[lvl] = e_bm

        # reweight (+ skip): rw = en * E + en, written per time row into work_seq
        for t in range(T):
            r = t * Bp
            work_seq[r:r + Bp, :] = en[r:r + Bp, :] * (e_bm[:, t:t + 1] + 1.0)

        # Conv1d(D->D, zeros pad, no bias) over time + ReLU -> work_seq[:T_out*Bp]
        rw = work_seq[...]
        yk = [_mm(rw, wconv_ref[lvl, k]) for k in range(K)]         # K x (T*Bp, D)
        for p_ in range(T_out):
            acc = None
            for k in range(K):
                j = p_ * stride - pad + k
                if 0 <= j < T:                                      # zero padding: skip tap
                    part = yk[k][j * Bp:(j + 1) * Bp, :]
                    acc = part if acc is None else acc + part
            if acc is None:
                acc = jnp.zeros((Bp, D), jnp.float32)
            work_seq[p_ * Bp:(p_ + 1) * Bp, :] = jnp.maximum(acc, 0.0)

        # decoder LSTM: h0 = 0 (all layers), c0[layer 0] = c_en[-1], rest 0
        n_rows = T_out * Bp
        for l in range(de_layers):
            xp_buf[0:n_rows, :] = _mm(work_seq[0:n_rows, :], wih_dec_ref[lvl, l])
            whh_l = whh_dec_ref[lvl, l]
            h = jnp.zeros((Bp, H), jnp.float32)
            c = c_en if l == 0 else jnp.zeros((Bp, H), jnp.float32)
            for t in range(T_out):
                r = t * Bp
                h, c = lstm_cell(xp_buf[r:r + Bp, :] + _mm(h, whh_l), c)
                work_seq[r:r + Bp, :] = h

        # LayerNorm(D) + output Linear(D -> n_oup, bias) padded to 128 lanes
        y = work_seq[0:n_rows, :]
        mu = jnp.mean(y, axis=-1, keepdims=True)
        yc = y - mu
        var = jnp.mean(yc * yc, axis=-1, keepdims=True)
        yn = yc * lax.rsqrt(var + 1e-5) * gamma_ref[lvl] + beta_ref[lvl]
        coef_ref[lvl] = _mm(yn, wout_ref[lvl]) + bout_ref[lvl]


def run_wtftp(x_flat, p, *, Bp, T, T_out, stride, pad):
    levels = p['wc1'].shape[0]
    D = p['we2'].shape[1]
    NP = p['wout_pad'].shape[-1]
    n_inp = x_flat.shape[1]
    L = p['wih_enc'].shape[0]
    de_layers = p['wih_dec'].shape[1]
    K = p['wconv'].shape[1]
    Dh = D // 2

    inputs = (x_flat, p['we1'], p['we2'], p['wih_enc'], p['whh_enc'],
              p['wc1'], p['wc2_row'], p['wa1t'], p['wa2t'], p['wconv'],
              p['wih_dec'], p['whh_dec'], p['gamma'], p['beta'],
              p['wout_pad'], p['bout_pad'])

    # rough cost hints for the XLA scheduler around this single custom call
    mm_elems = (T * Bp * n_inp * Dh + T * Bp * Dh * D
                + L * (T * Bp * D * 4 * D + T * Bp * D * 4 * D)
                + levels * (T * Bp * D * Dh + K * T * Bp * D * D
                            + de_layers * (2 * T_out * Bp * D * 4 * D)
                            + T_out * Bp * D * NP))
    flops = 2 * mm_elems
    transcendentals = (L * T + levels * de_layers * T_out) * Bp * 5 * D + levels * Bp * T
    bytes_accessed = (sum(int(a.size) * a.dtype.itemsize for a in inputs)
                      + (levels * Bp * T + levels * T_out * Bp * NP) * 4)

    kern = functools.partial(wtftp_kernel, Bp=Bp, T=T, T_out=T_out,
                             stride=stride, pad=pad, levels=levels)
    vspec = pl.BlockSpec(memory_space=VMEM)
    return pl.pallas_call(
        kern,
        out_shape=(jax.ShapeDtypeStruct((levels, Bp, T), jnp.float32),
                   jax.ShapeDtypeStruct((levels, T_out * Bp, NP), jnp.float32)),
        in_specs=[vspec] * len(inputs),
        out_specs=(vspec, vspec),
        scratch_shapes=[pltpu.VMEM((T * Bp, D), jnp.float32),       # enc_seq
                        pltpu.VMEM((T * Bp, 4 * D), jnp.float32),   # xp_buf
                        pltpu.VMEM((T * Bp, D), jnp.float32)],      # work_seq
        cost_estimate=pl.CostEstimate(flops=int(flops),
                                      transcendentals=int(transcendentals),
                                      bytes_accessed=int(bytes_accessed)),
    )(*inputs)


# ----------------------------------- params -----------------------------------

def make_params(key, n_inp, n_oup, his_step, D=64, en_layers=4, de_layers=1,
                maxlevel=1, kernel=2):
    """Random params in torch-equivalent layouts.
    Mapping from PyTorch: we*/wc1/wout = torch Linear weight.T; wc2 = comp[2]
    weight.T; wa1/wa2 = activate Linear weights as-is; wih/whh = torch LSTM
    weight_ih/hh.T with gate column order i|f|g|o; wconv[lvl, k, ci, co] =
    torch conv weight[co, ci, k]; gamma/beta = LayerNorm affine; bout = bias."""
    levels = maxlevel + 1
    T = his_step
    ks = iter(jax.random.split(key, 16))

    def r(shape, scale=0.1):
        return jax.random.normal(next(ks), shape, jnp.float32) * scale

    return {
        'we1': r((n_inp, D // 2)),
        'we2': r((D // 2, D)),
        'wih_enc': r((en_layers, D, 4 * D)),
        'whh_enc': r((en_layers, D, 4 * D)),
        'wc1': r((levels, D, D // 2)),
        'wc2': r((levels, D // 2, 1)),
        'wa1': r((levels, T // 2, T)),
        'wa2': r((levels, T, T // 2)),
        'wconv': r((levels, kernel, D, D)),
        'wih_dec': r((levels, de_layers, D, 4 * D)),
        'whh_dec': r((levels, de_layers, D, 4 * D)),
        'gamma': jnp.ones((levels, 1, D), jnp.float32),
        'beta': jnp.zeros((levels, 1, D), jnp.float32),
        'wout': r((levels, D, n_oup)),
        'bout': r((levels, 1, n_oup)),
    }


def prepare_params(params, *, n_lanes=128):
    """One-time host-side transforms: gate reorder i|f|g|o -> i|f|o|g, activate
    weight transposes, comp[2] weight as a lane row, output Linear padded to a
    lane-dense 128-wide slab, matmul weights cast to bf16."""
    D = params['we2'].shape[1]
    H = D
    n_oup = params['wout'].shape[-1]
    NP = max(n_lanes, ((n_oup + n_lanes - 1) // n_lanes) * n_lanes)

    def reorder(w):  # i|f|g|o -> i|f|o|g along the 4H column axis
        return jnp.concatenate([w[..., 0:H], w[..., H:2 * H],
                                w[..., 3 * H:4 * H], w[..., 2 * H:3 * H]], axis=-1)

    bf = lambda a: a.astype(MXU_DTYPE)
    wout_pad = jnp.pad(params['wout'], ((0, 0), (0, 0), (0, NP - n_oup)))
    bout_pad = jnp.pad(params['bout'], ((0, 0), (0, 0), (0, NP - n_oup)))
    return {
        'we1': bf(params['we1']),
        'we2': bf(params['we2']),
        'wih_enc': bf(reorder(params['wih_enc'])),
        'whh_enc': bf(reorder(params['whh_enc'])),
        'wc1': bf(params['wc1']),
        'wc2_row': jnp.transpose(params['wc2'], (0, 2, 1)),   # (levels, 1, D/2) f32
        'wa1t': jnp.transpose(params['wa1'], (0, 2, 1)),      # (levels, T, T/2) f32
        'wa2t': jnp.transpose(params['wa2'], (0, 2, 1)),      # (levels, T/2, T) f32
        'wconv': bf(params['wconv']),
        'wih_dec': bf(reorder(params['wih_dec'])),
        'whh_dec': bf(reorder(params['whh_dec'])),
        'gamma': params['gamma'],
        'beta': params['beta'],
        'wout_pad': bf(wout_pad),
        'bout_pad': bout_pad,
    }


# ------------------------------- WTFTP forward ---------------------------------

def wtftp_forward(inp, p, *, n_oup, conv_kernel, conv_stride, conv_pad):
    """inp: (B, T, n_inp) f32.  Returns (coef_set: list of (B, T_out, n_oup),
    all_scores: (B, levels, T)) — same as the PyTorch module (out_split=False).
    All levels share the same conv params (true for the maxlevel=1 defaults)."""
    B, T, n_inp = inp.shape
    Bp = ((B + 7) // 8) * 8                         # pad batch to sublane multiple
    levels = p['wc1'].shape[0]
    t_out = (T + 2 * conv_pad - conv_kernel) // conv_stride + 1

    x = jnp.pad(inp, ((0, Bp - B), (0, 0), (0, 0)))
    x_flat = jnp.transpose(x, (1, 0, 2)).reshape(T * Bp, n_inp)   # time-major flat

    scores, coef = run_wtftp(x_flat, p, Bp=Bp, T=T, T_out=t_out,
                             stride=conv_stride, pad=conv_pad)

    # scores: (levels, Bp, T) -> (B, levels, T)   [== torch.cat(weights, dim=1)]
    all_scores = jnp.transpose(scores[:, :B, :], (1, 0, 2))
    # coef: (levels, T_out*Bp, 128) -> list of (B, T_out, n_oup)
    coef4 = coef.reshape(levels, t_out, Bp, -1)[:, :, :B, :n_oup]
    coef_set = [jnp.transpose(coef4[i], (1, 0, 2)) for i in range(levels)]
    return coef_set, all_scores


# ------------------------------------ main --------------------------------------

if __name__ == "__main__":
    B, T, n_inp, n_oup = 2, 8, 4, 3            # his_step = 8
    D, en_layers, de_layers, maxlevel = 64, 4, 1, 1
    CONV_K, CONV_S, CONV_P = 2, 2, 1           # attn_conv_params[0] (both levels)
    # TODO(synk): maxlevel >= 2 with per-level differing conv params (different
    # per-level output lengths) and the out_split=True head are not covered by
    # this single fused kernel; not needed for the module defaults.

    key = jax.random.PRNGKey(0)
    k_inp, k_par = jax.random.split(key)
    inp = jax.random.normal(k_inp, (B, T, n_inp), jnp.float32)
    params = make_params(k_par, n_inp, n_oup, T, D=D, en_layers=en_layers,
                         de_layers=de_layers, maxlevel=maxlevel, kernel=CONV_K)
    prepped = prepare_params(params)

    fwd = jax.jit(functools.partial(wtftp_forward, n_oup=n_oup,
                                    conv_kernel=CONV_K, conv_stride=CONV_S,
                                    conv_pad=CONV_P))
    coef_set, all_scores = fwd(inp, prepped)
    coef_set = [jax.block_until_ready(c) for c in coef_set]
    all_scores = jax.block_until_ready(all_scores)

    t_out = (T + 2 * CONV_P - CONV_K) // CONV_S + 1
    assert len(coef_set) == maxlevel + 1
    assert all(c.shape == (B, t_out, n_oup) for c in coef_set)
    assert all_scores.shape == (B, maxlevel + 1, T)
    assert all(bool(jnp.all(jnp.isfinite(c))) for c in coef_set)
    assert bool(jnp.all(jnp.isfinite(all_scores)))
    print("KERNEL_OK")
</pallas_src>

<mosaic_0001>
module attributes {stable_mosaic.version = 11 : i64} {
  func.func @wtftp_kernel(%arg0: memref<64x4xf32, #tpu.memory_space<vmem>>, %arg1: memref<4x32xbf16, #tpu.memory_space<vmem>>, %arg2: memref<32x64xbf16, #tpu.memory_space<vmem>>, %arg3: memref<4x64x256xbf16, #tpu.memory_space<vmem>>, %arg4: memref<4x64x256xbf16, #tpu.memory_space<vmem>>, %arg5: memref<2x64x32xbf16, #tpu.memory_space<vmem>>, %arg6: memref<2x1x32xf32, #tpu.memory_space<vmem>>, %arg7: memref<2x8x4xf32, #tpu.memory_space<vmem>>, %arg8: memref<2x4x8xf32, #tpu.memory_space<vmem>>, %arg9: memref<2x2x64x64xbf16, #tpu.memory_space<vmem>>, %arg10: memref<2x1x64x256xbf16, #tpu.memory_space<vmem>>, %arg11: memref<2x1x64x256xbf16, #tpu.memory_space<vmem>>, %arg12: memref<2x1x64xf32, #tpu.memory_space<vmem>>, %arg13: memref<2x1x64xf32, #tpu.memory_space<vmem>>, %arg14: memref<2x64x128xbf16, #tpu.memory_space<vmem>>, %arg15: memref<2x1x128xf32, #tpu.memory_space<vmem>>, %arg16: memref<2x8x8xf32, #tpu.memory_space<vmem>>, %arg17: memref<2x40x128xf32, #tpu.memory_space<vmem>>, %arg18: memref<64x64xf32, #tpu.memory_space<vmem>>, %arg19: memref<64x256xf32, #tpu.memory_space<vmem>>, %arg20: memref<64x64xf32, #tpu.memory_space<vmem>>) attributes {dimension_semantics = [], scalar_prefetch = 0 : i64, scratch_operands = 3 : i64, tpu.core_type = #tpu.core_type<tc>} {
    %c0 = arith.constant 0 : index
    %c0_0 = arith.constant 0 : index
    %0 = vector.load %arg0[%c0, %c0_0] : memref<64x4xf32, #tpu.memory_space<vmem>>, vector<64x4xf32>
    %c0_1 = arith.constant 0 : index
    %c0_2 = arith.constant 0 : index
    %1 = vector.load %arg1[%c0_1, %c0_2] : memref<4x32xbf16, #tpu.memory_space<vmem>>, vector<4x32xbf16>
    %2 = arith.truncf %0 : vector<64x4xf32> to vector<64x4xbf16>
    %cst = arith.constant dense<0.000000e+00> : vector<64x32xf32>
    %3 = tpu.matmul %2, %1, %cst {dimension_numbers = #tpu.dot_dimension_numbers<[1], [0], [0], [1], [0, 0, 1, 1], [], []>} : vector<64x4xbf16>, vector<4x32xbf16>, vector<64x32xf32> -> vector<64x32xf32>
    %cst_3 = arith.constant 0.000000e+00 : f32
    %4 = vector.broadcast %cst_3 : f32 to vector<64x32xf32>
    %5 = arith.maximumf %3, %4 : vector<64x32xf32>
    %c0_4 = arith.constant 0 : index
    %c0_5 = arith.constant 0 : index
    %6 = vector.load %arg2[%c0_4, %c0_5] : memref<32x64xbf16, #tpu.memory_space<vmem>>, vector<32x64xbf16>
    %7 = arith.truncf %5 : vector<64x32xf32> to vector<64x32xbf16>
    %cst_6 = arith.constant dense<0.000000e+00> : vector<64x64xf32>
    %8 = tpu.matmul %7, %6, %cst_6 {dimension_numbers = #tpu.dot_dimension_numbers<[1], [0], [0], [1], [0, 0, 1, 1], [], []>} : vector<64x32xbf16>, vector<32x64xbf16>, vector<64x64xf32> -> vector<64x64xf32>
    %cst_7 = arith.constant 0.000000e+00 : f32
    %9 = vector.broadcast %cst_7 : f32 to vector<64x64xf32>
    %10 = arith.maximumf %8, %9 : vector<64x64xf32>
    %c0_8 = arith.constant 0 : index
    %c0_9 = arith.constant 0 : index
    %11 = vector.load %arg18[%c0_8, %c0_9] : memref<64x64xf32, #tpu.memory_space<vmem>>, vector<64x64xf32>
    tpu.vector_store %arg18[%c0_8, %c0_9], %10 {strides = array<i32>} : memref<64x64xf32, #tpu.memory_space<vmem>>, vector<64x64xf32>,
    %c0_10 = arith.constant 0 : index
    %c0_11 = arith.constant 0 : index
    %12 = vector.load %arg18[%c0_10, %c0_11] : memref<64x64xf32, #tpu.memory_space<vmem>>, vector<64x64xf32>
    %c0_12 = arith.constant 0 : index
    %c0_13 = arith.constant 0 : index
    %c0_14 = arith.constant 0 : index
    %13 = vector.load %arg3[%c0_12, %c0_13, %c0_14] : memref<4x64x256xbf16, #tpu.memory_space<vmem>>, vector<1x64x256xbf16>
    %14 = vector.shape_cast %13 : vector<1x64x256xbf16> to vector<64x256xbf16>
    %15 = arith.truncf %12 : vector<64x64xf32> to vector<64x64xbf16>
    %cst_15 = arith.constant dense<0.000000e+00> : vector<64x256xf32>
    %16 = tpu.matmul %15, %14, %cst_15 {dimension_numbers = #tpu.dot_dimension_numbers<[1], [0], [0], [1], [0, 0, 1, 1], [], []>} : vector<64x64xbf16>, vector<64x256xbf16>, vector<64x256xf32> -> vector<64x256xf32>
    %c0_16 = arith.constant 0 : index
    %c0_17 = arith.constant 0 : index
    %17 = vector.load %arg19[%c0_16, %c0_17] : memref<64x256xf32, #tpu.memory_space<vmem>>, vector<64x256xf32>
    tpu.vector_store %arg19[%c0_16, %c0_17], %16 {strides = array<i32>} : memref<64x256xf32, #tpu.memory_space<vmem>>, vector<64x256xf32>,
    %c0_18 = arith.constant 0 : index
    %c0_19 = arith.constant 0 : index
    %c0_20 = arith.constant 0 : index
    %18 = vector.load %arg4[%c0_18, %c0_19, %c0_20] : memref<4x64x256xbf16, #tpu.memory_space<vmem>>, vector<1x64x256xbf16>
    %19 = vector.shape_cast %18 : vector<1x64x256xbf16> to vector<64x256xbf16>
    %cst_21 = arith.constant 0.000000e+00 : f32
    %20 = vector.broadcast %cst_21 : f32 to vector<8x64xf32>
    %cst_22 = arith.constant 0.000000e+00 : f32
    %21 = vector.broadcast %cst_22 : f32 to vector<8x64xf32>
    %c0_23 = arith.constant 0 : index
    %c0_24 = arith.constant 0 : index
    %22 = vector.load %arg19[%c0_23, %c0_24] : memref<64x256xf32, #tpu.memory_space<vmem>>, vector<8x256xf32>
    %23 = arith.truncf %20 : vector<8x64xf32> to vector<8x64xbf16>
    %cst_25 = arith.constant dense<0.000000e+00> : vector<8x256xf32>
    %24 = tpu.matmul %23, %19, %cst_25 {dimension_numbers = #tpu.dot_dimension_numbers<[1], [0], [0], [1], [0, 0, 1, 1], [], []>} : vector<8x64xbf16>, vector<64x256xbf16>, vector<8x256xf32> -> vector<8x256xf32>
    %25 = arith.addf %22, %24 : vector<8x256xf32>
    %26 = vector.extract_strided_slice %25 {offsets = [0, 0], sizes = [8, 192], strides = [1, 1]} : vector<8x256xf32> to vector<8x192xf32>
    %27 = arith.negf %26 : vector<8x192xf32>
    %28 = math.exp %27 : vector<8x192xf32>
    %cst_26 = arith.constant 1.000000e+00 : f32
    %29 = vector.broadcast %cst_26 : f32 to vector<8x192xf32>
    %30 = arith.addf %29, %28 : vector<8x192xf32>
    %31 = arith.divf %29, %30 : vector<8x192xf32>
    %32 = vector.extract_strided_slice %25 {offsets = [0, 192], sizes = [8, 64], strides = [1, 1]} : vector<8x256xf32> to vector<8x64xf32>
    %33 = math.tanh %32 : vector<8x64xf32>
    %34 = vector.extract_strided_slice %31 {offsets = [0, 64], sizes = [8, 64], strides = [1, 1]} : vector<8x192xf32> to vector<8x64xf32>
    %35 = arith.mulf %34, %21 : vector<8x64xf32>
    %36 = vector.extract_strided_slice %31 {offsets = [0, 0], sizes = [8, 64], strides = [1, 1]} : vector<8x192xf32> to vector<8x64xf32>
    %37 = arith.mulf %36, %33 : vector<8x64xf32>
    %38 = arith.addf %35, %37 : vector<8x64xf32>
    %39 = vector.extract_strided_slice %31 {offsets = [0, 128], sizes = [8, 64], strides = [1, 1]} : vector<8x192xf32> to vector<8x64xf32>
    %40 = math.tanh %38 : vector<8x64xf32>
    %41 = arith.mulf %39, %40 : vector<8x64xf32>
    %c0_27 = arith.constant 0 : index
    %c0_28 = arith.constant 0 : index
    %42 = vector.load %arg18[%c0_27, %c0_28] : memref<64x64xf32, #tpu.memory_space<vmem>>, vector<8x64xf32>
    tpu.vector_store %arg18[%c0_27, %c0_28], %41 {strides = array<i32>} : memref<64x64xf32, #tpu.memory_space<vmem>>, vector<8x64xf32>,
    %c8 = arith.constant 8 : index
    %c0_29 = arith.constant 0 : index
    %43 = vector.load %arg19[%c8, %c0_29] : memref<64x256xf32, #tpu.memory_space<vmem>>, vector<8x256xf32>
    %44 = arith.truncf %41 : vector<8x64xf32> to vector<8x64xbf16>
    %cst_30 = arith.constant dense<0.000000e+00> : vector<8x256xf32>
    %45 = tpu.matmul %44, %19, %cst_30 {dimension_numbers = #tpu.dot_dimension_numbers<[1], [0], [0], [1], [0, 0, 1, 1], [], []>} : vector<8x64xbf16>, vector<64x256xbf16>, vector<8x256xf32> -> vector<8x256xf32>
    %46 = arith.addf %43, %45 : vector<8x256xf32>
    %47 = vector.extract_strided_slice %46 {offsets = [0, 0], sizes = [8, 192], strides = [1, 1]} : vector<8x256xf32> to vector<8x192xf32>
    %48 = arith.negf %47 : vector<8x192xf32>
    %49 = math.exp %48 : vector<8x192xf32>
    %cst_31 = arith.constant 1.000000e+00 : f32
    %50 = vector.broadcast %cst_31 : f32 to vector<8x192xf32>
    %51 = arith.addf %50, %49 : vector<8x192xf32>
    %52 = arith.divf %50, %51 : vector<8x192xf32>
    %53 = vector.extract_strided_slice %46 {offsets = [0, 192], sizes = [8, 64], strides = [1, 1]} : vector<8x256xf32> to vector<8x64xf32>
    %54 = math.tanh %53 : vector<8x64xf32>
    %55 = vector.extract_strided_slice %52 {offsets = [0, 64], sizes = [8, 64], strides = [1, 1]} : vector<8x192xf32> to vector<8x64xf32>
    %56 = arith.mulf %55, %38 : vector<8x64xf32>
    %57 = vector.extract_strided_slice %52 {offsets = [0, 0], sizes = [8, 64], strides = [1, 1]} : vector<8x192xf32> to vector<8x64xf32>
    %58 = arith.mulf %57, %54 : vector<8x64xf32>
    %59 = arith.addf %56, %58 : vector<8x64xf32>
    %60 = vector.extract_strided_slice %52 {offsets = [0, 128], sizes = [8, 64], strides = [1, 1]} : vector<8x192xf32> to vector<8x64xf32>
    %61 = math.tanh %59 : vector<8x64xf32>
    %62 = arith.mulf %60, %61 : vector<8x64xf32>
    %c8_32 = arith.constant 8 : index
    %c0_33 = arith.constant 0 : index
    %63 = vector.load %arg18[%c8_32, %c0_33] : memref<64x64xf32, #tpu.memory_space<vmem>>, vector<8x64xf32>
    tpu.vector_store %arg18[%c8_32, %c0_33], %62 {strides = array<i32>} : memref<64x64xf32, #tpu.memory_space<vmem>>, vector<8x64xf32>,
    %c16 = arith.constant 16 : index
    %c0_34 = arith.constant 0 : index
    %64 = vector.load %arg19[%c16, %c0_34] : memref<64x256xf32, #tpu.memory_space<vmem>>, vector<8x256xf32>
    %65 = arith.truncf %62 : vector<8x64xf32> to vector<8x64xbf16>
    %cst_35 = arith.constant dense<0.000000e+00> : vector<8x256xf32>
    %66 = tpu.matmul %65, %19, %cst_35 {dimension_numbers = #tpu.dot_dimension_numbers<[1], [0], [0], [1], [0, 0, 1, 1], [], []>} : vector<8x64xbf16>, vector<64x256xbf16>, vector<8x256xf32> -> vector<8x256xf32>
    %67 = arith.addf %64, %66 : vector<8x256xf32>
    %68 = vector.extract_strided_slice %67 {offsets = [0, 0], sizes = [8, 192], strides = [1, 1]} : vector<8x256xf32> to vector<8x192xf32>
    %69 = arith.negf %68 : vector<8x192xf32>
    %70 = math.exp %69 : vector<8x192xf32>
    %cst_36 = arith.constant 1.000000e+00 : f32
    %71 = vector.broadcast %cst_36 : f32 to vector<8x192xf32>
    %72 = arith.addf %71, %70 : vector<8x192xf32>
    %73 = arith.divf %71, %72 : vector<8x192xf32>
    %74 = vector.extract_strided_slice %67 {offsets = [0, 192], sizes = [8, 64], strides = [1, 1]} : vector<8x256xf32> to vector<8x64xf32>
    %75 = math.tanh %74 : vector<8x64xf32>
    %76 = vector.extract_strided_slice %73 {offsets = [0, 64], sizes = [8, 64], strides = [1, 1]} : vector<8x192xf32> to vector<8x64xf32>
    %77 = arith.mulf %76, %59 : vector<8x64xf32>
    %78 = vector.extract_strided_slice %73 {offsets = [0, 0], sizes = [8, 64], strides = [1, 1]} : vector<8x192xf32> to vector<8x64xf32>
    %79 = arith.mulf %78, %75 : vector<8x64xf32>
    %80 = arith.addf %77, %79 : vector<8x64xf32>
    %81 = vector.extract_strided_slice %73 {offsets = [0, 128], sizes = [8, 64], strides = [1, 1]} : vector<8x192xf32> to vector<8x64xf32>
    %82 = math.tanh %80 : vector<8x64xf32>
    %83 = arith.mulf %81, %82 : vector<8x64xf32>
    %c16_37 = arith.constant 16 : index
    %c0_38 = arith.constant 0 : index
    %84 = vector.load %arg18[%c16_37, %c0_38] : memref<64x64xf32, #tpu.memory_space<vmem>>, vector<8x64xf32>
    tpu.vector_store %arg18[%c16_37, %c0_38], %83 {strides = array<i32>} : memref<64x64xf32, #tpu.memory_space<vmem>>, vector<8x64xf32>,
    %c24 = arith.constant 24 : index
    %c0_39 = arith.constant 0 : index
    %85 = vector.load %arg19[%c24, %c0_39] : memref<64x256xf32, #tpu.memory_space<vmem>>, vector<8x256xf32>
    %86 = arith.truncf %83 : vector<8x64xf32> to vector<8x64xbf16>
    %cst_40 = arith.constant dense<0.000000e+00> : vector<8x256xf32>
    %87 = tpu.matmul %86, %19, %cst_40 {dimension_numbers = #tpu.dot_dimension_numbers<[1], [0], [0], [1], [0, 0, 1, 1], [], []>} : vector<8x64xbf16>, vector<64x256xbf16>, vector<8x256xf32> -> vector<8x256xf32>
    %88 = arith.addf %85, %87 : vector<8x256xf32>
    %89 = vector.extract_strided_slice %88 {offsets = [0, 0], sizes = [8, 192], strides = [1, 1]} : vector<8x256xf32> to vector<8x192xf32>
    %90 = arith.negf %89 : vector<8x192xf32>
    %91 = math.exp %90 : vector<8x192xf32>
    %cst_41 = arith.constant 1.000000e+00 : f32
    %92 = vector.broadcast %cst_41 : f32 to vector<8x192xf32>
    %93 = arith.addf %92, %91 : vector<8x192xf32>
    %94 = arith.divf %92, %93 : vector<8x192xf32>
    %95 = vector.extract_strided_slice %88 {offsets = [0, 192], sizes = [8, 64], strides = [1, 1]} : vector<8x256xf32> to vector<8x64xf32>
    %96 = math.tanh %95 : vector<8x64xf32>
    %97 = vector.extract_strided_slice %94 {offsets = [0, 64], sizes = [8, 64], strides = [1, 1]} : vector<8x192xf32> to vector<8x64xf32>
    %98 = arith.mulf %97, %80 : vector<8x64xf32>
    %99 = vector.extract_strided_slice %94 {offsets = [0, 0], sizes = [8, 64], strides = [1, 1]} : vector<8x192xf32> to vector<8x64xf32>
    %100 = arith.mulf %99, %96 : vector<8x64xf32>
    %101 = arith.addf %98, %100 : vector<8x64xf32>
    %102 = vector.extract_strided_slice %94 {offsets = [0, 128], sizes = [8, 64], strides = [1, 1]} : vector<8x192xf32> to vector<8x64xf32>
    %103 = math.tanh %101 : vector<8x64xf32>
    %104 = arith.mulf %102, %103 : vector<8x64xf32>
    %c24_42 = arith.constant 24 : index
    %c0_43 = arith.constant 0 : index
    %105 = vector.load %arg18[%c24_42, %c0_43] : memref<64x64xf32, #tpu.memory_space<vmem>>, vector<8x64xf32>
    tpu.vector_store %arg18[%c24_42, %c0_43], %104 {strides = array<i32>} : memref<64x64xf32, #tpu.memory_space<vmem>>, vector<8x64xf32>,
    %c32 = arith.constant 32 : index
    %c0_44 = arith.constant 0 : index
    %106 = vector.load %arg19[%c32, %c0_44] : memref<64x256xf32, #tpu.memory_space<vmem>>, vector<8x256xf32>
    %107 = arith.truncf %104 : vector<8x64xf32> to vector<8x64xbf16>
    %cst_45 = arith.constant dense<0.000000e+00> : vector<8x256xf32>
    %108 = tpu.matmul %107, %19, %cst_45 {dimension_numbers = #tpu.dot_dimension_numbers<[1], [0], [0], [1], [0, 0, 1, 1], [], []>} : vector<8x64xbf16>, vector<64x256xbf16>, vector<8x256xf32> -> vector<8x256xf32>
    %109 = arith.addf %106, %108 : vector<8x256xf32>
    %110 = vector.extract_strided_slice %109 {offsets = [0, 0], sizes = [8, 192], strides = [1, 1]} : vector<8x256xf32> to vector<8x192xf32>
    %111 = arith.negf %110 : vector<8x192xf32>
    %112 = math.exp %111 : vector<8x192xf32>
    %cst_46 = arith.constant 1.000000e+00 : f32
    %113 = vector.broadcast %cst_46 : f32 to vector<8x192xf32>
    %114 = arith.addf %113, %112 : vector<8x192xf32>
    %115 = arith.divf %113, %114 : vector<8x192xf32>
    %116 = vector.extract_strided_slice %109 {offsets = [0, 192], sizes = [8, 64], strides = [1, 1]} : vector<8x256xf32> to vector<8x64xf32>
    %117 = math.tanh %116 : vector<8x64xf32>
    %118 = vector.extract_strided_slice %115 {offsets = [0, 64], sizes = [8, 64], strides = [1, 1]} : vector<8x192xf32> to vector<8x64xf32>
    %119 = arith.mulf %118, %101 : vector<8x64xf32>
    %120 = vector.extract_strided_slice %115 {offsets = [0, 0], sizes = [8, 64], strides = [1, 1]} : vector<8x192xf32> to vector<8x64xf32>
    %121 = arith.mulf %120, %117 : vector<8x64xf32>
    %122 = arith.addf %119, %121 : vector<8x64xf32>
    %123 = vector.extract_strided_slice %115 {offsets = [0, 128], sizes = [8, 64], strides = [1, 1]} : vector<8x192xf32> to vector<8x64xf32>
    %124 = math.tanh %122 : vector<8x64xf32>
    %125 = arith.mulf %123, %124 : vector<8x64xf32>
    %c32_47 = arith.constant 32 : index
    %c0_48 = arith.constant 0 : index
    %126 = vector.load %arg18[%c32_47, %c0_48] : memref<64x64xf32, #tpu.memory_space<vmem>>, vector<8x64xf32>
    tpu.vector_store %arg18[%c32_47, %c0_48], %125 {strides = array<i32>} : memref<64x64xf32, #tpu.memory_space<vmem>>, vector<8x64xf32>,
    %c40 = arith.constant 40 : index
    %c0_49 = arith.constant 0 : index
    %127 = vector.load %arg19[%c40, %c0_49] : memref<64x256xf32, #tpu.memory_space<vmem>>, vector<8x256xf32>
    %128 = arith.truncf %125 : vector<8x64xf32> to vector<8x64xbf16>
    %cst_50 = arith.constant dense<0.000000e+00> : vector<8x256xf32>
    %129 = tpu.matmul %128, %19, %cst_50 {dimension_numbers = #tpu.dot_dimension_numbers<[1], [0], [0], [1], [0, 0, 1, 1], [], []>} : vector<8x64xbf16>, vector<64x256xbf16>, vector<8x256xf32> -> vector<8x256xf32>
    %130 = arith.addf %127, %129 : vector<8x256xf32>
    %131 = vector.extract_strided_slice %130 {offsets = [0, 0], sizes = [8, 192], strides = [1, 1]} : vector<8x256xf32> to vector<8x192xf32>
    %132 = arith.negf %131 : vector<8x192xf32>
    %133 = math.exp %132 : vector<8x192xf32>
    %cst_51 = arith.constant 1.000000e+00 : f32
    %134 = vector.broadcast %cst_51 : f32 to vector<8x192xf32>
    %135 = arith.addf %134, %133 : vector<8x192xf32>
    %136 = arith.divf %134, %135 : vector<8x192xf32>
    %137 = vector.extract_strided_slice %130 {offsets = [0, 192], sizes = [8, 64], strides = [1, 1]} : vector<8x256xf32> to vector<8x64xf32>
    %138 = math.tanh %137 : vector<8x64xf32>
    %139 = vector.extract_strided_slice %136 {offsets = [0, 64], sizes = [8, 64], strides = [1, 1]} : vector<8x192xf32> to vector<8x64xf32>
    %140 = arith.mulf %139, %122 : vector<8x64xf32>
    %141 = vector.extract_strided_slice %136 {offsets = [0, 0], sizes = [8, 64], strides = [1, 1]} : vector<8x192xf32> to vector<8x64xf32>
    %142 = arith.mulf %141, %138 : vector<8x64xf32>
    %143 = arith.addf %140, %142 : vector<8x64xf32>
    %144 = vector.extract_strided_slice %136 {offsets = [0, 128], sizes = [8, 64], strides = [1, 1]} : vector<8x192xf32> to vector<8x64xf32>
    %145 = math.tanh %143 : vector<8x64xf32>
    %146 = arith.mulf %144, %145 : vector<8x64xf32>
    %c40_52 = arith.constant 40 : index
    %c0_53 = arith.constant 0 : index
    %147 = vector.load %arg18[%c40_52, %c0_53] : memref<64x64xf32, #tpu.memory_space<vmem>>, vector<8x64xf32>
    tpu.vector_store %arg18[%c40_52, %c0_53], %146 {strides = array<i32>} : memref<64x64xf32, #tpu.memory_space<vmem>>, vector<8x64xf32>,
    %c48 = arith.constant 48 : index
    %c0_54 = arith.constant 0 : index
    %148 = vector.load %arg19[%c48, %c0_54] : memref<64x256xf32, #tpu.memory_space<vmem>>, vector<8x256xf32>
    %149 = arith.truncf %146 : vector<8x64xf32> to vector<8x64xbf16>
    %cst_55 = arith.constant dense<0.000000e+00> : vector<8x256xf32>
    %150 = tpu.matmul %149, %19, %cst_55 {dimension_numbers = #tpu.dot_dimension_numbers<[1], [0], [0], [1], [0, 0, 1, 1], [], []>} : vector<8x64xbf16>, vector<64x256xbf16>, vector<8x256xf32> -> vector<8x256xf32>
    %151 = arith.addf %148, %150 : vector<8x256xf32>
    %152 = vector.extract_strided_slice %151 {offsets = [0, 0], sizes = [8, 192], strides = [1, 1]} : vector<8x256xf32> to vector<8x192xf32>
    %153 = arith.negf %152 : vector<8x192xf32>
    %154 = math.exp %153 : vector<8x192xf32>
    %cst_56 = arith.constant 1.000000e+00 : f32
    %155 = vector.broadcast %cst_56 : f32 to vector<8x192xf32>
    %156 = arith.addf %155, %154 : vector<8x192xf32>
    %157 = arith.divf %155, %156 : vector<8x192xf32>
    %158 = vector.extract_strided_slice %151 {offsets = [0, 192], sizes = [8, 64], strides = [1, 1]} : vector<8x256xf32> to vector<8x64xf32>
    %159 = math.tanh %158 : vector<8x64xf32>
    %160 = vector.extract_strided_slice %157 {offsets = [0, 64], sizes = [8, 64], strides = [1, 1]} : vector<8x192xf32> to vector<8x64xf32>
    %161 = arith.mulf %160, %143 : vector<8x64xf32>
    %162 = vector.extract_strided_slice %157 {offsets = [0, 0], sizes = [8, 64], strides = [1, 1]} : vector<8x192xf32> to vector<8x64xf32>
    %163 = arith.mulf %162, %159 : vector<8x64xf32>
    %164 = arith.addf %161, %163 : vector<8x64xf32>
    %165 = vector.extract_strided_slice %157 {offsets = [0, 128], sizes = [8, 64], strides = [1, 1]} : vector<8x192xf32> to vector<8x64xf32>
    %166 = math.tanh %164 : vector<8x64xf32>
    %167 = arith.mulf %165, %166 : vector<8x64xf32>
    %c48_57 = arith.constant 48 : index
    %c0_58 = arith.constant 0 : index
    %168 = vector.load %arg18[%c48_57, %c0_58] : memref<64x64xf32, #tpu.memory_space<vmem>>, vector<8x64xf32>
    tpu.vector_store %arg18[%c48_57, %c0_58], %167 {strides = array<i32>} : memref<64x64xf32, #tpu.memory_space<vmem>>, vector<8x64xf32>,
    %c56 = arith.constant 56 : index
    %c0_59 = arith.constant 0 : index
    %169 = vector.load %arg19[%c56, %c0_59] : memref<64x256xf32, #tpu.memory_space<vmem>>, vector<8x256xf32>
    %170 = arith.truncf %167 : vector<8x64xf32> to vector<8x64xbf16>
    %cst_60 = arith.constant dense<0.000000e+00> : vector<8x256xf32>
    %171 = tpu.matmul %170, %19, %cst_60 {dimension_numbers = #tpu.dot_dimension_numbers<[1], [0], [0], [1], [0, 0, 1, 1], [], []>} : vector<8x64xbf16>, vector<64x256xbf16>, vector<8x256xf32> -> vector<8x256xf32>
    %172 = arith.addf %169, %171 : vector<8x256xf32>
    %173 = vector.extract_strided_slice %172 {offsets = [0, 0], sizes = [8, 192], strides = [1, 1]} : vector<8x256xf32> to vector<8x192xf32>
    %174 = arith.negf %173 : vector<8x192xf32>
    %175 = math.exp %174 : vector<8x192xf32>
    %cst_61 = arith.constant 1.000000e+00 : f32
    %176 = vector.broadcast %cst_61 : f32 to vector<8x192xf32>
    %177 = arith.addf %176, %175 : vector<8x192xf32>
    %178 = arith.divf %176, %177 : vector<8x192xf32>
    %179 = vector.extract_strided_slice %172 {offsets = [0, 192], sizes = [8, 64], strides = [1, 1]} : vector<8x256xf32> to vector<8x64xf32>
    %180 = math.tanh %179 : vector<8x64xf32>
    %181 = vector.extract_strided_slice %178 {offsets = [0, 64], sizes = [8, 64], strides = [1, 1]} : vector<8x192xf32> to vector<8x64xf32>
    %182 = arith.mulf %181, %164 : vector<8x64xf32>
    %183 = vector.extract_strided_slice %178 {offsets = [0, 0], sizes = [8, 64], strides = [1, 1]} : vector<8x192xf32> to vector<8x64xf32>
    %184 = arith.mulf %183, %180 : vector<8x64xf32>
    %185 = arith.addf %182, %184 : vector<8x64xf32>
    %186 = vector.extract_strided_slice %178 {offsets = [0, 128], sizes = [8, 64], strides = [1, 1]} : vector<8x192xf32> to vector<8x64xf32>
    %187 = math.tanh %185 : vector<8x64xf32>
    %188 = arith.mulf %186, %187 : vector<8x64xf32>
    %c56_62 = arith.constant 56 : index
    %c0_63 = arith.constant 0 : index
    %189 = vector.load %arg18[%c56_62, %c0_63] : memref<64x64xf32, #tpu.memory_space<vmem>>, vector<8x64xf32>
    tpu.vector_store %arg18[%c56_62, %c0_63], %188 {strides = array<i32>} : memref<64x64xf32, #tpu.memory_space<vmem>>, vector<8x64xf32>,
    %c0_64 = arith.constant 0 : index
    %c0_65 = arith.constant 0 : index
    %190 = vector.load %arg18[%c0_64, %c0_65] : memref<64x64xf32, #tpu.memory_space<vmem>>, vector<64x64xf32>
    %c1 = arith.constant 1 : index
    %c0_66 = arith.constant 0 : index
    %c0_67 = arith.constant 0 : index
    %191 = vector.load %arg3[%c1, %c0_66, %c0_67] : memref<4x64x256xbf16, #tpu.memory_space<vmem>>, vector<1x64x256xbf16>
    %192 = vector.shape_cast %191 : vector<1x64x256xbf16> to vector<64x256xbf16>
    %193 = arith.truncf %190 : vector<64x64xf32> to vector<64x64xbf16>
    %cst_68 = arith.constant dense<0.000000e+00> : vector<64x256xf32>
    %194 = tpu.matmul %193, %192, %cst_68 {dimension_numbers = #tpu.dot_dimension_numbers<[1], [0], [0], [1], [0, 0, 1, 1], [], []>} : vector<64x64xbf16>, vector<64x256xbf16>, vector<64x256xf32> -> vector<64x256xf32>
    %c0_69 = arith.constant 0 : index
    %c0_70 = arith.constant 0 : index
    %195 = vector.load %arg19[%c0_69, %c0_70] : memref<64x256xf32, #tpu.memory_space<vmem>>, vector<64x256xf32>
    tpu.vector_store %arg19[%c0_69, %c0_70], %194 {strides = array<i32>} : memref<64x256xf32, #tpu.memory_space<vmem>>, vector<64x256xf32>,
    %c1_71 = arith.constant 1 : index
    %c0_72 = arith.constant 0 : index
    %c0_73 = arith.constant 0 : index
    %196 = vector.load %arg4[%c1_71, %c0_72, %c0_73] : memref<4x64x256xbf16, #tpu.memory_space<vmem>>, vector<1x64x256xbf16>
    %197 = vector.shape_cast %196 : vector<1x64x256xbf16> to vector<64x256xbf16>
    %cst_74 = arith.constant 0.000000e+00 : f32
    %198 = vector.broadcast %cst_74 : f32 to vector<8x64xf32>
    %cst_75 = arith.constant 0.000000e+00 : f32
    %199 = vector.broadcast %cst_75 : f32 to vector<8x64xf32>
    %c0_76 = arith.constant 0 : index
    %c0_77 = arith.constant 0 : index
    %200 = vector.load %arg19[%c0_76, %c0_77] : memref<64x256xf32, #tpu.memory_space<vmem>>, vector<8x256xf32>
    %201 = arith.truncf %198 : vector<8x64xf32> to vector<8x64xbf16>
    %cst_78 = arith.constant dense<0.000000e+00> : vector<8x256xf32>
    %202 = tpu.matmul %201, %197, %cst_78 {dimension_numbers = #tpu.dot_dimension_numbers<[1], [0], [0], [1], [0, 0, 1, 1], [], []>} : vector<8x64xbf16>, vector<64x256xbf16>, vector<8x256xf32> -> vector<8x256xf32>
    %203 = arith.addf %200, %202 : vector<8x256xf32>
    %204 = vector.extract_strided_slice %203 {offsets = [0, 0], sizes = [8, 192], strides = [1, 1]} : vector<8x256xf32> to vector<8x192xf32>
    %205 = arith.negf %204 : vector<8x192xf32>
    %206 = math.exp %205 : vector<8x192xf32>
    %cst_79 = arith.constant 1.000000e+00 : f32
    %207 = vector.broadcast %cst_79 : f32 to vector<8x192xf32>
    %208 = arith.addf %207, %206 : vector<8x192xf32>
    %209 = arith.divf %207, %208 : vector<8x192xf32>
    %210 = vector.extract_strided_slice %203 {offsets = [0, 192], sizes = [8, 64], strides = [1, 1]} : vector<8x256xf32> to vector<8x64xf32>
    %211 = math.tanh %210 : vector<8x64xf32>
    %212 = vector.extract_strided_slice %209 {offsets = [0, 64], sizes = [8, 64], strides = [1, 1]} : vector<8x192xf32> to vector<8x64xf32>
    %213 = arith.mulf %212, %199 : vector<8x64xf32>
    %214 = vector.extract_strided_slice %209 {offsets = [0, 0], sizes = [8, 64], strides = [1, 1]} : vector<8x192xf32> to vector<8x64xf32>
    %215 = arith.mulf %214, %211 : vector<8x64xf32>
    %216 = arith.addf %213, %215 : vector<8x64xf32>
    %217 = vector.extract_strided_slice %209 {offsets = [0, 128], sizes = [8, 64], strides = [1, 1]} : vector<8x192xf32> to vector<8x64xf32>
    %218 = math.tanh %216 : vector<8x64xf32>
    %219 = arith.mulf %217, %218 : vector<8x64xf32>
    %c0_80 = arith.constant 0 : index
    %c0_81 = arith.constant 0 : index
    %220 = vector.load %arg18[%c0_80, %c0_81] : memref<64x64xf32, #tpu.memory_space<vmem>>, vector<8x64xf32>
    tpu.vector_store %arg18[%c0_80, %c0_81], %219 {strides = array<i32>} : memref<64x64xf32, #tpu.memory_space<vmem>>, vector<8x64xf32>,
    %c8_82 = arith.constant 8 : index
    %c0_83 = arith.constant 0 : index
    %221 = vector.load %arg19[%c8_82, %c0_83] : memref<64x256xf32, #tpu.memory_space<vmem>>, vector<8x256xf32>
    %222 = arith.truncf %219 : vector<8x64xf32> to vector<8x64xbf16>
    %cst_84 = arith.constant dense<0.000000e+00> : vector<8x256xf32>
    %223 = tpu.matmul %222, %197, %cst_84 {dimension_numbers = #tpu.dot_dimension_numbers<[1], [0], [0], [1], [0, 0, 1, 1], [], []>} : vector<8x64xbf16>, vector<64x256xbf16>, vector<8x256xf32> -> vector<8x256xf32>
    %224 = arith.addf %221, %223 : vector<8x256xf32>
    %225 = vector.extract_strided_slice %224 {offsets = [0, 0], sizes = [8, 192], strides = [1, 1]} : vector<8x256xf32> to vector<8x192xf32>
    %226 = arith.negf %225 : vector<8x192xf32>
    %227 = math.exp %226 : vector<8x192xf32>
    %cst_85 = arith.constant 1.000000e+00 : f32
    %228 = vector.broadcast %cst_85 : f32 to vector<8x192xf32>
    %229 = arith.addf %228, %227 : vector<8x192xf32>
    %230 = arith.divf %228, %229 : vector<8x192xf32>
    %231 = vector.extract_strided_slice %224 {offsets = [0, 192], sizes = [8, 64], strides = [1, 1]} : vector<8x256xf32> to vector<8x64xf32>
    %232 = math.tanh %231 : vector<8x64xf32>
    %233 = vector.extract_strided_slice %230 {offsets = [0, 64], sizes = [8, 64], strides = [1, 1]} : vector<8x192xf32> to vector<8x64xf32>
    %234 = arith.mulf %233, %216 : vector<8x64xf32>
    %235 = vector.extract_strided_slice %230 {offsets = [0, 0], sizes = [8, 64], strides = [1, 1]} : vector<8x192xf32> to vector<8x64xf32>
    %236 = arith.mulf %235, %232 : vector<8x64xf32>
    %237 = arith.addf %234, %236 : vector<8x64xf32>
    %238 = vector.extract_strided_slice %230 {offsets = [0, 128], sizes = [8, 64], strides = [1, 1]} : vector<8x192xf32> to vector<8x64xf32>
    %239 = math.tanh %237 : vector<8x64xf32>
    %240 = arith.mulf %238, %239 : vector<8x64xf32>
    %c8_86 = arith.constant 8 : index
    %c0_87 = arith.constant 0 : index
    %241 = vector.load %arg18[%c8_86, %c0_87] : memref<64x64xf32, #tpu.memory_space<vmem>>, vector<8x64xf32>
    tpu.vector_store %arg18[%c8_86, %c0_87], %240 {strides = array<i32>} : memref<64x64xf32, #tpu.memory_space<vmem>>, vector<8x64xf32>,
    %c16_88 = arith.constant 16 : index
    %c0_89 = arith.constant 0 : index
    %242 = vector.load %arg19[%c16_88, %c0_89] : memref<64x256xf32, #tpu.memory_space<vmem>>, vector<8x256xf32>
    %243 = arith.truncf %240 : vector<8x64xf32> to vector<8x64xbf16>
    %cst_90 = arith.constant dense<0.000000e+00> : vector<8x256xf32>
    %244 = tpu.matmul %243, %197, %cst_90 {dimension_numbers = #tpu.dot_dimension_numbers<[1], [0], [0], [1], [0, 0, 1, 1], [], []>} : vector<8x64xbf16>, vector<64x256xbf16>, vector<8x256xf32> -> vector<8x256xf32>
    %245 = arith.addf %242, %244 : vector<8x256xf32>
    %246 = vector.extract_strided_slice %245 {offsets = [0, 0], sizes = [8, 192], strides = [1, 1]} : vector<8x256xf32> to vector<8x192xf32>
    %247 = arith.negf %246 : vector<8x192xf32>
    %248 = math.exp %247 : vector<8x192xf32>
    %cst_91 = arith.constant 1.000000e+00 : f32
    %249 = vector.broadcast %cst_91 : f32 to vector<8x192xf32>
    %250 = arith.addf %249, %248 : vector<8x192xf32>
    %251 = arith.divf %249, %250 : vector<8x192xf32>
    %252 = vector.extract_strided_slice %245 {offsets = [0, 192], sizes = [8, 64], strides = [1, 1]} : vector<8x256xf32> to vector<8x64xf32>
    %253 = math.tanh %252 : vector<8x64xf32>
    %254 = vector.extract_strided_slice %251 {offsets = [0, 64], sizes = [8, 64], strides = [1, 1]} : vector<8x192xf32> to vector<8x64xf32>
    %255 = arith.mulf %254, %237 : vector<8x64xf32>
    %256 = vector.extract_strided_slice %251 {offsets = [0, 0], sizes = [8, 64], strides = [1, 1]} : vector<8x192xf32> to vector<8x64xf32>
    %257 = arith.mulf %256, %253 : vector<8x64xf32>
    %258 = arith.addf %255, %257 : vector<8x64xf32>
    %259 = vector.extract_strided_slice %251 {offsets = [0, 128], sizes = [8, 64], strides = [1, 1]} : vector<8x192xf32> to vector<8x64xf32>
    %260 = math.tanh %258 : vector<8x64xf32>
    %261 = arith.mulf %259, %260 : vector<8x64xf32>
    %c16_92 = arith.constant 16 : index
    %c0_93 = arith.constant 0 : index
    %262 = vector.load %arg18[%c16_92, %c0_93] : memref<64x64xf32, #tpu.memory_space<vmem>>, vector<8x64xf32>
    tpu.vector_store %arg18[%c16_92, %c0_93], %261 {strides = array<i32>} : memref<64x64xf32, #tpu.memory_space<vmem>>, vector<8x64xf32>,
    %c24_94 = arith.constant 24 : index
    %c0_95 = arith.constant 0 : index
    %263 = vector.load %arg19[%c24_94, %c0_95] : memref<64x256xf32, #tpu.memory_space<vmem>>, vector<8x256xf32>
    %264 = arith.truncf %261 : vector<8x64xf32> to vector<8x64xbf16>
    %cst_96 = arith.constant dense<0.000000e+00> : vector<8x256xf32>
    %265 = tpu.matmul %264, %197, %cst_96 {dimension_numbers = #tpu.dot_dimension_numbers<[1], [0], [0], [1], [0, 0, 1, 1], [], []>} : vector<8x64xbf16>, vector<64x256xbf16>, vector<8x256xf32> -> vector<8x256xf32>
    %266 = arith.addf %263, %265 : vector<8x256xf32>
    %267 = vector.extract_strided_slice %266 {offsets = [0, 0], sizes = [8, 192], strides = [1, 1]} : vector<8x256xf32> to vector<8x192xf32>
    %268 = arith.negf %267 : vector<8x192xf32>
    %269 = math.exp %268 : vector<8x192xf32>
    %cst_97 = arith.constant 1.000000e+00 : f32
    %270 = vector.broadcast %cst_97 : f32 to vector<8x192xf32>
    %271 = arith.addf %270, %269 : vector<8x192xf32>
    %272 = arith.divf %270, %271 : vector<8x192xf32>
    %273 = vector.extract_strided_slice %266 {offsets = [0, 192], sizes = [8, 64], strides = [1, 1]} : vector<8x256xf32> to vector<8x64xf32>
    %274 = math.tanh %273 : vector<8x64xf32>
    %275 = vector.extract_strided_slice %272 {offsets = [0, 64], sizes = [8, 64], strides = [1, 1]} : vector<8x192xf32> to vector<8x64xf32>
    %276 = arith.mulf %275, %258 : vector<8x64xf32>
    %277 = vector.extract_strided_slice %272 {offsets = [0, 0], sizes = [8, 64], strides = [1, 1]} : vector<8x192xf32> to vector<8x64xf32>
    %278 = arith.mulf %277, %274 : vector<8x64xf32>
    %279 = arith.addf %276, %278 : vector<8x64xf32>
    %280 = vector.extract_strided_slice %272 {offsets = [0, 128], sizes = [8, 64], strides = [1, 1]} : vector<8x192xf32> to vector<8x64xf32>
    %281 = math.tanh %279 : vector<8x64xf32>
    %282 = arith.mulf %280, %281 : vector<8x64xf32>
    %c24_98 = arith.constant 24 : index
    %c0_99 = arith.constant 0 : index
    %283 = vector.load %arg18[%c24_98, %c0_99] : memref<64x64xf32, #tpu.memory_space<vmem>>, vector<8x64xf32>
    tpu.vector_store %arg18[%c24_98, %c0_99], %282 {strides = array<i32>} : memref<64x64xf32, #tpu.memory_space<vmem>>, vector<8x64xf32>,
    %c32_100 = arith.constant 32 : index
    %c0_101 = arith.constant 0 : index
    %284 = vector.load %arg19[%c32_100, %c0_101] : memref<64x256xf32, #tpu.memory_space<vmem>>, vector<8x256xf32>
    %285 = arith.truncf %282 : vector<8x64xf32> to vector<8x64xbf16>
    %cst_102 = arith.constant dense<0.000000e+00> : vector<8x256xf32>
    %286 = tpu.matmul %285, %197, %cst_102 {dimension_numbers = #tpu.dot_dimension_numbers<[1], [0], [0], [1], [0, 0, 1, 1], [], []>} : vector<8x64xbf16>, vector<64x256xbf16>, vector<8x256xf32> -> vector<8x256xf32>
    %287 = arith.addf %284, %286 : vector<8x256xf32>
    %288 = vector.extract_strided_slice %287 {offsets = [0, 0], sizes = [8, 192], strides = [1, 1]} : vector<8x256xf32> to vector<8x192xf32>
    %289 = arith.negf %288 : vector<8x192xf32>
    %290 = math.exp %289 : vector<8x192xf32>
    %cst_103 = arith.constant 1.000000e+00 : f32
    %291 = vector.broadcast %cst_103 : f32 to vector<8x192xf32>
    %292 = arith.addf %291, %290 : vector<8x192xf32>
    %293 = arith.divf %291, %292 : vector<8x192xf32>
    %294 = vector.extract_strided_slice %287 {offsets = [0, 192], sizes = [8, 64], strides = [1, 1]} : vector<8x256xf32> to vector<8x64xf32>
    %295 = math.tanh %294 : vector<8x64xf32>
    %296 = vector.extract_strided_slice %293 {offsets = [0, 64], sizes = [8, 64], strides = [1, 1]} : vector<8x192xf32> to vector<8x64xf32>
    %297 = arith.mulf %296, %279 : vector<8x64xf32>
    %298 = vector.extract_strided_slice %293 {offsets = [0, 0], sizes = [8, 64], strides = [1, 1]} : vector<8x192xf32> to vector<8x64xf32>
    %299 = arith.mulf %298, %295 : vector<8x64xf32>
    %300 = arith.addf %297, %299 : vector<8x64xf32>
    %301 = vector.extract_strided_slice %293 {offsets = [0, 128], sizes = [8, 64], strides = [1, 1]} : vector<8x192xf32> to vector<8x64xf32>
    %302 = math.tanh %300 : vector<8x64xf32>
    %303 = arith.mulf %301, %302 : vector<8x64xf32>
    %c32_104 = arith.constant 32 : index
    %c0_105 = arith.constant 0 : index
    %304 = vector.load %arg18[%c32_104, %c0_105] : memref<64x64xf32, #tpu.memory_space<vmem>>, vector<8x64xf32>
    tpu.vector_store %arg18[%c32_104, %c0_105], %303 {strides = array<i32>} : memref<64x64xf32, #tpu.memory_space<vmem>>, vector<8x64xf32>,
    %c40_106 = arith.constant 40 : index
    %c0_107 = arith.constant 0 : index
    %305 = vector.load %arg19[%c40_106, %c0_107] : memref<64x256xf32, #tpu.memory_space<vmem>>, vector<8x256xf32>
    %306 = arith.truncf %303 : vector<8x64xf32> to vector<8x64xbf16>
    %cst_108 = arith.constant dense<0.000000e+00> : vector<8x256xf32>
    %307 = tpu.matmul %306, %197, %cst_108 {dimension_numbers = #tpu.dot_dimension_numbers<[1], [0], [0], [1], [0, 0, 1, 1], [], []>} : vector<8x64xbf16>, vector<64x256xbf16>, vector<8x256xf32> -> vector<8x256xf32>
    %308 = arith.addf %305, %307 : vector<8x256xf32>
    %309 = vector.extract_strided_slice %308 {offsets = [0, 0], sizes = [8, 192], strides = [1, 1]} : vector<8x256xf32> to vector<8x192xf32>
    %310 = arith.negf %309 : vector<8x192xf32>
    %311 = math.exp %310 : vector<8x192xf32>
    %cst_109 = arith.constant 1.000000e+00 : f32
    %312 = vector.broadcast %cst_109 : f32 to vector<8x192xf32>
    %313 = arith.addf %312, %311 : vector<8x192xf32>
    %314 = arith.divf %312, %313 : vector<8x192xf32>
    %315 = vector.extract_strided_slice %308 {offsets = [0, 192], sizes = [8, 64], strides = [1, 1]} : vector<8x256xf32> to vector<8x64xf32>
    %316 = math.tanh %315 : vector<8x64xf32>
    %317 = vector.extract_strided_slice %314 {offsets = [0, 64], sizes = [8, 64], strides = [1, 1]} : vector<8x192xf32> to vector<8x64xf32>
    %318 = arith.mulf %317, %300 : vector<8x64xf32>
    %319 = vector.extract_strided_slice %314 {offsets = [0, 0], sizes = [8, 64], strides = [1, 1]} : vector<8x192xf32> to vector<8x64xf32>
    %320 = arith.mulf %319, %316 : vector<8x64xf32>
    %321 = arith.addf %318, %320 : vector<8x64xf32>
    %322 = vector.extract_strided_slice %314 {offsets = [0, 128], sizes = [8, 64], strides = [1, 1]} : vector<8x192xf32> to vector<8x64xf32>
    %323 = math.tanh %321 : vector<8x64xf32>
    %324 = arith.mulf %322, %323 : vector<8x64xf32>
    %c40_110 = arith.constant 40 : index
    %c0_111 = arith.constant 0 : index
    %325 = vector.load %arg18[%c40_110, %c0_111] : memref<64x64xf32, #tpu.memory_space<vmem>>, vector<8x64xf32>
    tpu.vector_store %arg18[%c40_110, %c0_111], %324 {strides = array<i32>} : memref<64x64xf32, #tpu.memory_space<vmem>>, vector<8x64xf32>,
    %c48_112 = arith.constant 48 : index
    %c0_113 = arith.constant 0 : index
    %326 = vector.load %arg19[%c48_112, %c0_113] : memref<64x256xf32, #tpu.memory_space<vmem>>, vector<8x256xf32>
    %327 = arith.truncf %324 : vector<8x64xf32> to vector<8x64xbf16>
    %cst_114 = arith.constant dense<0.000000e+00> : vector<8x256xf32>
    %328 = tpu.matmul %327, %197, %cst_114 {dimension_numbers = #tpu.dot_dimension_numbers<[1], [0], [0], [1], [0, 0, 1, 1], [], []>} : vector<8x64xbf16>, vector<64x256xbf16>, vector<8x256xf32> -> vector<8x256xf32>
    %329 = arith.addf %326, %328 : vector<8x256xf32>
    %330 = vector.extract_strided_slice %329 {offsets = [0, 0], sizes = [8, 192], strides = [1, 1]} : vector<8x256xf32> to vector<8x192xf32>
    %331 = arith.negf %330 : vector<8x192xf32>
    %332 = math.exp %331 : vector<8x192xf32>
    %cst_115 = arith.constant 1.000000e+00 : f32
    %333 = vector.broadcast %cst_115 : f32 to vector<8x192xf32>
    %334 = arith.addf %333, %332 : vector<8x192xf32>
    %335 = arith.divf %333, %334 : vector<8x192xf32>
    %336 = vector.extract_strided_slice %329 {offsets = [0, 192], sizes = [8, 64], strides = [1, 1]} : vector<8x256xf32> to vector<8x64xf32>
    %337 = math.tanh %336 : vector<8x64xf32>
    %338 = vector.extract_strided_slice %335 {offsets = [0, 64], sizes = [8, 64], strides = [1, 1]} : vector<8x192xf32> to vector<8x64xf32>
    %339 = arith.mulf %338, %321 : vector<8x64xf32>
    %340 = vector.extract_strided_slice %335 {offsets = [0, 0], sizes = [8, 64], strides = [1, 1]} : vector<8x192xf32> to vector<8x64xf32>
    %341 = arith.mulf %340, %337 : vector<8x64xf32>
    %342 = arith.addf %339, %341 : vector<8x64xf32>
    %343 = vector.extract_strided_slice %335 {offsets = [0, 128], sizes = [8, 64], strides = [1, 1]} : vector<8x192xf32> to vector<8x64xf32>
    %344 = math.tanh %342 : vector<8x64xf32>
    %345 = arith.mulf %343, %344 : vector<8x64xf32>
    %c48_116 = arith.constant 48 : index
    %c0_117 = arith.constant 0 : index
    %346 = vector.load %arg18[%c48_116, %c0_117] : memref<64x64xf32, #tpu.memory_space<vmem>>, vector<8x64xf32>
    tpu.vector_store %arg18[%c48_116, %c0_117], %345 {strides = array<i32>} : memref<64x64xf32, #tpu.memory_space<vmem>>, vector<8x64xf32>,
    %c56_118 = arith.constant 56 : index
    %c0_119 = arith.constant 0 : index
    %347 = vector.load %arg19[%c56_118, %c0_119] : memref<64x256xf32, #tpu.memory_space<vmem>>, vector<8x256xf32>
    %348 = arith.truncf %345 : vector<8x64xf32> to vector<8x64xbf16>
    %cst_120 = arith.constant dense<0.000000e+00> : vector<8x256xf32>
    %349 = tpu.matmul %348, %197, %cst_120 {dimension_numbers = #tpu.dot_dimension_numbers<[1], [0], [0], [1], [0, 0, 1, 1], [], []>} : vector<8x64xbf16>, vector<64x256xbf16>, vector<8x256xf32> -> vector<8x256xf32>
    %350 = arith.addf %347, %349 : vector<8x256xf32>
    %351 = vector.extract_strided_slice %350 {offsets = [0, 0], sizes = [8, 192], strides = [1, 1]} : vector<8x256xf32> to vector<8x192xf32>
    %352 = arith.negf %351 : vector<8x192xf32>
    %353 = math.exp %352 : vector<8x192xf32>
    %cst_121 = arith.constant 1.000000e+00 : f32
    %354 = vector.broadcast %cst_121 : f32 to vector<8x192xf32>
    %355 = arith.addf %354, %353 : vector<8x192xf32>
    %356 = arith.divf %354, %355 : vector<8x192xf32>
    %357 = vector.extract_strided_slice %350 {offsets = [0, 192], sizes = [8, 64], strides = [1, 1]} : vector<8x256xf32> to vector<8x64xf32>
    %358 = math.tanh %357 : vector<8x64xf32>
    %359 = vector.extract_strided_slice %356 {offsets = [0, 64], sizes = [8, 64], strides = [1, 1]} : vector<8x192xf32> to vector<8x64xf32>
    %360 = arith.mulf %359, %342 : vector<8x64xf32>
    %361 = vector.extract_strided_slice %356 {offsets = [0, 0], sizes = [8, 64], strides = [1, 1]} : vector<8x192xf32> to vector<8x64xf32>
    %362 = arith.mulf %361, %358 : vector<8x64xf32>
    %363 = arith.addf %360, %362 : vector<8x64xf32>
    %364 = vector.extract_strided_slice %356 {offsets = [0, 128], sizes = [8, 64], strides = [1, 1]} : vector<8x192xf32> to vector<8x64xf32>
    %365 = math.tanh %363 : vector<8x64xf32>
    %366 = arith.mulf %364, %365 : vector<8x64xf32>
    %c56_122 = arith.constant 56 : index
    %c0_123 = arith.constant 0 : index
    %367 = vector.load %arg18[%c56_122, %c0_123] : memref<64x64xf32, #tpu.memory_space<vmem>>, vector<8x64xf32>
    tpu.vector_store %arg18[%c56_122, %c0_123], %366 {strides = array<i32>} : memref<64x64xf32, #tpu.memory_space<vmem>>, vector<8x64xf32>,
    %c0_124 = arith.constant 0 : index
    %c0_125 = arith.constant 0 : index
    %368 = vector.load %arg18[%c0_124, %c0_125] : memref<64x64xf32, #tpu.memory_space<vmem>>, vector<64x64xf32>
    %c2 = arith.constant 2 : index
    %c0_126 = arith.constant 0 : index
    %c0_127 = arith.constant 0 : index
    %369 = vector.load %arg3[%c2, %c0_126, %c0_127] : memref<4x64x256xbf16, #tpu.memory_space<vmem>>, vector<1x64x256xbf16>
    %370 = vector.shape_cast %369 : vector<1x64x256xbf16> to vector<64x256xbf16>
    %371 = arith.truncf %368 : vector<64x64xf32> to vector<64x64xbf16>
    %cst_128 = arith.constant dense<0.000000e+00> : vector<64x256xf32>
    %372 = tpu.matmul %371, %370, %cst_128 {dimension_numbers = #tpu.dot_dimension_numbers<[1], [0], [0], [1], [0, 0, 1, 1], [], []>} : vector<64x64xbf16>, vector<64x256xbf16>, vector<64x256xf32> -> vector<64x256xf32>
    %c0_129 = arith.constant 0 : index
    %c0_130 = arith.constant 0 : index
    %373 = vector.load %arg19[%c0_129, %c0_130] : memref<64x256xf32, #tpu.memory_space<vmem>>, vector<64x256xf32>
    tpu.vector_store %arg19[%c0_129, %c0_130], %372 {strides = array<i32>} : memref<64x256xf32, #tpu.memory_space<vmem>>, vector<64x256xf32>,
    %c2_131 = arith.constant 2 : index
    %c0_132 = arith.constant 0 : index
    %c0_133 = arith.constant 0 : index
    %374 = vector.load %arg4[%c2_131, %c0_132, %c0_133] : memref<4x64x256xbf16, #tpu.memory_space<vmem>>, vector<1x64x256xbf16>
    %375 = vector.shape_cast %374 : vector<1x64x256xbf16> to vector<64x256xbf16>
    %cst_134 = arith.constant 0.000000e+00 : f32
    %376 = vector.broadcast %cst_134 : f32 to vector<8x64xf32>
    %cst_135 = arith.constant 0.000000e+00 : f32
    %377 = vector.broadcast %cst_135 : f32 to vector<8x64xf32>
    %c0_136 = arith.constant 0 : index
    %c0_137 = arith.constant 0 : index
    %378 = vector.load %arg19[%c0_136, %c0_137] : memref<64x256xf32, #tpu.memory_space<vmem>>, vector<8x256xf32>
    %379 = arith.truncf %376 : vector<8x64xf32> to vector<8x64xbf16>
    %cst_138 = arith.constant dense<0.000000e+00> : vector<8x256xf32>
    %380 = tpu.matmul %379, %375, %cst_138 {dimension_numbers = #tpu.dot_dimension_numbers<[1], [0], [0], [1], [0, 0, 1, 1], [], []>} : vector<8x64xbf16>, vector<64x256xbf16>, vector<8x256xf32> -> vector<8x256xf32>
    %381 = arith.addf %378, %380 : vector<8x256xf32>
    %382 = vector.extract_strided_slice %381 {offsets = [0, 0], sizes = [8, 192], strides = [1, 1]} : vector<8x256xf32> to vector<8x192xf32>
    %383 = arith.negf %382 : vector<8x192xf32>
    %384 = math.exp %383 : vector<8x192xf32>
    %cst_139 = arith.constant 1.000000e+00 : f32
    %385 = vector.broadcast %cst_139 : f32 to vector<8x192xf32>
    %386 = arith.addf %385, %384 : vector<8x192xf32>
    %387 = arith.divf %385, %386 : vector<8x192xf32>
    %388 = vector.extract_strided_slice %381 {offsets = [0, 192], sizes = [8, 64], strides = [1, 1]} : vector<8x256xf32> to vector<8x64xf32>
    %389 = math.tanh %388 : vector<8x64xf32>
    %390 = vector.extract_strided_slice %387 {offsets = [0, 64], sizes = [8, 64], strides = [1, 1]} : vector<8x192xf32> to vector<8x64xf32>
    %391 = arith.mulf %390, %377 : vector<8x64xf32>
    %392 = vector.extract_strided_slice %387 {offsets = [0, 0], sizes = [8, 64], strides = [1, 1]} : vector<8x192xf32> to vector<8x64xf32>
    %393 = arith.mulf %392, %389 : vector<8x64xf32>
    %394 = arith.addf %391, %393 : vector<8x64xf32>
    %395 = vector.extract_strided_slice %387 {offsets = [0, 128], sizes = [8, 64], strides = [1, 1]} : vector<8x192xf32> to vector<8x64xf32>
    %396 = math.tanh %394 : vector<8x64xf32>
    %397 = arith.mulf %395, %396 : vector<8x64xf32>
    %c0_140 = arith.constant 0 : index
    %c0_141 = arith.constant 0 : index
    %398 = vector.load %arg18[%c0_140, %c0_141] : memref<64x64xf32, #tpu.memory_space<vmem>>, vector<8x64xf32>
    tpu.vector_store %arg18[%c0_140, %c0_141], %397 {strides = array<i32>} : memref<64x64xf32, #tpu.memory_space<vmem>>, vector<8x64xf32>,
    %c8_142 = arith.constant 8 : index
    %c0_143 = arith.constant 0 : index
    %399 = vector.load %arg19[%c8_142, %c0_143] : memref<64x256xf32, #tpu.memory_space<vmem>>, vector<8x256xf32>
    %400 = arith.truncf %397 : vector<8x64xf32> to vector<8x64xbf16>
    %cst_144 = arith.constant dense<0.000000e+00> : vector<8x256xf32>
    %401 = tpu.matmul %400, %375, %cst_144 {dimension_numbers = #tpu.dot_dimension_numbers<[1], [0], [0], [1], [0, 0, 1, 1], [], []>} : vector<8x64xbf16>, vector<64x256xbf16>, vector<8x256xf32> -> vector<8x256xf32>
    %402 = arith.addf %399, %401 : vector<8x256xf32>
    %403 = vector.extract_strided_slice %402 {offsets = [0, 0], sizes = [8, 192], strides = [1, 1]} : vector<8x256xf32> to vector<8x192xf32>
    %404 = arith.negf %403 : vector<8x192xf32>
    %405 = math.exp %404 : vector<8x192xf32>
    %cst_145 = arith.constant 1.000000e+00 : f32
    %406 = vector.broadcast %cst_145 : f32 to vector<8x192xf32>
    %407 = arith.addf %406, %405 : vector<8x192xf32>
    %408 = arith.divf %406, %407 : vector<8x192xf32>
    %409 = vector.extract_strided_slice %402 {offsets = [0, 192], sizes = [8, 64], strides = [1, 1]} : vector<8x256xf32> to vector<8x64xf32>
    %410 = math.tanh %409 : vector<8x64xf32>
    %411 = vector.extract_strided_slice %408 {offsets = [0, 64], sizes = [8, 64], strides = [1, 1]} : vector<8x192xf32> to vector<8x64xf32>
    %412 = arith.mulf %411, %394 : vector<8x64xf32>
    %413 = vector.extract_strided_slice %408 {offsets = [0, 0], sizes = [8, 64], strides = [1, 1]} : vector<8x192xf32> to vector<8x64xf32>
    %414 = arith.mulf %413, %410 : vector<8x64xf32>
    %415 = arith.addf %412, %414 : vector<8x64xf32>
    %416 = vector.extract_strided_slice %408 {offsets = [0, 128], sizes = [8, 64], strides = [1, 1]} : vector<8x192xf32> to vector<8x64xf32>
    %417 = math.tanh %415 : vector<8x64xf32>
    %418 = arith.mulf %416, %417 : vector<8x64xf32>
    %c8_146 = arith.constant 8 : index
    %c0_147 = arith.constant 0 : index
    %419 = vector.load %arg18[%c8_146, %c0_147] : memref<64x64xf32, #tpu.memory_space<vmem>>, vector<8x64xf32>
    tpu.vector_store %arg18[%c8_146, %c0_147], %418 {strides = array<i32>} : memref<64x64xf32, #tpu.memory_space<vmem>>, vector<8x64xf32>,
    %c16_148 = arith.constant 16 : index
    %c0_149 = arith.constant 0 : index
    %420 = vector.load %arg19[%c16_148, %c0_149] : memref<64x256xf32, #tpu.memory_space<vmem>>, vector<8x256xf32>
    %421 = arith.truncf %418 : vector<8x64xf32> to vector<8x64xbf16>
    %cst_150 = arith.constant dense<0.000000e+00> : vector<8x256xf32>
    %422 = tpu.matmul %421, %375, %cst_150 {dimension_numbers = #tpu.dot_dimension_numbers<[1], [0], [0], [1], [0, 0, 1, 1], [], []>} : vector<8x64xbf16>, vector<64x256xbf16>, vector<8x256xf32> -> vector<8x256xf32>
    %423 = arith.addf %420, %422 : vector<8x256xf32>
    %424 = vector.extract_strided_slice %423 {offsets = [0, 0], sizes = [8, 192], strides = [1, 1]} : vector<8x256xf32> to vector<8x192xf32>
    %425 = arith.negf %424 : vector<8x192xf32>
    %426 = math.exp %425 : vector<8x192xf32>
    %cst_151 = arith.constant 1.000000e+00 : f32
    %427 = vector.broadcast %cst_151 : f32 to vector<8x192xf32>
    %428 = arith.addf %427, %426 : vector<8x192xf32>
    %429 = arith.divf %427, %428 : vector<8x192xf32>
    %430 = vector.extract_strided_slice %423 {offsets = [0, 192], sizes = [8, 64], strides = [1, 1]} : vector<8x256xf32> to vector<8x64xf32>
    %431 = math.tanh %430 : vector<8x64xf32>
    %432 = vector.extract_strided_slice %429 {offsets = [0, 64], sizes = [8, 64], strides = [1, 1]} : vector<8x192xf32> to vector<8x64xf32>
    %433 = arith.mulf %432, %415 : vector<8x64xf32>
    %434 = vector.extract_strided_slice %429 {offsets = [0, 0], sizes = [8, 64], strides = [1, 1]} : vector<8x192xf32> to vector<8x64xf32>
    %435 = arith.mulf %434, %431 : vector<8x64xf32>
    %436 = arith.addf %433, %435 : vector<8x64xf32>
    %437 = vector.extract_strided_slice %429 {offsets = [0, 128], sizes = [8, 64], strides = [1, 1]} : vector<8x192xf32> to vector<8x64xf32>
    %438 = math.tanh %436 : vector<8x64xf32>
    %439 = arith.mulf %437, %438 : vector<8x64xf32>
    %c16_152 = arith.constant 16 : index
    %c0_153 = arith.constant 0 : index
    %440 = vector.load %arg18[%c16_152, %c0_153] : memref<64x64xf32, #tpu.memory_space<vmem>>, vector<8x64xf32>
    tpu.vector_store %arg18[%c16_152, %c0_153], %439 {strides = array<i32>} : memref<64x64xf32, #tpu.memory_space<vmem>>, vector<8x64xf32>,
    %c24_154 = arith.constant 24 : index
    %c0_155 = arith.constant 0 : index
    %441 = vector.load %arg19[%c24_154, %c0_155] : memref<64x256xf32, #tpu.memory_space<vmem>>, vector<8x256xf32>
    %442 = arith.truncf %439 : vector<8x64xf32> to vector<8x64xbf16>
    %cst_156 = arith.constant dense<0.000000e+00> : vector<8x256xf32>
    %443 = tpu.matmul %442, %375, %cst_156 {dimension_numbers = #tpu.dot_dimension_numbers<[1], [0], [0], [1], [0, 0, 1, 1], [], []>} : vector<8x64xbf16>, vector<64x256xbf16>, vector<8x256xf32> -> vector<8x256xf32>
    %444 = arith.addf %441, %443 : vector<8x256xf32>
    %445 = vector.extract_strided_slice %444 {offsets = [0, 0], sizes = [8, 192], strides = [1, 1]} : vector<8x256xf32> to vector<8x192xf32>
    %446 = arith.negf %445 : vector<8x192xf32>
    %447 = math.exp %446 : vector<8x192xf32>
    %cst_157 = arith.constant 1.000000e+00 : f32
    %448 = vector.broadcast %cst_157 : f32 to vector<8x192xf32>
    %449 = arith.addf %448, %447 : vector<8x192xf32>
    %450 = arith.divf %448, %449 : vector<8x192xf32>
    %451 = vector.extract_strided_slice %444 {offsets = [0, 192], sizes = [8, 64], strides = [1, 1]} : vector<8x256xf32> to vector<8x64xf32>
    %452 = math.tanh %451 : vector<8x64xf32>
    %453 = vector.extract_strided_slice %450 {offsets = [0, 64], sizes = [8, 64], strides = [1, 1]} : vector<8x192xf32> to vector<8x64xf32>
    %454 = arith.mulf %453, %436 : vector<8x64xf32>
    %455 = vector.extract_strided_slice %450 {offsets = [0, 0], sizes = [8, 64], strides = [1, 1]} : vector<8x192xf32> to vector<8x64xf32>
    %456 = arith.mulf %455, %452 : vector<8x64xf32>
    %457 = arith.addf %454, %456 : vector<8x64xf32>
    %458 = vector.extract_strided_slice %450 {offsets = [0, 128], sizes = [8, 64], strides = [1, 1]} : vector<8x192xf32> to vector<8x64xf32>
    %459 = math.tanh %457 : vector<8x64xf32>
    %460 = arith.mulf %458, %459 : vector<8x64xf32>
    %c24_158 = arith.constant 24 : index
    %c0_159 = arith.constant 0 : index
    %461 = vector.load %arg18[%c24_158, %c0_159] : memref<64x64xf32, #tpu.memory_space<vmem>>, vector<8x64xf32>
    tpu.vector_store %arg18[%c24_158, %c0_159], %460 {strides = array<i32>} : memref<64x64xf32, #tpu.memory_space<vmem>>, vector<8x64xf32>,
    %c32_160 = arith.constant 32 : index
    %c0_161 = arith.constant 0 : index
    %462 = vector.load %arg19[%c32_160, %c0_161] : memref<64x256xf32, #tpu.memory_space<vmem>>, vector<8x256xf32>
    %463 = arith.truncf %460 : vector<8x64xf32> to vector<8x64xbf16>
    %cst_162 = arith.constant dense<0.000000e+00> : vector<8x256xf32>
    %464 = tpu.matmul %463, %375, %cst_162 {dimension_numbers = #tpu.dot_dimension_numbers<[1], [0], [0], [1], [0, 0, 1, 1], [], []>} : vector<8x64xbf16>, vector<64x256xbf16>, vector<8x256xf32> -> vector<8x256xf32>
    %465 = arith.addf %462, %464 : vector<8x256xf32>
    %466 = vector.extract_strided_slice %465 {offsets = [0, 0], sizes = [8, 192], strides = [1, 1]} : vector<8x256xf32> to vector<8x192xf32>
    %467 = arith.negf %466 : vector<8x192xf32>
    %468 = math.exp %467 : vector<8x192xf32>
    %cst_163 = arith.constant 1.000000e+00 : f32
    %469 = vector.broadcast %cst_163 : f32 to vector<8x192xf32>
    %470 = arith.addf %469, %468 : vector<8x192xf32>
    %471 = arith.divf %469, %470 : vector<8x192xf32>
    %472 = vector.extract_strided_slice %465 {offsets = [0, 192], sizes = [8, 64], strides = [1, 1]} : vector<8x256xf32> to vector<8x64xf32>
    %473 = math.tanh %472 : vector<8x64xf32>
    %474 = vector.extract_strided_slice %471 {offsets = [0, 64], sizes = [8, 64], strides = [1, 1]} : vector<8x192xf32> to vector<8x64xf32>
    %475 = arith.mulf %474, %457 : vector<8x64xf32>
    %476 = vector.extract_strided_slice %471 {offsets = [0, 0], sizes = [8, 64], strides = [1, 1]} : vector<8x192xf32> to vector<8x64xf32>
    %477 = arith.mulf %476, %473 : vector<8x64xf32>
    %478 = arith.addf %475, %477 : vector<8x64xf32>
    %479 = vector.extract_strided_slice %471 {offsets = [0, 128], sizes = [8, 64], strides = [1, 1]} : vector<8x192xf32> to vector<8x64xf32>
    %480 = math.tanh %478 : vector<8x64xf32>
    %481 = arith.mulf %479, %480 : vector<8x64xf32>
    %c32_164 = arith.constant 32 : index
    %c0_165 = arith.constant 0 : index
    %482 = vector.load %arg18[%c32_164, %c0_165] : memref<64x64xf32, #tpu.memory_space<vmem>>, vector<8x64xf32>
    tpu.vector_store %arg18[%c32_164, %c0_165], %481 {strides = array<i32>} : memref<64x64xf32, #tpu.memory_space<vmem>>, vector<8x64xf32>,
    %c40_166 = arith.constant 40 : index
    %c0_167 = arith.constant 0 : index
    %483 = vector.load %arg19[%c40_166, %c0_167] : memref<64x256xf32, #tpu.memory_space<vmem>>, vector<8x256xf32>
    %484 = arith.truncf %481 : vector<8x64xf32> to vector<8x64xbf16>
    %cst_168 = arith.constant dense<0.000000e+00> : vector<8x256xf32>
    %485 = tpu.matmul %484, %375, %cst_168 {dimension_numbers = #tpu.dot_dimension_numbers<[1], [0], [0], [1], [0, 0, 1, 1], [], []>} : vector<8x64xbf16>, vector<64x256xbf16>, vector<8x256xf32> -> vector<8x256xf32>
    %486 = arith.addf %483, %485 : vector<8x256xf32>
    %487 = vector.extract_strided_slice %486 {offsets = [0, 0], sizes = [8, 192], strides = [1, 1]} : vector<8x256xf32> to vector<8x192xf32>
    %488 = arith.negf %487 : vector<8x192xf32>
    %489 = math.exp %488 : vector<8x192xf32>
    %cst_169 = arith.constant 1.000000e+00 : f32
    %490 = vector.broadcast %cst_169 : f32 to vector<8x192xf32>
    %491 = arith.addf %490, %489 : vector<8x192xf32>
    %492 = arith.divf %490, %491 : vector<8x192xf32>
    %493 = vector.extract_strided_slice %486 {offsets = [0, 192], sizes = [8, 64], strides = [1, 1]} : vector<8x256xf32> to vector<8x64xf32>
    %494 = math.tanh %493 : vector<8x64xf32>
    %495 = vector.extract_strided_slice %492 {offsets = [0, 64], sizes = [8, 64], strides = [1, 1]} : vector<8x192xf32> to vector<8x64xf32>
    %496 = arith.mulf %495, %478 : vector<8x64xf32>
    %497 = vector.extract_strided_slice %492 {offsets = [0, 0], sizes = [8, 64], strides = [1, 1]} : vector<8x192xf32> to vector<8x64xf32>
    %498 = arith.mulf %497, %494 : vector<8x64xf32>
    %499 = arith.addf %496, %498 : vector<8x64xf32>
    %500 = vector.extract_strided_slice %492 {offsets = [0, 128], sizes = [8, 64], strides = [1, 1]} : vector<8x192xf32> to vector<8x64xf32>
    %501 = math.tanh %499 : vector<8x64xf32>
    %502 = arith.mulf %500, %501 : vector<8x64xf32>
    %c40_170 = arith.constant 40 : index
    %c0_171 = arith.constant 0 : index
    %503 = vector.load %arg18[%c40_170, %c0_171] : memref<64x64xf32, #tpu.memory_space<vmem>>, vector<8x64xf32>
    tpu.vector_store %arg18[%c40_170, %c0_171], %502 {strides = array<i32>} : memref<64x64xf32, #tpu.memory_space<vmem>>, vector<8x64xf32>,
    %c48_172 = arith.constant 48 : index
    %c0_173 = arith.constant 0 : index
    %504 = vector.load %arg19[%c48_172, %c0_173] : memref<64x256xf32, #tpu.memory_space<vmem>>, vector<8x256xf32>
    %505 = arith.truncf %502 : vector<8x64xf32> to vector<8x64xbf16>
    %cst_174 = arith.constant dense<0.000000e+00> : vector<8x256xf32>
    %506 = tpu.matmul %505, %375, %cst_174 {dimension_numbers = #tpu.dot_dimension_numbers<[1], [0], [0], [1], [0, 0, 1, 1], [], []>} : vector<8x64xbf16>, vector<64x256xbf16>, vector<8x256xf32> -> vector<8x256xf32>
    %507 = arith.addf %504, %506 : vector<8x256xf32>
    %508 = vector.extract_strided_slice %507 {offsets = [0, 0], sizes = [8, 192], strides = [1, 1]} : vector<8x256xf32> to vector<8x192xf32>
    %509 = arith.negf %508 : vector<8x192xf32>
    %510 = math.exp %509 : vector<8x192xf32>
    %cst_175 = arith.constant 1.000000e+00 : f32
    %511 = vector.broadcast %cst_175 : f32 to vector<8x192xf32>
    %512 = arith.addf %511, %510 : vector<8x192xf32>
    %513 = arith.divf %511, %512 : vector<8x192xf32>
    %514 = vector.extract_strided_slice %507 {offsets = [0, 192], sizes = [8, 64], strides = [1, 1]} : vector<8x256xf32> to vector<8x64xf32>
    %515 = math.tanh %514 : vector<8x64xf32>
    %516 = vector.extract_strided_slice %513 {offsets = [0, 64], sizes = [8, 64], strides = [1, 1]} : vector<8x192xf32> to vector<8x64xf32>
    %517 = arith.mulf %516, %499 : vector<8x64xf32>
    %518 = vector.extract_strided_slice %513 {offsets = [0, 0], sizes = [8, 64], strides = [1, 1]} : vector<8x192xf32> to vector<8x64xf32>
    %519 = arith.mulf %518, %515 : vector<8x64xf32>
    %520 = arith.addf %517, %519 : vector<8x64xf32>
    %521 = vector.extract_strided_slice %513 {offsets = [0, 128], sizes = [8, 64], strides = [1, 1]} : vector<8x192xf32> to vector<8x64xf32>
    %522 = math.tanh %520 : vector<8x64xf32>
    %523 = arith.mulf %521, %522 : vector<8x64xf32>
    %c48_176 = arith.constant 48 : index
    %c0_177 = arith.constant 0 : index
    %524 = vector.load %arg18[%c48_176, %c0_177] : memref<64x64xf32, #tpu.memory_space<vmem>>, vector<8x64xf32>
    tpu.vector_store %arg18[%c48_176, %c0_177], %523 {strides = array<i32>} : memref<64x64xf32, #tpu.memory_space<vmem>>, vector<8x64xf32>,
    %c56_178 = arith.constant 56 : index
    %c0_179 = arith.constant 0 : index
    %525 = vector.load %arg19[%c56_178, %c0_179] : memref<64x256xf32, #tpu.memory_space<vmem>>, vector<8x256xf32>
    %526 = arith.truncf %523 : vector<8x64xf32> to vector<8x64xbf16>
    %cst_180 = arith.constant dense<0.000000e+00> : vector<8x256xf32>
    %527 = tpu.matmul %526, %375, %cst_180 {dimension_numbers = #tpu.dot_dimension_numbers<[1], [0], [0], [1], [0, 0, 1, 1], [], []>} : vector<8x64xbf16>, vector<64x256xbf16>, vector<8x256xf32> -> vector<8x256xf32>
    %528 = arith.addf %525, %527 : vector<8x256xf32>
    %529 = vector.extract_strided_slice %528 {offsets = [0, 0], sizes = [8, 192], strides = [1, 1]} : vector<8x256xf32> to vector<8x192xf32>
    %530 = arith.negf %529 : vector<8x192xf32>
    %531 = math.exp %530 : vector<8x192xf32>
    %cst_181 = arith.constant 1.000000e+00 : f32
    %532 = vector.broadcast %cst_181 : f32 to vector<8x192xf32>
    %533 = arith.addf %532, %531 : vector<8x192xf32>
    %534 = arith.divf %532, %533 : vector<8x192xf32>
    %535 = vector.extract_strided_slice %528 {offsets = [0, 192], sizes = [8, 64], strides = [1, 1]} : vector<8x256xf32> to vector<8x64xf32>
    %536 = math.tanh %535 : vector<8x64xf32>
    %537 = vector.extract_strided_slice %534 {offsets = [0, 64], sizes = [8, 64], strides = [1, 1]} : vector<8x192xf32> to vector<8x64xf32>
    %538 = arith.mulf %537, %520 : vector<8x64xf32>
    %539 = vector.extract_strided_slice %534 {offsets = [0, 0], sizes = [8, 64], strides = [1, 1]} : vector<8x192xf32> to vector<8x64xf32>
    %540 = arith.mulf %539, %536 : vector<8x64xf32>
    %541 = arith.addf %538, %540 : vector<8x64xf32>
    %542 = vector.extract_strided_slice %534 {offsets = [0, 128], sizes = [8, 64], strides = [1, 1]} : vector<8x192xf32> to vector<8x64xf32>
    %543 = math.tanh %541 : vector<8x64xf32>
    %544 = arith.mulf %542, %543 : vector<8x64xf32>
    %c56_182 = arith.constant 56 : index
    %c0_183 = arith.constant 0 : index
    %545 = vector.load %arg18[%c56_182, %c0_183] : memref<64x64xf32, #tpu.memory_space<vmem>>, vector<8x64xf32>
    tpu.vector_store %arg18[%c56_182, %c0_183], %544 {strides = array<i32>} : memref<64x64xf32, #tpu.memory_space<vmem>>, vector<8x64xf32>,
    %c0_184 = arith.constant 0 : index
    %c0_185 = arith.constant 0 : index
    %546 = vector.load %arg18[%c0_184, %c0_185] : memref<64x64xf32, #tpu.memory_space<vmem>>, vector<64x64xf32>
    %c3 = arith.constant 3 : index
    %c0_186 = arith.constant 0 : index
    %c0_187 = arith.constant 0 : index
    %547 = vector.load %arg3[%c3, %c0_186, %c0_187] : memref<4x64x256xbf16, #tpu.memory_space<vmem>>, vector<1x64x256xbf16>
    %548 = vector.shape_cast %547 : vector<1x64x256xbf16> to vector<64x256xbf16>
    %549 = arith.truncf %546 : vector<64x64xf32> to vector<64x64xbf16>
    %cst_188 = arith.constant dense<0.000000e+00> : vector<64x256xf32>
    %550 = tpu.matmul %549, %548, %cst_188 {dimension_numbers = #tpu.dot_dimension_numbers<[1], [0], [0], [1], [0, 0, 1, 1], [], []>} : vector<64x64xbf16>, vector<64x256xbf16>, vector<64x256xf32> -> vector<64x256xf32>
    %c0_189 = arith.constant 0 : index
    %c0_190 = arith.constant 0 : index
    %551 = vector.load %arg19[%c0_189, %c0_190] : memref<64x256xf32, #tpu.memory_space<vmem>>, vector<64x256xf32>
    tpu.vector_store %arg19[%c0_189, %c0_190], %550 {strides = array<i32>} : memref<64x256xf32, #tpu.memory_space<vmem>>, vector<64x256xf32>,
    %c3_191 = arith.constant 3 : index
    %c0_192 = arith.constant 0 : index
    %c0_193 = arith.constant 0 : index
    %552 = vector.load %arg4[%c3_191, %c0_192, %c0_193] : memref<4x64x256xbf16, #tpu.memory_space<vmem>>, vector<1x64x256xbf16>
    %553 = vector.shape_cast %552 : vector<1x64x256xbf16> to vector<64x256xbf16>
    %cst_194 = arith.constant 0.000000e+00 : f32
    %554 = vector.broadcast %cst_194 : f32 to vector<8x64xf32>
    %cst_195 = arith.constant 0.000000e+00 : f32
    %555 = vector.broadcast %cst_195 : f32 to vector<8x64xf32>
    %c0_196 = arith.constant 0 : index
    %c0_197 = arith.constant 0 : index
    %556 = vector.load %arg19[%c0_196, %c0_197] : memref<64x256xf32, #tpu.memory_space<vmem>>, vector<8x256xf32>
    %557 = arith.truncf %554 : vector<8x64xf32> to vector<8x64xbf16>
    %cst_198 = arith.constant dense<0.000000e+00> : vector<8x256xf32>
    %558 = tpu.matmul %557, %553, %cst_198 {dimension_numbers = #tpu.dot_dimension_numbers<[1], [0], [0], [1], [0, 0, 1, 1], [], []>} : vector<8x64xbf16>, vector<64x256xbf16>, vector<8x256xf32> -> vector<8x256xf32>
    %559 = arith.addf %556, %558 : vector<8x256xf32>
    %560 = vector.extract_strided_slice %559 {offsets = [0, 0], sizes = [8, 192], strides = [1, 1]} : vector<8x256xf32> to vector<8x192xf32>
    %561 = arith.negf %560 : vector<8x192xf32>
    %562 = math.exp %561 : vector<8x192xf32>
    %cst_199 = arith.constant 1.000000e+00 : f32
    %563 = vector.broadcast %cst_199 : f32 to vector<8x192xf32>
    %564 = arith.addf %563, %562 : vector<8x192xf32>
    %565 = arith.divf %563, %564 : vector<8x192xf32>
    %566 = vector.extract_strided_slice %559 {offsets = [0, 192], sizes = [8, 64], strides = [1, 1]} : vector<8x256xf32> to vector<8x64xf32>
    %567 = math.tanh %566 : vector<8x64xf32>
    %568 = vector.extract_strided_slice %565 {offsets = [0, 64], sizes = [8, 64], strides = [1, 1]} : vector<8x192xf32> to vector<8x64xf32>
    %569 = arith.mulf %568, %555 : vector<8x64xf32>
    %570 = vector.extract_strided_slice %565 {offsets = [0, 0], sizes = [8, 64], strides = [1, 1]} : vector<8x192xf32> to vector<8x64xf32>
    %571 = arith.mulf %570, %567 : vector<8x64xf32>
    %572 = arith.addf %569, %571 : vector<8x64xf32>
    %573 = vector.extract_strided_slice %565 {offsets = [0, 128], sizes = [8, 64], strides = [1, 1]} : vector<8x192xf32> to vector<8x64xf32>
    %574 = math.tanh %572 : vector<8x64xf32>
    %575 = arith.mulf %573, %574 : vector<8x64xf32>
    %c0_200 = arith.constant 0 : index
    %c0_201 = arith.constant 0 : index
    %576 = vector.load %arg18[%c0_200, %c0_201] : memref<64x64xf32, #tpu.memory_space<vmem>>, vector<8x64xf32>
    tpu.vector_store %arg18[%c0_200, %c0_201], %575 {strides = array<i32>} : memref<64x64xf32, #tpu.memory_space<vmem>>, vector<8x64xf32>,
    %c8_202 = arith.constant 8 : index
    %c0_203 = arith.constant 0 : index
    %577 = vector.load %arg19[%c8_202, %c0_203] : memref<64x256xf32, #tpu.memory_space<vmem>>, vector<8x256xf32>
    %578 = arith.truncf %575 : vector<8x64xf32> to vector<8x64xbf16>
    %cst_204 = arith.constant dense<0.000000e+00> : vector<8x256xf32>
    %579 = tpu.matmul %578, %553, %cst_204 {dimension_numbers = #tpu.dot_dimension_numbers<[1], [0], [0], [1], [0, 0, 1, 1], [], []>} : vector<8x64xbf16>, vector<64x256xbf16>, vector<8x256xf32> -> vector<8x256xf32>
    %580 = arith.addf %577, %579 : vector<8x256xf32>
    %581 = vector.extract_strided_slice %580 {offsets = [0, 0], sizes = [8, 192], strides = [1, 1]} : vector<8x256xf32> to vector<8x192xf32>
    %582 = arith.negf %581 : vector<8x192xf32>
    %583 = math.exp %582 : vector<8x192xf32>
    %cst_205 = arith.constant 1.000000e+00 : f32
    %584 = vector.broadcast %cst_205 : f32 to vector<8x192xf32>
    %585 = arith.addf %584, %583 : vector<8x192xf32>
    %586 = arith.divf %584, %585 : vector<8x192xf32>
    %587 = vector.extract_strided_slice %580 {offsets = [0, 192], sizes = [8, 64], strides = [1, 1]} : vector<8x256xf32> to vector<8x64xf32>
    %588 = math.tanh %587 : vector<8x64xf32>
    %589 = vector.extract_strided_slice %586 {offsets = [0, 64], sizes = [8, 64], strides = [1, 1]} : vector<8x192xf32> to vector<8x64xf32>
    %590 = arith.mulf %589, %572 : vector<8x64xf32>
    %591 = vector.extract_strided_slice %586 {offsets = [0, 0], sizes = [8, 64], strides = [1, 1]} : vector<8x192xf32> to vector<8x64xf32>
    %592 = arith.mulf %591, %588 : vector<8x64xf32>
    %593 = arith.addf %590, %592 : vector<8x64xf32>
    %594 = vector.extract_strided_slice %586 {offsets = [0, 128], sizes = [8, 64], strides = [1, 1]} : vector<8x192xf32> to vector<8x64xf32>
    %595 = math.tanh %593 : vector<8x64xf32>
    %596 = arith.mulf %594, %595 : vector<8x64xf32>
    %c8_206 = arith.constant 8 : index
    %c0_207 = arith.constant 0 : index
    %597 = vector.load %arg18[%c8_206, %c0_207] : memref<64x64xf32, #tpu.memory_space<vmem>>, vector<8x64xf32>
    tpu.vector_store %arg18[%c8_206, %c0_207], %596 {strides = array<i32>} : memref<64x64xf32, #tpu.memory_space<vmem>>, vector<8x64xf32>,
    %c16_208 = arith.constant 16 : index
    %c0_209 = arith.constant 0 : index
    %598 = vector.load %arg19[%c16_208, %c0_209] : memref<64x256xf32, #tpu.memory_space<vmem>>, vector<8x256xf32>
    %599 = arith.truncf %596 : vector<8x64xf32> to vector<8x64xbf16>
    %cst_210 = arith.constant dense<0.000000e+00> : vector<8x256xf32>
    %600 = tpu.matmul %599, %553, %cst_210 {dimension_numbers = #tpu.dot_dimension_numbers<[1], [0], [0], [1], [0, 0, 1, 1], [], []>} : vector<8x64xbf16>, vector<64x256xbf16>, vector<8x256xf32> -> vector<8x256xf32>
    %601 = arith.addf %598, %600 : vector<8x256xf32>
    %602 = vector.extract_strided_slice %601 {offsets = [0, 0], sizes = [8, 192], strides = [1, 1]} : vector<8x256xf32> to vector<8x192xf32>
    %603 = arith.negf %602 : vector<8x192xf32>
    %604 = math.exp %603 : vector<8x192xf32>
    %cst_211 = arith.constant 1.000000e+00 : f32
    %605 = vector.broadcast %cst_211 : f32 to vector<8x192xf32>
    %606 = arith.addf %605, %604 : vector<8x192xf32>
    %607 = arith.divf %605, %606 : vector<8x192xf32>
    %608 = vector.extract_strided_slice %601 {offsets = [0, 192], sizes = [8, 64], strides = [1, 1]} : vector<8x256xf32> to vector<8x64xf32>
    %609 = math.tanh %608 : vector<8x64xf32>
    %610 = vector.extract_strided_slice %607 {offsets = [0, 64], sizes = [8, 64], strides = [1, 1]} : vector<8x192xf32> to vector<8x64xf32>
    %611 = arith.mulf %610, %593 : vector<8x64xf32>
    %612 = vector.extract_strided_slice %607 {offsets = [0, 0], sizes = [8, 64], strides = [1, 1]} : vector<8x192xf32> to vector<8x64xf32>
    %613 = arith.mulf %612, %609 : vector<8x64xf32>
    %614 = arith.addf %611, %613 : vector<8x64xf32>
    %615 = vector.extract_strided_slice %607 {offsets = [0, 128], sizes = [8, 64], strides = [1, 1]} : vector<8x192xf32> to vector<8x64xf32>
    %616 = math.tanh %614 : vector<8x64xf32>
    %617 = arith.mulf %615, %616 : vector<8x64xf32>
    %c16_212 = arith.constant 16 : index
    %c0_213 = arith.constant 0 : index
    %618 = vector.load %arg18[%c16_212, %c0_213] : memref<64x64xf32, #tpu.memory_space<vmem>>, vector<8x64xf32>
    tpu.vector_store %arg18[%c16_212, %c0_213], %617 {strides = array<i32>} : memref<64x64xf32, #tpu.memory_space<vmem>>, vector<8x64xf32>,
    %c24_214 = arith.constant 24 : index
    %c0_215 = arith.constant 0 : index
    %619 = vector.load %arg19[%c24_214, %c0_215] : memref<64x256xf32, #tpu.memory_space<vmem>>, vector<8x256xf32>
    %620 = arith.truncf %617 : vector<8x64xf32> to vector<8x64xbf16>
    %cst_216 = arith.constant dense<0.000000e+00> : vector<8x256xf32>
    %621 = tpu.matmul %620, %553, %cst_216 {dimension_numbers = #tpu.dot_dimension_numbers<[1], [0], [0], [1], [0, 0, 1, 1], [], []>} : vector<8x64xbf16>, vector<64x256xbf16>, vector<8x256xf32> -> vector<8x256xf32>
    %622 = arith.addf %619, %621 : vector<8x256xf32>
    %623 = vector.extract_strided_slice %622 {offsets = [0, 0], sizes = [8, 192], strides = [1, 1]} : vector<8x256xf32> to vector<8x192xf32>
    %624 = arith.negf %623 : vector<8x192xf32>
    %625 = math.exp %624 : vector<8x192xf32>
    %cst_217 = arith.constant 1.000000e+00 : f32
    %626 = vector.broadcast %cst_217 : f32 to vector<8x192xf32>
    %627 = arith.addf %626, %625 : vector<8x192xf32>
    %628 = arith.divf %626, %627 : vector<8x192xf32>
    %629 = vector.extract_strided_slice %622 {offsets = [0, 192], sizes = [8, 64], strides = [1, 1]} : vector<8x256xf32> to vector<8x64xf32>
    %630 = math.tanh %629 : vector<8x64xf32>
    %631 = vector.extract_strided_slice %628 {offsets = [0, 64], sizes = [8, 64], strides = [1, 1]} : vector<8x192xf32> to vector<8x64xf32>
    %632 = arith.mulf %631, %614 : vector<8x64xf32>
    %633 = vector.extract_strided_slice %628 {offsets = [0, 0], sizes = [8, 64], strides = [1, 1]} : vector<8x192xf32> to vector<8x64xf32>
    %634 = arith.mulf %633, %630 : vector<8x64xf32>
    %635 = arith.addf %632, %634 : vector<8x64xf32>
    %636 = vector.extract_strided_slice %628 {offsets = [0, 128], sizes = [8, 64], strides = [1, 1]} : vector<8x192xf32> to vector<8x64xf32>
    %637 = math.tanh %635 : vector<8x64xf32>
    %638 = arith.mulf %636, %637 : vector<8x64xf32>
    %c24_218 = arith.constant 24 : index
    %c0_219 = arith.constant 0 : index
    %639 = vector.load %arg18[%c24_218, %c0_219] : memref<64x64xf32, #tpu.memory_space<vmem>>, vector<8x64xf32>
    tpu.vector_store %arg18[%c24_218, %c0_219], %638 {strides = array<i32>} : memref<64x64xf32, #tpu.memory_space<vmem>>, vector<8x64xf32>,
    %c32_220 = arith.constant 32 : index
    %c0_221 = arith.constant 0 : index
    %640 = vector.load %arg19[%c32_220, %c0_221] : memref<64x256xf32, #tpu.memory_space<vmem>>, vector<8x256xf32>
    %641 = arith.truncf %638 : vector<8x64xf32> to vector<8x64xbf16>
    %cst_222 = arith.constant dense<0.000000e+00> : vector<8x256xf32>
    %642 = tpu.matmul %641, %553, %cst_222 {dimension_numbers = #tpu.dot_dimension_numbers<[1], [0], [0], [1], [0, 0, 1, 1], [], []>} : vector<8x64xbf16>, vector<64x256xbf16>, vector<8x256xf32> -> vector<8x256xf32>
    %643 = arith.addf %640, %642 : vector<8x256xf32>
    %644 = vector.extract_strided_slice %643 {offsets = [0, 0], sizes = [8, 192], strides = [1, 1]} : vector<8x256xf32> to vector<8x192xf32>
    %645 = arith.negf %644 : vector<8x192xf32>
    %646 = math.exp %645 : vector<8x192xf32>
    %cst_223 = arith.constant 1.000000e+00 : f32
    %647 = vector.broadcast %cst_223 : f32 to vector<8x192xf32>
    %648 = arith.addf %647, %646 : vector<8x192xf32>
    %649 = arith.divf %647, %648 : vector<8x192xf32>
    %650 = vector.extract_strided_slice %643 {offsets = [0, 192], sizes = [8, 64], strides = [1, 1]} : vector<8x256xf32> to vector<8x64xf32>
    %651 = math.tanh %650 : vector<8x64xf32>
    %652 = vector.extract_strided_slice %649 {offsets = [0, 64], sizes = [8, 64], strides = [1, 1]} : vector<8x192xf32> to vector<8x64xf32>
    %653 = arith.mulf %652, %635 : vector<8x64xf32>
    %654 = vector.extract_strided_slice %649 {offsets = [0, 0], sizes = [8, 64], strides = [1, 1]} : vector<8x192xf32> to vector<8x64xf32>
    %655 = arith.mulf %654, %651 : vector<8x64xf32>
    %656 = arith.addf %653, %655 : vector<8x64xf32>
    %657 = vector.extract_strided_slice %649 {offsets = [0, 128], sizes = [8, 64], strides = [1, 1]} : vector<8x192xf32> to vector<8x64xf32>
    %658 = math.tanh %656 : vector<8x64xf32>
    %659 = arith.mulf %657, %658 : vector<8x64xf32>
    %c32_224 = arith.constant 32 : index
    %c0_225 = arith.constant 0 : index
    %660 = vector.load %arg18[%c32_224, %c0_225] : memref<64x64xf32, #tpu.memory_space<vmem>>, vector<8x64xf32>
    tpu.vector_store %arg18[%c32_224, %c0_225], %659 {strides = array<i32>} : memref<64x64xf32, #tpu.memory_space<vmem>>, vector<8x64xf32>,
    %c40_226 = arith.constant 40 : index
    %c0_227 = arith.constant 0 : index
    %661 = vector.load %arg19[%c40_226, %c0_227] : memref<64x256xf32, #tpu.memory_space<vmem>>, vector<8x256xf32>
    %662 = arith.truncf %659 : vector<8x64xf32> to vector<8x64xbf16>
    %cst_228 = arith.constant dense<0.000000e+00> : vector<8x256xf32>
    %663 = tpu.matmul %662, %553, %cst_228 {dimension_numbers = #tpu.dot_dimension_numbers<[1], [0], [0], [1], [0, 0, 1, 1], [], []>} : vector<8x64xbf16>, vector<64x256xbf16>, vector<8x256xf32> -> vector<8x256xf32>
    %664 = arith.addf %661, %663 : vector<8x256xf32>
    %665 = vector.extract_strided_slice %664 {offsets = [0, 0], sizes = [8, 192], strides = [1, 1]} : vector<8x256xf32> to vector<8x192xf32>
    %666 = arith.negf %665 : vector<8x192xf32>
    %667 = math.exp %666 : vector<8x192xf32>
    %cst_229 = arith.constant 1.000000e+00 : f32
    %668 = vector.broadcast %cst_229 : f32 to vector<8x192xf32>
    %669 = arith.addf %668, %667 : vector<8x192xf32>
    %670 = arith.divf %668, %669 : vector<8x192xf32>
    %671 = vector.extract_strided_slice %664 {offsets = [0, 192], sizes = [8, 64], strides = [1, 1]} : vector<8x256xf32> to vector<8x64xf32>
    %672 = math.tanh %671 : vector<8x64xf32>
    %673 = vector.extract_strided_slice %670 {offsets = [0, 64], sizes = [8, 64], strides = [1, 1]} : vector<8x192xf32> to vector<8x64xf32>
    %674 = arith.mulf %673, %656 : vector<8x64xf32>
    %675 = vector.extract_strided_slice %670 {offsets = [0, 0], sizes = [8, 64], strides = [1, 1]} : vector<8x192xf32> to vector<8x64xf32>
    %676 = arith.mulf %675, %672 : vector<8x64xf32>
    %677 = arith.addf %674, %676 : vector<8x64xf32>
    %678 = vector.extract_strided_slice %670 {offsets = [0, 128], sizes = [8, 64], strides = [1, 1]} : vector<8x192xf32> to vector<8x64xf32>
    %679 = math.tanh %677 : vector<8x64xf32>
    %680 = arith.mulf %678, %679 : vector<8x64xf32>
    %c40_230 = arith.constant 40 : index
    %c0_231 = arith.constant 0 : index
    %681 = vector.load %arg18[%c40_230, %c0_231] : memref<64x64xf32, #tpu.memory_space<vmem>>, vector<8x64xf32>
    tpu.vector_store %arg18[%c40_230, %c0_231], %680 {strides = array<i32>} : memref<64x64xf32, #tpu.memory_space<vmem>>, vector<8x64xf32>,
    %c48_232 = arith.constant 48 : index
    %c0_233 = arith.constant 0 : index
    %682 = vector.load %arg19[%c48_232, %c0_233] : memref<64x256xf32, #tpu.memory_space<vmem>>, vector<8x256xf32>
    %683 = arith.truncf %680 : vector<8x64xf32> to vector<8x64xbf16>
    %cst_234 = arith.constant dense<0.000000e+00> : vector<8x256xf32>
    %684 = tpu.matmul %683, %553, %cst_234 {dimension_numbers = #tpu.dot_dimension_numbers<[1], [0], [0], [1], [0, 0, 1, 1], [], []>} : vector<8x64xbf16>, vector<64x256xbf16>, vector<8x256xf32> -> vector<8x256xf32>
    %685 = arith.addf %682, %684 : vector<8x256xf32>
    %686 = vector.extract_strided_slice %685 {offsets = [0, 0], sizes = [8, 192], strides = [1, 1]} : vector<8x256xf32> to vector<8x192xf32>
    %687 = arith.negf %686 : vector<8x192xf32>
    %688 = math.exp %687 : vector<8x192xf32>
    %cst_235 = arith.constant 1.000000e+00 : f32
    %689 = vector.broadcast %cst_235 : f32 to vector<8x192xf32>
    %690 = arith.addf %689, %688 : vector<8x192xf32>
    %691 = arith.divf %689, %690 : vector<8x192xf32>
    %692 = vector.extract_strided_slice %685 {offsets = [0, 192], sizes = [8, 64], strides = [1, 1]} : vector<8x256xf32> to vector<8x64xf32>
    %693 = math.tanh %692 : vector<8x64xf32>
    %694 = vector.extract_strided_slice %691 {offsets = [0, 64], sizes = [8, 64], strides = [1, 1]} : vector<8x192xf32> to vector<8x64xf32>
    %695 = arith.mulf %694, %677 : vector<8x64xf32>
    %696 = vector.extract_strided_slice %691 {offsets = [0, 0], sizes = [8, 64], strides = [1, 1]} : vector<8x192xf32> to vector<8x64xf32>
    %697 = arith.mulf %696, %693 : vector<8x64xf32>
    %698 = arith.addf %695, %697 : vector<8x64xf32>
    %699 = vector.extract_strided_slice %691 {offsets = [0, 128], sizes = [8, 64], strides = [1, 1]} : vector<8x192xf32> to vector<8x64xf32>
    %700 = math.tanh %698 : vector<8x64xf32>
    %701 = arith.mulf %699, %700 : vector<8x64xf32>
    %c48_236 = arith.constant 48 : index
    %c0_237 = arith.constant 0 : index
    %702 = vector.load %arg18[%c48_236, %c0_237] : memref<64x64xf32, #tpu.memory_space<vmem>>, vector<8x64xf32>
    tpu.vector_store %arg18[%c48_236, %c0_237], %701 {strides = array<i32>} : memref<64x64xf32, #tpu.memory_space<vmem>>, vector<8x64xf32>,
    %c56_238 = arith.constant 56 : index
    %c0_239 = arith.constant 0 : index
    %703 = vector.load %arg19[%c56_238, %c0_239] : memref<64x256xf32, #tpu.memory_space<vmem>>, vector<8x256xf32>
    %704 = arith.truncf %701 : vector<8x64xf32> to vector<8x64xbf16>
    %cst_240 = arith.constant dense<0.000000e+00> : vector<8x256xf32>
    %705 = tpu.matmul %704, %553, %cst_240 {dimension_numbers = #tpu.dot_dimension_numbers<[1], [0], [0], [1], [0, 0, 1, 1], [], []>} : vector<8x64xbf16>, vector<64x256xbf16>, vector<8x256xf32> -> vector<8x256xf32>
    %706 = arith.addf %703, %705 : vector<8x256xf32>
    %707 = vector.extract_strided_slice %706 {offsets = [0, 0], sizes = [8, 192], strides = [1, 1]} : vector<8x256xf32> to vector<8x192xf32>
    %708 = arith.negf %707 : vector<8x192xf32>
    %709 = math.exp %708 : vector<8x192xf32>
    %cst_241 = arith.constant 1.000000e+00 : f32
    %710 = vector.broadcast %cst_241 : f32 to vector<8x192xf32>
    %711 = arith.addf %710, %709 : vector<8x192xf32>
    %712 = arith.divf %710, %711 : vector<8x192xf32>
    %713 = vector.extract_strided_slice %706 {offsets = [0, 192], sizes = [8, 64], strides = [1, 1]} : vector<8x256xf32> to vector<8x64xf32>
    %714 = math.tanh %713 : vector<8x64xf32>
    %715 = vector.extract_strided_slice %712 {offsets = [0, 64], sizes = [8, 64], strides = [1, 1]} : vector<8x192xf32> to vector<8x64xf32>
    %716 = arith.mulf %715, %698 : vector<8x64xf32>
    %717 = vector.extract_strided_slice %712 {offsets = [0, 0], sizes = [8, 64], strides = [1, 1]} : vector<8x192xf32> to vector<8x64xf32>
    %718 = arith.mulf %717, %714 : vector<8x64xf32>
    %719 = arith.addf %716, %718 : vector<8x64xf32>
    %720 = vector.extract_strided_slice %712 {offsets = [0, 128], sizes = [8, 64], strides = [1, 1]} : vector<8x192xf32> to vector<8x64xf32>
    %721 = math.tanh %719 : vector<8x64xf32>
    %722 = arith.mulf %720, %721 : vector<8x64xf32>
    %c56_242 = arith.constant 56 : index
    %c0_243 = arith.constant 0 : index
    %723 = vector.load %arg18[%c56_242, %c0_243] : memref<64x64xf32, #tpu.memory_space<vmem>>, vector<8x64xf32>
    tpu.vector_store %arg18[%c56_242, %c0_243], %722 {strides = array<i32>} : memref<64x64xf32, #tpu.memory_space<vmem>>, vector<8x64xf32>,
    %c0_244 = arith.constant 0 : index
    %c0_245 = arith.constant 0 : index
    %724 = vector.load %arg18[%c0_244, %c0_245] : memref<64x64xf32, #tpu.memory_space<vmem>>, vector<64x64xf32>
    %c0_246 = arith.constant 0 : index
    %c0_247 = arith.constant 0 : index
    %c0_248 = arith.constant 0 : index
    %725 = vector.load %arg5[%c0_246, %c0_247, %c0_248] : memref<2x64x32xbf16, #tpu.memory_space<vmem>>, vector<1x64x32xbf16>
    %726 = vector.shape_cast %725 : vector<1x64x32xbf16> to vector<64x32xbf16>
    %727 = arith.truncf %724 : vector<64x64xf32> to vector<64x64xbf16>
    %cst_249 = arith.constant dense<0.000000e+00> : vector<64x32xf32>
    %728 = tpu.matmul %727, %726, %cst_249 {dimension_numbers = #tpu.dot_dimension_numbers<[1], [0], [0], [1], [0, 0, 1, 1], [], []>} : vector<64x64xbf16>, vector<64x32xbf16>, vector<64x32xf32> -> vector<64x32xf32>
    %cst_250 = arith.constant 0.000000e+00 : f32
    %729 = vector.broadcast %cst_250 : f32 to vector<64x32xf32>
    %730 = arith.maximumf %728, %729 : vector<64x32xf32>
    %c0_251 = arith.constant 0 : index
    %c0_252 = arith.constant 0 : index
    %c0_253 = arith.constant 0 : index
    %731 = vector.load %arg6[%c0_251, %c0_252, %c0_253] : memref<2x1x32xf32, #tpu.memory_space<vmem>>, vector<1x1x32xf32>
    %732 = vector.shape_cast %731 : vector<1x1x32xf32> to vector<1x32xf32>
    %733 = vector.broadcast %732 : vector<1x32xf32> to vector<64x32xf32>
    %734 = arith.mulf %730, %733 : vector<64x32xf32>
    %cst_254 = arith.constant dense<0.000000e+00> : vector<64xf32>
    %735 = vector.multi_reduction <add>, %734, %cst_254 [1] : vector<64x32xf32> to vector<64xf32>
    %736 = vector.shape_cast %735 : vector<64xf32> to vector<64x1xf32>
    %c0_255 = arith.constant 0 : index
    %c0_256 = arith.constant 0 : index
    %c0_257 = arith.constant 0 : index
    %737 = vector.load %arg7[%c0_255, %c0_256, %c0_257] : memref<2x8x4xf32, #tpu.memory_space<vmem>>, vector<1x8x4xf32>
    %738 = vector.shape_cast %737 : vector<1x8x4xf32> to vector<8x4xf32>
    %c0_258 = arith.constant 0 : index
    %c0_259 = arith.constant 0 : index
    %c0_260 = arith.constant 0 : index
    %739 = vector.load %arg8[%c0_258, %c0_259, %c0_260] : memref<2x4x8xf32, #tpu.memory_space<vmem>>, vector<1x4x8xf32>
    %740 = vector.shape_cast %739 : vector<1x4x8xf32> to vector<4x8xf32>
    %cst_261 = arith.constant 0.000000e+00 : f32
    %741 = vector.broadcast %cst_261 : f32 to vector<8x4xf32>
    %742 = vector.extract_strided_slice %736 {offsets = [0, 0], sizes = [8, 1], strides = [1, 1]} : vector<64x1xf32> to vector<8x1xf32>
    %743 = vector.extract_strided_slice %738 {offsets = [0, 0], sizes = [1, 4], strides = [1, 1]} : vector<8x4xf32> to vector<1x4xf32>
    %744 = vector.broadcast %742 : vector<8x1xf32> to vector<8x4xf32>
    %745 = vector.broadcast %743 : vector<1x4xf32> to vector<8x4xf32>
    %746 = arith.mulf %744, %745 : vector<8x4xf32>
    %747 = arith.addf %741, %746 : vector<8x4xf32>
    %748 = vector.extract_strided_slice %736 {offsets = [8, 0], sizes = [8, 1], strides = [1, 1]} : vector<64x1xf32> to vector<8x1xf32>
    %749 = vector.extract_strided_slice %738 {offsets = [1, 0], sizes = [1, 4], strides = [1, 1]} : vector<8x4xf32> to vector<1x4xf32>
    %750 = vector.broadcast %748 : vector<8x1xf32> to vector<8x4xf32>
    %751 = vector.broadcast %749 : vector<1x4xf32> to vector<8x4xf32>
    %752 = arith.mulf %750, %751 : vector<8x4xf32>
    %753 = arith.addf %747, %752 : vector<8x4xf32>
    %754 = vector.extract_strided_slice %736 {offsets = [16, 0], sizes = [8, 1], strides = [1, 1]} : vector<64x1xf32> to vector<8x1xf32>
    %755 = vector.extract_strided_slice %738 {offsets = [2, 0], sizes = [1, 4], strides = [1, 1]} : vector<8x4xf32> to vector<1x4xf32>
    %756 = vector.broadcast %754 : vector<8x1xf32> to vector<8x4xf32>
    %757 = vector.broadcast %755 : vector<1x4xf32> to vector<8x4xf32>
    %758 = arith.mulf %756, %757 : vector<8x4xf32>
    %759 = arith.addf %753, %758 : vector<8x4xf32>
    %760 = vector.extract_strided_slice %736 {offsets = [24, 0], sizes = [8, 1], strides = [1, 1]} : vector<64x1xf32> to vector<8x1xf32>
    %761 = vector.extract_strided_slice %738 {offsets = [3, 0], sizes = [1, 4], strides = [1, 1]} : vector<8x4xf32> to vector<1x4xf32>
    %762 = vector.broadcast %760 : vector<8x1xf32> to vector<8x4xf32>
    %763 = vector.broadcast %761 : vector<1x4xf32> to vector<8x4xf32>
    %764 = arith.mulf %762, %763 : vector<8x4xf32>
    %765 = arith.addf %759, %764 : vector<8x4xf32>
    %766 = vector.extract_strided_slice %736 {offsets = [32, 0], sizes = [8, 1], strides = [1, 1]} : vector<64x1xf32> to vector<8x1xf32>
    %767 = vector.extract_strided_slice %738 {offsets = [4, 0], sizes = [1, 4], strides = [1, 1]} : vector<8x4xf32> to vector<1x4xf32>
    %768 = vector.broadcast %766 : vector<8x1xf32> to vector<8x4xf32>
    %769 = vector.broadcast %767 : vector<1x4xf32> to vector<8x4xf32>
    %770 = arith.mulf %768, %769 : vector<8x4xf32>
    %771 = arith.addf %765, %770 : vector<8x4xf32>
    %772 = vector.extract_strided_slice %736 {offsets = [40, 0], sizes = [8, 1], strides = [1, 1]} : vector<64x1xf32> to vector<8x1xf32>
    %773 = vector.extract_strided_slice %738 {offsets = [5, 0], sizes = [1, 4], strides = [1, 1]} : vector<8x4xf32> to vector<1x4xf32>
    %774 = vector.broadcast %772 : vector<8x1xf32> to vector<8x4xf32>
    %775 = vector.broadcast %773 : vector<1x4xf32> to vector<8x4xf32>
    %776 = arith.mulf %774, %775 : vector<8x4xf32>
    %777 = arith.addf %771, %776 : vector<8x4xf32>
    %778 = vector.extract_strided_slice %736 {offsets = [48, 0], sizes = [8, 1], strides = [1, 1]} : vector<64x1xf32> to vector<8x1xf32>
    %779 = vector.extract_strided_slice %738 {offsets = [6, 0], sizes = [1, 4], strides = [1, 1]} : vector<8x4xf32> to vector<1x4xf32>
    %780 = vector.broadcast %778 : vector<8x1xf32> to vector<8x4xf32>
    %781 = vector.broadcast %779 : vector<1x4xf32> to vector<8x4xf32>
    %782 = arith.mulf %780, %781 : vector<8x4xf32>
    %783 = arith.addf %777, %782 : vector<8x4xf32>
    %784 = vector.extract_strided_slice %736 {offsets = [56, 0], sizes = [8, 1], strides = [1, 1]} : vector<64x1xf32> to vector<8x1xf32>
    %785 = vector.extract_strided_slice %738 {offsets = [7, 0], sizes = [1, 4], strides = [1, 1]} : vector<8x4xf32> to vector<1x4xf32>
    %786 = vector.broadcast %784 : vector<8x1xf32> to vector<8x4xf32>
    %787 = vector.broadcast %785 : vector<1x4xf32> to vector<8x4xf32>
    %788 = arith.mulf %786, %787 : vector<8x4xf32>
    %789 = arith.addf %783, %788 : vector<8x4xf32>
    %cst_262 = arith.constant 0.000000e+00 : f32
    %790 = vector.broadcast %cst_262 : f32 to vector<8x4xf32>
    %791 = arith.maximumf %789, %790 : vector<8x4xf32>
    %cst_263 = arith.constant 0.000000e+00 : f32
    %792 = vector.broadcast %cst_263 : f32 to vector<8x8xf32>
    %793 = vector.extract_strided_slice %791 {offsets = [0, 0], sizes = [8, 1], strides = [1, 1]} : vector<8x4xf32> to vector<8x1xf32>
    %794 = vector.extract_strided_slice %740 {offsets = [0, 0], sizes = [1, 8], strides = [1, 1]} : vector<4x8xf32> to vector<1x8xf32>
    %795 = vector.broadcast %793 : vector<8x1xf32> to vector<8x8xf32>
    %796 = vector.broadcast %794 : vector<1x8xf32> to vector<8x8xf32>
    %797 = arith.mulf %795, %796 : vector<8x8xf32>
    %798 = arith.addf %792, %797 : vector<8x8xf32>
    %799 = vector.extract_strided_slice %791 {offsets = [0, 1], sizes = [8, 1], strides = [1, 1]} : vector<8x4xf32> to vector<8x1xf32>
    %800 = vector.extract_strided_slice %740 {offsets = [1, 0], sizes = [1, 8], strides = [1, 1]} : vector<4x8xf32> to vector<1x8xf32>
    %801 = vector.broadcast %799 : vector<8x1xf32> to vector<8x8xf32>
    %802 = vector.broadcast %800 : vector<1x8xf32> to vector<8x8xf32>
    %803 = arith.mulf %801, %802 : vector<8x8xf32>
    %804 = arith.addf %798, %803 : vector<8x8xf32>
    %805 = vector.extract_strided_slice %791 {offsets = [0, 2], sizes = [8, 1], strides = [1, 1]} : vector<8x4xf32> to vector<8x1xf32>
    %806 = vector.extract_strided_slice %740 {offsets = [2, 0], sizes = [1, 8], strides = [1, 1]} : vector<4x8xf32> to vector<1x8xf32>
    %807 = vector.broadcast %805 : vector<8x1xf32> to vector<8x8xf32>
    %808 = vector.broadcast %806 : vector<1x8xf32> to vector<8x8xf32>
    %809 = arith.mulf %807, %808 : vector<8x8xf32>
    %810 = arith.addf %804, %809 : vector<8x8xf32>
    %811 = vector.extract_strided_slice %791 {offsets = [0, 3], sizes = [8, 1], strides = [1, 1]} : vector<8x4xf32> to vector<8x1xf32>
    %812 = vector.extract_strided_slice %740 {offsets = [3, 0], sizes = [1, 8], strides = [1, 1]} : vector<4x8xf32> to vector<1x8xf32>
    %813 = vector.broadcast %811 : vector<8x1xf32> to vector<8x8xf32>
    %814 = vector.broadcast %812 : vector<1x8xf32> to vector<8x8xf32>
    %815 = arith.mulf %813, %814 : vector<8x8xf32>
    %816 = arith.addf %810, %815 : vector<8x8xf32>
    %817 = arith.negf %816 : vector<8x8xf32>
    %818 = math.exp %817 : vector<8x8xf32>
    %cst_264 = arith.constant 1.000000e+00 : f32
    %819 = vector.broadcast %cst_264 : f32 to vector<8x8xf32>
    %820 = arith.addf %819, %818 : vector<8x8xf32>
    %821 = arith.divf %819, %820 : vector<8x8xf32>
    %c0_265 = arith.constant 0 : index
    %c0_266 = arith.constant 0 : index
    %c0_267 = arith.constant 0 : index
    %822 = vector.load %arg16[%c0_265, %c0_266, %c0_267] : memref<2x8x8xf32, #tpu.memory_space<vmem>>, vector<1x8x8xf32>
    %823 = vector.shape_cast %822 : vector<1x8x8xf32> to vector<8x8xf32>
    %824 = vector.shape_cast %821 : vector<8x8xf32> to vector<1x8x8xf32>
    tpu.vector_store %arg16[%c0_265, %c0_266, %c0_267], %824 {strides = array<i32>} : memref<2x8x8xf32, #tpu.memory_space<vmem>>, vector<1x8x8xf32>,
    %825 = vector.extract_strided_slice %724 {offsets = [0, 0], sizes = [8, 64], strides = [1, 1]} : vector<64x64xf32> to vector<8x64xf32>
    %826 = vector.extract_strided_slice %821 {offsets = [0, 0], sizes = [8, 1], strides = [1, 1]} : vector<8x8xf32> to vector<8x1xf32>
    %cst_268 = arith.constant 1.000000e+00 : f32
    %827 = vector.broadcast %cst_268 : f32 to vector<8x1xf32>
    %828 = arith.addf %826, %827 : vector<8x1xf32>
    %829 = vector.broadcast %828 : vector<8x1xf32> to vector<8x64xf32>
    %830 = arith.mulf %825, %829 : vector<8x64xf32>
    %c0_269 = arith.constant 0 : index
    %c0_270 = arith.constant 0 : index
    %831 = vector.load %arg20[%c0_269, %c0_270] : memref<64x64xf32, #tpu.memory_space<vmem>>, vector<8x64xf32>
    tpu.vector_store %arg20[%c0_269, %c0_270], %830 {strides = array<i32>} : memref<64x64xf32, #tpu.memory_space<vmem>>, vector<8x64xf32>,
    %832 = vector.extract_strided_slice %724 {offsets = [8, 0], sizes = [8, 64], strides = [1, 1]} : vector<64x64xf32> to vector<8x64xf32>
    %833 = vector.extract_strided_slice %821 {offsets = [0, 1], sizes = [8, 1], strides = [1, 1]} : vector<8x8xf32> to vector<8x1xf32>
    %cst_271 = arith.constant 1.000000e+00 : f32
    %834 = vector.broadcast %cst_271 : f32 to vector<8x1xf32>
    %835 = arith.addf %833, %834 : vector<8x1xf32>
    %836 = vector.broadcast %835 : vector<8x1xf32> to vector<8x64xf32>
    %837 = arith.mulf %832, %836 : vector<8x64xf32>
    %c8_272 = arith.constant 8 : index
    %c0_273 = arith.constant 0 : index
    %838 = vector.load %arg20[%c8_272, %c0_273] : memref<64x64xf32, #tpu.memory_space<vmem>>, vector<8x64xf32>
    tpu.vector_store %arg20[%c8_272, %c0_273], %837 {strides = array<i32>} : memref<64x64xf32, #tpu.memory_space<vmem>>, vector<8x64xf32>,
    %839 = vector.extract_strided_slice %724 {offsets = [16, 0], sizes = [8, 64], strides = [1, 1]} : vector<64x64xf32> to vector<8x64xf32>
    %840 = vector.extract_strided_slice %821 {offsets = [0, 2], sizes = [8, 1], strides = [1, 1]} : vector<8x8xf32> to vector<8x1xf32>
    %cst_274 = arith.constant 1.000000e+00 : f32
    %841 = vector.broadcast %cst_274 : f32 to vector<8x1xf32>
    %842 = arith.addf %840, %841 : vector<8x1xf32>
    %843 = vector.broadcast %842 : vector<8x1xf32> to vector<8x64xf32>
    %844 = arith.mulf %839, %843 : vector<8x64xf32>
    %c16_275 = arith.constant 16 : index
    %c0_276 = arith.constant 0 : index
    %845 = vector.load %arg20[%c16_275, %c0_276] : memref<64x64xf32, #tpu.memory_space<vmem>>, vector<8x64xf32>
    tpu.vector_store %arg20[%c16_275, %c0_276], %844 {strides = array<i32>} : memref<64x64xf32, #tpu.memory_space<vmem>>, vector<8x64xf32>,
    %846 = vector.extract_strided_slice %724 {offsets = [24, 0], sizes = [8, 64], strides = [1, 1]} : vector<64x64xf32> to vector<8x64xf32>
    %847 = vector.extract_strided_slice %821 {offsets = [0, 3], sizes = [8, 1], strides = [1, 1]} : vector<8x8xf32> to vector<8x1xf32>
    %cst_277 = arith.constant 1.000000e+00 : f32
    %848 = vector.broadcast %cst_277 : f32 to vector<8x1xf32>
    %849 = arith.addf %847, %848 : vector<8x1xf32>
    %850 = vector.broadcast %849 : vector<8x1xf32> to vector<8x64xf32>
    %851 = arith.mulf %846, %850 : vector<8x64xf32>
    %c24_278 = arith.constant 24 : index
    %c0_279 = arith.constant 0 : index
    %852 = vector.load %arg20[%c24_278, %c0_279] : memref<64x64xf32, #tpu.memory_space<vmem>>, vector<8x64xf32>
    tpu.vector_store %arg20[%c24_278, %c0_279], %851 {strides = array<i32>} : memref<64x64xf32, #tpu.memory_space<vmem>>, vector<8x64xf32>,
    %853 = vector.extract_strided_slice %724 {offsets = [32, 0], sizes = [8, 64], strides = [1, 1]} : vector<64x64xf32> to vector<8x64xf32>
    %854 = vector.extract_strided_slice %821 {offsets = [0, 4], sizes = [8, 1], strides = [1, 1]} : vector<8x8xf32> to vector<8x1xf32>
    %cst_280 = arith.constant 1.000000e+00 : f32
    %855 = vector.broadcast %cst_280 : f32 to vector<8x1xf32>
    %856 = arith.addf %854, %855 : vector<8x1xf32>
    %857 = vector.broadcast %856 : vector<8x1xf32> to vector<8x64xf32>
    %858 = arith.mulf %853, %857 : vector<8x64xf32>
    %c32_281 = arith.constant 32 : index
    %c0_282 = arith.constant 0 : index
    %859 = vector.load %arg20[%c32_281, %c0_282] : memref<64x64xf32, #tpu.memory_space<vmem>>, vector<8x64xf32>
    tpu.vector_store %arg20[%c32_281, %c0_282], %858 {strides = array<i32>} : memref<64x64xf32, #tpu.memory_space<vmem>>, vector<8x64xf32>,
    %860 = vector.extract_strided_slice %724 {offsets = [40, 0], sizes = [8, 64], strides = [1, 1]} : vector<64x64xf32> to vector<8x64xf32>
    %861 = vector.extract_strided_slice %821 {offsets = [0, 5], sizes = [8, 1], strides = [1, 1]} : vector<8x8xf32> to vector<8x1xf32>
    %cst_283 = arith.constant 1.000000e+00 : f32
    %862 = vector.broadcast %cst_283 : f32 to vector<8x1xf32>
    %863 = arith.addf %861, %862 : vector<8x1xf32>
    %864 = vector.broadcast %863 : vector<8x1xf32> to vector<8x64xf32>
    %865 = arith.mulf %860, %864 : vector<8x64xf32>
    %c40_284 = arith.constant 40 : index
    %c0_285 = arith.constant 0 : index
    %866 = vector.load %arg20[%c40_284, %c0_285] : memref<64x64xf32, #tpu.memory_space<vmem>>, vector<8x64xf32>
    tpu.vector_store %arg20[%c40_284, %c0_285], %865 {strides = array<i32>} : memref<64x64xf32, #tpu.memory_space<vmem>>, vector<8x64xf32>,
    %867 = vector.extract_strided_slice %724 {offsets = [48, 0], sizes = [8, 64], strides = [1, 1]} : vector<64x64xf32> to vector<8x64xf32>
    %868 = vector.extract_strided_slice %821 {offsets = [0, 6], sizes = [8, 1], strides = [1, 1]} : vector<8x8xf32> to vector<8x1xf32>
    %cst_286 = arith.constant 1.000000e+00 : f32
    %869 = vector.broadcast %cst_286 : f32 to vector<8x1xf32>
    %870 = arith.addf %868, %869 : vector<8x1xf32>
    %871 = vector.broadcast %870 : vector<8x1xf32> to vector<8x64xf32>
    %872 = arith.mulf %867, %871 : vector<8x64xf32>
    %c48_287 = arith.constant 48 : index
    %c0_288 = arith.constant 0 : index
    %873 = vector.load %arg20[%c48_287, %c0_288] : memref<64x64xf32, #tpu.memory_space<vmem>>, vector<8x64xf32>
    tpu.vector_store %arg20[%c48_287, %c0_288], %872 {strides = array<i32>} : memref<64x64xf32, #tpu.memory_space<vmem>>, vector<8x64xf32>,
    %874 = vector.extract_strided_slice %724 {offsets = [56, 0], sizes = [8, 64], strides = [1, 1]} : vector<64x64xf32> to vector<8x64xf32>
    %875 = vector.extract_strided_slice %821 {offsets = [0, 7], sizes = [8, 1], strides = [1, 1]} : vector<8x8xf32> to vector<8x1xf32>
    %cst_289 = arith.constant 1.000000e+00 : f32
    %876 = vector.broadcast %cst_289 : f32 to vector<8x1xf32>
    %877 = arith.addf %875, %876 : vector<8x1xf32>
    %878 = vector.broadcast %877 : vector<8x1xf32> to vector<8x64xf32>
    %879 = arith.mulf %874, %878 : vector<8x64xf32>
    %c56_290 = arith.constant 56 : index
    %c0_291 = arith.constant 0 : index
    %880 = vector.load %arg20[%c56_290, %c0_291] : memref<64x64xf32, #tpu.memory_space<vmem>>, vector<8x64xf32>
    tpu.vector_store %arg20[%c56_290, %c0_291], %879 {strides = array<i32>} : memref<64x64xf32, #tpu.memory_space<vmem>>, vector<8x64xf32>,
    %c0_292 = arith.constant 0 : index
    %c0_293 = arith.constant 0 : index
    %881 = vector.load %arg20[%c0_292, %c0_293] : memref<64x64xf32, #tpu.memory_space<vmem>>, vector<64x64xf32>
    %c0_294 = arith.constant 0 : index
    %c0_295 = arith.constant 0 : index
    %c0_296 = arith.constant 0 : index
    %c0_297 = arith.constant 0 : index
    %882 = vector.load %arg9[%c0_294, %c0_295, %c0_296, %c0_297] : memref<2x2x64x64xbf16, #tpu.memory_space<vmem>>, vector<1x1x64x64xbf16>
    %883 = vector.shape_cast %882 : vector<1x1x64x64xbf16> to vector<64x64xbf16>
    %884 = arith.truncf %881 : vector<64x64xf32> to vector<64x64xbf16>
    %cst_298 = arith.constant dense<0.000000e+00> : vector<64x64xf32>
    %885 = tpu.matmul %884, %883, %cst_298 {dimension_numbers = #tpu.dot_dimension_numbers<[1], [0], [0], [1], [0, 0, 1, 1], [], []>} : vector<64x64xbf16>, vector<64x64xbf16>, vector<64x64xf32> -> vector<64x64xf32>
    %c0_299 = arith.constant 0 : index
    %c1_300 = arith.constant 1 : index
    %c0_301 = arith.constant 0 : index
    %c0_302 = arith.constant 0 : index
    %886 = vector.load %arg9[%c0_299, %c1_300, %c0_301, %c0_302] : memref<2x2x64x64xbf16, #tpu.memory_space<vmem>>, vector<1x1x64x64xbf16>
    %887 = vector.shape_cast %886 : vector<1x1x64x64xbf16> to vector<64x64xbf16>
    %888 = arith.truncf %881 : vector<64x64xf32> to vector<64x64xbf16>
    %cst_303 = arith.constant dense<0.000000e+00> : vector<64x64xf32>
    %889 = tpu.matmul %888, %887, %cst_303 {dimension_numbers = #tpu.dot_dimension_numbers<[1], [0], [0], [1], [0, 0, 1, 1], [], []>} : vector<64x64xbf16>, vector<64x64xbf16>, vector<64x64xf32> -> vector<64x64xf32>
    %890 = vector.extract_strided_slice %889 {offsets = [0, 0], sizes = [8, 64], strides = [1, 1]} : vector<64x64xf32> to vector<8x64xf32>
    %cst_304 = arith.constant 0.000000e+00 : f32
    %891 = vector.broadcast %cst_304 : f32 to vector<8x64xf32>
    %892 = arith.maximumf %890, %891 : vector<8x64xf32>
    %c0_305 = arith.constant 0 : index
    %c0_306 = arith.constant 0 : index
    %893 = vector.load %arg20[%c0_305, %c0_306] : memref<64x64xf32, #tpu.memory_space<vmem>>, vector<8x64xf32>
    tpu.vector_store %arg20[%c0_305, %c0_306], %892 {strides = array<i32>} : memref<64x64xf32, #tpu.memory_space<vmem>>, vector<8x64xf32>,
    %894 = vector.extract_strided_slice %885 {offsets = [8, 0], sizes = [8, 64], strides = [1, 1]} : vector<64x64xf32> to vector<8x64xf32>
    %895 = vector.extract_strided_slice %889 {offsets = [16, 0], sizes = [8, 64], strides = [1, 1]} : vector<64x64xf32> to vector<8x64xf32>
    %896 = arith.addf %894, %895 : vector<8x64xf32>
    %cst_307 = arith.constant 0.000000e+00 : f32
    %897 = vector.broadcast %cst_307 : f32 to vector<8x64xf32>
    %898 = arith.maximumf %896, %897 : vector<8x64xf32>
    %c8_308 = arith.constant 8 : index
    %c0_309 = arith.constant 0 : index
    %899 = vector.load %arg20[%c8_308, %c0_309] : memref<64x64xf32, #tpu.memory_space<vmem>>, vector<8x64xf32>
    tpu.vector_store %arg20[%c8_308, %c0_309], %898 {strides = array<i32>} : memref<64x64xf32, #tpu.memory_space<vmem>>, vector<8x64xf32>,
    %900 = vector.extract_strided_slice %885 {offsets = [24, 0], sizes = [8, 64], strides = [1, 1]} : vector<64x64xf32> to vector<8x64xf32>
    %901 = vector.extract_strided_slice %889 {offsets = [32, 0], sizes = [8, 64], strides = [1, 1]} : vector<64x64xf32> to vector<8x64xf32>
    %902 = arith.addf %900, %901 : vector<8x64xf32>
    %cst_310 = arith.constant 0.000000e+00 : f32
    %903 = vector.broadcast %cst_310 : f32 to vector<8x64xf32>
    %904 = arith.maximumf %902, %903 : vector<8x64xf32>
    %c16_311 = arith.constant 16 : index
    %c0_312 = arith.constant 0 : index
    %905 = vector.load %arg20[%c16_311, %c0_312] : memref<64x64xf32, #tpu.memory_space<vmem>>, vector<8x64xf32>
    tpu.vector_store %arg20[%c16_311, %c0_312], %904 {strides = array<i32>} : memref<64x64xf32, #tpu.memory_space<vmem>>, vector<8x64xf32>,
    %906 = vector.extract_strided_slice %885 {offsets = [40, 0], sizes = [8, 64], strides = [1, 1]} : vector<64x64xf32> to vector<8x64xf32>
    %907 = vector.extract_strided_slice %889 {offsets = [48, 0], sizes = [8, 64], strides = [1, 1]} : vector<64x64xf32> to vector<8x64xf32>
    %908 = arith.addf %906, %907 : vector<8x64xf32>
    %cst_313 = arith.constant 0.000000e+00 : f32
    %909 = vector.broadcast %cst_313 : f32 to vector<8x64xf32>
    %910 = arith.maximumf %908, %909 : vector<8x64xf32>
    %c24_314 = arith.constant 24 : index
    %c0_315 = arith.constant 0 : index
    %911 = vector.load %arg20[%c24_314, %c0_315] : memref<64x64xf32, #tpu.memory_space<vmem>>, vector<8x64xf32>
    tpu.vector_store %arg20[%c24_314, %c0_315], %910 {strides = array<i32>} : memref<64x64xf32, #tpu.memory_space<vmem>>, vector<8x64xf32>,
    %912 = vector.extract_strided_slice %885 {offsets = [56, 0], sizes = [8, 64], strides = [1, 1]} : vector<64x64xf32> to vector<8x64xf32>
    %cst_316 = arith.constant 0.000000e+00 : f32
    %913 = vector.broadcast %cst_316 : f32 to vector<8x64xf32>
    %914 = arith.maximumf %912, %913 : vector<8x64xf32>
    %c32_317 = arith.constant 32 : index
    %c0_318 = arith.constant 0 : index
    %915 = vector.load %arg20[%c32_317, %c0_318] : memref<64x64xf32, #tpu.memory_space<vmem>>, vector<8x64xf32>
    tpu.vector_store %arg20[%c32_317, %c0_318], %914 {strides = array<i32>} : memref<64x64xf32, #tpu.memory_space<vmem>>, vector<8x64xf32>,
    %c0_319 = arith.constant 0 : index
    %c0_320 = arith.constant 0 : index
    %916 = vector.load %arg20[%c0_319, %c0_320] : memref<64x64xf32, #tpu.memory_space<vmem>>, vector<40x64xf32>
    %c0_321 = arith.constant 0 : index
    %c0_322 = arith.constant 0 : index
    %c0_323 = arith.constant 0 : index
    %c0_324 = arith.constant 0 : index
    %917 = vector.load %arg10[%c0_321, %c0_322, %c0_323, %c0_324] : memref<2x1x64x256xbf16, #tpu.memory_space<vmem>>, vector<1x1x64x256xbf16>
    %918 = vector.shape_cast %917 : vector<1x1x64x256xbf16> to vector<64x256xbf16>
    %919 = arith.truncf %916 : vector<40x64xf32> to vector<40x64xbf16>
    %cst_325 = arith.constant dense<0.000000e+00> : vector<40x256xf32>
    %920 = tpu.matmul %919, %918, %cst_325 {dimension_numbers = #tpu.dot_dimension_numbers<[1], [0], [0], [1], [0, 0, 1, 1], [], []>} : vector<40x64xbf16>, vector<64x256xbf16>, vector<40x256xf32> -> vector<40x256xf32>
    %c0_326 = arith.constant 0 : index
    %c0_327 = arith.constant 0 : index
    %921 = vector.load %arg19[%c0_326, %c0_327] : memref<64x256xf32, #tpu.memory_space<vmem>>, vector<40x256xf32>
    tpu.vector_store %arg19[%c0_326, %c0_327], %920 {strides = array<i32>} : memref<64x256xf32, #tpu.memory_space<vmem>>, vector<40x256xf32>,
    %c0_328 = arith.constant 0 : index
    %c0_329 = arith.constant 0 : index
    %c0_330 = arith.constant 0 : index
    %c0_331 = arith.constant 0 : index
    %922 = vector.load %arg11[%c0_328, %c0_329, %c0_330, %c0_331] : memref<2x1x64x256xbf16, #tpu.memory_space<vmem>>, vector<1x1x64x256xbf16>
    %923 = vector.shape_cast %922 : vector<1x1x64x256xbf16> to vector<64x256xbf16>
    %cst_332 = arith.constant 0.000000e+00 : f32
    %924 = vector.broadcast %cst_332 : f32 to vector<8x64xf32>
    %c0_333 = arith.constant 0 : index
    %c0_334 = arith.constant 0 : index
    %925 = vector.load %arg19[%c0_333, %c0_334] : memref<64x256xf32, #tpu.memory_space<vmem>>, vector<8x256xf32>
    %926 = arith.truncf %924 : vector<8x64xf32> to vector<8x64xbf16>
    %cst_335 = arith.constant dense<0.000000e+00> : vector<8x256xf32>
    %927 = tpu.matmul %926, %923, %cst_335 {dimension_numbers = #tpu.dot_dimension_numbers<[1], [0], [0], [1], [0, 0, 1, 1], [], []>} : vector<8x64xbf16>, vector<64x256xbf16>, vector<8x256xf32> -> vector<8x256xf32>
    %928 = arith.addf %925, %927 : vector<8x256xf32>
    %929 = vector.extract_strided_slice %928 {offsets = [0, 0], sizes = [8, 192], strides = [1, 1]} : vector<8x256xf32> to vector<8x192xf32>
    %930 = arith.negf %929 : vector<8x192xf32>
    %931 = math.exp %930 : vector<8x192xf32>
    %cst_336 = arith.constant 1.000000e+00 : f32
    %932 = vector.broadcast %cst_336 : f32 to vector<8x192xf32>
    %933 = arith.addf %932, %931 : vector<8x192xf32>
    %934 = arith.divf %932, %933 : vector<8x192xf32>
    %935 = vector.extract_strided_slice %928 {offsets = [0, 192], sizes = [8, 64], strides = [1, 1]} : vector<8x256xf32> to vector<8x64xf32>
    %936 = math.tanh %935 : vector<8x64xf32>
    %937 = vector.extract_strided_slice %934 {offsets = [0, 64], sizes = [8, 64], strides = [1, 1]} : vector<8x192xf32> to vector<8x64xf32>
    %938 = arith.mulf %937, %719 : vector<8x64xf32>
    %939 = vector.extract_strided_slice %934 {offsets = [0, 0], sizes = [8, 64], strides = [1, 1]} : vector<8x192xf32> to vector<8x64xf32>
    %940 = arith.mulf %939, %936 : vector<8x64xf32>
    %941 = arith.addf %938, %940 : vector<8x64xf32>
    %942 = vector.extract_strided_slice %934 {offsets = [0, 128], sizes = [8, 64], strides = [1, 1]} : vector<8x192xf32> to vector<8x64xf32>
    %943 = math.tanh %941 : vector<8x64xf32>
    %944 = arith.mulf %942, %943 : vector<8x64xf32>
    %c0_337 = arith.constant 0 : index
    %c0_338 = arith.constant 0 : index
    %945 = vector.load %arg20[%c0_337, %c0_338] : memref<64x64xf32, #tpu.memory_space<vmem>>, vector<8x64xf32>
    tpu.vector_store %arg20[%c0_337, %c0_338], %944 {strides = array<i32>} : memref<64x64xf32, #tpu.memory_space<vmem>>, vector<8x64xf32>,
    %c8_339 = arith.constant 8 : index
    %c0_340 = arith.constant 0 : index
    %946 = vector.load %arg19[%c8_339, %c0_340] : memref<64x256xf32, #tpu.memory_space<vmem>>, vector<8x256xf32>
    %947 = arith.truncf %944 : vector<8x64xf32> to vector<8x64xbf16>
    %cst_341 = arith.constant dense<0.000000e+00> : vector<8x256xf32>
    %948 = tpu.matmul %947, %923, %cst_341 {dimension_numbers = #tpu.dot_dimension_numbers<[1], [0], [0], [1], [0, 0, 1, 1], [], []>} : vector<8x64xbf16>, vector<64x256xbf16>, vector<8x256xf32> -> vector<8x256xf32>
    %949 = arith.addf %946, %948 : vector<8x256xf32>
    %950 = vector.extract_strided_slice %949 {offsets = [0, 0], sizes = [8, 192], strides = [1, 1]} : vector<8x256xf32> to vector<8x192xf32>
    %951 = arith.negf %950 : vector<8x192xf32>
    %952 = math.exp %951 : vector<8x192xf32>
    %cst_342 = arith.constant 1.000000e+00 : f32
    %953 = vector.broadcast %cst_342 : f32 to vector<8x192xf32>
    %954 = arith.addf %953, %952 : vector<8x192xf32>
    %955 = arith.divf %953, %954 : vector<8x192xf32>
    %956 = vector.extract_strided_slice %949 {offsets = [0, 192], sizes = [8, 64], strides = [1, 1]} : vector<8x256xf32> to vector<8x64xf32>
    %957 = math.tanh %956 : vector<8x64xf32>
    %958 = vector.extract_strided_slice %955 {offsets = [0, 64], sizes = [8, 64], strides = [1, 1]} : vector<8x192xf32> to vector<8x64xf32>
    %959 = arith.mulf %958, %941 : vector<8x64xf32>
    %960 = vector.extract_strided_slice %955 {offsets = [0, 0], sizes = [8, 64], strides = [1, 1]} : vector<8x192xf32> to vector<8x64xf32>
    %961 = arith.mulf %960, %957 : vector<8x64xf32>
    %962 = arith.addf %959, %961 : vector<8x64xf32>
    %963 = vector.extract_strided_slice %955 {offsets = [0, 128], sizes = [8, 64], strides = [1, 1]} : vector<8x192xf32> to vector<8x64xf32>
    %964 = math.tanh %962 : vector<8x64xf32>
    %965 = arith.mulf %963, %964 : vector<8x64xf32>
    %c8_343 = arith.constant 8 : index
    %c0_344 = arith.constant 0 : index
    %966 = vector.load %arg20[%c8_343, %c0_344] : memref<64x64xf32, #tpu.memory_space<vmem>>, vector<8x64xf32>
    tpu.vector_store %arg20[%c8_343, %c0_344], %965 {strides = array<i32>} : memref<64x64xf32, #tpu.memory_space<vmem>>, vector<8x64xf32>,
    %c16_345 = arith.constant 16 : index
    %c0_346 = arith.constant 0 : index
    %967 = vector.load %arg19[%c16_345, %c0_346] : memref<64x256xf32, #tpu.memory_space<vmem>>, vector<8x256xf32>
    %968 = arith.truncf %965 : vector<8x64xf32> to vector<8x64xbf16>
    %cst_347 = arith.constant dense<0.000000e+00> : vector<8x256xf32>
    %969 = tpu.matmul %968, %923, %cst_347 {dimension_numbers = #tpu.dot_dimension_numbers<[1], [0], [0], [1], [0, 0, 1, 1], [], []>} : vector<8x64xbf16>, vector<64x256xbf16>, vector<8x256xf32> -> vector<8x256xf32>
    %970 = arith.addf %967, %969 : vector<8x256xf32>
    %971 = vector.extract_strided_slice %970 {offsets = [0, 0], sizes = [8, 192], strides = [1, 1]} : vector<8x256xf32> to vector<8x192xf32>
    %972 = arith.negf %971 : vector<8x192xf32>
    %973 = math.exp %972 : vector<8x192xf32>
    %cst_348 = arith.constant 1.000000e+00 : f32
    %974 = vector.broadcast %cst_348 : f32 to vector<8x192xf32>
    %975 = arith.addf %974, %973 : vector<8x192xf32>
    %976 = arith.divf %974, %975 : vector<8x192xf32>
    %977 = vector.extract_strided_slice %970 {offsets = [0, 192], sizes = [8, 64], strides = [1, 1]} : vector<8x256xf32> to vector<8x64xf32>
    %978 = math.tanh %977 : vector<8x64xf32>
    %979 = vector.extract_strided_slice %976 {offsets = [0, 64], sizes = [8, 64], strides = [1, 1]} : vector<8x192xf32> to vector<8x64xf32>
    %980 = arith.mulf %979, %962 : vector<8x64xf32>
    %981 = vector.extract_strided_slice %976 {offsets = [0, 0], sizes = [8, 64], strides = [1, 1]} : vector<8x192xf32> to vector<8x64xf32>
    %982 = arith.mulf %981, %978 : vector<8x64xf32>
    %983 = arith.addf %980, %982 : vector<8x64xf32>
    %984 = vector.extract_strided_slice %976 {offsets = [0, 128], sizes = [8, 64], strides = [1, 1]} : vector<8x192xf32> to vector<8x64xf32>
    %985 = math.tanh %983 : vector<8x64xf32>
    %986 = arith.mulf %984, %985 : vector<8x64xf32>
    %c16_349 = arith.constant 16 : index
    %c0_350 = arith.constant 0 : index
    %987 = vector.load %arg20[%c16_349, %c0_350] : memref<64x64xf32, #tpu.memory_space<vmem>>, vector<8x64xf32>
    tpu.vector_store %arg20[%c16_349, %c0_350], %986 {strides = array<i32>} : memref<64x64xf32, #tpu.memory_space<vmem>>, vector<8x64xf32>,
    %c24_351 = arith.constant 24 : index
    %c0_352 = arith.constant 0 : index
    %988 = vector.load %arg19[%c24_351, %c0_352] : memref<64x256xf32, #tpu.memory_space<vmem>>, vector<8x256xf32>
    %989 = arith.truncf %986 : vector<8x64xf32> to vector<8x64xbf16>
    %cst_353 = arith.constant dense<0.000000e+00> : vector<8x256xf32>
    %990 = tpu.matmul %989, %923, %cst_353 {dimension_numbers = #tpu.dot_dimension_numbers<[1], [0], [0], [1], [0, 0, 1, 1], [], []>} : vector<8x64xbf16>, vector<64x256xbf16>, vector<8x256xf32> -> vector<8x256xf32>
    %991 = arith.addf %988, %990 : vector<8x256xf32>
    %992 = vector.extract_strided_slice %991 {offsets = [0, 0], sizes = [8, 192], strides = [1, 1]} : vector<8x256xf32> to vector<8x192xf32>
    %993 = arith.negf %992 : vector<8x192xf32>
    %994 = math.exp %993 : vector<8x192xf32>
    %cst_354 = arith.constant 1.000000e+00 : f32
    %995 = vector.broadcast %cst_354 : f32 to vector<8x192xf32>
    %996 = arith.addf %995, %994 : vector<8x192xf32>
    %997 = arith.divf %995, %996 : vector<8x192xf32>
    %998 = vector.extract_strided_slice %991 {offsets = [0, 192], sizes = [8, 64], strides = [1, 1]} : vector<8x256xf32> to vector<8x64xf32>
    %999 = math.tanh %998 : vector<8x64xf32>
    %1000 = vector.extract_strided_slice %997 {offsets = [0, 64], sizes = [8, 64], strides = [1, 1]} : vector<8x192xf32> to vector<8x64xf32>
    %1001 = arith.mulf %1000, %983 : vector<8x64xf32>
    %1002 = vector.extract_strided_slice %997 {offsets = [0, 0], sizes = [8, 64], strides = [1, 1]} : vector<8x192xf32> to vector<8x64xf32>
    %1003 = arith.mulf %1002, %999 : vector<8x64xf32>
    %1004 = arith.addf %1001, %1003 : vector<8x64xf32>
    %1005 = vector.extract_strided_slice %997 {offsets = [0, 128], sizes = [8, 64], strides = [1, 1]} : vector<8x192xf32> to vector<8x64xf32>
    %1006 = math.tanh %1004 : vector<8x64xf32>
    %1007 = arith.mulf %1005, %1006 : vector<8x64xf32>
    %c24_355 = arith.constant 24 : index
    %c0_356 = arith.constant 0 : index
    %1008 = vector.load %arg20[%c24_355, %c0_356] : memref<64x64xf32, #tpu.memory_space<vmem>>, vector<8x64xf32>
    tpu.vector_store %arg20[%c24_355, %c0_356], %1007 {strides = array<i32>} : memref<64x64xf32, #tpu.memory_space<vmem>>, vector<8x64xf32>,
    %c32_357 = arith.constant 32 : index
    %c0_358 = arith.constant 0 : index
    %1009 = vector.load %arg19[%c32_357, %c0_358] : memref<64x256xf32, #tpu.memory_space<vmem>>, vector<8x256xf32>
    %1010 = arith.truncf %1007 : vector<8x64xf32> to vector<8x64xbf16>
    %cst_359 = arith.constant dense<0.000000e+00> : vector<8x256xf32>
    %1011 = tpu.matmul %1010, %923, %cst_359 {dimension_numbers = #tpu.dot_dimension_numbers<[1], [0], [0], [1], [0, 0, 1, 1], [], []>} : vector<8x64xbf16>, vector<64x256xbf16>, vector<8x256xf32> -> vector<8x256xf32>
    %1012 = arith.addf %1009, %1011 : vector<8x256xf32>
    %1013 = vector.extract_strided_slice %1012 {offsets = [0, 0], sizes = [8, 192], strides = [1, 1]} : vector<8x256xf32> to vector<8x192xf32>
    %1014 = arith.negf %1013 : vector<8x192xf32>
    %1015 = math.exp %1014 : vector<8x192xf32>
    %cst_360 = arith.constant 1.000000e+00 : f32
    %1016 = vector.broadcast %cst_360 : f32 to vector<8x192xf32>
    %1017 = arith.addf %1016, %1015 : vector<8x192xf32>
    %1018 = arith.divf %1016, %1017 : vector<8x192xf32>
    %1019 = vector.extract_strided_slice %1012 {offsets = [0, 192], sizes = [8, 64], strides = [1, 1]} : vector<8x256xf32> to vector<8x64xf32>
    %1020 = math.tanh %1019 : vector<8x64xf32>
    %1021 = vector.extract_strided_slice %1018 {offsets = [0, 64], sizes = [8, 64], strides = [1, 1]} : vector<8x192xf32> to vector<8x64xf32>
    %1022 = arith.mulf %1021, %1004 : vector<8x64xf32>
    %1023 = vector.extract_strided_slice %1018 {offsets = [0, 0], sizes = [8, 64], strides = [1, 1]} : vector<8x192xf32> to vector<8x64xf32>
    %1024 = arith.mulf %1023, %1020 : vector<8x64xf32>
    %1025 = arith.addf %1022, %1024 : vector<8x64xf32>
    %1026 = vector.extract_strided_slice %1018 {offsets = [0, 128], sizes = [8, 64], strides = [1, 1]} : vector<8x192xf32> to vector<8x64xf32>
    %1027 = math.tanh %1025 : vector<8x64xf32>
    %1028 = arith.mulf %1026, %1027 : vector<8x64xf32>
    %c32_361 = arith.constant 32 : index
    %c0_362 = arith.constant 0 : index
    %1029 = vector.load %arg20[%c32_361, %c0_362] : memref<64x64xf32, #tpu.memory_space<vmem>>, vector<8x64xf32>
    tpu.vector_store %arg20[%c32_361, %c0_362], %1028 {strides = array<i32>} : memref<64x64xf32, #tpu.memory_space<vmem>>, vector<8x64xf32>,
    %c0_363 = arith.constant 0 : index
    %c0_364 = arith.constant 0 : index
    %1030 = vector.load %arg20[%c0_363, %c0_364] : memref<64x64xf32, #tpu.memory_space<vmem>>, vector<40x64xf32>
    %cst_365 = arith.constant dense<0.000000e+00> : vector<40xf32>
    %1031 = vector.multi_reduction <add>, %1030, %cst_365 [1] : vector<40x64xf32> to vector<40xf32>
    %1032 = vector.shape_cast %1031 : vector<40xf32> to vector<40x1xf32>
    %cst_366 = arith.constant 6.400000e+01 : f32
    %1033 = vector.broadcast %cst_366 : f32 to vector<40x1xf32>
    %1034 = arith.divf %1032, %1033 : vector<40x1xf32>
    %1035 = vector.broadcast %1034 : vector<40x1xf32> to vector<40x64xf32>
    %1036 = arith.subf %1030, %1035 : vector<40x64xf32>
    %1037 = arith.mulf %1036, %1036 : vector<40x64xf32>
    %cst_367 = arith.constant dense<0.000000e+00> : vector<40xf32>
    %1038 = vector.multi_reduction <add>, %1037, %cst_367 [1] : vector<40x64xf32> to vector<40xf32>
    %1039 = vector.shape_cast %1038 : vector<40xf32> to vector<40x1xf32>
    %cst_368 = arith.constant 6.400000e+01 : f32
    %1040 = vector.broadcast %cst_368 : f32 to vector<40x1xf32>
    %1041 = arith.divf %1039, %1040 : vector<40x1xf32>
    %cst_369 = arith.constant 9.99999974E-6 : f32
    %1042 = vector.broadcast %cst_369 : f32 to vector<40x1xf32>
    %1043 = arith.addf %1041, %1042 : vector<40x1xf32>
    %1044 = math.rsqrt %1043 : vector<40x1xf32>
    %1045 = vector.broadcast %1044 : vector<40x1xf32> to vector<40x64xf32>
    %1046 = arith.mulf %1036, %1045 : vector<40x64xf32>
    %c0_370 = arith.constant 0 : index
    %c0_371 = arith.constant 0 : index
    %c0_372 = arith.constant 0 : index
    %1047 = vector.load %arg12[%c0_370, %c0_371, %c0_372] : memref<2x1x64xf32, #tpu.memory_space<vmem>>, vector<1x1x64xf32>
    %1048 = vector.shape_cast %1047 : vector<1x1x64xf32> to vector<1x64xf32>
    %1049 = vector.broadcast %1048 : vector<1x64xf32> to vector<40x64xf32>
    %1050 = arith.mulf %1046, %1049 : vector<40x64xf32>
    %c0_373 = arith.constant 0 : index
    %c0_374 = arith.constant 0 : index
    %c0_375 = arith.constant 0 : index
    %1051 = vector.load %arg13[%c0_373, %c0_374, %c0_375] : memref<2x1x64xf32, #tpu.memory_space<vmem>>, vector<1x1x64xf32>
    %1052 = vector.shape_cast %1051 : vector<1x1x64xf32> to vector<1x64xf32>
    %1053 = vector.broadcast %1052 : vector<1x64xf32> to vector<40x64xf32>
    %1054 = arith.addf %1050, %1053 : vector<40x64xf32>
    %c0_376 = arith.constant 0 : index
    %c0_377 = arith.constant 0 : index
    %c0_378 = arith.constant 0 : index
    %1055 = vector.load %arg14[%c0_376, %c0_377, %c0_378] : memref<2x64x128xbf16, #tpu.memory_space<vmem>>, vector<1x64x128xbf16>
    %1056 = vector.shape_cast %1055 : vector<1x64x128xbf16> to vector<64x128xbf16>
    %1057 = arith.truncf %1054 : vector<40x64xf32> to vector<40x64xbf16>
    %cst_379 = arith.constant dense<0.000000e+00> : vector<40x128xf32>
    %1058 = tpu.matmul %1057, %1056, %cst_379 {dimension_numbers = #tpu.dot_dimension_numbers<[1], [0], [0], [1], [0, 0, 1, 1], [], []>} : vector<40x64xbf16>, vector<64x128xbf16>, vector<40x128xf32> -> vector<40x128xf32>
    %c0_380 = arith.constant 0 : index
    %c0_381 = arith.constant 0 : index
    %c0_382 = arith.constant 0 : index
    %1059 = vector.load %arg15[%c0_380, %c0_381, %c0_382] : memref<2x1x128xf32, #tpu.memory_space<vmem>>, vector<1x1x128xf32>
    %1060 = vector.shape_cast %1059 : vector<1x1x128xf32> to vector<1x128xf32>
    %1061 = vector.broadcast %1060 : vector<1x128xf32> to vector<40x128xf32>
    %1062 = arith.addf %1058, %1061 : vector<40x128xf32>
    %c0_383 = arith.constant 0 : index
    %c0_384 = arith.constant 0 : index
    %c0_385 = arith.constant 0 : index
    %1063 = vector.load %arg17[%c0_383, %c0_384, %c0_385] : memref<2x40x128xf32, #tpu.memory_space<vmem>>, vector<1x40x128xf32>
    %1064 = vector.shape_cast %1063 : vector<1x40x128xf32> to vector<40x128xf32>
    %1065 = vector.shape_cast %1062 : vector<40x128xf32> to vector<1x40x128xf32>
    tpu.vector_store %arg17[%c0_383, %c0_384, %c0_385], %1065 {strides = array<i32>} : memref<2x40x128xf32, #tpu.memory_space<vmem>>, vector<1x40x128xf32>,
    %c0_386 = arith.constant 0 : index
    %c0_387 = arith.constant 0 : index
    %1066 = vector.load %arg18[%c0_386, %c0_387] : memref<64x64xf32, #tpu.memory_space<vmem>>, vector<64x64xf32>
    %c1_388 = arith.constant 1 : index
    %c0_389 = arith.constant 0 : index
    %c0_390 = arith.constant 0 : index
    %1067 = vector.load %arg5[%c1_388, %c0_389, %c0_390] : memref<2x64x32xbf16, #tpu.memory_space<vmem>>, vector<1x64x32xbf16>
    %1068 = vector.shape_cast %1067 : vector<1x64x32xbf16> to vector<64x32xbf16>
    %1069 = arith.truncf %1066 : vector<64x64xf32> to vector<64x64xbf16>
    %cst_391 = arith.constant dense<0.000000e+00> : vector<64x32xf32>
    %1070 = tpu.matmul %1069, %1068, %cst_391 {dimension_numbers = #tpu.dot_dimension_numbers<[1], [0], [0], [1], [0, 0, 1, 1], [], []>} : vector<64x64xbf16>, vector<64x32xbf16>, vector<64x32xf32> -> vector<64x32xf32>
    %cst_392 = arith.constant 0.000000e+00 : f32
    %1071 = vector.broadcast %cst_392 : f32 to vector<64x32xf32>
    %1072 = arith.maximumf %1070, %1071 : vector<64x32xf32>
    %c1_393 = arith.constant 1 : index
    %c0_394 = arith.constant 0 : index
    %c0_395 = arith.constant 0 : index
    %1073 = vector.load %arg6[%c1_393, %c0_394, %c0_395] : memref<2x1x32xf32, #tpu.memory_space<vmem>>, vector<1x1x32xf32>
    %1074 = vector.shape_cast %1073 : vector<1x1x32xf32> to vector<1x32xf32>
    %1075 = vector.broadcast %1074 : vector<1x32xf32> to vector<64x32xf32>
    %1076 = arith.mulf %1072, %1075 : vector<64x32xf32>
    %cst_396 = arith.constant dense<0.000000e+00> : vector<64xf32>
    %1077 = vector.multi_reduction <add>, %1076, %cst_396 [1] : vector<64x32xf32> to vector<64xf32>
    %1078 = vector.shape_cast %1077 : vector<64xf32> to vector<64x1xf32>
    %c1_397 = arith.constant 1 : index
    %c0_398 = arith.constant 0 : index
    %c0_399 = arith.constant 0 : index
    %1079 = vector.load %arg7[%c1_397, %c0_398, %c0_399] : memref<2x8x4xf32, #tpu.memory_space<vmem>>, vector<1x8x4xf32>
    %1080 = vector.shape_cast %1079 : vector<1x8x4xf32> to vector<8x4xf32>
    %c1_400 = arith.constant 1 : index
    %c0_401 = arith.constant 0 : index
    %c0_402 = arith.constant 0 : index
    %1081 = vector.load %arg8[%c1_400, %c0_401, %c0_402] : memref<2x4x8xf32, #tpu.memory_space<vmem>>, vector<1x4x8xf32>
    %1082 = vector.shape_cast %1081 : vector<1x4x8xf32> to vector<4x8xf32>
    %cst_403 = arith.constant 0.000000e+00 : f32
    %1083 = vector.broadcast %cst_403 : f32 to vector<8x4xf32>
    %1084 = vector.extract_strided_slice %1078 {offsets = [0, 0], sizes = [8, 1], strides = [1, 1]} : vector<64x1xf32> to vector<8x1xf32>
    %1085 = vector.extract_strided_slice %1080 {offsets = [0, 0], sizes = [1, 4], strides = [1, 1]} : vector<8x4xf32> to vector<1x4xf32>
    %1086 = vector.broadcast %1084 : vector<8x1xf32> to vector<8x4xf32>
    %1087 = vector.broadcast %1085 : vector<1x4xf32> to vector<8x4xf32>
    %1088 = arith.mulf %1086, %1087 : vector<8x4xf32>
    %1089 = arith.addf %1083, %1088 : vector<8x4xf32>
    %1090 = vector.extract_strided_slice %1078 {offsets = [8, 0], sizes = [8, 1], strides = [1, 1]} : vector<64x1xf32> to vector<8x1xf32>
    %1091 = vector.extract_strided_slice %1080 {offsets = [1, 0], sizes = [1, 4], strides = [1, 1]} : vector<8x4xf32> to vector<1x4xf32>
    %1092 = vector.broadcast %1090 : vector<8x1xf32> to vector<8x4xf32>
    %1093 = vector.broadcast %1091 : vector<1x4xf32> to vector<8x4xf32>
    %1094 = arith.mulf %1092, %1093 : vector<8x4xf32>
    %1095 = arith.addf %1089, %1094 : vector<8x4xf32>
    %1096 = vector.extract_strided_slice %1078 {offsets = [16, 0], sizes = [8, 1], strides = [1, 1]} : vector<64x1xf32> to vector<8x1xf32>
    %1097 = vector.extract_strided_slice %1080 {offsets = [2, 0], sizes = [1, 4], strides = [1, 1]} : vector<8x4xf32> to vector<1x4xf32>
    %1098 = vector.broadcast %1096 : vector<8x1xf32> to vector<8x4xf32>
    %1099 = vector.broadcast %1097 : vector<1x4xf32> to vector<8x4xf32>
    %1100 = arith.mulf %1098, %1099 : vector<8x4xf32>
    %1101 = arith.addf %1095, %1100 : vector<8x4xf32>
    %1102 = vector.extract_strided_slice %1078 {offsets = [24, 0], sizes = [8, 1], strides = [1, 1]} : vector<64x1xf32> to vector<8x1xf32>
    %1103 = vector.extract_strided_slice %1080 {offsets = [3, 0], sizes = [1, 4], strides = [1, 1]} : vector<8x4xf32> to vector<1x4xf32>
    %1104 = vector.broadcast %1102 : vector<8x1xf32> to vector<8x4xf32>
    %1105 = vector.broadcast %1103 : vector<1x4xf32> to vector<8x4xf32>
    %1106 = arith.mulf %1104, %1105 : vector<8x4xf32>
    %1107 = arith.addf %1101, %1106 : vector<8x4xf32>
    %1108 = vector.extract_strided_slice %1078 {offsets = [32, 0], sizes = [8, 1], strides = [1, 1]} : vector<64x1xf32> to vector<8x1xf32>
    %1109 = vector.extract_strided_slice %1080 {offsets = [4, 0], sizes = [1, 4], strides = [1, 1]} : vector<8x4xf32> to vector<1x4xf32>
    %1110 = vector.broadcast %1108 : vector<8x1xf32> to vector<8x4xf32>
    %1111 = vector.broadcast %1109 : vector<1x4xf32> to vector<8x4xf32>
    %1112 = arith.mulf %1110, %1111 : vector<8x4xf32>
    %1113 = arith.addf %1107, %1112 : vector<8x4xf32>
    %1114 = vector.extract_strided_slice %1078 {offsets = [40, 0], sizes = [8, 1], strides = [1, 1]} : vector<64x1xf32> to vector<8x1xf32>
    %1115 = vector.extract_strided_slice %1080 {offsets = [5, 0], sizes = [1, 4], strides = [1, 1]} : vector<8x4xf32> to vector<1x4xf32>
    %1116 = vector.broadcast %1114 : vector<8x1xf32> to vector<8x4xf32>
    %1117 = vector.broadcast %1115 : vector<1x4xf32> to vector<8x4xf32>
    %1118 = arith.mulf %1116, %1117 : vector<8x4xf32>
    %1119 = arith.addf %1113, %1118 : vector<8x4xf32>
    %1120 = vector.extract_strided_slice %1078 {offsets = [48, 0], sizes = [8, 1], strides = [1, 1]} : vector<64x1xf32> to vector<8x1xf32>
    %1121 = vector.extract_strided_slice %1080 {offsets = [6, 0], sizes = [1, 4], strides = [1, 1]} : vector<8x4xf32> to vector<1x4xf32>
    %1122 = vector.broadcast %1120 : vector<8x1xf32> to vector<8x4xf32>
    %1123 = vector.broadcast %1121 : vector<1x4xf32> to vector<8x4xf32>
    %1124 = arith.mulf %1122, %1123 : vector<8x4xf32>
    %1125 = arith.addf %1119, %1124 : vector<8x4xf32>
    %1126 = vector.extract_strided_slice %1078 {offsets = [56, 0], sizes = [8, 1], strides = [1, 1]} : vector<64x1xf32> to vector<8x1xf32>
    %1127 = vector.extract_strided_slice %1080 {offsets = [7, 0], sizes = [1, 4], strides = [1, 1]} : vector<8x4xf32> to vector<1x4xf32>
    %1128 = vector.broadcast %1126 : vector<8x1xf32> to vector<8x4xf32>
    %1129 = vector.broadcast %1127 : vector<1x4xf32> to vector<8x4xf32>
    %1130 = arith.mulf %1128, %1129 : vector<8x4xf32>
    %1131 = arith.addf %1125, %1130 : vector<8x4xf32>
    %cst_404 = arith.constant 0.000000e+00 : f32
    %1132 = vector.broadcast %cst_404 : f32 to vector<8x4xf32>
    %1133 = arith.maximumf %1131, %1132 : vector<8x4xf32>
    %cst_405 = arith.constant 0.000000e+00 : f32
    %1134 = vector.broadcast %cst_405 : f32 to vector<8x8xf32>
    %1135 = vector.extract_strided_slice %1133 {offsets = [0, 0], sizes = [8, 1], strides = [1, 1]} : vector<8x4xf32> to vector<8x1xf32>
    %1136 = vector.extract_strided_slice %1082 {offsets = [0, 0], sizes = [1, 8], strides = [1, 1]} : vector<4x8xf32> to vector<1x8xf32>
    %1137 = vector.broadcast %1135 : vector<8x1xf32> to vector<8x8xf32>
    %1138 = vector.broadcast %1136 : vector<1x8xf32> to vector<8x8xf32>
    %1139 = arith.mulf %1137, %1138 : vector<8x8xf32>
    %1140 = arith.addf %1134, %1139 : vector<8x8xf32>
    %1141 = vector.extract_strided_slice %1133 {offsets = [0, 1], sizes = [8, 1], strides = [1, 1]} : vector<8x4xf32> to vector<8x1xf32>
    %1142 = vector.extract_strided_slice %1082 {offsets = [1, 0], sizes = [1, 8], strides = [1, 1]} : vector<4x8xf32> to vector<1x8xf32>
    %1143 = vector.broadcast %1141 : vector<8x1xf32> to vector<8x8xf32>
    %1144 = vector.broadcast %1142 : vector<1x8xf32> to vector<8x8xf32>
    %1145 = arith.mulf %1143, %1144 : vector<8x8xf32>
    %1146 = arith.addf %1140, %1145 : vector<8x8xf32>
    %1147 = vector.extract_strided_slice %1133 {offsets = [0, 2], sizes = [8, 1], strides = [1, 1]} : vector<8x4xf32> to vector<8x1xf32>
    %1148 = vector.extract_strided_slice %1082 {offsets = [2, 0], sizes = [1, 8], strides = [1, 1]} : vector<4x8xf32> to vector<1x8xf32>
    %1149 = vector.broadcast %1147 : vector<8x1xf32> to vector<8x8xf32>
    %1150 = vector.broadcast %1148 : vector<1x8xf32> to vector<8x8xf32>
    %1151 = arith.mulf %1149, %1150 : vector<8x8xf32>
    %1152 = arith.addf %1146, %1151 : vector<8x8xf32>
    %1153 = vector.extract_strided_slice %1133 {offsets = [0, 3], sizes = [8, 1], strides = [1, 1]} : vector<8x4xf32> to vector<8x1xf32>
    %1154 = vector.extract_strided_slice %1082 {offsets = [3, 0], sizes = [1, 8], strides = [1, 1]} : vector<4x8xf32> to vector<1x8xf32>
    %1155 = vector.broadcast %1153 : vector<8x1xf32> to vector<8x8xf32>
    %1156 = vector.broadcast %1154 : vector<1x8xf32> to vector<8x8xf32>
    %1157 = arith.mulf %1155, %1156 : vector<8x8xf32>
    %1158 = arith.addf %1152, %1157 : vector<8x8xf32>
    %1159 = arith.negf %1158 : vector<8x8xf32>
    %1160 = math.exp %1159 : vector<8x8xf32>
    %cst_406 = arith.constant 1.000000e+00 : f32
    %1161 = vector.broadcast %cst_406 : f32 to vector<8x8xf32>
    %1162 = arith.addf %1161, %1160 : vector<8x8xf32>
    %1163 = arith.divf %1161, %1162 : vector<8x8xf32>
    %c1_407 = arith.constant 1 : index
    %c0_408 = arith.constant 0 : index
    %c0_409 = arith.constant 0 : index
    %1164 = vector.load %arg16[%c1_407, %c0_408, %c0_409] : memref<2x8x8xf32, #tpu.memory_space<vmem>>, vector<1x8x8xf32>
    %1165 = vector.shape_cast %1164 : vector<1x8x8xf32> to vector<8x8xf32>
    %1166 = vector.shape_cast %1163 : vector<8x8xf32> to vector<1x8x8xf32>
    tpu.vector_store %arg16[%c1_407, %c0_408, %c0_409], %1166 {strides = array<i32>} : memref<2x8x8xf32, #tpu.memory_space<vmem>>, vector<1x8x8xf32>,
    %1167 = vector.extract_strided_slice %1066 {offsets = [0, 0], sizes = [8, 64], strides = [1, 1]} : vector<64x64xf32> to vector<8x64xf32>
    %1168 = vector.extract_strided_slice %1163 {offsets = [0, 0], sizes = [8, 1], strides = [1, 1]} : vector<8x8xf32> to vector<8x1xf32>
    %cst_410 = arith.constant 1.000000e+00 : f32
    %1169 = vector.broadcast %cst_410 : f32 to vector<8x1xf32>
    %1170 = arith.addf %1168, %1169 : vector<8x1xf32>
    %1171 = vector.broadcast %1170 : vector<8x1xf32> to vector<8x64xf32>
    %1172 = arith.mulf %1167, %1171 : vector<8x64xf32>
    %c0_411 = arith.constant 0 : index
    %c0_412 = arith.constant 0 : index
    %1173 = vector.load %arg20[%c0_411, %c0_412] : memref<64x64xf32, #tpu.memory_space<vmem>>, vector<8x64xf32>
    tpu.vector_store %arg20[%c0_411, %c0_412], %1172 {strides = array<i32>} : memref<64x64xf32, #tpu.memory_space<vmem>>, vector<8x64xf32>,
    %1174 = vector.extract_strided_slice %1066 {offsets = [8, 0], sizes = [8, 64], strides = [1, 1]} : vector<64x64xf32> to vector<8x64xf32>
    %1175 = vector.extract_strided_slice %1163 {offsets = [0, 1], sizes = [8, 1], strides = [1, 1]} : vector<8x8xf32> to vector<8x1xf32>
    %cst_413 = arith.constant 1.000000e+00 : f32
    %1176 = vector.broadcast %cst_413 : f32 to vector<8x1xf32>
    %1177 = arith.addf %1175, %1176 : vector<8x1xf32>
    %1178 = vector.broadcast %1177 : vector<8x1xf32> to vector<8x64xf32>
    %1179 = arith.mulf %1174, %1178 : vector<8x64xf32>
    %c8_414 = arith.constant 8 : index
    %c0_415 = arith.constant 0 : index
    %1180 = vector.load %arg20[%c8_414, %c0_415] : memref<64x64xf32, #tpu.memory_space<vmem>>, vector<8x64xf32>
    tpu.vector_store %arg20[%c8_414, %c0_415], %1179 {strides = array<i32>} : memref<64x64xf32, #tpu.memory_space<vmem>>, vector<8x64xf32>,
    %1181 = vector.extract_strided_slice %1066 {offsets = [16, 0], sizes = [8, 64], strides = [1, 1]} : vector<64x64xf32> to vector<8x64xf32>
    %1182 = vector.extract_strided_slice %1163 {offsets = [0, 2], sizes = [8, 1], strides = [1, 1]} : vector<8x8xf32> to vector<8x1xf32>
    %cst_416 = arith.constant 1.000000e+00 : f32
    %1183 = vector.broadcast %cst_416 : f32 to vector<8x1xf32>
    %1184 = arith.addf %1182, %1183 : vector<8x1xf32>
    %1185 = vector.broadcast %1184 : vector<8x1xf32> to vector<8x64xf32>
    %1186 = arith.mulf %1181, %1185 : vector<8x64xf32>
    %c16_417 = arith.constant 16 : index
    %c0_418 = arith.constant 0 : index
    %1187 = vector.load %arg20[%c16_417, %c0_418] : memref<64x64xf32, #tpu.memory_space<vmem>>, vector<8x64xf32>
    tpu.vector_store %arg20[%c16_417, %c0_418], %1186 {strides = array<i32>} : memref<64x64xf32, #tpu.memory_space<vmem>>, vector<8x64xf32>,
    %1188 = vector.extract_strided_slice %1066 {offsets = [24, 0], sizes = [8, 64], strides = [1, 1]} : vector<64x64xf32> to vector<8x64xf32>
    %1189 = vector.extract_strided_slice %1163 {offsets = [0, 3], sizes = [8, 1], strides = [1, 1]} : vector<8x8xf32> to vector<8x1xf32>
    %cst_419 = arith.constant 1.000000e+00 : f32
    %1190 = vector.broadcast %cst_419 : f32 to vector<8x1xf32>
    %1191 = arith.addf %1189, %1190 : vector<8x1xf32>
    %1192 = vector.broadcast %1191 : vector<8x1xf32> to vector<8x64xf32>
    %1193 = arith.mulf %1188, %1192 : vector<8x64xf32>
    %c24_420 = arith.constant 24 : index
    %c0_421 = arith.constant 0 : index
    %1194 = vector.load %arg20[%c24_420, %c0_421] : memref<64x64xf32, #tpu.memory_space<vmem>>, vector<8x64xf32>
    tpu.vector_store %arg20[%c24_420, %c0_421], %1193 {strides = array<i32>} : memref<64x64xf32, #tpu.memory_space<vmem>>, vector<8x64xf32>,
    %1195 = vector.extract_strided_slice %1066 {offsets = [32, 0], sizes = [8, 64], strides = [1, 1]} : vector<64x64xf32> to vector<8x64xf32>
    %1196 = vector.extract_strided_slice %1163 {offsets = [0, 4], sizes = [8, 1], strides = [1, 1]} : vector<8x8xf32> to vector<8x1xf32>
    %cst_422 = arith.constant 1.000000e+00 : f32
    %1197 = vector.broadcast %cst_422 : f32 to vector<8x1xf32>
    %1198 = arith.addf %1196, %1197 : vector<8x1xf32>
    %1199 = vector.broadcast %1198 : vector<8x1xf32> to vector<8x64xf32>
    %1200 = arith.mulf %1195, %1199 : vector<8x64xf32>
    %c32_423 = arith.constant 32 : index
    %c0_424 = arith.constant 0 : index
    %1201 = vector.load %arg20[%c32_423, %c0_424] : memref<64x64xf32, #tpu.memory_space<vmem>>, vector<8x64xf32>
    tpu.vector_store %arg20[%c32_423, %c0_424], %1200 {strides = array<i32>} : memref<64x64xf32, #tpu.memory_space<vmem>>, vector<8x64xf32>,
    %1202 = vector.extract_strided_slice %1066 {offsets = [40, 0], sizes = [8, 64], strides = [1, 1]} : vector<64x64xf32> to vector<8x64xf32>
    %1203 = vector.extract_strided_slice %1163 {offsets = [0, 5], sizes = [8, 1], strides = [1, 1]} : vector<8x8xf32> to vector<8x1xf32>
    %cst_425 = arith.constant 1.000000e+00 : f32
    %1204 = vector.broadcast %cst_425 : f32 to vector<8x1xf32>
    %1205 = arith.addf %1203, %1204 : vector<8x1xf32>
    %1206 = vector.broadcast %1205 : vector<8x1xf32> to vector<8x64xf32>
    %1207 = arith.mulf %1202, %1206 : vector<8x64xf32>
    %c40_426 = arith.constant 40 : index
    %c0_427 = arith.constant 0 : index
    %1208 = vector.load %arg20[%c40_426, %c0_427] : memref<64x64xf32, #tpu.memory_space<vmem>>, vector<8x64xf32>
    tpu.vector_store %arg20[%c40_426, %c0_427], %1207 {strides = array<i32>} : memref<64x64xf32, #tpu.memory_space<vmem>>, vector<8x64xf32>,
    %1209 = vector.extract_strided_slice %1066 {offsets = [48, 0], sizes = [8, 64], strides = [1, 1]} : vector<64x64xf32> to vector<8x64xf32>
    %1210 = vector.extract_strided_slice %1163 {offsets = [0, 6], sizes = [8, 1], strides = [1, 1]} : vector<8x8xf32> to vector<8x1xf32>
    %cst_428 = arith.constant 1.000000e+00 : f32
    %1211 = vector.broadcast %cst_428 : f32 to vector<8x1xf32>
    %1212 = arith.addf %1210, %1211 : vector<8x1xf32>
    %1213 = vector.broadcast %1212 : vector<8x1xf32> to vector<8x64xf32>
    %1214 = arith.mulf %1209, %1213 : vector<8x64xf32>
    %c48_429 = arith.constant 48 : index
    %c0_430 = arith.constant 0 : index
    %1215 = vector.load %arg20[%c48_429, %c0_430] : memref<64x64xf32, #tpu.memory_space<vmem>>, vector<8x64xf32>
    tpu.vector_store %arg20[%c48_429, %c0_430], %1214 {strides = array<i32>} : memref<64x64xf32, #tpu.memory_space<vmem>>, vector<8x64xf32>,
    %1216 = vector.extract_strided_slice %1066 {offsets = [56, 0], sizes = [8, 64], strides = [1, 1]} : vector<64x64xf32> to vector<8x64xf32>
    %1217 = vector.extract_strided_slice %1163 {offsets = [0, 7], sizes = [8, 1], strides = [1, 1]} : vector<8x8xf32> to vector<8x1xf32>
    %cst_431 = arith.constant 1.000000e+00 : f32
    %1218 = vector.broadcast %cst_431 : f32 to vector<8x1xf32>
    %1219 = arith.addf %1217, %1218 : vector<8x1xf32>
    %1220 = vector.broadcast %1219 : vector<8x1xf32> to vector<8x64xf32>
    %1221 = arith.mulf %1216, %1220 : vector<8x64xf32>
    %c56_432 = arith.constant 56 : index
    %c0_433 = arith.constant 0 : index
    %1222 = vector.load %arg20[%c56_432, %c0_433] : memref<64x64xf32, #tpu.memory_space<vmem>>, vector<8x64xf32>
    tpu.vector_store %arg20[%c56_432, %c0_433], %1221 {strides = array<i32>} : memref<64x64xf32, #tpu.memory_space<vmem>>, vector<8x64xf32>,
    %c0_434 = arith.constant 0 : index
    %c0_435 = arith.constant 0 : index
    %1223 = vector.load %arg20[%c0_434, %c0_435] : memref<64x64xf32, #tpu.memory_space<vmem>>, vector<64x64xf32>
    %c1_436 = arith.constant 1 : index
    %c0_437 = arith.constant 0 : index
    %c0_438 = arith.constant 0 : index
    %c0_439 = arith.constant 0 : index
    %1224 = vector.load %arg9[%c1_436, %c0_437, %c0_438, %c0_439] : memref<2x2x64x64xbf16, #tpu.memory_space<vmem>>, vector<1x1x64x64xbf16>
    %1225 = vector.shape_cast %1224 : vector<1x1x64x64xbf16> to vector<64x64xbf16>
    %1226 = arith.truncf %1223 : vector<64x64xf32> to vector<64x64xbf16>
    %cst_440 = arith.constant dense<0.000000e+00> : vector<64x64xf32>
    %1227 = tpu.matmul %1226, %1225, %cst_440 {dimension_numbers = #tpu.dot_dimension_numbers<[1], [0], [0], [1], [0, 0, 1, 1], [], []>} : vector<64x64xbf16>, vector<64x64xbf16>, vector<64x64xf32> -> vector<64x64xf32>
    %c1_441 = arith.constant 1 : index
    %c1_442 = arith.constant 1 : index
    %c0_443 = arith.constant 0 : index
    %c0_444 = arith.constant 0 : index
    %1228 = vector.load %arg9[%c1_441, %c1_442, %c0_443, %c0_444] : memref<2x2x64x64xbf16, #tpu.memory_space<vmem>>, vector<1x1x64x64xbf16>
    %1229 = vector.shape_cast %1228 : vector<1x1x64x64xbf16> to vector<64x64xbf16>
    %1230 = arith.truncf %1223 : vector<64x64xf32> to vector<64x64xbf16>
    %cst_445 = arith.constant dense<0.000000e+00> : vector<64x64xf32>
    %1231 = tpu.matmul %1230, %1229, %cst_445 {dimension_numbers = #tpu.dot_dimension_numbers<[1], [0], [0], [1], [0, 0, 1, 1], [], []>} : vector<64x64xbf16>, vector<64x64xbf16>, vector<64x64xf32> -> vector<64x64xf32>
    %1232 = vector.extract_strided_slice %1231 {offsets = [0, 0], sizes = [8, 64], strides = [1, 1]} : vector<64x64xf32> to vector<8x64xf32>
    %cst_446 = arith.constant 0.000000e+00 : f32
    %1233 = vector.broadcast %cst_446 : f32 to vector<8x64xf32>
    %1234 = arith.maximumf %1232, %1233 : vector<8x64xf32>
    %c0_447 = arith.constant 0 : index
    %c0_448 = arith.constant 0 : index
    %1235 = vector.load %arg20[%c0_447, %c0_448] : memref<64x64xf32, #tpu.memory_space<vmem>>, vector<8x64xf32>
    tpu.vector_store %arg20[%c0_447, %c0_448], %1234 {strides = array<i32>} : memref<64x64xf32, #tpu.memory_space<vmem>>, vector<8x64xf32>,
    %1236 = vector.extract_strided_slice %1227 {offsets = [8, 0], sizes = [8, 64], strides = [1, 1]} : vector<64x64xf32> to vector<8x64xf32>
    %1237 = vector.extract_strided_slice %1231 {offsets = [16, 0], sizes = [8, 64], strides = [1, 1]} : vector<64x64xf32> to vector<8x64xf32>
    %1238 = arith.addf %1236, %1237 : vector<8x64xf32>
    %cst_449 = arith.constant 0.000000e+00 : f32
    %1239 = vector.broadcast %cst_449 : f32 to vector<8x64xf32>
    %1240 = arith.maximumf %1238, %1239 : vector<8x64xf32>
    %c8_450 = arith.constant 8 : index
    %c0_451 = arith.constant 0 : index
    %1241 = vector.load %arg20[%c8_450, %c0_451] : memref<64x64xf32, #tpu.memory_space<vmem>>, vector<8x64xf32>
    tpu.vector_store %arg20[%c8_450, %c0_451], %1240 {strides = array<i32>} : memref<64x64xf32, #tpu.memory_space<vmem>>, vector<8x64xf32>,
    %1242 = vector.extract_strided_slice %1227 {offsets = [24, 0], sizes = [8, 64], strides = [1, 1]} : vector<64x64xf32> to vector<8x64xf32>
    %1243 = vector.extract_strided_slice %1231 {offsets = [32, 0], sizes = [8, 64], strides = [1, 1]} : vector<64x64xf32> to vector<8x64xf32>
    %1244 = arith.addf %1242, %1243 : vector<8x64xf32>
    %cst_452 = arith.constant 0.000000e+00 : f32
    %1245 = vector.broadcast %cst_452 : f32 to vector<8x64xf32>
    %1246 = arith.maximumf %1244, %1245 : vector<8x64xf32>
    %c16_453 = arith.constant 16 : index
    %c0_454 = arith.constant 0 : index
    %1247 = vector.load %arg20[%c16_453, %c0_454] : memref<64x64xf32, #tpu.memory_space<vmem>>, vector<8x64xf32>
    tpu.vector_store %arg20[%c16_453, %c0_454], %1246 {strides = array<i32>} : memref<64x64xf32, #tpu.memory_space<vmem>>, vector<8x64xf32>,
    %1248 = vector.extract_strided_slice %1227 {offsets = [40, 0], sizes = [8, 64], strides = [1, 1]} : vector<64x64xf32> to vector<8x64xf32>
    %1249 = vector.extract_strided_slice %1231 {offsets = [48, 0], sizes = [8, 64], strides = [1, 1]} : vector<64x64xf32> to vector<8x64xf32>
    %1250 = arith.addf %1248, %1249 : vector<8x64xf32>
    %cst_455 = arith.constant 0.000000e+00 : f32
    %1251 = vector.broadcast %cst_455 : f32 to vector<8x64xf32>
    %1252 = arith.maximumf %1250, %1251 : vector<8x64xf32>
    %c24_456 = arith.constant 24 : index
    %c0_457 = arith.constant 0 : index
    %1253 = vector.load %arg20[%c24_456, %c0_457] : memref<64x64xf32, #tpu.memory_space<vmem>>, vector<8x64xf32>
    tpu.vector_store %arg20[%c24_456, %c0_457], %1252 {strides = array<i32>} : memref<64x64xf32, #tpu.memory_space<vmem>>, vector<8x64xf32>,
    %1254 = vector.extract_strided_slice %1227 {offsets = [56, 0], sizes = [8, 64], strides = [1, 1]} : vector<64x64xf32> to vector<8x64xf32>
    %cst_458 = arith.constant 0.000000e+00 : f32
    %1255 = vector.broadcast %cst_458 : f32 to vector<8x64xf32>
    %1256 = arith.maximumf %1254, %1255 : vector<8x64xf32>
    %c32_459 = arith.constant 32 : index
    %c0_460 = arith.constant 0 : index
    %1257 = vector.load %arg20[%c32_459, %c0_460] : memref<64x64xf32, #tpu.memory_space<vmem>>, vector<8x64xf32>
    tpu.vector_store %arg20[%c32_459, %c0_460], %1256 {strides = array<i32>} : memref<64x64xf32, #tpu.memory_space<vmem>>, vector<8x64xf32>,
    %c0_461 = arith.constant 0 : index
    %c0_462 = arith.constant 0 : index
    %1258 = vector.load %arg20[%c0_461, %c0_462] : memref<64x64xf32, #tpu.memory_space<vmem>>, vector<40x64xf32>
    %c1_463 = arith.constant 1 : index
    %c0_464 = arith.constant 0 : index
    %c0_465 = arith.constant 0 : index
    %c0_466 = arith.constant 0 : index
    %1259 = vector.load %arg10[%c1_463, %c0_464, %c0_465, %c0_466] : memref<2x1x64x256xbf16, #tpu.memory_space<vmem>>, vector<1x1x64x256xbf16>
    %1260 = vector.shape_cast %1259 : vector<1x1x64x256xbf16> to vector<64x256xbf16>
    %1261 = arith.truncf %1258 : vector<40x64xf32> to vector<40x64xbf16>
    %cst_467 = arith.constant dense<0.000000e+00> : vector<40x256xf32>
    %1262 = tpu.matmul %1261, %1260, %cst_467 {dimension_numbers = #tpu.dot_dimension_numbers<[1], [0], [0], [1], [0, 0, 1, 1], [], []>} : vector<40x64xbf16>, vector<64x256xbf16>, vector<40x256xf32> -> vector<40x256xf32>
    %c0_468 = arith.constant 0 : index
    %c0_469 = arith.constant 0 : index
    %1263 = vector.load %arg19[%c0_468, %c0_469] : memref<64x256xf32, #tpu.memory_space<vmem>>, vector<40x256xf32>
    tpu.vector_store %arg19[%c0_468, %c0_469], %1262 {strides = array<i32>} : memref<64x256xf32, #tpu.memory_space<vmem>>, vector<40x256xf32>,
    %c1_470 = arith.constant 1 : index
    %c0_471 = arith.constant 0 : index
    %c0_472 = arith.constant 0 : index
    %c0_473 = arith.constant 0 : index
    %1264 = vector.load %arg11[%c1_470, %c0_471, %c0_472, %c0_473] : memref<2x1x64x256xbf16, #tpu.memory_space<vmem>>, vector<1x1x64x256xbf16>
    %1265 = vector.shape_cast %1264 : vector<1x1x64x256xbf16> to vector<64x256xbf16>
    %cst_474 = arith.constant 0.000000e+00 : f32
    %1266 = vector.broadcast %cst_474 : f32 to vector<8x64xf32>
    %c0_475 = arith.constant 0 : index
    %c0_476 = arith.constant 0 : index
    %1267 = vector.load %arg19[%c0_475, %c0_476] : memref<64x256xf32, #tpu.memory_space<vmem>>, vector<8x256xf32>
    %1268 = arith.truncf %1266 : vector<8x64xf32> to vector<8x64xbf16>
    %cst_477 = arith.constant dense<0.000000e+00> : vector<8x256xf32>
    %1269 = tpu.matmul %1268, %1265, %cst_477 {dimension_numbers = #tpu.dot_dimension_numbers<[1], [0], [0], [1], [0, 0, 1, 1], [], []>} : vector<8x64xbf16>, vector<64x256xbf16>, vector<8x256xf32> -> vector<8x256xf32>
    %1270 = arith.addf %1267, %1269 : vector<8x256xf32>
    %1271 = vector.extract_strided_slice %1270 {offsets = [0, 0], sizes = [8, 192], strides = [1, 1]} : vector<8x256xf32> to vector<8x192xf32>
    %1272 = arith.negf %1271 : vector<8x192xf32>
    %1273 = math.exp %1272 : vector<8x192xf32>
    %cst_478 = arith.constant 1.000000e+00 : f32
    %1274 = vector.broadcast %cst_478 : f32 to vector<8x192xf32>
    %1275 = arith.addf %1274, %1273 : vector<8x192xf32>
    %1276 = arith.divf %1274, %1275 : vector<8x192xf32>
    %1277 = vector.extract_strided_slice %1270 {offsets = [0, 192], sizes = [8, 64], strides = [1, 1]} : vector<8x256xf32> to vector<8x64xf32>
    %1278 = math.tanh %1277 : vector<8x64xf32>
    %1279 = vector.extract_strided_slice %1276 {offsets = [0, 64], sizes = [8, 64], strides = [1, 1]} : vector<8x192xf32> to vector<8x64xf32>
    %1280 = arith.mulf %1279, %719 : vector<8x64xf32>
    %1281 = vector.extract_strided_slice %1276 {offsets = [0, 0], sizes = [8, 64], strides = [1, 1]} : vector<8x192xf32> to vector<8x64xf32>
    %1282 = arith.mulf %1281, %1278 : vector<8x64xf32>
    %1283 = arith.addf %1280, %1282 : vector<8x64xf32>
    %1284 = vector.extract_strided_slice %1276 {offsets = [0, 128], sizes = [8, 64], strides = [1, 1]} : vector<8x192xf32> to vector<8x64xf32>
    %1285 = math.tanh %1283 : vector<8x64xf32>
    %1286 = arith.mulf %1284, %1285 : vector<8x64xf32>
    %c0_479 = arith.constant 0 : index
    %c0_480 = arith.constant 0 : index
    %1287 = vector.load %arg20[%c0_479, %c0_480] : memref<64x64xf32, #tpu.memory_space<vmem>>, vector<8x64xf32>
    tpu.vector_store %arg20[%c0_479, %c0_480], %1286 {strides = array<i32>} : memref<64x64xf32, #tpu.memory_space<vmem>>, vector<8x64xf32>,
    %c8_481 = arith.constant 8 : index
    %c0_482 = arith.constant 0 : index
    %1288 = vector.load %arg19[%c8_481, %c0_482] : memref<64x256xf32, #tpu.memory_space<vmem>>, vector<8x256xf32>
    %1289 = arith.truncf %1286 : vector<8x64xf32> to vector<8x64xbf16>
    %cst_483 = arith.constant dense<0.000000e+00> : vector<8x256xf32>
    %1290 = tpu.matmul %1289, %1265, %cst_483 {dimension_numbers = #tpu.dot_dimension_numbers<[1], [0], [0], [1], [0, 0, 1, 1], [], []>} : vector<8x64xbf16>, vector<64x256xbf16>, vector<8x256xf32> -> vector<8x256xf32>
    %1291 = arith.addf %1288, %1290 : vector<8x256xf32>
    %1292 = vector.extract_strided_slice %1291 {offsets = [0, 0], sizes = [8, 192], strides = [1, 1]} : vector<8x256xf32> to vector<8x192xf32>
    %1293 = arith.negf %1292 : vector<8x192xf32>
    %1294 = math.exp %1293 : vector<8x192xf32>
    %cst_484 = arith.constant 1.000000e+00 : f32
    %1295 = vector.broadcast %cst_484 : f32 to vector<8x192xf32>
    %1296 = arith.addf %1295, %1294 : vector<8x192xf32>
    %1297 = arith.divf %1295, %1296 : vector<8x192xf32>
    %1298 = vector.extract_strided_slice %1291 {offsets = [0, 192], sizes = [8, 64], strides = [1, 1]} : vector<8x256xf32> to vector<8x64xf32>
    %1299 = math.tanh %1298 : vector<8x64xf32>
    %1300 = vector.extract_strided_slice %1297 {offsets = [0, 64], sizes = [8, 64], strides = [1, 1]} : vector<8x192xf32> to vector<8x64xf32>
    %1301 = arith.mulf %1300, %1283 : vector<8x64xf32>
    %1302 = vector.extract_strided_slice %1297 {offsets = [0, 0], sizes = [8, 64], strides = [1, 1]} : vector<8x192xf32> to vector<8x64xf32>
    %1303 = arith.mulf %1302, %1299 : vector<8x64xf32>
    %1304 = arith.addf %1301, %1303 : vector<8x64xf32>
    %1305 = vector.extract_strided_slice %1297 {offsets = [0, 128], sizes = [8, 64], strides = [1, 1]} : vector<8x192xf32> to vector<8x64xf32>
    %1306 = math.tanh %1304 : vector<8x64xf32>
    %1307 = arith.mulf %1305, %1306 : vector<8x64xf32>
    %c8_485 = arith.constant 8 : index
    %c0_486 = arith.constant 0 : index
    %1308 = vector.load %arg20[%c8_485, %c0_486] : memref<64x64xf32, #tpu.memory_space<vmem>>, vector<8x64xf32>
    tpu.vector_store %arg20[%c8_485, %c0_486], %1307 {strides = array<i32>} : memref<64x64xf32, #tpu.memory_space<vmem>>, vector<8x64xf32>,
    %c16_487 = arith.constant 16 : index
    %c0_488 = arith.constant 0 : index
    %1309 = vector.load %arg19[%c16_487, %c0_488] : memref<64x256xf32, #tpu.memory_space<vmem>>, vector<8x256xf32>
    %1310 = arith.truncf %1307 : vector<8x64xf32> to vector<8x64xbf16>
    %cst_489 = arith.constant dense<0.000000e+00> : vector<8x256xf32>
    %1311 = tpu.matmul %1310, %1265, %cst_489 {dimension_numbers = #tpu.dot_dimension_numbers<[1], [0], [0], [1], [0, 0, 1, 1], [], []>} : vector<8x64xbf16>, vector<64x256xbf16>, vector<8x256xf32> -> vector<8x256xf32>
    %1312 = arith.addf %1309, %1311 : vector<8x256xf32>
    %1313 = vector.extract_strided_slice %1312 {offsets = [0, 0], sizes = [8, 192], strides = [1, 1]} : vector<8x256xf32> to vector<8x192xf32>
    %1314 = arith.negf %1313 : vector<8x192xf32>
    %1315 = math.exp %1314 : vector<8x192xf32>
    %cst_490 = arith.constant 1.000000e+00 : f32
    %1316 = vector.broadcast %cst_490 : f32 to vector<8x192xf32>
    %1317 = arith.addf %1316, %1315 : vector<8x192xf32>
    %1318 = arith.divf %1316, %1317 : vector<8x192xf32>
    %1319 = vector.extract_strided_slice %1312 {offsets = [0, 192], sizes = [8, 64], strides = [1, 1]} : vector<8x256xf32> to vector<8x64xf32>
    %1320 = math.tanh %1319 : vector<8x64xf32>
    %1321 = vector.extract_strided_slice %1318 {offsets = [0, 64], sizes = [8, 64], strides = [1, 1]} : vector<8x192xf32> to vector<8x64xf32>
    %1322 = arith.mulf %1321, %1304 : vector<8x64xf32>
    %1323 = vector.extract_strided_slice %1318 {offsets = [0, 0], sizes = [8, 64], strides = [1, 1]} : vector<8x192xf32> to vector<8x64xf32>
    %1324 = arith.mulf %1323, %1320 : vector<8x64xf32>
    %1325 = arith.addf %1322, %1324 : vector<8x64xf32>
    %1326 = vector.extract_strided_slice %1318 {offsets = [0, 128], sizes = [8, 64], strides = [1, 1]} : vector<8x192xf32> to vector<8x64xf32>
    %1327 = math.tanh %1325 : vector<8x64xf32>
    %1328 = arith.mulf %1326, %1327 : vector<8x64xf32>
    %c16_491 = arith.constant 16 : index
    %c0_492 = arith.constant 0 : index
    %1329 = vector.load %arg20[%c16_491, %c0_492] : memref<64x64xf32, #tpu.memory_space<vmem>>, vector<8x64xf32>
    tpu.vector_store %arg20[%c16_491, %c0_492], %1328 {strides = array<i32>} : memref<64x64xf32, #tpu.memory_space<vmem>>, vector<8x64xf32>,
    %c24_493 = arith.constant 24 : index
    %c0_494 = arith.constant 0 : index
    %1330 = vector.load %arg19[%c24_493, %c0_494] : memref<64x256xf32, #tpu.memory_space<vmem>>, vector<8x256xf32>
    %1331 = arith.truncf %1328 : vector<8x64xf32> to vector<8x64xbf16>
    %cst_495 = arith.constant dense<0.000000e+00> : vector<8x256xf32>
    %1332 = tpu.matmul %1331, %1265, %cst_495 {dimension_numbers = #tpu.dot_dimension_numbers<[1], [0], [0], [1], [0, 0, 1, 1], [], []>} : vector<8x64xbf16>, vector<64x256xbf16>, vector<8x256xf32> -> vector<8x256xf32>
    %1333 = arith.addf %1330, %1332 : vector<8x256xf32>
    %1334 = vector.extract_strided_slice %1333 {offsets = [0, 0], sizes = [8, 192], strides = [1, 1]} : vector<8x256xf32> to vector<8x192xf32>
    %1335 = arith.negf %1334 : vector<8x192xf32>
    %1336 = math.exp %1335 : vector<8x192xf32>
    %cst_496 = arith.constant 1.000000e+00 : f32
    %1337 = vector.broadcast %cst_496 : f32 to vector<8x192xf32>
    %1338 = arith.addf %1337, %1336 : vector<8x192xf32>
    %1339 = arith.divf %1337, %1338 : vector<8x192xf32>
    %1340 = vector.extract_strided_slice %1333 {offsets = [0, 192], sizes = [8, 64], strides = [1, 1]} : vector<8x256xf32> to vector<8x64xf32>
    %1341 = math.tanh %1340 : vector<8x64xf32>
    %1342 = vector.extract_strided_slice %1339 {offsets = [0, 64], sizes = [8, 64], strides = [1, 1]} : vector<8x192xf32> to vector<8x64xf32>
    %1343 = arith.mulf %1342, %1325 : vector<8x64xf32>
    %1344 = vector.extract_strided_slice %1339 {offsets = [0, 0], sizes = [8, 64], strides = [1, 1]} : vector<8x192xf32> to vector<8x64xf32>
    %1345 = arith.mulf %1344, %1341 : vector<8x64xf32>
    %1346 = arith.addf %1343, %1345 : vector<8x64xf32>
    %1347 = vector.extract_strided_slice %1339 {offsets = [0, 128], sizes = [8, 64], strides = [1, 1]} : vector<8x192xf32> to vector<8x64xf32>
    %1348 = math.tanh %1346 : vector<8x64xf32>
    %1349 = arith.mulf %1347, %1348 : vector<8x64xf32>
    %c24_497 = arith.constant 24 : index
    %c0_498 = arith.constant 0 : index
    %1350 = vector.load %arg20[%c24_497, %c0_498] : memref<64x64xf32, #tpu.memory_space<vmem>>, vector<8x64xf32>
    tpu.vector_store %arg20[%c24_497, %c0_498], %1349 {strides = array<i32>} : memref<64x64xf32, #tpu.memory_space<vmem>>, vector<8x64xf32>,
    %c32_499 = arith.constant 32 : index
    %c0_500 = arith.constant 0 : index
    %1351 = vector.load %arg19[%c32_499, %c0_500] : memref<64x256xf32, #tpu.memory_space<vmem>>, vector<8x256xf32>
    %1352 = arith.truncf %1349 : vector<8x64xf32> to vector<8x64xbf16>
    %cst_501 = arith.constant dense<0.000000e+00> : vector<8x256xf32>
    %1353 = tpu.matmul %1352, %1265, %cst_501 {dimension_numbers = #tpu.dot_dimension_numbers<[1], [0], [0], [1], [0, 0, 1, 1], [], []>} : vector<8x64xbf16>, vector<64x256xbf16>, vector<8x256xf32> -> vector<8x256xf32>
    %1354 = arith.addf %1351, %1353 : vector<8x256xf32>
    %1355 = vector.extract_strided_slice %1354 {offsets = [0, 0], sizes = [8, 192], strides = [1, 1]} : vector<8x256xf32> to vector<8x192xf32>
    %1356 = arith.negf %1355 : vector<8x192xf32>
    %1357 = math.exp %1356 : vector<8x192xf32>
    %cst_502 = arith.constant 1.000000e+00 : f32
    %1358 = vector.broadcast %cst_502 : f32 to vector<8x192xf32>
    %1359 = arith.addf %1358, %1357 : vector<8x192xf32>
    %1360 = arith.divf %1358, %1359 : vector<8x192xf32>
    %1361 = vector.extract_strided_slice %1354 {offsets = [0, 192], sizes = [8, 64], strides = [1, 1]} : vector<8x256xf32> to vector<8x64xf32>
    %1362 = math.tanh %1361 : vector<8x64xf32>
    %1363 = vector.extract_strided_slice %1360 {offsets = [0, 64], sizes = [8, 64], strides = [1, 1]} : vector<8x192xf32> to vector<8x64xf32>
    %1364 = arith.mulf %1363, %1346 : vector<8x64xf32>
    %1365 = vector.extract_strided_slice %1360 {offsets = [0, 0], sizes = [8, 64], strides = [1, 1]} : vector<8x192xf32> to vector<8x64xf32>
    %1366 = arith.mulf %1365, %1362 : vector<8x64xf32>
    %1367 = arith.addf %1364, %1366 : vector<8x64xf32>
    %1368 = vector.extract_strided_slice %1360 {offsets = [0, 128], sizes = [8, 64], strides = [1, 1]} : vector<8x192xf32> to vector<8x64xf32>
    %1369 = math.tanh %1367 : vector<8x64xf32>
    %1370 = arith.mulf %1368, %1369 : vector<8x64xf32>
    %c32_503 = arith.constant 32 : index
    %c0_504 = arith.constant 0 : index
    %1371 = vector.load %arg20[%c32_503, %c0_504] : memref<64x64xf32, #tpu.memory_space<vmem>>, vector<8x64xf32>
    tpu.vector_store %arg20[%c32_503, %c0_504], %1370 {strides = array<i32>} : memref<64x64xf32, #tpu.memory_space<vmem>>, vector<8x64xf32>,
    %c0_505 = arith.constant 0 : index
    %c0_506 = arith.constant 0 : index
    %1372 = vector.load %arg20[%c0_505, %c0_506] : memref<64x64xf32, #tpu.memory_space<vmem>>, vector<40x64xf32>
    %cst_507 = arith.constant dense<0.000000e+00> : vector<40xf32>
    %1373 = vector.multi_reduction <add>, %1372, %cst_507 [1] : vector<40x64xf32> to vector<40xf32>
    %1374 = vector.shape_cast %1373 : vector<40xf32> to vector<40x1xf32>
    %cst_508 = arith.constant 6.400000e+01 : f32
    %1375 = vector.broadcast %cst_508 : f32 to vector<40x1xf32>
    %1376 = arith.divf %1374, %1375 : vector<40x1xf32>
    %1377 = vector.broadcast %1376 : vector<40x1xf32> to vector<40x64xf32>
    %1378 = arith.subf %1372, %1377 : vector<40x64xf32>
    %1379 = arith.mulf %1378, %1378 : vector<40x64xf32>
    %cst_509 = arith.constant dense<0.000000e+00> : vector<40xf32>
    %1380 = vector.multi_reduction <add>, %1379, %cst_509 [1] : vector<40x64xf32> to vector<40xf32>
    %1381 = vector.shape_cast %1380 : vector<40xf32> to vector<40x1xf32>
    %cst_510 = arith.constant 6.400000e+01 : f32
    %1382 = vector.broadcast %cst_510 : f32 to vector<40x1xf32>
    %1383 = arith.divf %1381, %1382 : vector<40x1xf32>
    %cst_511 = arith.constant 9.99999974E-6 : f32
    %1384 = vector.broadcast %cst_511 : f32 to vector<40x1xf32>
    %1385 = arith.addf %1383, %1384 : vector<40x1xf32>
    %1386 = math.rsqrt %1385 : vector<40x1xf32>
    %1387 = vector.broadcast %1386 : vector<40x1xf32> to vector<40x64xf32>
    %1388 = arith.mulf %1378, %1387 : vector<40x64xf32>
    %c1_512 = arith.constant 1 : index
    %c0_513 = arith.constant 0 : index
    %c0_514 = arith.constant 0 : index
    %1389 = vector.load %arg12[%c1_512, %c0_513, %c0_514] : memref<2x1x64xf32, #tpu.memory_space<vmem>>, vector<1x1x64xf32>
    %1390 = vector.shape_cast %1389 : vector<1x1x64xf32> to vector<1x64xf32>
    %1391 = vector.broadcast %1390 : vector<1x64xf32> to vector<40x64xf32>
    %1392 = arith.mulf %1388, %1391 : vector<40x64xf32>
    %c1_515 = arith.constant 1 : index
    %c0_516 = arith.constant 0 : index
    %c0_517 = arith.constant 0 : index
    %1393 = vector.load %arg13[%c1_515, %c0_516, %c0_517] : memref<2x1x64xf32, #tpu.memory_space<vmem>>, vector<1x1x64xf32>
    %1394 = vector.shape_cast %1393 : vector<1x1x64xf32> to vector<1x64xf32>
    %1395 = vector.broadcast %1394 : vector<1x64xf32> to vector<40x64xf32>
    %1396 = arith.addf %1392, %1395 : vector<40x64xf32>
    %c1_518 = arith.constant 1 : index
    %c0_519 = arith.constant 0 : index
    %c0_520 = arith.constant 0 : index
    %1397 = vector.load %arg14[%c1_518, %c0_519, %c0_520] : memref<2x64x128xbf16, #tpu.memory_space<vmem>>, vector<1x64x128xbf16>
    %1398 = vector.shape_cast %1397 : vector<1x64x128xbf16> to vector<64x128xbf16>
    %1399 = arith.truncf %1396 : vector<40x64xf32> to vector<40x64xbf16>
    %cst_521 = arith.constant dense<0.000000e+00> : vector<40x128xf32>
    %1400 = tpu.matmul %1399, %1398, %cst_521 {dimension_numbers = #tpu.dot_dimension_numbers<[1], [0], [0], [1], [0, 0, 1, 1], [], []>} : vector<40x64xbf16>, vector<64x128xbf16>, vector<40x128xf32> -> vector<40x128xf32>
    %c1_522 = arith.constant 1 : index
    %c0_523 = arith.constant 0 : index
    %c0_524 = arith.constant 0 : index
    %1401 = vector.load %arg15[%c1_522, %c0_523, %c0_524] : memref<2x1x128xf32, #tpu.memory_space<vmem>>, vector<1x1x128xf32>
    %1402 = vector.shape_cast %1401 : vector<1x1x128xf32> to vector<1x128xf32>
    %1403 = vector.broadcast %1402 : vector<1x128xf32> to vector<40x128xf32>
    %1404 = arith.addf %1400, %1403 : vector<40x128xf32>
    %c1_525 = arith.constant 1 : index
    %c0_526 = arith.constant 0 : index
    %c0_527 = arith.constant 0 : index
    %1405 = vector.load %arg17[%c1_525, %c0_526, %c0_527] : memref<2x40x128xf32, #tpu.memory_space<vmem>>, vector<1x40x128xf32>
    %1406 = vector.shape_cast %1405 : vector<1x40x128xf32> to vector<40x128xf32>
    %1407 = vector.shape_cast %1404 : vector<40x128xf32> to vector<1x40x128xf32>
    tpu.vector_store %arg17[%c1_525, %c0_526, %c0_527], %1407 {strides = array<i32>} : memref<2x40x128xf32, #tpu.memory_space<vmem>>, vector<1x40x128xf32>,
    return
  }
}

</mosaic_0001>

<bundles_post_ra>
// kernel: wtftp_forward.1
= control target key start
LH: loop header
LB: loop body
LE: loop exit
PB: predicated region body
PF: predicated region fallthrough
CT: control target
= control target key end

     0   :  { %s9641_s0 = inlined_call_operand.vmem [shape: f32[64,4], index: 0, kind: input, shape index: {}]   ;;  %s9642_s1 = inlined_call_operand.vmem [shape: bf16[4,32], index: 1, kind: input, shape index: {}]   ;;  %s9643_s2 = inlined_call_operand.vmem [shape: bf16[32,64], index: 2, kind: input, shape index: {}]   ;;  %s9644_s3 = inlined_call_operand.vmem [shape: bf16[4,64,256], index: 3, kind: input, shape index: {}]   ;;  %s9645_s4 = inlined_call_operand.hbm [shape: bf16[4,64,256], index: 4, kind: input, shape index: {}]   ;;  %s9646_s5 = inlined_call_operand.vmem [shape: bf16[2,64,32], index: 5, kind: input, shape index: {}]   ;;  %s9647_s6 = inlined_call_operand.hbm [shape: f32[2,1,32], index: 6, kind: input, shape index: {}]   ;;  %s9648_s7 = inlined_call_operand.vmem [shape: f32[2,8,4], index: 7, kind: input, shape index: {}]   ;;  %s9649_s8 = inlined_call_operand.vmem [shape: f32[2,4,8], index: 8, kind: input, shape index: {}]   ;;  %s9650_s9 = inlined_call_operand.hbm [shape: bf16[2,2,64,64], index: 9, kind: input, shape index: {}]   ;;  %s9651_s10 = inlined_call_operand.hbm [shape: bf16[2,1,64,256], index: 10, kind: input, shape index: {}]   ;;  %s9652_s11 = inlined_call_operand.hbm [shape: bf16[2,1,64,256], index: 11, kind: input, shape index: {}]   ;;  %s9653_s12 = inlined_call_operand.hbm [shape: f32[2,1,64], index: 12, kind: input, shape index: {}]   ;;  %s9654_s13 = inlined_call_operand.hbm [shape: f32[2,1,64], index: 13, kind: input, shape index: {}]   ;;  %s9655_s14 = inlined_call_operand.hbm [shape: bf16[2,64,128], index: 14, kind: input, shape index: {}]   ;;  %s9656_s15 = inlined_call_operand.hbm [shape: f32[2,1,128], index: 15, kind: input, shape index: {}]   ;;  %s9657_s16 = inlined_call_operand.vmem [shape: f32[2,8,8], index: 16, kind: output, shape index: {0}]   ;;  %s9658_s17 = inlined_call_operand.vmem [shape: f32[2,40,128], index: 17, kind: output, shape index: {1}]  }
   0x1   :  { %9660 = sst [smem:[#allocation24_spill]] %s9641_s0 }
   0x2   :  { %9661 = sst [smem:[#allocation25_spill]] %s9642_s1 }
   0x3   :  { %23 = vsyncpa [#allocation6], 0 }
   0x4   :  { %24 = vsyncpa [#allocation8], 0 }
   0x5   :  { %25 = vsyncpa [#allocation11], 0 }
   0x6   :  { %26 = vsyncpa [#allocation14], 0 }
   0x7   :  { %27 = vsyncpa [#allocation17], 0  ;;  %s8009_s24 = smov [#allocation7]  }
   0x8   :  { %s55_s25 = sshll.u32 %s8009_s24, 4  ;;  %s56_s25 = int_to_ptr.vmem [resolvable:$true] %s55_s25 }
   0x9   :  { %s7827_s26 = scalar_lea.vmem %s56_s25, 32  ;;  %p7832_p1 = scmp.lt.s32.totalorder %s56_s25, %s56_s25 }
   0xa   :  { %p7828_p0 = scmp.ne.s32.totalorder %s56_s25, %s7827_s26  ;;  %p7833_p2 = scmp.lt.s32.totalorder %s7827_s26, %s7827_s26 }
   0xc   :  { %p7834_p3 = por %p7833_p2, %p7832_p1 }
   0xe   :  { %p7835_p4 = pnand %p7834_p3, %p7828_p0 }
  0x10   :  { %7838 = shalt.err (!%p7835_p4)
}
  0x11   :  { %s8010_s27 = smov 16   ;;  %s8011_s28 = smov 1  }
  0x12   :  { %61 = dma.hbm_to_vmem [thread:$0]  %s9647_s6, 32, %s56_s25, [#allocation8], %s8010_s27, %s8010_s27, %s8011_s28  }
  0x13   :  { %s8012_s30 = smov [#allocation10]   ;;  %s8013_s19 = smov [#allocation13]  }
  0x14   :  { %s83_s18 = sshll.u32 %s8012_s30, 4  ;;  %s107_s1 = sshll.u32 %s8013_s19, 4  ;;  %s84_s18 = int_to_ptr.vmem [resolvable:$true] %s83_s18  ;;  %s108_s1 = int_to_ptr.vmem [resolvable:$true] %s107_s1 }
  0x15   :  { %s7847_s20 = scalar_lea.vmem %s84_s18, 2048  ;;  %p7852_p6 = scmp.lt.s32.totalorder %s84_s18, %s84_s18 }
  0x16   :  { %p7848_p5 = scmp.ne.s32.totalorder %s84_s18, %s7847_s20  ;;  %p7853_p7 = scmp.lt.s32.totalorder %s7847_s20, %s7847_s20 }
  0x18   :  { %p7854_p8 = por %p7853_p7, %p7852_p6 }
  0x1a   :  { %p7855_p9 = pnand %p7854_p8, %p7848_p5 }
  0x1c   :  { %7858 = shalt.err (!%p7855_p9)
}
  0x1d   :  { %s8014_s21 = smov 128   ;;  %s8015_s22 = smov 8  }
  0x1e   :  { %89 = dma.hbm_to_vmem [thread:$0]  %s9651_s10, 2048, %s84_s18, [#allocation11], %s8014_s21, %s8014_s21, %s8015_s22  }
  0x1f   :  { %s7867_s6 = scalar_lea.vmem %s108_s1, 32  ;;  %p7872_p11 = scmp.lt.s32.totalorder %s108_s1, %s108_s1 }
  0x20   :  { %p7868_p10 = scmp.ne.s32.totalorder %s108_s1, %s7867_s6  ;;  %p7873_p12 = scmp.lt.s32.totalorder %s7867_s6, %s7867_s6 }
  0x22   :  { %p7874_p13 = por %p7873_p12, %p7872_p11 }
  0x24   :  { %p7875_p0 = pnand %p7874_p13, %p7868_p10 }
  0x26   :  { %7878 = shalt.err (!%p7875_p0)
}
  0x27   :  { %113 = dma.hbm_to_vmem [thread:$0]  %s9653_s12, 32, %s108_s1, [#allocation14], %s8010_s27, %s8010_s27, %s8011_s28  }
  0x28   :  { %s8016_s29 = smov [#allocation16]   ;;  %s8017_s30 = smov [#allocation5]  }
  0x29   :  { %s131_s0 = sshll.u32 %s8016_s29, 4  ;;  %s41_s10 = sshll.u32 %s8017_s30, 4  ;;  %s132_s0 = int_to_ptr.vmem [resolvable:$true] %s131_s0  ;;  %s42_s10 = int_to_ptr.vmem [resolvable:$true] %s41_s10 }
  0x2a   :  { %s7887_s18 = scalar_lea.vmem %s132_s0, 1024  ;;  %p7892_p2 = scmp.lt.s32.totalorder %s132_s0, %s132_s0 }
  0x2b   :  { %p7888_p1 = scmp.ne.s32.totalorder %s132_s0, %s7887_s18  ;;  %p7893_p3 = scmp.lt.s32.totalorder %s7887_s18, %s7887_s18 }
  0x2d   :  { %p7894_p4 = por %p7893_p3, %p7892_p2 }
  0x2f   :  { %p7895_p5 = pnand %p7894_p4, %p7888_p1 }
  0x31   :  { %7898 = shalt.err (!%p7895_p5)
}
  0x32   :  { %s8018_s19 = smov 64   ;;  %s8019_s20 = smov 4  }
  0x33   :  { %137 = dma.hbm_to_vmem [thread:$0]  %s9655_s14, 1024, %s132_s0, [#allocation17], %s8018_s19, %s8018_s19, %s8019_s20  }
  0x34   :  { %s7907_s12 = scalar_lea.vmem %s42_s10, 4096  ;;  %p7912_p7 = scmp.lt.s32.totalorder %s42_s10, %s42_s10 }
  0x35   :  { %p7908_p6 = scmp.ne.s32.totalorder %s42_s10, %s7907_s12  ;;  %p7913_p8 = scmp.lt.s32.totalorder %s7907_s12, %s7907_s12 }
  0x37   :  { %p7914_p9 = por %p7913_p8, %p7912_p7 }
  0x39   :  { %p7915_p10 = pnand %p7914_p9, %p7908_p6 }
  0x3b   :  { %7918 = shalt.err (!%p7915_p10)
}
  0x3c   :  { %47 = dma.hbm_to_vmem [thread:$0]  %s9645_s4, 4096, %s42_s10, [#allocation6], %s8014_s21, %s8014_s21, %s8015_s22  }
  0x3d   :  { %s8020_s25 = smov [#allocation9]   ;;  %s8021_s29 = smov [#allocation12]  }
  0x3e   :  { %s71_s26 = sshll.u32 %s8020_s25, 4  ;;  %s95_s14 = sshll.u32 %s8021_s29, 4  ;;  %s72_s26 = int_to_ptr.vmem [resolvable:$true] %s71_s26  ;;  %s96_s14 = int_to_ptr.vmem [resolvable:$true] %s95_s14 }
  0x3f   :  { %s7927_s0 = scalar_lea.vmem %s72_s26, 2048  ;;  %p7932_p12 = scmp.lt.s32.totalorder %s72_s26, %s72_s26 }
  0x40   :  { %p7928_p11 = scmp.ne.s32.totalorder %s72_s26, %s7927_s0  ;;  %p7933_p13 = scmp.lt.s32.totalorder %s7927_s0, %s7927_s0 }
  0x42   :  { %p7934_p0 = por %p7933_p13, %p7932_p12 }
  0x44   :  { %p7935_p1 = pnand %p7934_p0, %p7928_p11 }
  0x46   :  { %7938 = shalt.err (!%p7935_p1)
}
  0x47   :  { %77 = dma.hbm_to_vmem [thread:$0]  %s9650_s9, 2048, %s72_s26, [#allocation8], %s8018_s19, %s8018_s19, %s8019_s20  }
  0x48   :  { %s7947_s4 = scalar_lea.vmem %s96_s14, 2048  ;;  %p7952_p3 = scmp.lt.s32.totalorder %s96_s14, %s96_s14 }
  0x49   :  { %p7948_p2 = scmp.ne.s32.totalorder %s96_s14, %s7947_s4  ;;  %p7953_p4 = scmp.lt.s32.totalorder %s7947_s4, %s7947_s4 }
  0x4b   :  { %p7954_p5 = por %p7953_p4, %p7952_p3 }
  0x4d   :  { %p7955_p6 = pnand %p7954_p5, %p7948_p2 }
  0x4f   :  { %7958 = shalt.err (!%p7955_p6)
}
  0x50   :  { %101 = dma.hbm_to_vmem [thread:$0]  %s9652_s11, 2048, %s96_s14, [#allocation11], %s8014_s21, %s8014_s21, %s8015_s22  }
  0x51   :  { %s8022_s24 = smov [#allocation15]   ;;  %s8023_s1 = smov [#allocation18]  }
  0x52   :  { %s119_s12 = sshll.u32 %s8022_s24, 4  ;;  %s143_s9 = sshll.u32 %s8023_s1, 4  ;;  %s120_s12 = int_to_ptr.vmem [resolvable:$true] %s119_s12  ;;  %s144_s9 = int_to_ptr.vmem [resolvable:$true] %s143_s9 }
  0x53   :  { %s7967_s20 = scalar_lea.vmem %s120_s12, 32  ;;  %p7972_p8 = scmp.lt.s32.totalorder %s120_s12, %s120_s12 }
  0x54   :  { %p7968_p7 = scmp.ne.s32.totalorder %s120_s12, %s7967_s20  ;;  %p7973_p9 = scmp.lt.s32.totalorder %s7967_s20, %s7967_s20 }
  0x56   :  { %p7974_p10 = por %p7973_p9, %p7972_p8 }
  0x58   :  { %p7975_p11 = pnand %p7974_p10, %p7968_p7 }
  0x5a   :  { %7978 = shalt.err (!%p7975_p11)
}
  0x5b   :  { %125 = dma.hbm_to_vmem [thread:$0]  %s9654_s13, 32, %s120_s12, [#allocation14], %s8010_s27, %s8010_s27, %s8011_s28  }
  0x5c   :  { %s7987_s11 = scalar_lea.vmem %s144_s9, 32  ;;  %p7992_p13 = scmp.lt.s32.totalorder %s144_s9, %s144_s9 }
  0x5d   :  { %p7988_p12 = scmp.ne.s32.totalorder %s144_s9, %s7987_s11  ;;  %p7993_p0 = scmp.lt.s32.totalorder %s7987_s11, %s7987_s11 }
  0x5f   :  { %p7994_p1 = por %p7993_p0, %p7992_p13 }
  0x61   :  { %p7995_p2 = pnand %p7994_p1, %p7988_p12 }
  0x63   :  { %7998 = shalt.err (!%p7995_p2)
}
  0x64   :  { %149 = dma.hbm_to_vmem [thread:$0]  %s9656_s15, 32, %s144_s9, [#allocation17], %s8010_s27, %s8010_s27, %s8011_s28  }
  0x65   :  { %7999 = dma.done.wait [#allocation6], 4096  }
  0x66   :  { %8000 = vsyncadd [#allocation6], 4294963200 }
  0x67   :  { %8001 = dma.done.wait [#allocation8], 2080  }
  0x68   :  { %8002 = vsyncadd [#allocation8], 4294965216 }
  0x69   :  { %8003 = dma.done.wait [#allocation11], 4096  }
  0x6a   :  { %8004 = vsyncadd [#allocation11], 4294963200 }
  0x6b   :  { %8005 = dma.done.wait [#allocation14], 64  }
  0x6c   :  { %8006 = vsyncadd [#allocation14], 4294967232 }
  0x6d   :  { %8007 = dma.done.wait [#allocation17], 1056  }
  0x6e   :  { %8008 = vsyncadd [#allocation17], 4294966240  ;;  %vm204_vm0 = vcmask 1041408   ;;  %s9662_s29 = sld [smem:[#allocation25_spill]]  ;;  %vm191_vm1 = vcmask 31744   ;;  %v7108_v14 = vld [vmem:[%s9643_s2 + $0x8] sm:$0xff]  }
  0x6f   :  { %s9663_s30 = sld [smem:[#allocation24_spill]]  ;;  %6910 = vmatprep.subr.bf16.mxu1 %v7108_v14  ;;  %v7109_v15 = vld [vmem:[%s9643_s2] sm:$0xff]   ;;  %vm301_vm2 = vcmask 261120   ;;  %v7112_v36 = vld [vmem:[%s9644_s3 + $0x34] ss:$8 sps:$4 sm:$0xff]   ;;  %v8024_v45 = vmov 0  }
  0x70   :  { %6911 = vmatpush3.bf16.msra.mxu1 %v7108_v14  ;;  %v7110_v37 = vld [vmem:[%s9644_s3 + $0x30] ss:$8 sps:$4 sm:$0xff]   ;;  %v7115_v38 = vld [vmem:[%s9644_s3 + $0x24] ss:$8 sps:$4 sm:$0xff]   ;;  %v7113_v39 = vld [vmem:[%s9644_s3 + $0x20] ss:$8 sps:$4 sm:$0xff]   ;;  %7084 = vset.pattern.permute.xlu1 %v8024_v45 }
  0x71   :  { %6912 = vmatprep.subr.bf16.mxu1 %v7109_v15  ;;  %v7118_v40 = vld [vmem:[%s9644_s3 + $0x14] ss:$8 sps:$4 sm:$0xff]   ;;  %v7116_v41 = vld [vmem:[%s9644_s3 + $0x10] ss:$8 sps:$4 sm:$0xff]   ;;  %v7121_v42 = vld [vmem:[%s9644_s3 + $0x4] ss:$8 sps:$4 sm:$0xff]  }
  0x72   :  { %v7119_v43 = vld [vmem:[%s9644_s3] ss:$8 sps:$4 sm:$0xff]   ;;  %v8241_v44 = vld [vmem:[#allocation5 + $0x34] ss:$8 sps:$4 sm:$0xff]   ;;  %v8246_v46 = vld [vmem:[#allocation5 + $0x30] ss:$8 sps:$4 sm:$0xff]  }
  0x73   :  { %v8249_v47 = vld [vmem:[#allocation5 + $0x24] ss:$8 sps:$4 sm:$0xff]   ;;  %v8254_v48 = vld [vmem:[#allocation5 + $0x20] ss:$8 sps:$4 sm:$0xff]   ;;  %v8256_v49 = vld [vmem:[#allocation5 + $0x14] ss:$8 sps:$4 sm:$0xff]  }
  0x74   :  { %v186_v0 = vld [vmem:[%s9662_s29] sm:$0x3]  ;;  %6913 = vmatpush3.bf16.msra.mxu1 %v7109_v15  ;;  %v8260_v50 = vld [vmem:[#allocation5 + $0x10] ss:$8 sps:$4 sm:$0xff]   ;;  %v8262_v51 = vld [vmem:[#allocation5 + $0x4] ss:$8 sps:$4 sm:$0xff]  }
  0x75   :  { %v178_v1 = vld [vmem:[%s9663_s30] sm:$0xff]  ;;  %v179_v2 = vld [vmem:[%s9663_s30 + $0x8] sm:$0xff]  ;;  %7058 = vmatprep.subr.msk.bf16.mxu0 %vm204_vm0, %v186_v0  ;;  %v206_v3 = vsel %vm204_vm0, %v186_v0, 0  ;;  %v180_v5 = vld [vmem:[%s9663_s30 + $0x10] sm:$0xff]  ;;  %698 = vmatprep.subr.bf16.mxu1 %v8241_v44  ;;  %vm387_vm3 = vcmask 523264   ;;  %vm4051_vm4 = vcmask 64512  }
  0x76   :  { %v187_v4 = vpack.c.bf16 %v179_v2, %v178_v1  ;;  %v181_v6 = vld [vmem:[%s9663_s30 + $0x18] sm:$0xff]  ;;  %v182_v7 = vld [vmem:[%s9663_s30 + $0x20] sm:$0xff]  ;;  %6901 = vmatpush3.bf16.msra.mxu0 %v206_v3  ;;  %v183_v9 = vld [vmem:[%s9663_s30 + $0x28] sm:$0xff]  ;;  %vm8033_vm5 = vmmov 0  }
  0x77   :  { %v188_v8 = vpack.c.bf16 %v181_v6, %v180_v5  ;;  %v189_v10 = vpack.c.bf16 %v183_v9, %v182_v7  ;;  %v184_v11 = vld [vmem:[%s9663_s30 + $0x30] sm:$0xff]  ;;  %v185_v12 = vld [vmem:[%s9663_s30 + $0x38] sm:$0xff]  ;;  %476 = vmatprep.subr.bf16.mxu0 %v7112_v36  ;;  %v8266_v52 = vld [vmem:[#allocation5] ss:$8 sps:$4 sm:$0xff]  }
  0x78   :  { %6902 = vmatprep.mubr.msk.bf16.mxu0 %vm191_vm1, %v187_v4  ;;  %v190_v13 = vpack.c.bf16 %v185_v12, %v184_v11 }
  0x79   :  { %6903 = vmatmul.mubr.msk.bf16.vlgmr.msra.gmra.mxu0 %vm191_vm1, %v188_v8 }
  0x7a   :  { %6906 = vmatprep.mubr.msk.bf16.mxu0 %vm191_vm1, %v189_v10  ;;  %477 = vmatpush1.bf16.msra.mxu0 %v7110_v37 }
  0x7b   :  { %478 = vmatprep.subr.bf16.mxu0 %v7115_v38 }
  0x7e   :  { %479 = vmatpush1.bf16.msra.mxu0 %v7113_v39 }
  0x7f   :  { %480 = vmatprep.subr.bf16.mxu0 %v7118_v40 }
  0x81   :  { %6907 = vmatmul.mubr.msk.bf16.gmra.mxu0 %vm191_vm1, %v190_v13 }
  0x82   :  { %481 = vmatpush1.bf16.msra.mxu0 %v7116_v41  ;;  %500 = vmatprep.mubr.bf16.mxu0 %v8024_v45 }
  0x83   :  { %482 = vmatprep.subr.bf16.mxu0 %v7121_v42 }
  0x86   :  { %483 = vmatpush1.bf16.msra.mxu0 %v7119_v43 }
  0x87   :  { %618 = vmatprep.subr.bf16.mxu0 %v8241_v44 }
 0x139   :  { %v6904_v16 = vpop.f32.mrf.mxu0 }
 0x13a   :  { %v275_v23 = vmax.f32 %v6904_v16, 0.0 }
 0x13b   :  { %v242_v17 = vpop.f32.mrf.mxu0 }
 0x13c   :  { %v273_v21 = vmax.f32 %v242_v17, 0.0 }
 0x13d   :  { %v6905_v18 = vpop.f32.mrf.mxu0 }
 0x13e   :  { %v276_v19 = vmax.f32 %v6905_v18, 0.0 }
 0x13f   :  { %v245_v20 = vpop.f32.mrf.mxu0 }
 0x140   :  { %v274_v22 = vmax.f32 %v245_v20, 0.0  ;;  %v286_v26 = vpack.c.bf16 %v276_v19, %v275_v23 }
 0x141   :  { %v6908_v24 = vpop.f32.mrf.mxu0 }
 0x142   :  { %v285_v25 = vpack.c.bf16 %v274_v22, %v273_v21  ;;  %v279_v28 = vmax.f32 %v6908_v24, 0.0 }
 0x143   :  { %v258_v27 = vpop.f32.mrf.mxu0 }
 0x144   :  { %6914 = vmatprep.mubr.msk.bf16.mxu1 %vm301_vm2, %v285_v25  ;;  %v277_v30 = vmax.f32 %v258_v27, 0.0 }
 0x145   :  { %v6909_v29 = vpop.f32.mrf.mxu0  ;;  %6915 = vmatmul.mubr.msk.bf16.vlgmr.msra.gmra.mxu1 %vm301_vm2, %v286_v26 }
 0x146   :  { %v280_v31 = vmax.f32 %v6909_v29, 0.0  ;;  %699 = vmatpush1.bf16.msra.mxu1 %v8246_v46 }
 0x147   :  { %v261_v32 = vpop.f32.mrf.mxu0  ;;  %700 = vmatprep.subr.bf16.mxu1 %v8249_v47 }
 0x148   :  { %v278_v33 = vmax.f32 %v261_v32, 0.0  ;;  %v288_v34 = vpack.c.bf16 %v280_v31, %v279_v28 }
 0x14a   :  { %v287_v35 = vpack.c.bf16 %v278_v33, %v277_v30  ;;  %701 = vmatpush1.bf16.msra.mxu1 %v8254_v48 }
 0x14b   :  { %702 = vmatprep.subr.bf16.mxu1 %v8256_v49 }
 0x14c   :  { %6918 = vmatprep.mubr.msk.bf16.mxu1 %vm301_vm2, %v287_v35 }
 0x14d   :  { %6919 = vmatmul.mubr.msk.bf16.gmra.mxu1 %vm301_vm2, %v288_v34 }
 0x14e   :  { %722 = vmatprep.mubr.bf16.mxu1 %v8024_v45  ;;  %703 = vmatpush1.bf16.msra.mxu1 %v8260_v50 }
 0x14f   :  { %704 = vmatprep.subr.bf16.mxu1 %v8262_v51 }
 0x152   :  { %705 = vmatpush1.bf16.msra.mxu1 %v8266_v52 }
 0x153   :  { %858 = vmatprep.subr.bf16.mxu1 %v8241_v44 }
 0x205   :  { %v6916_v53 = vpop.f32.mrf.mxu1 }
 0x206   :  { %v381_v54 = vmax.f32 %v6916_v53, 0.0 }
 0x207   :  { %v348_v55 = vpop.f32.mrf.mxu1 }
 0x208   :  { %390 = vst.msk [vmem:[#allocation2 + $0x10] sm:$0xff] %vm387_vm3, %v381_v54  ;;  %v379_v56 = vmax.f32 %v348_v55, 0.0 }
 0x209   :  { %v6917_v57 = vpop.f32.mrf.mxu1 }
 0x20a   :  { %388 = vst.msk [vmem:[#allocation2] sm:$0xff] %vm387_vm3, %v379_v56  ;;  %v382_v58 = vmax.f32 %v6917_v57, 0.0 }
 0x20b   :  { %v351_v59 = vpop.f32.mrf.mxu1 }
 0x20c   :  { %391 = vst.msk [vmem:[#allocation2 + $0x18] sm:$0xff] %vm387_vm3, %v382_v58  ;;  %v380_v60 = vmax.f32 %v351_v59, 0.0 }
 0x20d   :  { %v6920_v61 = vpop.f32.mrf.mxu1 }
 0x20e   :  { %389 = vst.msk [vmem:[#allocation2 + $0x8] sm:$0xff] %vm387_vm3, %v380_v60  ;;  %v385_v62 = vmax.f32 %v6920_v61, 0.0 }
 0x20f   :  { %v364_v63 = vpop.f32.mrf.mxu1  ;;  %v398_v9 = vld [vmem:[#allocation2 + $0x10] sm:$0xff] }
 0x210   :  { %394 = vst.msk [vmem:[#allocation2 + $0x30] sm:$0xff] %vm387_vm3, %v385_v62  ;;  %v383_v0 = vmax.f32 %v364_v63, 0.0 }
 0x211   :  { %v6921_v1 = vpop.f32.mrf.mxu1  ;;  %v396_v5 = vld [vmem:[#allocation2] sm:$0xff] }
 0x212   :  { %392 = vst.msk [vmem:[#allocation2 + $0x20] sm:$0xff] %vm387_vm3, %v383_v0  ;;  %v386_v2 = vmax.f32 %v6921_v1, 0.0 }
 0x213   :  { %v367_v3 = vpop.f32.mrf.mxu1  ;;  %v399_v8 = vld [vmem:[#allocation2 + $0x18] sm:$0xff] }
 0x214   :  { %395 = vst.msk [vmem:[#allocation2 + $0x38] sm:$0xff] %vm387_vm3, %v386_v2  ;;  %v384_v4 = vmax.f32 %v367_v3, 0.0  ;;  %v413_v10 = vpack.c.bf16 %v399_v8, %v398_v9 }
 0x215   :  { %v397_v6 = vld [vmem:[#allocation2 + $0x8] sm:$0xff] }
 0x216   :  { %393 = vst.msk [vmem:[#allocation2 + $0x28] sm:$0xff] %vm387_vm3, %v384_v4  ;;  %v412_v7 = vpack.c.bf16 %v397_v6, %v396_v5 }
 0x217   :  { %v402_v15 = vld [vmem:[#allocation2 + $0x30] sm:$0xff] }
 0x218   :  { %6485 = vmatmul.mubr.msk.bf16.vlgmr.msra.gmra.mxu0 %vm387_vm3, %v412_v7 }
 0x219   :  { %619 = vmatpush1.bf16.msra.mxu0 %v8246_v46  ;;  %510 = vmatprep.mubr.bf16.mxu0 %v8024_v45  ;;  %v400_v12 = vld [vmem:[#allocation2 + $0x20] sm:$0xff] }
 0x21a   :  { %620 = vmatprep.subr.bf16.mxu0 %v8249_v47 }
 0x21b   :  { %v403_v14 = vld [vmem:[#allocation2 + $0x38] sm:$0xff] }
 0x21c   :  { %v415_v16 = vpack.c.bf16 %v403_v14, %v402_v15 }
 0x21d   :  { %621 = vmatpush1.bf16.msra.mxu0 %v8254_v48  ;;  %v401_v11 = vld [vmem:[#allocation2 + $0x28] sm:$0xff] }
 0x21e   :  { %622 = vmatprep.subr.bf16.mxu0 %v8256_v49  ;;  %v414_v13 = vpack.c.bf16 %v401_v11, %v400_v12 }
 0x220   :  { %6486 = vmatmul.mubr.msk.bf16.gmra.mxu0 %vm387_vm3, %v413_v10 }
 0x221   :  { %520 = vmatprep.mubr.bf16.mxu0 %v8024_v45  ;;  %623 = vmatpush1.bf16.msra.mxu0 %v8260_v50 }
 0x222   :  { %624 = vmatprep.subr.bf16.mxu0 %v8262_v51 }
 0x225   :  { %625 = vmatpush1.bf16.msra.mxu0 %v8266_v52 }
 0x226   :  { %778 = vmatprep.subr.bf16.mxu0 %v8241_v44 }
 0x228   :  { %6487 = vmatmul.mubr.msk.bf16.gmra.mxu0 %vm387_vm3, %v414_v13 }
 0x229   :  { %530 = vmatprep.mubr.bf16.mxu0 %v8024_v45 }
 0x230   :  { %6488 = vmatmul.mubr.msk.bf16.gmra.mxu0 %vm387_vm3, %v415_v16 }
 0x231   :  { %642 = vmatprep.mubr.bf16.mxu0 %v8024_v45 }
 0x238   :  { %643 = vmatmul.mubr.bf16.vlgmr.msra.gmra.mxu0 %v8024_v45 }
 0x239   :  { %779 = vmatpush1.bf16.msra.mxu0 %v8246_v46  ;;  %802 = vmatprep.mubr.bf16.mxu0 %v8024_v45 }
 0x23a   :  { %780 = vmatprep.subr.bf16.mxu0 %v8249_v47 }
 0x23d   :  { %781 = vmatpush1.bf16.msra.mxu0 %v8254_v48 }
 0x23e   :  { %782 = vmatprep.subr.bf16.mxu0 %v8256_v49 }
 0x241   :  { %783 = vmatpush1.bf16.msra.mxu0 %v8260_v50 }
 0x242   :  { %784 = vmatprep.subr.bf16.mxu0 %v8262_v51 }
 0x245   :  { %785 = vmatpush1.bf16.msra.mxu0 %v8266_v52 }
 0x246   :  { %938 = vmatprep.subr.bf16.mxu0 %v8241_v44 }
 0x2d8   :  { %v502_v17 = vpop.f32.mrf.mxu0 }
 0x2da   :  { %v504_v18 = vpop.f32.mrf.mxu0 }
 0x2dc   :  { %v8304_v19 = vpop.f32.mrf.mxu0 }
 0x2de   :  { %v508_v20 = vpop.f32.mrf.mxu0 }
 0x2e0   :  { %v8306_v21 = vpop.f32.mrf.mxu0 }
 0x2e2   :  { %v8308_v22 = vpop.f32.mrf.mxu0 }
 0x2e4   :  { %v8310_v23 = vpop.f32.mrf.mxu0 }
 0x2e6   :  { %v8312_v24 = vpop.f32.mrf.mxu0 }
 0x2e8   :  { %v8314_v25 = vpop.f32.mrf.mxu0 }
 0x2ea   :  { %v8316_v26 = vpop.f32.mrf.mxu0 }
 0x2ec   :  { %v8318_v27 = vpop.f32.mrf.mxu0 }
 0x2ee   :  { %v8320_v28 = vpop.f32.mrf.mxu0 }
 0x2f0   :  { %v8322_v29 = vpop.f32.mrf.mxu0 }
 0x2f2   :  { %v8324_v30 = vpop.f32.mrf.mxu0 }
 0x2f4   :  { %v8326_v31 = vpop.f32.mrf.mxu0 }
 0x2f6   :  { %v8328_v32 = vpop.f32.mrf.mxu0 }
 0x2f8   :  { %v644_v33 = vpop.f32.mrf.mxu0 }
 0x2f9   :  { %v651_v34 = vadd.f32 %v644_v33, %v502_v17 }
 0x2fa   :  { %v646_v35 = vpop.f32.mrf.mxu0 }
 0x2fb   :  { %v652_v36 = vadd.f32 %v646_v35, %v504_v18  ;;  %v6497_v40 = vmul.f32 -1.442695, %v651_v34 }
 0x2fc   :  { %v648_v37 = vpop.f32.mrf.mxu0 }
 0x2fd   :  { %7285 = vtanh.f32 %v652_v36  ;;  %v6498_v59 = vmul.f32 -1.442695, %v652_v36 }
 0x2fe   :  { %v649_v38 = vpop.f32.mrf.mxu0  ;;  %7287 = vpow2.f32 %v6497_v40 }
 0x30a   :  { %v7286_v39 = vpop.eup %7285 }
 0x30b   :  { %668 = vrot.lane.b32.xlu0 %v7286_v39, %s8018_s19  ;;  %v7288_v41 = vpop.eup %7287 }
 0x30c   :  { %v659_v42 = vadd.f32 1.0, %v7288_v41 }
 0x30e   :  { %7289 = vrcp.f32 %v659_v42 }
 0x31b   :  { %v7290_v43 = vpop.eup %7289 }
 0x31c   :  { %v666_v55 = vmul.f32 0.0, %v7290_v43 }
 0x37d   :  { %v669_v53 = vpop.permute.xlu0 %668 }
 0x37e   :  { %v671_v54 = vmul.f32 %v7290_v43, %v669_v53 }
 0x380   :  { %673 = vrot.lane.b32.xlu0 %v671_v54, %s8018_s19 }
 0x3f2   :  { %v674_v56 = vpop.permute.xlu0 %673 }
 0x3f3   :  { %v676_v57 = vadd.f32 %v674_v56, %v666_v55 }
 0x3f5   :  { %7291 = vtanh.f32 %v676_v57 }
 0x3f6   :  { %7293 = vpow2.f32 %v6498_v59 }
 0x402   :  { %v7292_v58 = vpop.eup %7291 }
 0x403   :  { %679 = vrot.lane.b32.xlu1 %v7292_v58, %s8018_s19  ;;  %v7294_v60 = vpop.eup %7293 }
 0x404   :  { %v660_v61 = vadd.f32 1.0, %v7294_v60 }
 0x406   :  { %7295 = vrcp.f32 %v660_v61 }
 0x413   :  { %v7296_v62 = vpop.eup %7295 }
 0x475   :  { %v680_v63 = vpop.permute.xlu1 %679 }
 0x476   :  { %v682_v0 = vmul.f32 %v7296_v62, %v680_v63 }
 0x478   :  { %683 = vst.msk [vmem:[#allocation2] sm:$0xff] %vm387_vm3, %v682_v0  ;;  %v686_v1 = vpack.c.bf16 %v682_v0, %v682_v0 }
 0x47a   :  { %6499 = vmatmul.mubr.msk.bf16.vlgmr.msra.gmra.mxu1 %vm387_vm3, %v686_v1 }
 0x47b   :  { %859 = vmatpush1.bf16.msra.mxu1 %v8246_v46  ;;  %882 = vmatprep.mubr.bf16.mxu1 %v8024_v45 }
 0x47c   :  { %860 = vmatprep.subr.bf16.mxu1 %v8249_v47 }
 0x47f   :  { %861 = vmatpush1.bf16.msra.mxu1 %v8254_v48 }
 0x480   :  { %862 = vmatprep.subr.bf16.mxu1 %v8256_v49 }
 0x483   :  { %863 = vmatpush1.bf16.msra.mxu1 %v8260_v50 }
 0x484   :  { %864 = vmatprep.subr.bf16.mxu1 %v8262_v51 }
 0x487   :  { %865 = vmatpush1.bf16.msra.mxu1 %v8266_v52 }
 0x488   :  { %1018 = vmatprep.subr.bf16.mxu1 %v8241_v44 }
 0x53a   :  { %v724_v2 = vpop.f32.mrf.mxu1 }
 0x53b   :  { %v731_v8 = vadd.f32 %v724_v2, %v8304_v19 }
 0x53c   :  { %v726_v3 = vpop.f32.mrf.mxu1 }
 0x53d   :  { %v732_v4 = vadd.f32 %v726_v3, %v508_v20  ;;  %v6500_v9 = vmul.f32 -1.442695, %v731_v8 }
 0x53e   :  { %v728_v5 = vpop.f32.mrf.mxu1 }
 0x53f   :  { %7297 = vtanh.f32 %v732_v4  ;;  %v6501_v20 = vmul.f32 -1.442695, %v732_v4 }
 0x540   :  { %v729_v6 = vpop.f32.mrf.mxu1  ;;  %7299 = vpow2.f32 %v6500_v9 }
 0x54c   :  { %v7298_v7 = vpop.eup %7297 }
 0x54d   :  { %748 = vrot.lane.b32.xlu1 %v7298_v7, %s8018_s19  ;;  %v7300_v10 = vpop.eup %7299 }
 0x54e   :  { %v739_v11 = vadd.f32 1.0, %v7300_v10 }
 0x550   :  { %7301 = vrcp.f32 %v739_v11 }
 0x55d   :  { %v7302_v12 = vpop.eup %7301 }
 0x55e   :  { %v746_v15 = vmul.f32 %v7302_v12, %v676_v57 }
 0x5bf   :  { %v749_v13 = vpop.permute.xlu1 %748 }
 0x5c0   :  { %v751_v14 = vmul.f32 %v7302_v12, %v749_v13 }
 0x5c2   :  { %753 = vrot.lane.b32.xlu0 %v751_v14, %s8018_s19 }
 0x634   :  { %v754_v16 = vpop.permute.xlu0 %753 }
 0x635   :  { %v756_v17 = vadd.f32 %v754_v16, %v746_v15 }
 0x637   :  { %7303 = vtanh.f32 %v756_v17 }
 0x638   :  { %7305 = vpow2.f32 %v6501_v20 }
 0x644   :  { %v7304_v18 = vpop.eup %7303 }
 0x645   :  { %759 = vrot.lane.b32.xlu1 %v7304_v18, %s8018_s19  ;;  %v7306_v19 = vpop.eup %7305 }
 0x646   :  { %v740_v33 = vadd.f32 1.0, %v7306_v19 }
 0x648   :  { %7307 = vrcp.f32 %v740_v33 }
 0x655   :  { %v7308_v34 = vpop.eup %7307 }
 0x6b7   :  { %v760_v35 = vpop.permute.xlu1 %759 }
 0x6b8   :  { %v762_v36 = vmul.f32 %v7308_v34, %v760_v35 }
 0x6ba   :  { %763 = vst.msk [vmem:[#allocation2 + $0x8] sm:$0xff] %vm387_vm3, %v762_v36  ;;  %v766_v37 = vpack.c.bf16 %v762_v36, %v762_v36 }
 0x6bc   :  { %6502 = vmatmul.mubr.msk.bf16.vlgmr.msra.gmra.mxu0 %vm387_vm3, %v766_v37 }
 0x6bd   :  { %939 = vmatpush1.bf16.msra.mxu0 %v8246_v46  ;;  %962 = vmatprep.mubr.bf16.mxu0 %v8024_v45 }
 0x6be   :  { %940 = vmatprep.subr.bf16.mxu0 %v8249_v47 }
 0x6c1   :  { %941 = vmatpush1.bf16.msra.mxu0 %v8254_v48 }
 0x6c2   :  { %942 = vmatprep.subr.bf16.mxu0 %v8256_v49 }
 0x6c5   :  { %943 = vmatpush1.bf16.msra.mxu0 %v8260_v50 }
 0x6c6   :  { %944 = vmatprep.subr.bf16.mxu0 %v8262_v51 }
 0x6c9   :  { %945 = vmatpush1.bf16.msra.mxu0 %v8266_v52 }
 0x6ca   :  { %1098 = vmatprep.subr.bf16.mxu0 %v8241_v44 }
 0x77c   :  { %v804_v38 = vpop.f32.mrf.mxu0 }
 0x77d   :  { %v811_v53 = vadd.f32 %v804_v38, %v8306_v21 }
 0x77e   :  { %v806_v39 = vpop.f32.mrf.mxu0 }
 0x77f   :  { %v812_v40 = vadd.f32 %v806_v39, %v8308_v22  ;;  %v6503_v54 = vmul.f32 -1.442695, %v811_v53 }
 0x780   :  { %v808_v41 = vpop.f32.mrf.mxu0 }
 0x781   :  { %7309 = vtanh.f32 %v812_v40  ;;  %v6504_v63 = vmul.f32 -1.442695, %v812_v40 }
 0x782   :  { %v809_v42 = vpop.f32.mrf.mxu0  ;;  %7311 = vpow2.f32 %v6503_v54 }
 0x78e   :  { %v7310_v43 = vpop.eup %7309 }
 0x78f   :  { %828 = vrot.lane.b32.xlu0 %v7310_v43, %s8018_s19  ;;  %v7312_v55 = vpop.eup %7311 }
 0x790   :  { %v819_v56 = vadd.f32 1.0, %v7312_v55 }
 0x792   :  { %7313 = vrcp.f32 %v819_v56 }
 0x79f   :  { %v7314_v57 = vpop.eup %7313 }
 0x7a0   :  { %v826_v60 = vmul.f32 %v7314_v57, %v756_v17 }
 0x801   :  { %v829_v58 = vpop.permute.xlu0 %828 }
 0x802   :  { %v831_v59 = vmul.f32 %v7314_v57, %v829_v58 }
 0x804   :  { %833 = vrot.lane.b32.xlu1 %v831_v59, %s8018_s19 }
 0x876   :  { %v834_v22 = vpop.permute.xlu1 %833 }
 0x877   :  { %v836_v61 = vadd.f32 %v834_v22, %v826_v60 }
 0x879   :  { %7315 = vtanh.f32 %v836_v61 }
 0x87a   :  { %7317 = vpow2.f32 %v6504_v63 }
 0x886   :  { %v7316_v62 = vpop.eup %7315 }
 0x887   :  { %839 = vrot.lane.b32.xlu0 %v7316_v62, %s8018_s19  ;;  %v7318_v21 = vpop.eup %7317 }
 0x888   :  { %v820_v0 = vadd.f32 1.0, %v7318_v21 }
 0x88a   :  { %7319 = vrcp.f32 %v820_v0 }
 0x897   :  { %v7320_v1 = vpop.eup %7319 }
 0x8f9   :  { %v840_v2 = vpop.permute.xlu0 %839 }
 0x8fa   :  { %v842_v3 = vmul.f32 %v7320_v1, %v840_v2 }
 0x8fc   :  { %843 = vst.msk [vmem:[#allocation2 + $0x10] sm:$0xff] %vm387_vm3, %v842_v3  ;;  %v846_v4 = vpack.c.bf16 %v842_v3, %v842_v3 }
 0x8fe   :  { %6505 = vmatmul.mubr.msk.bf16.vlgmr.msra.gmra.mxu1 %vm387_vm3, %v846_v4 }
 0x8ff   :  { %1019 = vmatpush1.bf16.msra.mxu1 %v8246_v46  ;;  %1042 = vmatprep.mubr.bf16.mxu1 %v8024_v45 }
 0x900   :  { %1020 = vmatprep.subr.bf16.mxu1 %v8249_v47 }
 0x903   :  { %1021 = vmatpush1.bf16.msra.mxu1 %v8254_v48 }
 0x904   :  { %1022 = vmatprep.subr.bf16.mxu1 %v8256_v49 }
 0x907   :  { %1023 = vmatpush1.bf16.msra.mxu1 %v8260_v50 }
 0x908   :  { %1024 = vmatprep.subr.bf16.mxu1 %v8262_v51 }
 0x90b   :  { %1025 = vmatpush1.bf16.msra.mxu1 %v8266_v52 }
 0x90c   :  { %1178 = vmatprep.subr.bf16.mxu1 %v8241_v44 }
 0x9be   :  { %v884_v5 = vpop.f32.mrf.mxu1 }
 0x9bf   :  { %v891_v11 = vadd.f32 %v884_v5, %v8310_v23 }
 0x9c0   :  { %v886_v6 = vpop.f32.mrf.mxu1 }
 0x9c1   :  { %v892_v7 = vadd.f32 %v886_v6, %v8312_v24  ;;  %v6506_v12 = vmul.f32 -1.442695, %v891_v11 }
 0x9c2   :  { %v888_v8 = vpop.f32.mrf.mxu1 }
 0x9c3   :  { %7321 = vtanh.f32 %v892_v7  ;;  %v6507_v19 = vmul.f32 -1.442695, %v892_v7 }
 0x9c4   :  { %v889_v9 = vpop.f32.mrf.mxu1  ;;  %7323 = vpow2.f32 %v6506_v12 }
 0x9d0   :  { %v7322_v10 = vpop.eup %7321 }
 0x9d1   :  { %908 = vrot.lane.b32.xlu1 %v7322_v10, %s8018_s19  ;;  %v7324_v13 = vpop.eup %7323 }
 0x9d2   :  { %v899_v14 = vadd.f32 1.0, %v7324_v13 }
 0x9d4   :  { %7325 = vrcp.f32 %v899_v14 }
 0x9e1   :  { %v7326_v15 = vpop.eup %7325 }
 0x9e2   :  { %v906_v17 = vmul.f32 %v7326_v15, %v836_v61 }
 0xa43   :  { %v909_v16 = vpop.permute.xlu1 %908 }
 0xa44   :  { %v911_v44 = vmul.f32 %v7326_v15, %v909_v16 }
 0xa46   :  { %913 = vrot.lane.b32.xlu0 %v911_v44, %s8018_s19 }
 0xab8   :  { %v914_v24 = vpop.permute.xlu0 %913 }
 0xab9   :  { %v916_v18 = vadd.f32 %v914_v24, %v906_v17  ;;  %v7134_v17 = vld [vmem:[%s9644_s3 + $0x70] ss:$8 sps:$4 sm:$0xff]  }
 0xabb   :  { %7327 = vtanh.f32 %v916_v18 }
 0xabc   :  { %7329 = vpow2.f32 %v6507_v19  ;;  %v7142_v19 = vld [vmem:[%s9644_s3 + $0x54] ss:$8 sps:$4 sm:$0xff]  }
 0xac8   :  { %v7328_v20 = vpop.eup %7327 }
 0xac9   :  { %919 = vrot.lane.b32.xlu1 %v7328_v20, %s8018_s19  ;;  %v7330_v23 = vpop.eup %7329  ;;  %v7137_v20 = vld [vmem:[%s9644_s3 + $0x60] ss:$8 sps:$4 sm:$0xff]  }
 0xaca   :  { %v900_v33 = vadd.f32 1.0, %v7330_v23  ;;  %v7140_v23 = vld [vmem:[%s9644_s3 + $0x50] ss:$8 sps:$4 sm:$0xff]  }
 0xacc   :  { %7331 = vrcp.f32 %v900_v33  ;;  %v7145_v33 = vld [vmem:[%s9644_s3 + $0x44] ss:$8 sps:$4 sm:$0xff]  }
 0xad9   :  { %v7332_v34 = vpop.eup %7331 }
 0xb3b   :  { %v920_v35 = vpop.permute.xlu1 %919 }
 0xb3c   :  { %v922_v36 = vmul.f32 %v7332_v34, %v920_v35  ;;  %v7143_v34 = vld [vmem:[%s9644_s3 + $0x40] ss:$8 sps:$4 sm:$0xff]  }
 0xb3d   :  { %v1245_v35 = vld [vmem:[#allocation2 + $0x8] sm:$0xff] }
 0xb3e   :  { %923 = vst.msk [vmem:[#allocation2 + $0x18] sm:$0xff] %vm387_vm3, %v922_v36  ;;  %v926_v37 = vpack.c.bf16 %v922_v36, %v922_v36  ;;  %v1244_v36 = vld [vmem:[#allocation2] sm:$0xff] }
 0xb40   :  { %6508 = vmatmul.mubr.msk.bf16.vlgmr.msra.gmra.mxu0 %vm387_vm3, %v926_v37  ;;  %v1261_v37 = vpack.c.bf16 %v1245_v35, %v1244_v36 }
 0xb41   :  { %1099 = vmatpush1.bf16.msra.mxu0 %v8246_v46  ;;  %1122 = vmatprep.mubr.bf16.mxu0 %v8024_v45 }
 0xb42   :  { %1100 = vmatprep.subr.bf16.mxu0 %v8249_v47 }
 0xb45   :  { %1101 = vmatpush1.bf16.msra.mxu0 %v8254_v48 }
 0xb46   :  { %1102 = vmatprep.subr.bf16.mxu0 %v8256_v49 }
 0xb49   :  { %1103 = vmatpush1.bf16.msra.mxu0 %v8260_v50 }
 0xb4a   :  { %1104 = vmatprep.subr.bf16.mxu0 %v8262_v51 }
 0xb4d   :  { %1105 = vmatpush1.bf16.msra.mxu0 %v8266_v52 }
 0xc00   :  { %v964_v38 = vpop.f32.mrf.mxu0 }
 0xc01   :  { %v971_v53 = vadd.f32 %v964_v38, %v8314_v25  ;;  %v1247_v38 = vld [vmem:[#allocation2 + $0x18] sm:$0xff] }
 0xc02   :  { %v966_v39 = vpop.f32.mrf.mxu0 }
 0xc03   :  { %v972_v40 = vadd.f32 %v966_v39, %v8316_v26  ;;  %v6509_v54 = vmul.f32 -1.442695, %v971_v53  ;;  %v1246_v39 = vld [vmem:[#allocation2 + $0x10] sm:$0xff] }
 0xc04   :  { %v968_v41 = vpop.f32.mrf.mxu0 }
 0xc05   :  { %7333 = vtanh.f32 %v972_v40  ;;  %v6510_v62 = vmul.f32 -1.442695, %v972_v40  ;;  %v1262_v40 = vpack.c.bf16 %v1247_v38, %v1246_v39 }
 0xc06   :  { %v969_v42 = vpop.f32.mrf.mxu0  ;;  %7335 = vpow2.f32 %v6509_v54 }
 0xc12   :  { %v7334_v43 = vpop.eup %7333 }
 0xc13   :  { %988 = vrot.lane.b32.xlu0 %v7334_v43, %s8018_s19  ;;  %v7336_v55 = vpop.eup %7335 }
 0xc14   :  { %v979_v56 = vadd.f32 1.0, %v7336_v55 }
 0xc16   :  { %7337 = vrcp.f32 %v979_v56 }
 0xc23   :  { %v7338_v57 = vpop.eup %7337 }
 0xc24   :  { %v986_v60 = vmul.f32 %v7338_v57, %v916_v18  ;;  %v7139_v18 = vld [vmem:[%s9644_s3 + $0x64] ss:$8 sps:$4 sm:$0xff]  }
 0xc85   :  { %v989_v58 = vpop.permute.xlu0 %988 }
 0xc86   :  { %v991_v59 = vmul.f32 %v7338_v57, %v989_v58 }
 0xc88   :  { %993 = vrot.lane.b32.xlu1 %v991_v59, %s8018_s19 }
 0xcfa   :  { %v994_v26 = vpop.permute.xlu1 %993 }
 0xcfb   :  { %v996_v22 = vadd.f32 %v994_v26, %v986_v60 }
 0xcfd   :  { %7339 = vtanh.f32 %v996_v22 }
 0xcfe   :  { %7341 = vpow2.f32 %v6510_v62 }
 0xd0a   :  { %v7340_v61 = vpop.eup %7339 }
 0xd0b   :  { %999 = vrot.lane.b32.xlu0 %v7340_v61, %s8018_s19  ;;  %v7342_v25 = vpop.eup %7341 }
 0xd0c   :  { %v980_v63 = vadd.f32 1.0, %v7342_v25 }
 0xd0e   :  { %7343 = vrcp.f32 %v980_v63 }
 0xd1b   :  { %v7344_v21 = vpop.eup %7343 }
 0xd7d   :  { %v1000_v0 = vpop.permute.xlu0 %999 }
 0xd7e   :  { %v1002_v1 = vmul.f32 %v7344_v21, %v1000_v0  ;;  %v8454_v0 = vld [vmem:[#allocation5 + $0x74] ss:$8 sps:$4 sm:$0xff]  }
 0xd80   :  { %1003 = vst.msk [vmem:[#allocation2 + $0x20] sm:$0xff] %vm387_vm3, %v1002_v1  ;;  %v1006_v2 = vpack.c.bf16 %v1002_v1, %v1002_v1  ;;  %v8461_v1 = vld [vmem:[#allocation5 + $0x64] ss:$8 sps:$4 sm:$0xff]  }
 0xd82   :  { %6511 = vmatmul.mubr.msk.bf16.vlgmr.msra.gmra.mxu1 %vm387_vm3, %v1006_v2  ;;  %v8463_v2 = vld [vmem:[#allocation5 + $0x60] ss:$8 sps:$4 sm:$0xff]  }
 0xd83   :  { %1179 = vmatpush1.bf16.msra.mxu1 %v8246_v46  ;;  %1202 = vmatprep.mubr.bf16.mxu1 %v8024_v45 }
 0xd84   :  { %1180 = vmatprep.subr.bf16.mxu1 %v8249_v47 }
 0xd87   :  { %1181 = vmatpush1.bf16.msra.mxu1 %v8254_v48  ;;  %v1248_v42 = vld [vmem:[#allocation2 + $0x20] sm:$0xff] }
 0xd88   :  { %1182 = vmatprep.subr.bf16.mxu1 %v8256_v49 }
 0xd8b   :  { %1183 = vmatpush1.bf16.msra.mxu1 %v8260_v50 }
 0xd8c   :  { %1184 = vmatprep.subr.bf16.mxu1 %v8262_v51 }
 0xd8f   :  { %1185 = vmatpush1.bf16.msra.mxu1 %v8266_v52 }
 0xd90   :  { %1465 = vmatprep.subr.bf16.mxu1 %v8454_v0 }
 0xe42   :  { %v1044_v3 = vpop.f32.mrf.mxu1 }
 0xe43   :  { %v1051_v47 = vadd.f32 %v1044_v3, %v8318_v27  ;;  %v7136_v27 = vld [vmem:[%s9644_s3 + $0x74] ss:$8 sps:$4 sm:$0xff]  }
 0xe44   :  { %v1046_v4 = vpop.f32.mrf.mxu1  ;;  %1325 = vmatprep.subr.bf16.mxu0 %v7136_v27  ;;  %v8467_v3 = vld [vmem:[#allocation5 + $0x54] ss:$8 sps:$4 sm:$0xff]  }
 0xe45   :  { %v1052_v5 = vadd.f32 %v1046_v4, %v8320_v28  ;;  %v6512_v48 = vmul.f32 -1.442695, %v1051_v47  ;;  %v8469_v4 = vld [vmem:[#allocation5 + $0x50] ss:$8 sps:$4 sm:$0xff]  }
 0xe46   :  { %v1048_v6 = vpop.f32.mrf.mxu1 }
 0xe47   :  { %7345 = vtanh.f32 %v1052_v5  ;;  %v6513_v12 = vmul.f32 -1.442695, %v1052_v5  ;;  %v8474_v6 = vld [vmem:[#allocation5 + $0x44] ss:$8 sps:$4 sm:$0xff]  }
 0xe48   :  { %v1049_v46 = vpop.f32.mrf.mxu1  ;;  %7347 = vpow2.f32 %v6512_v48 }
 0xe49   :  { %v8476_v46 = vld [vmem:[#allocation5 + $0x40] ss:$8 sps:$4 sm:$0xff]  }
 0xe54   :  { %v7346_v7 = vpop.eup %7345 }
 0xe55   :  { %1068 = vrot.lane.b32.xlu1 %v7346_v7, %s8018_s19  ;;  %v7348_v49 = vpop.eup %7347 }
 0xe56   :  { %v1059_v50 = vadd.f32 1.0, %v7348_v49 }
 0xe58   :  { %7349 = vrcp.f32 %v1059_v50 }
 0xe65   :  { %v7350_v51 = vpop.eup %7349 }
 0xe66   :  { %v1066_v9 = vmul.f32 %v7350_v51, %v996_v22 }
 0xec7   :  { %v1069_v8 = vpop.permute.xlu1 %1068 }
 0xec8   :  { %v1071_v52 = vmul.f32 %v7350_v51, %v1069_v8 }
 0xeca   :  { %1073 = vrot.lane.b32.xlu0 %v1071_v52, %s8018_s19 }
 0xf3c   :  { %v1074_v28 = vpop.permute.xlu0 %1073 }
 0xf3d   :  { %v8409_v10 = vadd.f32 %v1074_v28, %v1066_v9 }
 0xf3f   :  { %7351 = vtanh.f32 %v8409_v10 }
 0xf40   :  { %7353 = vpow2.f32 %v6513_v12 }
 0xf4c   :  { %v7352_v11 = vpop.eup %7351 }
 0xf4d   :  { %1079 = vrot.lane.b32.xlu1 %v7352_v11, %s8018_s19  ;;  %v7354_v13 = vpop.eup %7353 }
 0xf4e   :  { %v1060_v14 = vadd.f32 1.0, %v7354_v13 }
 0xf50   :  { %7355 = vrcp.f32 %v1060_v14 }
 0xf5d   :  { %v7356_v15 = vpop.eup %7355 }
 0xfbf   :  { %v1080_v16 = vpop.permute.xlu1 %1079 }
 0xfc0   :  { %v1082_v44 = vmul.f32 %v7356_v15, %v1080_v16 }
 0xfc2   :  { %1083 = vst.msk [vmem:[#allocation2 + $0x28] sm:$0xff] %vm387_vm3, %v1082_v44  ;;  %v1086_v24 = vpack.c.bf16 %v1082_v44, %v1082_v44 }
 0xfc4   :  { %6514 = vmatmul.mubr.msk.bf16.vlgmr.msra.gmra.mxu0 %vm387_vm3, %v1086_v24 }
 0xfc5   :  { %1326 = vmatpush1.bf16.msra.mxu0 %v7134_v17  ;;  %1349 = vmatprep.mubr.bf16.mxu0 %v8024_v45 }
 0xfc6   :  { %1327 = vmatprep.subr.bf16.mxu0 %v7139_v18 }
 0xfc9   :  { %1328 = vmatpush1.bf16.msra.mxu0 %v7137_v20  ;;  %v1249_v41 = vld [vmem:[#allocation2 + $0x28] sm:$0xff] }
 0xfca   :  { %1329 = vmatprep.subr.bf16.mxu0 %v7142_v19  ;;  %v1263_v43 = vpack.c.bf16 %v1249_v41, %v1248_v42 }
 0xfcd   :  { %1330 = vmatpush1.bf16.msra.mxu0 %v7140_v23 }
 0xfce   :  { %1331 = vmatprep.subr.bf16.mxu0 %v7145_v33 }
 0xfd1   :  { %1332 = vmatpush1.bf16.msra.mxu0 %v7143_v34 }
 0xfd2   :  { %1625 = vmatprep.subr.bf16.mxu0 %v8454_v0 }
 0xfd4   :  { %6536 = vmatmul.mubr.msk.bf16.vlgmr.msra.gmra.mxu0 %vm387_vm3, %v1261_v37 }
 0xfd5   :  { %1359 = vmatprep.mubr.bf16.mxu0 %v8024_v45 }
 0xfdc   :  { %6537 = vmatmul.mubr.msk.bf16.gmra.mxu0 %vm387_vm3, %v1262_v40 }
 0xfdd   :  { %1369 = vmatprep.mubr.bf16.mxu0 %v8024_v45 }
 0xfe4   :  { %6538 = vmatmul.mubr.msk.bf16.gmra.mxu0 %vm387_vm3, %v1263_v43 }
 0xfe5   :  { %1379 = vmatprep.mubr.bf16.mxu0 %v8024_v45 }
0x1084   :  { %v1124_v53 = vpop.f32.mrf.mxu0 }
0x1085   :  { %v1131_v59 = vadd.f32 %v1124_v53, %v8322_v29  ;;  %v8456_v29 = vld [vmem:[#allocation5 + $0x70] ss:$8 sps:$4 sm:$0xff]  }
0x1086   :  { %v1126_v54 = vpop.f32.mrf.mxu0  ;;  %1626 = vmatpush1.bf16.msra.mxu0 %v8456_v29 }
0x1087   :  { %v1132_v55 = vadd.f32 %v1126_v54, %v8324_v30  ;;  %v6515_v60 = vmul.f32 -1.442695, %v1131_v59  ;;  %1627 = vmatprep.subr.bf16.mxu0 %v8461_v1 }
0x1088   :  { %v1128_v56 = vpop.f32.mrf.mxu0 }
0x1089   :  { %7357 = vtanh.f32 %v1132_v55  ;;  %v6516_v7 = vmul.f32 -1.442695, %v1132_v55 }
0x108a   :  { %v1129_v57 = vpop.f32.mrf.mxu0  ;;  %7359 = vpow2.f32 %v6515_v60  ;;  %1628 = vmatpush1.bf16.msra.mxu0 %v8463_v2 }
0x108b   :  { %1629 = vmatprep.subr.bf16.mxu0 %v8467_v3 }
0x108e   :  { %1630 = vmatpush1.bf16.msra.mxu0 %v8469_v4 }
0x108f   :  { %1631 = vmatprep.subr.bf16.mxu0 %v8474_v6 }
0x1092   :  { %1632 = vmatpush1.bf16.msra.mxu0 %v8476_v46 }
0x1093   :  { %1785 = vmatprep.subr.bf16.mxu0 %v8454_v0 }
0x1094   :  { %v1351_v27 = vpop.f32.mrf.mxu0 }
0x1096   :  { %v7358_v58 = vpop.eup %7357  ;;  %v1353_v13 = vpop.f32.mrf.mxu0 }
0x1097   :  { %1148 = vrot.lane.b32.xlu0 %v7358_v58, %s8018_s19  ;;  %v7360_v26 = vpop.eup %7359 }
0x1098   :  { %v1139_v22 = vadd.f32 1.0, %v7360_v26 }
0x109a   :  { %7361 = vrcp.f32 %v1139_v22 }
0x10a7   :  { %v7362_v61 = vpop.eup %7361 }
0x10a8   :  { %v1146_v30 = vmul.f32 %v7362_v61, %v8409_v10 }
0x1109   :  { %v1149_v62 = vpop.permute.xlu0 %1148 }
0x110a   :  { %v1151_v25 = vmul.f32 %v7362_v61, %v1149_v62 }
0x110c   :  { %1153 = vrot.lane.b32.xlu1 %v1151_v25, %s8018_s19 }
0x117e   :  { %v1154_v63 = vpop.permute.xlu1 %1153 }
0x117f   :  { %v8451_v21 = vadd.f32 %v1154_v63, %v1146_v30 }
0x1181   :  { %7363 = vtanh.f32 %v8451_v21 }
0x1182   :  { %7365 = vpow2.f32 %v6516_v7 }
0x118e   :  { %v7364_v5 = vpop.eup %7363 }
0x118f   :  { %1159 = vrot.lane.b32.xlu0 %v7364_v5, %s8018_s19  ;;  %v7366_v47 = vpop.eup %7365 }
0x1190   :  { %v1140_v48 = vadd.f32 1.0, %v7366_v47 }
0x1192   :  { %7367 = vrcp.f32 %v1140_v48 }
0x119f   :  { %v7368_v49 = vpop.eup %7367 }
0x1201   :  { %v1160_v50 = vpop.permute.xlu0 %1159 }
0x1202   :  { %v1162_v51 = vmul.f32 %v7368_v49, %v1160_v50  ;;  %v1355_v50 = vpop.f32.mrf.mxu0 }
0x1204   :  { %1163 = vst.msk [vmem:[#allocation2 + $0x30] sm:$0xff] %vm387_vm3, %v1162_v51  ;;  %v1166_v8 = vpack.c.bf16 %v1162_v51, %v1162_v51 }
0x1206   :  { %6517 = vmatmul.mubr.msk.bf16.vlgmr.msra.gmra.mxu1 %vm387_vm3, %v1166_v8  ;;  %v1357_v8 = vpop.f32.mrf.mxu0 }
0x1207   :  { %1466 = vmatpush1.bf16.msra.mxu1 %v8456_v29  ;;  %1489 = vmatprep.mubr.bf16.mxu1 %v8024_v45 }
0x1208   :  { %1467 = vmatprep.subr.bf16.mxu1 %v8461_v1 }
0x120b   :  { %1468 = vmatpush1.bf16.msra.mxu1 %v8463_v2  ;;  %v1250_v47 = vld [vmem:[#allocation2 + $0x30] sm:$0xff] }
0x120c   :  { %1469 = vmatprep.subr.bf16.mxu1 %v8467_v3 }
0x120f   :  { %1470 = vmatpush1.bf16.msra.mxu1 %v8469_v4 }
0x1210   :  { %1471 = vmatprep.subr.bf16.mxu1 %v8474_v6 }
0x1213   :  { %1472 = vmatpush1.bf16.msra.mxu1 %v8476_v46 }
0x1214   :  { %1545 = vmatprep.subr.bf16.mxu1 %v8454_v0 }
0x1216   :  { %1490 = vmatmul.mubr.bf16.vlgmr.msra.gmra.mxu1 %v8024_v45 }
0x1217   :  { %1546 = vmatpush1.bf16.msra.mxu1 %v8456_v29  ;;  %1569 = vmatprep.mubr.bf16.mxu1 %v8024_v45 }
0x1218   :  { %1547 = vmatprep.subr.bf16.mxu1 %v8461_v1 }
0x121b   :  { %1548 = vmatpush1.bf16.msra.mxu1 %v8463_v2 }
0x121c   :  { %1549 = vmatprep.subr.bf16.mxu1 %v8467_v3 }
0x121f   :  { %1550 = vmatpush1.bf16.msra.mxu1 %v8469_v4 }
0x1220   :  { %1551 = vmatprep.subr.bf16.mxu1 %v8474_v6 }
0x1223   :  { %1552 = vmatpush1.bf16.msra.mxu1 %v8476_v46 }
0x1224   :  { %1705 = vmatprep.subr.bf16.mxu1 %v8454_v0 }
0x12c6   :  { %v1204_v52 = vpop.f32.mrf.mxu1 }
0x12c7   :  { %v1211_v36 = vadd.f32 %v1204_v52, %v8326_v31 }
0x12c8   :  { %v1206_v9 = vpop.f32.mrf.mxu1 }
0x12c9   :  { %v1212_v19 = vadd.f32 %v1206_v9, %v8328_v32  ;;  %v6518_v37 = vmul.f32 -1.442695, %v1211_v36 }
0x12ca   :  { %v1208_v28 = vpop.f32.mrf.mxu1 }
0x12cb   :  { %v6519_v25 = vmul.f32 -1.442695, %v1212_v19 }
0x12cc   :  { %v1209_v10 = vpop.f32.mrf.mxu1 }
0x12d6   :  { %v1491_v11 = vpop.f32.mrf.mxu1 }
0x12d7   :  { %v1498_v17 = vadd.f32 %v1491_v11, %v1351_v27 }
0x12d8   :  { %v1493_v12 = vpop.f32.mrf.mxu1 }
0x12d9   :  { %v1499_v15 = vadd.f32 %v1493_v12, %v1353_v13  ;;  %v6548_v24 = vmul.f32 -1.442695, %v1498_v17 }
0x12da   :  { %v1495_v14 = vpop.f32.mrf.mxu1 }
0x12db   :  { %7369 = vtanh.f32 %v1499_v15  ;;  %v6549_v31 = vmul.f32 -1.442695, %v1499_v15 }
0x12dc   :  { %v1496_v16 = vpop.f32.mrf.mxu1  ;;  %7371 = vpow2.f32 %v6548_v24 }
0x12e8   :  { %v7370_v44 = vpop.eup %7369 }
0x12e9   :  { %1515 = vrot.lane.b32.xlu1 %v7370_v44, %s8018_s19  ;;  %v7372_v18 = vpop.eup %7371 }
0x12ea   :  { %v1506_v20 = vadd.f32 1.0, %v7372_v18 }
0x12ec   :  { %7373 = vrcp.f32 %v1506_v20 }
0x12ed   :  { %7375 = vtanh.f32 %v1212_v19 }
0x12ee   :  { %7377 = vpow2.f32 %v6518_v37 }
0x12f9   :  { %v7374_v23 = vpop.eup %7373 }
0x12fa   :  { %v7376_v35 = vpop.eup %7375  ;;  %v1513_v40 = vmul.f32 0.0, %v7374_v23 }
0x12fb   :  { %v7378_v38 = vpop.eup %7377 }
0x12fc   :  { %v1219_v39 = vadd.f32 1.0, %v7378_v38  ;;  %v1361_v38 = vpop.f32.mrf.mxu0 }
0x12fe   :  { %7379 = vrcp.f32 %v1219_v39  ;;  %v1363_v39 = vpop.f32.mrf.mxu0 }
0x130b   :  { %v7380_v32 = vpop.eup %7379 }
0x130c   :  { %v1226_v57 = vmul.f32 %v7380_v32, %v8451_v21 }
0x135b   :  { %v1516_v33 = vpop.permute.xlu1 %1515 }
0x135c   :  { %v1518_v34 = vmul.f32 %v7374_v23, %v1516_v33 }
0x135e   :  { %1520 = vrot.lane.b32.xlu0 %v1518_v34, %s8018_s19 }
0x1362   :  { %1228 = vrot.lane.b32.xlu0 %v7376_v35, %s8018_s19 }
0x13d0   :  { %v1521_v41 = vpop.permute.xlu0 %1520 }
0x13d1   :  { %v8507_v42 = vadd.f32 %v1521_v41, %v1513_v40  ;;  %v1365_v40 = vpop.f32.mrf.mxu0 }
0x13d3   :  { %7381 = vtanh.f32 %v8507_v42  ;;  %v1367_v41 = vpop.f32.mrf.mxu0 }
0x13d4   :  { %v1229_v43 = vpop.permute.xlu0 %1228  ;;  %7383 = vpow2.f32 %v6549_v31 }
0x13d5   :  { %v1231_v53 = vmul.f32 %v7380_v32, %v1229_v43 }
0x13d7   :  { %1233 = vrot.lane.b32.xlu0 %v1231_v53, %s8018_s19 }
0x13e0   :  { %v7382_v54 = vpop.eup %7381 }
0x13e1   :  { %1526 = vrot.lane.b32.xlu1 %v7382_v54, %s8018_s19  ;;  %v7384_v55 = vpop.eup %7383 }
0x13e2   :  { %v1507_v56 = vadd.f32 1.0, %v7384_v55 }
0x13e4   :  { %7385 = vrcp.f32 %v1507_v56 }
0x13f1   :  { %v7386_v60 = vpop.eup %7385 }
0x1449   :  { %v1234_v58 = vpop.permute.xlu0 %1233 }
0x144a   :  { %v1236_v59 = vadd.f32 %v1234_v58, %v1226_v57 }
0x144c   :  { %7387 = vtanh.f32 %v1236_v59 }
0x144d   :  { %7389 = vpow2.f32 %v6519_v25 }
0x1453   :  { %v1527_v26 = vpop.permute.xlu1 %1526 }
0x1454   :  { %v1529_v22 = vmul.f32 %v7386_v60, %v1527_v26 }
0x1456   :  { %1530 = vst.msk [vmem:[#allocation2] sm:$0xff] %vm387_vm3, %v1529_v22  ;;  %v1533_v61 = vpack.c.bf16 %v1529_v22, %v1529_v22 }
0x1458   :  { %6550 = vmatmul.mubr.msk.bf16.vlgmr.msra.gmra.mxu1 %vm387_vm3, %v1533_v61 }
0x1459   :  { %v7388_v62 = vpop.eup %7387  ;;  %1706 = vmatpush1.bf16.msra.mxu1 %v8456_v29  ;;  %1729 = vmatprep.mubr.bf16.mxu1 %v8024_v45 }
0x145a   :  { %1239 = vrot.lane.b32.xlu0 %v7388_v62, %s8018_s19  ;;  %1707 = vmatprep.subr.bf16.mxu1 %v8461_v1  ;;  %v7390_v30 = vpop.eup %7389 }
0x145b   :  { %v1220_v63 = vadd.f32 1.0, %v7390_v30 }
0x145d   :  { %1708 = vmatpush1.bf16.msra.mxu1 %v8463_v2  ;;  %7391 = vrcp.f32 %v1220_v63 }
0x145e   :  { %1709 = vmatprep.subr.bf16.mxu1 %v8467_v3 }
0x1461   :  { %1710 = vmatpush1.bf16.msra.mxu1 %v8469_v4 }
0x1462   :  { %1711 = vmatprep.subr.bf16.mxu1 %v8474_v6 }
0x1465   :  { %1712 = vmatpush1.bf16.msra.mxu1 %v8476_v46 }
0x1466   :  { %1865 = vmatprep.subr.bf16.mxu1 %v8454_v0 }
0x146a   :  { %v7392_v21 = vpop.eup %7391 }
0x14cc   :  { %v1240_v5 = vpop.permute.xlu0 %1239 }
0x14cd   :  { %v1242_v7 = vmul.f32 %v7392_v21, %v1240_v5 }
0x14cf   :  { %1243 = vst.msk [vmem:[#allocation2 + $0x38] sm:$0xff] %vm387_vm3, %v1242_v7 }
0x14d6   :  { %v1251_v48 = vld [vmem:[#allocation2 + $0x38] sm:$0xff] }
0x14d7   :  { %v1264_v49 = vpack.c.bf16 %v1251_v48, %v1250_v47 }
0x14d9   :  { %6539 = vmatmul.mubr.msk.bf16.gmra.mxu0 %vm387_vm3, %v1264_v49 }
0x14da   :  { %1649 = vmatprep.mubr.bf16.mxu0 %v8024_v45 }
0x1518   :  { %v1571_v51 = vpop.f32.mrf.mxu1 }
0x1519   :  { %v1578_v11 = vadd.f32 %v1571_v51, %v1355_v50 }
0x151a   :  { %v1573_v52 = vpop.f32.mrf.mxu1 }
0x151b   :  { %v1579_v9 = vadd.f32 %v1573_v52, %v1357_v8  ;;  %v6551_v12 = vmul.f32 -1.442695, %v1578_v11 }
0x151c   :  { %v1575_v28 = vpop.f32.mrf.mxu1 }
0x151d   :  { %7393 = vtanh.f32 %v1579_v9  ;;  %v6552_v19 = vmul.f32 -1.442695, %v1579_v9 }
0x151e   :  { %v1576_v10 = vpop.f32.mrf.mxu1  ;;  %7395 = vpow2.f32 %v6551_v12 }
0x152a   :  { %v7394_v27 = vpop.eup %7393 }
0x152b   :  { %1595 = vrot.lane.b32.xlu1 %v7394_v27, %s8018_s19  ;;  %v7396_v13 = vpop.eup %7395 }
0x152c   :  { %v1586_v14 = vadd.f32 1.0, %v7396_v13 }
0x152e   :  { %7397 = vrcp.f32 %v1586_v14 }
0x153b   :  { %v7398_v15 = vpop.eup %7397 }
0x153c   :  { %v1593_v17 = vmul.f32 %v7398_v15, %v8507_v42  ;;  %v8543_v42 = vpop.f32.mrf.mxu0 }
0x153e   :  { %v8545_v32 = vpop.f32.mrf.mxu0 }
0x1540   :  { %v8547_v43 = vpop.f32.mrf.mxu0 }
0x1542   :  { %v8549_v53 = vpop.f32.mrf.mxu0 }
0x1599   :  { %v8551_v54 = vpop.f32.mrf.mxu0 }
0x159b   :  { %v8553_v31 = vpop.f32.mrf.mxu0 }
0x159d   :  { %v1596_v16 = vpop.permute.xlu1 %1595  ;;  %v8555_v55 = vpop.f32.mrf.mxu0 }
0x159e   :  { %v1598_v44 = vmul.f32 %v7398_v15, %v1596_v16 }
0x159f   :  { %v8557_v56 = vpop.f32.mrf.mxu0 }
0x15a0   :  { %1600 = vrot.lane.b32.xlu1 %v1598_v44, %s8018_s19 }
0x1612   :  { %v1601_v24 = vpop.permute.xlu1 %1600 }
0x1613   :  { %v1603_v18 = vadd.f32 %v1601_v24, %v1593_v17 }
0x1615   :  { %7399 = vtanh.f32 %v1603_v18 }
0x1616   :  { %7401 = vpow2.f32 %v6552_v19 }
0x1622   :  { %v7400_v20 = vpop.eup %7399 }
0x1623   :  { %1606 = vrot.lane.b32.xlu1 %v7400_v20, %s8018_s19  ;;  %v7402_v23 = vpop.eup %7401 }
0x1624   :  { %v1587_v33 = vadd.f32 1.0, %v7402_v23 }
0x1626   :  { %7403 = vrcp.f32 %v1587_v33 }
0x1633   :  { %v7404_v34 = vpop.eup %7403 }
0x1695   :  { %v1607_v35 = vpop.permute.xlu1 %1606 }
0x1696   :  { %v1609_v36 = vmul.f32 %v7404_v34, %v1607_v35 }
0x1698   :  { %1610 = vst.msk [vmem:[#allocation2 + $0x8] sm:$0xff] %vm387_vm3, %v1609_v36  ;;  %v1613_v37 = vpack.c.bf16 %v1609_v36, %v1609_v36 }
0x169a   :  { %6553 = vmatmul.mubr.msk.bf16.vlgmr.msra.gmra.mxu0 %vm387_vm3, %v1613_v37 }
0x169b   :  { %1786 = vmatpush1.bf16.msra.mxu0 %v8456_v29  ;;  %1809 = vmatprep.mubr.bf16.mxu0 %v8024_v45 }
0x169c   :  { %1787 = vmatprep.subr.bf16.mxu0 %v8461_v1 }
0x169f   :  { %1788 = vmatpush1.bf16.msra.mxu0 %v8463_v2 }
0x16a0   :  { %1789 = vmatprep.subr.bf16.mxu0 %v8467_v3 }
0x16a3   :  { %1790 = vmatpush1.bf16.msra.mxu0 %v8469_v4 }
0x16a4   :  { %1791 = vmatprep.subr.bf16.mxu0 %v8474_v6 }
0x16a7   :  { %1792 = vmatpush1.bf16.msra.mxu0 %v8476_v46 }
0x16a8   :  { %1945 = vmatprep.subr.bf16.mxu0 %v8454_v0 }
0x175a   :  { %v1651_v57 = vpop.f32.mrf.mxu0 }
0x175b   :  { %v1658_v61 = vadd.f32 %v1651_v57, %v1361_v38 }
0x175c   :  { %v1653_v58 = vpop.f32.mrf.mxu0 }
0x175d   :  { %v1659_v59 = vadd.f32 %v1653_v58, %v1363_v39  ;;  %v6554_v62 = vmul.f32 -1.442695, %v1658_v61 }
0x175e   :  { %v1655_v60 = vpop.f32.mrf.mxu0 }
0x175f   :  { %7405 = vtanh.f32 %v1659_v59  ;;  %v6555_v50 = vmul.f32 -1.442695, %v1659_v59 }
0x1760   :  { %v1656_v26 = vpop.f32.mrf.mxu0  ;;  %7407 = vpow2.f32 %v6554_v62 }
0x176c   :  { %v7406_v22 = vpop.eup %7405 }
0x176d   :  { %1675 = vrot.lane.b32.xlu0 %v7406_v22, %s8018_s19  ;;  %v7408_v25 = vpop.eup %7407 }
0x176e   :  { %v1666_v30 = vadd.f32 1.0, %v7408_v25 }
0x1770   :  { %7409 = vrcp.f32 %v1666_v30 }
0x177d   :  { %v7410_v63 = vpop.eup %7409 }
0x177e   :  { %v1673_v7 = vmul.f32 %v7410_v63, %v1603_v18 }
0x17df   :  { %v1676_v21 = vpop.permute.xlu0 %1675 }
0x17e0   :  { %v1678_v5 = vmul.f32 %v7410_v63, %v1676_v21 }
0x17e2   :  { %1680 = vrot.lane.b32.xlu1 %v1678_v5, %s8018_s19 }
0x1854   :  { %v1681_v47 = vpop.permute.xlu1 %1680 }
0x1855   :  { %v1683_v48 = vadd.f32 %v1681_v47, %v1673_v7 }
0x1857   :  { %7411 = vtanh.f32 %v1683_v48 }
0x1858   :  { %7413 = vpow2.f32 %v6555_v50 }
0x1864   :  { %v7412_v49 = vpop.eup %7411 }
0x1865   :  { %1686 = vrot.lane.b32.xlu0 %v7412_v49, %s8018_s19  ;;  %v7414_v51 = vpop.eup %7413 }
0x1866   :  { %v1667_v8 = vadd.f32 1.0, %v7414_v51 }
0x1868   :  { %7415 = vrcp.f32 %v1667_v8 }
0x1875   :  { %v7416_v52 = vpop.eup %7415 }
0x18d7   :  { %v1687_v9 = vpop.permute.xlu0 %1686 }
0x18d8   :  { %v1689_v28 = vmul.f32 %v7416_v52, %v1687_v9 }
0x18da   :  { %1690 = vst.msk [vmem:[#allocation2 + $0x10] sm:$0xff] %vm387_vm3, %v1689_v28  ;;  %v1693_v10 = vpack.c.bf16 %v1689_v28, %v1689_v28 }
0x18dc   :  { %6556 = vmatmul.mubr.msk.bf16.vlgmr.msra.gmra.mxu1 %vm387_vm3, %v1693_v10 }
0x18dd   :  { %1866 = vmatpush1.bf16.msra.mxu1 %v8456_v29  ;;  %1889 = vmatprep.mubr.bf16.mxu1 %v8024_v45 }
0x18de   :  { %1867 = vmatprep.subr.bf16.mxu1 %v8461_v1 }
0x18e1   :  { %1868 = vmatpush1.bf16.msra.mxu1 %v8463_v2 }
0x18e2   :  { %1869 = vmatprep.subr.bf16.mxu1 %v8467_v3 }
0x18e5   :  { %1870 = vmatpush1.bf16.msra.mxu1 %v8469_v4 }
0x18e6   :  { %1871 = vmatprep.subr.bf16.mxu1 %v8474_v6 }
0x18e9   :  { %1872 = vmatpush1.bf16.msra.mxu1 %v8476_v46 }
0x18ea   :  { %2025 = vmatprep.subr.bf16.mxu1 %v8454_v0 }
0x199c   :  { %v1731_v27 = vpop.f32.mrf.mxu1 }
0x199d   :  { %v1738_v16 = vadd.f32 %v1731_v27, %v1365_v40 }
0x199e   :  { %v1733_v11 = vpop.f32.mrf.mxu1 }
0x199f   :  { %v1739_v12 = vadd.f32 %v1733_v11, %v1367_v41  ;;  %v6557_v44 = vmul.f32 -1.442695, %v1738_v16 }
0x19a0   :  { %v1735_v13 = vpop.f32.mrf.mxu1 }
0x19a1   :  { %7417 = vtanh.f32 %v1739_v12  ;;  %v6558_v35 = vmul.f32 -1.442695, %v1739_v12 }
0x19a2   :  { %v1736_v14 = vpop.f32.mrf.mxu1  ;;  %7419 = vpow2.f32 %v6557_v44 }
0x19ae   :  { %v7418_v15 = vpop.eup %7417 }
0x19af   :  { %1755 = vrot.lane.b32.xlu1 %v7418_v15, %s8018_s19  ;;  %v7420_v17 = vpop.eup %7419 }
0x19b0   :  { %v1746_v24 = vadd.f32 1.0, %v7420_v17 }
0x19b2   :  { %7421 = vrcp.f32 %v1746_v24 }
0x19bf   :  { %v7422_v18 = vpop.eup %7421 }
0x19c0   :  { %v1753_v0 = vmul.f32 %v7422_v18, %v1683_v48 }
0x1a21   :  { %v1756_v20 = vpop.permute.xlu1 %1755 }
0x1a22   :  { %v1758_v19 = vmul.f32 %v7422_v18, %v1756_v20 }
0x1a24   :  { %1760 = vrot.lane.b32.xlu0 %v1758_v19, %s8018_s19 }
0x1a96   :  { %v1761_v23 = vpop.permute.xlu0 %1760 }
0x1a97   :  { %v1763_v33 = vadd.f32 %v1761_v23, %v1753_v0  ;;  %v7158_v0 = vld [vmem:[%s9644_s3 + $0xb0] ss:$8 sps:$4 sm:$0xff]  }
0x1a99   :  { %7423 = vtanh.f32 %v1763_v33 }
0x1a9a   :  { %7425 = vpow2.f32 %v6558_v35  ;;  %v7166_v35 = vld [vmem:[%s9644_s3 + $0x94] ss:$8 sps:$4 sm:$0xff]  }
0x1aa6   :  { %v7424_v34 = vpop.eup %7423 }
0x1aa7   :  { %1766 = vrot.lane.b32.xlu1 %v7424_v34, %s8018_s19  ;;  %v7426_v36 = vpop.eup %7425  ;;  %v7161_v34 = vld [vmem:[%s9644_s3 + $0xa0] ss:$8 sps:$4 sm:$0xff]  }
0x1aa8   :  { %v1747_v37 = vadd.f32 1.0, %v7426_v36  ;;  %v7164_v36 = vld [vmem:[%s9644_s3 + $0x90] ss:$8 sps:$4 sm:$0xff]  }
0x1aaa   :  { %7427 = vrcp.f32 %v1747_v37  ;;  %v7169_v37 = vld [vmem:[%s9644_s3 + $0x84] ss:$8 sps:$4 sm:$0xff]  }
0x1ab7   :  { %v7428_v38 = vpop.eup %7427 }
0x1b19   :  { %v1767_v39 = vpop.permute.xlu1 %1766 }
0x1b1a   :  { %v1769_v40 = vmul.f32 %v7428_v38, %v1767_v39  ;;  %v7167_v38 = vld [vmem:[%s9644_s3 + $0x80] ss:$8 sps:$4 sm:$0xff]  }
0x1b1b   :  { %v2092_v39 = vld [vmem:[#allocation2 + $0x8] sm:$0xff] }
0x1b1c   :  { %1770 = vst.msk [vmem:[#allocation2 + $0x18] sm:$0xff] %vm387_vm3, %v1769_v40  ;;  %v1773_v41 = vpack.c.bf16 %v1769_v40, %v1769_v40  ;;  %v2091_v40 = vld [vmem:[#allocation2] sm:$0xff] }
0x1b1e   :  { %6559 = vmatmul.mubr.msk.bf16.vlgmr.msra.gmra.mxu0 %vm387_vm3, %v1773_v41  ;;  %v2108_v41 = vpack.c.bf16 %v2092_v39, %v2091_v40 }
0x1b1f   :  { %1946 = vmatpush1.bf16.msra.mxu0 %v8456_v29  ;;  %1969 = vmatprep.mubr.bf16.mxu0 %v8024_v45 }
0x1b20   :  { %1947 = vmatprep.subr.bf16.mxu0 %v8461_v1 }
0x1b23   :  { %1948 = vmatpush1.bf16.msra.mxu0 %v8463_v2 }
0x1b24   :  { %1949 = vmatprep.subr.bf16.mxu0 %v8467_v3 }
0x1b27   :  { %1950 = vmatpush1.bf16.msra.mxu0 %v8469_v4 }
0x1b28   :  { %1951 = vmatprep.subr.bf16.mxu0 %v8474_v6 }
0x1b2b   :  { %1952 = vmatpush1.bf16.msra.mxu0 %v8476_v46 }
0x1bde   :  { %v1811_v57 = vpop.f32.mrf.mxu0 }
0x1bdf   :  { %v1818_v61 = vadd.f32 %v1811_v57, %v8543_v42  ;;  %v2094_v57 = vld [vmem:[#allocation2 + $0x18] sm:$0xff] }
0x1be0   :  { %v1813_v58 = vpop.f32.mrf.mxu0 }
0x1be1   :  { %v1819_v59 = vadd.f32 %v1813_v58, %v8545_v32  ;;  %v6560_v62 = vmul.f32 -1.442695, %v1818_v61  ;;  %v2093_v58 = vld [vmem:[#allocation2 + $0x10] sm:$0xff] }
0x1be2   :  { %v1815_v60 = vpop.f32.mrf.mxu0 }
0x1be3   :  { %7429 = vtanh.f32 %v1819_v59  ;;  %v6561_v49 = vmul.f32 -1.442695, %v1819_v59  ;;  %v2109_v59 = vpack.c.bf16 %v2094_v57, %v2093_v58 }
0x1be4   :  { %v1816_v26 = vpop.f32.mrf.mxu0  ;;  %7431 = vpow2.f32 %v6560_v62 }
0x1bf0   :  { %v7430_v22 = vpop.eup %7429 }
0x1bf1   :  { %1835 = vrot.lane.b32.xlu0 %v7430_v22, %s8018_s19  ;;  %v7432_v25 = vpop.eup %7431 }
0x1bf2   :  { %v1826_v30 = vadd.f32 1.0, %v7432_v25 }
0x1bf4   :  { %7433 = vrcp.f32 %v1826_v30 }
0x1c01   :  { %v7434_v63 = vpop.eup %7433 }
0x1c02   :  { %v1833_v7 = vmul.f32 %v7434_v63, %v1763_v33  ;;  %v7163_v33 = vld [vmem:[%s9644_s3 + $0xa4] ss:$8 sps:$4 sm:$0xff]  }
0x1c63   :  { %v1836_v21 = vpop.permute.xlu0 %1835 }
0x1c64   :  { %v1838_v5 = vmul.f32 %v7434_v63, %v1836_v21 }
0x1c66   :  { %1840 = vrot.lane.b32.xlu1 %v1838_v5, %s8018_s19 }
0x1cd8   :  { %v1841_v32 = vpop.permute.xlu1 %1840 }
0x1cd9   :  { %v1843_v47 = vadd.f32 %v1841_v32, %v1833_v7 }
0x1cdb   :  { %7435 = vtanh.f32 %v1843_v47 }
0x1cdc   :  { %7437 = vpow2.f32 %v6561_v49 }
0x1ce8   :  { %v7436_v48 = vpop.eup %7435 }
0x1ce9   :  { %1846 = vrot.lane.b32.xlu0 %v7436_v48, %s8018_s19  ;;  %v7438_v42 = vpop.eup %7437 }
0x1cea   :  { %v1827_v50 = vadd.f32 1.0, %v7438_v42 }
0x1cec   :  { %7439 = vrcp.f32 %v1827_v50 }
0x1cf9   :  { %v7440_v51 = vpop.eup %7439 }
0x1d5b   :  { %v1847_v8 = vpop.permute.xlu0 %1846 }
0x1d5c   :  { %v1849_v52 = vmul.f32 %v7440_v51, %v1847_v8  ;;  %v8650_v8 = vld [vmem:[#allocation5 + $0xb4] ss:$8 sps:$4 sm:$0xff]  }
0x1d5e   :  { %1850 = vst.msk [vmem:[#allocation2 + $0x20] sm:$0xff] %vm387_vm3, %v1849_v52  ;;  %v1853_v9 = vpack.c.bf16 %v1849_v52, %v1849_v52  ;;  %v8657_v52 = vld [vmem:[#allocation5 + $0xa4] ss:$8 sps:$4 sm:$0xff]  }
0x1d60   :  { %6562 = vmatmul.mubr.msk.bf16.vlgmr.msra.gmra.mxu1 %vm387_vm3, %v1853_v9  ;;  %v8659_v9 = vld [vmem:[#allocation5 + $0xa0] ss:$8 sps:$4 sm:$0xff]  }
0x1d61   :  { %2026 = vmatpush1.bf16.msra.mxu1 %v8456_v29  ;;  %2049 = vmatprep.mubr.bf16.mxu1 %v8024_v45 }
0x1d62   :  { %2027 = vmatprep.subr.bf16.mxu1 %v8461_v1 }
0x1d65   :  { %2028 = vmatpush1.bf16.msra.mxu1 %v8463_v2  ;;  %v2095_v26 = vld [vmem:[#allocation2 + $0x20] sm:$0xff] }
0x1d66   :  { %2029 = vmatprep.subr.bf16.mxu1 %v8467_v3 }
0x1d69   :  { %2030 = vmatpush1.bf16.msra.mxu1 %v8469_v4 }
0x1d6a   :  { %2031 = vmatprep.subr.bf16.mxu1 %v8474_v6 }
0x1d6d   :  { %2032 = vmatpush1.bf16.msra.mxu1 %v8476_v46 }
0x1d6e   :  { %2312 = vmatprep.subr.bf16.mxu1 %v8650_v8 }
0x1e20   :  { %v1891_v28 = vpop.f32.mrf.mxu1 }
0x1e21   :  { %v1898_v1 = vadd.f32 %v1891_v28, %v8547_v43  ;;  %v7160_v43 = vld [vmem:[%s9644_s3 + $0xb4] ss:$8 sps:$4 sm:$0xff]  }
0x1e22   :  { %v1893_v10 = vpop.f32.mrf.mxu1  ;;  %2172 = vmatprep.subr.bf16.mxu0 %v7160_v43  ;;  %v8663_v28 = vld [vmem:[#allocation5 + $0x94] ss:$8 sps:$4 sm:$0xff]  }
0x1e23   :  { %v1899_v27 = vadd.f32 %v1893_v10, %v8549_v53  ;;  %v6563_v2 = vmul.f32 -1.442695, %v1898_v1  ;;  %v8665_v10 = vld [vmem:[#allocation5 + $0x90] ss:$8 sps:$4 sm:$0xff]  }
0x1e24   :  { %v1895_v11 = vpop.f32.mrf.mxu1 }
0x1e25   :  { %7441 = vtanh.f32 %v1899_v27  ;;  %v6564_v44 = vmul.f32 -1.442695, %v1899_v27  ;;  %v8670_v11 = vld [vmem:[#allocation5 + $0x84] ss:$8 sps:$4 sm:$0xff]  }
0x1e26   :  { %v1896_v29 = vpop.f32.mrf.mxu1  ;;  %7443 = vpow2.f32 %v6563_v2 }
0x1e27   :  { %v8672_v29 = vld [vmem:[#allocation5 + $0x80] ss:$8 sps:$4 sm:$0xff]  }
0x1e32   :  { %v7442_v12 = vpop.eup %7441 }
0x1e33   :  { %1915 = vrot.lane.b32.xlu1 %v7442_v12, %s8018_s19  ;;  %v7444_v3 = vpop.eup %7443 }
0x1e34   :  { %v1906_v4 = vadd.f32 1.0, %v7444_v3 }
0x1e36   :  { %7445 = vrcp.f32 %v1906_v4 }
0x1e43   :  { %v7446_v6 = vpop.eup %7445 }
0x1e44   :  { %v1913_v14 = vmul.f32 %v7446_v6, %v1843_v47 }
0x1ea5   :  { %v1916_v13 = vpop.permute.xlu1 %1915 }
0x1ea6   :  { %v1918_v46 = vmul.f32 %v7446_v6, %v1916_v13 }
0x1ea8   :  { %1920 = vrot.lane.b32.xlu0 %v1918_v46, %s8018_s19 }
0x1f1a   :  { %v1921_v53 = vpop.permute.xlu0 %1920 }
0x1f1b   :  { %v8605_v15 = vadd.f32 %v1921_v53, %v1913_v14 }
0x1f1d   :  { %7447 = vtanh.f32 %v8605_v15 }
0x1f1e   :  { %7449 = vpow2.f32 %v6564_v44 }
0x1f2a   :  { %v7448_v16 = vpop.eup %7447 }
0x1f2b   :  { %1926 = vrot.lane.b32.xlu1 %v7448_v16, %s8018_s19  ;;  %v7450_v17 = vpop.eup %7449 }
0x1f2c   :  { %v1907_v24 = vadd.f32 1.0, %v7450_v17 }
0x1f2e   :  { %7451 = vrcp.f32 %v1907_v24 }
0x1f3b   :  { %v7452_v18 = vpop.eup %7451 }
0x1f9d   :  { %v1927_v20 = vpop.permute.xlu1 %1926 }
0x1f9e   :  { %v1929_v19 = vmul.f32 %v7452_v18, %v1927_v20 }
0x1fa0   :  { %1930 = vst.msk [vmem:[#allocation2 + $0x28] sm:$0xff] %vm387_vm3, %v1929_v19  ;;  %v1933_v23 = vpack.c.bf16 %v1929_v19, %v1929_v19 }
0x1fa2   :  { %6565 = vmatmul.mubr.msk.bf16.vlgmr.msra.gmra.mxu0 %vm387_vm3, %v1933_v23 }
0x1fa3   :  { %2173 = vmatpush1.bf16.msra.mxu0 %v7158_v0  ;;  %2196 = vmatprep.mubr.bf16.mxu0 %v8024_v45 }
0x1fa4   :  { %2174 = vmatprep.subr.bf16.mxu0 %v7163_v33 }
0x1fa7   :  { %2175 = vmatpush1.bf16.msra.mxu0 %v7161_v34  ;;  %v2096_v60 = vld [vmem:[#allocation2 + $0x28] sm:$0xff] }
0x1fa8   :  { %2176 = vmatprep.subr.bf16.mxu0 %v7166_v35  ;;  %v2110_v22 = vpack.c.bf16 %v2096_v60, %v2095_v26 }
0x1fab   :  { %2177 = vmatpush1.bf16.msra.mxu0 %v7164_v36 }
0x1fac   :  { %2178 = vmatprep.subr.bf16.mxu0 %v7169_v37 }
0x1faf   :  { %2179 = vmatpush1.bf16.msra.mxu0 %v7167_v38 }
0x1fb0   :  { %2472 = vmatprep.subr.bf16.mxu0 %v8650_v8 }
0x1fb2   :  { %6587 = vmatmul.mubr.msk.bf16.vlgmr.msra.gmra.mxu0 %vm387_vm3, %v2108_v41 }
0x1fb3   :  { %2206 = vmatprep.mubr.bf16.mxu0 %v8024_v45 }
0x1fba   :  { %6588 = vmatmul.mubr.msk.bf16.gmra.mxu0 %vm387_vm3, %v2109_v59 }
0x1fbb   :  { %2216 = vmatprep.mubr.bf16.mxu0 %v8024_v45 }
0x1fc2   :  { %6589 = vmatmul.mubr.msk.bf16.gmra.mxu0 %vm387_vm3, %v2110_v22 }
0x1fc3   :  { %2226 = vmatprep.mubr.bf16.mxu0 %v8024_v45 }
0x2062   :  { %v1971_v61 = vpop.f32.mrf.mxu0 }
0x2063   :  { %v1978_v5 = vadd.f32 %v1971_v61, %v8551_v54  ;;  %v8652_v54 = vld [vmem:[#allocation5 + $0xb0] ss:$8 sps:$4 sm:$0xff]  }
0x2064   :  { %v1973_v62 = vpop.f32.mrf.mxu0  ;;  %2473 = vmatpush1.bf16.msra.mxu0 %v8652_v54 }
0x2065   :  { %v1979_v25 = vadd.f32 %v1973_v62, %v8553_v31  ;;  %v6566_v7 = vmul.f32 -1.442695, %v1978_v5  ;;  %2474 = vmatprep.subr.bf16.mxu0 %v8657_v52 }
0x2066   :  { %v1975_v30 = vpop.f32.mrf.mxu0 }
0x2067   :  { %7453 = vtanh.f32 %v1979_v25  ;;  %v6567_v12 = vmul.f32 -1.442695, %v1979_v25 }
0x2068   :  { %v1976_v63 = vpop.f32.mrf.mxu0  ;;  %7455 = vpow2.f32 %v6566_v7  ;;  %2475 = vmatpush1.bf16.msra.mxu0 %v8659_v9 }
0x2069   :  { %2476 = vmatprep.subr.bf16.mxu0 %v8663_v28 }
0x206c   :  { %2477 = vmatpush1.bf16.msra.mxu0 %v8665_v10 }
0x206d   :  { %2478 = vmatprep.subr.bf16.mxu0 %v8670_v11 }
0x2070   :  { %2479 = vmatpush1.bf16.msra.mxu0 %v8672_v29 }
0x2071   :  { %2632 = vmatprep.subr.bf16.mxu0 %v8650_v8 }
0x2072   :  { %v2198_v43 = vpop.f32.mrf.mxu0 }
0x2074   :  { %v7454_v21 = vpop.eup %7453  ;;  %v2200_v17 = vpop.f32.mrf.mxu0 }
0x2075   :  { %1995 = vrot.lane.b32.xlu0 %v7454_v21, %s8018_s19  ;;  %v7456_v32 = vpop.eup %7455 }
0x2076   :  { %v1986_v47 = vadd.f32 1.0, %v7456_v32 }
0x2078   :  { %7457 = vrcp.f32 %v1986_v47 }
0x2085   :  { %v7458_v48 = vpop.eup %7457 }
0x2086   :  { %v1993_v31 = vmul.f32 %v7458_v48, %v8605_v15 }
0x20e7   :  { %v1996_v49 = vpop.permute.xlu0 %1995 }
0x20e8   :  { %v1998_v42 = vmul.f32 %v7458_v48, %v1996_v49 }
0x20ea   :  { %2000 = vrot.lane.b32.xlu1 %v1998_v42, %s8018_s19 }
0x215c   :  { %v2001_v50 = vpop.permute.xlu1 %2000 }
0x215d   :  { %v8647_v51 = vadd.f32 %v2001_v50, %v1993_v31 }
0x215f   :  { %7459 = vtanh.f32 %v8647_v51 }
0x2160   :  { %7461 = vpow2.f32 %v6567_v12 }
0x216c   :  { %v7460_v27 = vpop.eup %7459 }
0x216d   :  { %2006 = vrot.lane.b32.xlu0 %v7460_v27, %s8018_s19  ;;  %v7462_v1 = vpop.eup %7461 }
0x216e   :  { %v1987_v2 = vadd.f32 1.0, %v7462_v1 }
0x2170   :  { %7463 = vrcp.f32 %v1987_v2 }
0x217d   :  { %v7464_v3 = vpop.eup %7463 }
0x21df   :  { %v2007_v4 = vpop.permute.xlu0 %2006 }
0x21e0   :  { %v2009_v6 = vmul.f32 %v7464_v3, %v2007_v4  ;;  %v2202_v4 = vpop.f32.mrf.mxu0 }
0x21e2   :  { %2010 = vst.msk [vmem:[#allocation2 + $0x30] sm:$0xff] %vm387_vm3, %v2009_v6  ;;  %v2013_v13 = vpack.c.bf16 %v2009_v6, %v2009_v6 }
0x21e4   :  { %6568 = vmatmul.mubr.msk.bf16.vlgmr.msra.gmra.mxu1 %vm387_vm3, %v2013_v13  ;;  %v2204_v13 = vpop.f32.mrf.mxu0 }
0x21e5   :  { %2313 = vmatpush1.bf16.msra.mxu1 %v8652_v54  ;;  %2336 = vmatprep.mubr.bf16.mxu1 %v8024_v45 }
0x21e6   :  { %2314 = vmatprep.subr.bf16.mxu1 %v8657_v52 }
0x21e9   :  { %2315 = vmatpush1.bf16.msra.mxu1 %v8659_v9  ;;  %v2097_v1 = vld [vmem:[#allocation2 + $0x30] sm:$0xff] }
0x21ea   :  { %2316 = vmatprep.subr.bf16.mxu1 %v8663_v28 }
0x21ed   :  { %2317 = vmatpush1.bf16.msra.mxu1 %v8665_v10 }
0x21ee   :  { %2318 = vmatprep.subr.bf16.mxu1 %v8670_v11 }
0x21f1   :  { %2319 = vmatpush1.bf16.msra.mxu1 %v8672_v29 }
0x21f2   :  { %2392 = vmatprep.subr.bf16.mxu1 %v8650_v8 }
0x21f4   :  { %2337 = vmatmul.mubr.bf16.vlgmr.msra.gmra.mxu1 %v8024_v45 }
0x21f5   :  { %2393 = vmatpush1.bf16.msra.mxu1 %v8652_v54  ;;  %2416 = vmatprep.mubr.bf16.mxu1 %v8024_v45 }
0x21f6   :  { %2394 = vmatprep.subr.bf16.mxu1 %v8657_v52 }
0x21f9   :  { %2395 = vmatpush1.bf16.msra.mxu1 %v8659_v9 }
0x21fa   :  { %2396 = vmatprep.subr.bf16.mxu1 %v8663_v28 }
0x21fd   :  { %2397 = vmatpush1.bf16.msra.mxu1 %v8665_v10 }
0x21fe   :  { %2398 = vmatprep.subr.bf16.mxu1 %v8670_v11 }
0x2201   :  { %2399 = vmatpush1.bf16.msra.mxu1 %v8672_v29 }
0x2202   :  { %2552 = vmatprep.subr.bf16.mxu1 %v8650_v8 }
0x22a4   :  { %v2051_v46 = vpop.f32.mrf.mxu1 }
0x22a5   :  { %v2058_v40 = vadd.f32 %v2051_v46, %v8555_v55 }
0x22a6   :  { %v2053_v14 = vpop.f32.mrf.mxu1 }
0x22a7   :  { %v2059_v35 = vadd.f32 %v2053_v14, %v8557_v56  ;;  %v6569_v41 = vmul.f32 -1.442695, %v2058_v40 }
0x22a8   :  { %v2055_v53 = vpop.f32.mrf.mxu1 }
0x22a9   :  { %v6570_v42 = vmul.f32 -1.442695, %v2059_v35 }
0x22aa   :  { %v2056_v15 = vpop.f32.mrf.mxu1 }
0x22b4   :  { %v2338_v16 = vpop.f32.mrf.mxu1 }
0x22b5   :  { %v2345_v0 = vadd.f32 %v2338_v16, %v2198_v43 }
0x22b6   :  { %v2340_v44 = vpop.f32.mrf.mxu1 }
0x22b7   :  { %v2346_v18 = vadd.f32 %v2340_v44, %v2200_v17  ;;  %v6599_v23 = vmul.f32 -1.442695, %v2345_v0 }
0x22b8   :  { %v2342_v24 = vpop.f32.mrf.mxu1 }
0x22b9   :  { %7465 = vtanh.f32 %v2346_v18  ;;  %v6600_v55 = vmul.f32 -1.442695, %v2346_v18 }
0x22ba   :  { %v2343_v20 = vpop.f32.mrf.mxu1  ;;  %7467 = vpow2.f32 %v6599_v23 }
0x22c6   :  { %v7466_v19 = vpop.eup %7465 }
0x22c7   :  { %2362 = vrot.lane.b32.xlu1 %v7466_v19, %s8018_s19  ;;  %v7468_v33 = vpop.eup %7467 }
0x22c8   :  { %v2353_v34 = vadd.f32 1.0, %v7468_v33 }
0x22ca   :  { %7469 = vrcp.f32 %v2353_v34 }
0x22cb   :  { %7471 = vtanh.f32 %v2059_v35 }
0x22cc   :  { %7473 = vpow2.f32 %v6569_v41 }
0x22d7   :  { %v7470_v36 = vpop.eup %7469 }
0x22d8   :  { %v7472_v39 = vpop.eup %7471  ;;  %v2360_v59 = vmul.f32 0.0, %v7470_v36 }
0x22d9   :  { %v7474_v57 = vpop.eup %7473 }
0x22da   :  { %v2066_v58 = vadd.f32 1.0, %v7474_v57  ;;  %v2208_v57 = vpop.f32.mrf.mxu0 }
0x22dc   :  { %7475 = vrcp.f32 %v2066_v58  ;;  %v2210_v58 = vpop.f32.mrf.mxu0 }
0x22e9   :  { %v7476_v56 = vpop.eup %7475 }
0x22ea   :  { %v2073_v63 = vmul.f32 %v7476_v56, %v8647_v51 }
0x2339   :  { %v2363_v37 = vpop.permute.xlu1 %2362 }
0x233a   :  { %v2365_v38 = vmul.f32 %v7470_v36, %v2363_v37 }
0x233c   :  { %2367 = vrot.lane.b32.xlu0 %v2365_v38, %s8018_s19 }
0x2340   :  { %2075 = vrot.lane.b32.xlu0 %v7472_v39, %s8018_s19 }
0x23ae   :  { %v2368_v60 = vpop.permute.xlu0 %2367 }
0x23af   :  { %v8703_v26 = vadd.f32 %v2368_v60, %v2360_v59  ;;  %v2212_v59 = vpop.f32.mrf.mxu0 }
0x23b1   :  { %7477 = vtanh.f32 %v8703_v26  ;;  %v2214_v60 = vpop.f32.mrf.mxu0 }
0x23b2   :  { %v2076_v22 = vpop.permute.xlu0 %2075  ;;  %7479 = vpow2.f32 %v6600_v55 }
0x23b3   :  { %v2078_v61 = vmul.f32 %v7476_v56, %v2076_v22 }
0x23b5   :  { %2080 = vrot.lane.b32.xlu0 %v2078_v61, %s8018_s19 }
0x23be   :  { %v7478_v62 = vpop.eup %7477 }
0x23bf   :  { %2373 = vrot.lane.b32.xlu1 %v7478_v62, %s8018_s19  ;;  %v7480_v25 = vpop.eup %7479 }
0x23c0   :  { %v2354_v30 = vadd.f32 1.0, %v7480_v25 }
0x23c2   :  { %7481 = vrcp.f32 %v2354_v30 }
0x23cf   :  { %v7482_v7 = vpop.eup %7481 }
0x2427   :  { %v2081_v21 = vpop.permute.xlu0 %2080 }
0x2428   :  { %v2083_v5 = vadd.f32 %v2081_v21, %v2073_v63 }
0x242a   :  { %7483 = vtanh.f32 %v2083_v5 }
0x242b   :  { %7485 = vpow2.f32 %v6570_v42 }
0x2431   :  { %v2374_v32 = vpop.permute.xlu1 %2373 }
0x2432   :  { %v2376_v47 = vmul.f32 %v7482_v7, %v2374_v32 }
0x2434   :  { %2377 = vst.msk [vmem:[#allocation2] sm:$0xff] %vm387_vm3, %v2376_v47  ;;  %v2380_v48 = vpack.c.bf16 %v2376_v47, %v2376_v47 }
0x2436   :  { %6601 = vmatmul.mubr.msk.bf16.vlgmr.msra.gmra.mxu1 %vm387_vm3, %v2380_v48 }
0x2437   :  { %v7484_v49 = vpop.eup %7483  ;;  %2553 = vmatpush1.bf16.msra.mxu1 %v8652_v54  ;;  %2576 = vmatprep.mubr.bf16.mxu1 %v8024_v45 }
0x2438   :  { %2086 = vrot.lane.b32.xlu0 %v7484_v49, %s8018_s19  ;;  %2554 = vmatprep.subr.bf16.mxu1 %v8657_v52  ;;  %v7486_v31 = vpop.eup %7485 }
0x2439   :  { %v2067_v50 = vadd.f32 1.0, %v7486_v31 }
0x243b   :  { %2555 = vmatpush1.bf16.msra.mxu1 %v8659_v9  ;;  %7487 = vrcp.f32 %v2067_v50 }
0x243c   :  { %2556 = vmatprep.subr.bf16.mxu1 %v8663_v28 }
0x243f   :  { %2557 = vmatpush1.bf16.msra.mxu1 %v8665_v10 }
0x2440   :  { %2558 = vmatprep.subr.bf16.mxu1 %v8670_v11 }
0x2443   :  { %2559 = vmatpush1.bf16.msra.mxu1 %v8672_v29 }
0x2444   :  { %2712 = vmatprep.subr.bf16.mxu1 %v8650_v8 }
0x2448   :  { %v7488_v51 = vpop.eup %7487 }
0x24aa   :  { %v2087_v27 = vpop.permute.xlu0 %2086 }
0x24ab   :  { %v2089_v12 = vmul.f32 %v7488_v51, %v2087_v27 }
0x24ad   :  { %2090 = vst.msk [vmem:[#allocation2 + $0x38] sm:$0xff] %vm387_vm3, %v2089_v12 }
0x24b4   :  { %v2098_v2 = vld [vmem:[#allocation2 + $0x38] sm:$0xff] }
0x24b5   :  { %v2111_v3 = vpack.c.bf16 %v2098_v2, %v2097_v1 }
0x24b7   :  { %6590 = vmatmul.mubr.msk.bf16.gmra.mxu0 %vm387_vm3, %v2111_v3 }
0x24b8   :  { %2496 = vmatprep.mubr.bf16.mxu0 %v8024_v45 }
0x24f6   :  { %v2418_v6 = vpop.f32.mrf.mxu1 }
0x24f7   :  { %v2425_v16 = vadd.f32 %v2418_v6, %v2202_v4 }
0x24f8   :  { %v2420_v46 = vpop.f32.mrf.mxu1 }
0x24f9   :  { %v2426_v14 = vadd.f32 %v2420_v46, %v2204_v13  ;;  %v6602_v44 = vmul.f32 -1.442695, %v2425_v16 }
0x24fa   :  { %v2422_v53 = vpop.f32.mrf.mxu1 }
0x24fb   :  { %7489 = vtanh.f32 %v2426_v14  ;;  %v6603_v35 = vmul.f32 -1.442695, %v2426_v14 }
0x24fc   :  { %v2423_v15 = vpop.f32.mrf.mxu1  ;;  %7491 = vpow2.f32 %v6602_v44 }
0x2508   :  { %v7490_v43 = vpop.eup %7489 }
0x2509   :  { %2442 = vrot.lane.b32.xlu1 %v7490_v43, %s8018_s19  ;;  %v7492_v17 = vpop.eup %7491 }
0x250a   :  { %v2433_v24 = vadd.f32 1.0, %v7492_v17 }
0x250c   :  { %7493 = vrcp.f32 %v2433_v24 }
0x2519   :  { %v7494_v18 = vpop.eup %7493 }
0x251a   :  { %v2440_v0 = vmul.f32 %v7494_v18, %v8703_v26  ;;  %v8739_v26 = vpop.f32.mrf.mxu0 }
0x251c   :  { %v8741_v56 = vpop.f32.mrf.mxu0 }
0x251e   :  { %v8743_v22 = vpop.f32.mrf.mxu0 }
0x2520   :  { %v8745_v61 = vpop.f32.mrf.mxu0 }
0x2577   :  { %v8747_v62 = vpop.f32.mrf.mxu0 }
0x2579   :  { %v8749_v55 = vpop.f32.mrf.mxu0 }
0x257b   :  { %v2443_v20 = vpop.permute.xlu1 %2442  ;;  %v8751_v25 = vpop.f32.mrf.mxu0 }
0x257c   :  { %v2445_v19 = vmul.f32 %v7494_v18, %v2443_v20 }
0x257d   :  { %v8753_v30 = vpop.f32.mrf.mxu0 }
0x257e   :  { %2447 = vrot.lane.b32.xlu1 %v2445_v19, %s8018_s19 }
0x25f0   :  { %v2448_v23 = vpop.permute.xlu1 %2447 }
0x25f1   :  { %v2450_v33 = vadd.f32 %v2448_v23, %v2440_v0 }
0x25f3   :  { %7495 = vtanh.f32 %v2450_v33 }
0x25f4   :  { %7497 = vpow2.f32 %v6603_v35 }
0x2600   :  { %v7496_v34 = vpop.eup %7495 }
0x2601   :  { %2453 = vrot.lane.b32.xlu1 %v7496_v34, %s8018_s19  ;;  %v7498_v36 = vpop.eup %7497 }
0x2602   :  { %v2434_v37 = vadd.f32 1.0, %v7498_v36 }
0x2604   :  { %7499 = vrcp.f32 %v2434_v37 }
0x2611   :  { %v7500_v38 = vpop.eup %7499 }
0x2673   :  { %v2454_v39 = vpop.permute.xlu1 %2453 }
0x2674   :  { %v2456_v40 = vmul.f32 %v7500_v38, %v2454_v39 }
0x2676   :  { %2457 = vst.msk [vmem:[#allocation2 + $0x8] sm:$0xff] %vm387_vm3, %v2456_v40  ;;  %v2460_v41 = vpack.c.bf16 %v2456_v40, %v2456_v40 }
0x2678   :  { %6604 = vmatmul.mubr.msk.bf16.vlgmr.msra.gmra.mxu0 %vm387_vm3, %v2460_v41 }
0x2679   :  { %2633 = vmatpush1.bf16.msra.mxu0 %v8652_v54  ;;  %2656 = vmatprep.mubr.bf16.mxu0 %v8024_v45 }
0x267a   :  { %2634 = vmatprep.subr.bf16.mxu0 %v8657_v52 }
0x267d   :  { %2635 = vmatpush1.bf16.msra.mxu0 %v8659_v9 }
0x267e   :  { %2636 = vmatprep.subr.bf16.mxu0 %v8663_v28 }
0x2681   :  { %2637 = vmatpush1.bf16.msra.mxu0 %v8665_v10 }
0x2682   :  { %2638 = vmatprep.subr.bf16.mxu0 %v8670_v11 }
0x2685   :  { %2639 = vmatpush1.bf16.msra.mxu0 %v8672_v29 }
0x2686   :  { %2792 = vmatprep.subr.bf16.mxu0 %v8650_v8 }
0x2738   :  { %v2498_v63 = vpop.f32.mrf.mxu0 }
0x2739   :  { %v2505_v48 = vadd.f32 %v2498_v63, %v2208_v57 }
0x273a   :  { %v2500_v21 = vpop.f32.mrf.mxu0 }
0x273b   :  { %v2506_v5 = vadd.f32 %v2500_v21, %v2210_v58  ;;  %v6605_v49 = vmul.f32 -1.442695, %v2505_v48 }
0x273c   :  { %v2502_v7 = vpop.f32.mrf.mxu0 }
0x273d   :  { %7501 = vtanh.f32 %v2506_v5  ;;  %v6606_v4 = vmul.f32 -1.442695, %v2506_v5 }
0x273e   :  { %v2503_v32 = vpop.f32.mrf.mxu0  ;;  %7503 = vpow2.f32 %v6605_v49 }
0x274a   :  { %v7502_v47 = vpop.eup %7501 }
0x274b   :  { %2522 = vrot.lane.b32.xlu0 %v7502_v47, %s8018_s19  ;;  %v7504_v42 = vpop.eup %7503 }
0x274c   :  { %v2513_v31 = vadd.f32 1.0, %v7504_v42 }
0x274e   :  { %7505 = vrcp.f32 %v2513_v31 }
0x275b   :  { %v7506_v50 = vpop.eup %7505 }
0x275c   :  { %v2520_v12 = vmul.f32 %v7506_v50, %v2450_v33 }
0x27bd   :  { %v2523_v51 = vpop.permute.xlu0 %2522 }
0x27be   :  { %v2525_v27 = vmul.f32 %v7506_v50, %v2523_v51 }
0x27c0   :  { %2527 = vrot.lane.b32.xlu1 %v2525_v27, %s8018_s19 }
0x2832   :  { %v2528_v1 = vpop.permute.xlu1 %2527 }
0x2833   :  { %v2530_v2 = vadd.f32 %v2528_v1, %v2520_v12 }
0x2835   :  { %7507 = vtanh.f32 %v2530_v2 }
0x2836   :  { %7509 = vpow2.f32 %v6606_v4 }
0x2842   :  { %v7508_v3 = vpop.eup %7507 }
0x2843   :  { %2533 = vrot.lane.b32.xlu0 %v7508_v3, %s8018_s19  ;;  %v7510_v6 = vpop.eup %7509 }
0x2844   :  { %v2514_v13 = vadd.f32 1.0, %v7510_v6 }
0x2846   :  { %7511 = vrcp.f32 %v2514_v13 }
0x2853   :  { %v7512_v46 = vpop.eup %7511 }
0x28b5   :  { %v2534_v14 = vpop.permute.xlu0 %2533 }
0x28b6   :  { %v2536_v53 = vmul.f32 %v7512_v46, %v2534_v14 }
0x28b8   :  { %2537 = vst.msk [vmem:[#allocation2 + $0x10] sm:$0xff] %vm387_vm3, %v2536_v53  ;;  %v2540_v15 = vpack.c.bf16 %v2536_v53, %v2536_v53 }
0x28ba   :  { %6607 = vmatmul.mubr.msk.bf16.vlgmr.msra.gmra.mxu1 %vm387_vm3, %v2540_v15 }
0x28bb   :  { %2713 = vmatpush1.bf16.msra.mxu1 %v8652_v54  ;;  %2736 = vmatprep.mubr.bf16.mxu1 %v8024_v45 }
0x28bc   :  { %2714 = vmatprep.subr.bf16.mxu1 %v8657_v52 }
0x28bf   :  { %2715 = vmatpush1.bf16.msra.mxu1 %v8659_v9 }
0x28c0   :  { %2716 = vmatprep.subr.bf16.mxu1 %v8663_v28 }
0x28c3   :  { %2717 = vmatpush1.bf16.msra.mxu1 %v8665_v10 }
0x28c4   :  { %2718 = vmatprep.subr.bf16.mxu1 %v8670_v11 }
0x28c7   :  { %2719 = vmatpush1.bf16.msra.mxu1 %v8672_v29 }
0x28c8   :  { %2872 = vmatprep.subr.bf16.mxu1 %v8650_v8 }
0x297a   :  { %v2578_v43 = vpop.f32.mrf.mxu1 }
0x297b   :  { %v2585_v20 = vadd.f32 %v2578_v43, %v2212_v59 }
0x297c   :  { %v2580_v16 = vpop.f32.mrf.mxu1 }
0x297d   :  { %v2586_v44 = vadd.f32 %v2580_v16, %v2214_v60  ;;  %v6608_v19 = vmul.f32 -1.442695, %v2585_v20 }
0x297e   :  { %v2582_v17 = vpop.f32.mrf.mxu1 }
0x297f   :  { %7513 = vtanh.f32 %v2586_v44  ;;  %v6609_v39 = vmul.f32 -1.442695, %v2586_v44 }
0x2980   :  { %v2583_v24 = vpop.f32.mrf.mxu1  ;;  %7515 = vpow2.f32 %v6608_v19 }
0x298c   :  { %v7514_v18 = vpop.eup %7513 }
0x298d   :  { %2602 = vrot.lane.b32.xlu1 %v7514_v18, %s8018_s19  ;;  %v7516_v0 = vpop.eup %7515 }
0x298e   :  { %v2593_v23 = vadd.f32 1.0, %v7516_v0 }
0x2990   :  { %7517 = vrcp.f32 %v2593_v23 }
0x299d   :  { %v7518_v33 = vpop.eup %7517 }
0x299e   :  { %v2600_v8 = vmul.f32 %v7518_v33, %v2530_v2 }
0x29ff   :  { %v2603_v34 = vpop.permute.xlu1 %2602 }
0x2a00   :  { %v2605_v35 = vmul.f32 %v7518_v33, %v2603_v34 }
0x2a02   :  { %2607 = vrot.lane.b32.xlu0 %v2605_v35, %s8018_s19 }
0x2a74   :  { %v2608_v36 = vpop.permute.xlu0 %2607 }
0x2a75   :  { %v2610_v37 = vadd.f32 %v2608_v36, %v2600_v8  ;;  %v7182_v8 = vld [vmem:[%s9644_s3 + $0xf0] ss:$8 sps:$4 sm:$0xff]  }
0x2a77   :  { %7519 = vtanh.f32 %v2610_v37 }
0x2a78   :  { %7521 = vpow2.f32 %v6609_v39  ;;  %v7190_v39 = vld [vmem:[%s9644_s3 + $0xd4] ss:$8 sps:$4 sm:$0xff]  }
0x2a84   :  { %v7520_v38 = vpop.eup %7519 }
0x2a85   :  { %2613 = vrot.lane.b32.xlu1 %v7520_v38, %s8018_s19  ;;  %v7522_v40 = vpop.eup %7521  ;;  %v7185_v38 = vld [vmem:[%s9644_s3 + $0xe0] ss:$8 sps:$4 sm:$0xff]  }
0x2a86   :  { %v2594_v41 = vadd.f32 1.0, %v7522_v40  ;;  %v7188_v40 = vld [vmem:[%s9644_s3 + $0xd0] ss:$8 sps:$4 sm:$0xff]  }
0x2a88   :  { %7523 = vrcp.f32 %v2594_v41  ;;  %v7193_v41 = vld [vmem:[%s9644_s3 + $0xc4] ss:$8 sps:$4 sm:$0xff]  }
0x2a95   :  { %v7524_v57 = vpop.eup %7523 }
0x2af7   :  { %v2614_v58 = vpop.permute.xlu1 %2613 }
0x2af8   :  { %v2616_v59 = vmul.f32 %v7524_v57, %v2614_v58  ;;  %v7191_v57 = vld [vmem:[%s9644_s3 + $0xc0] ss:$8 sps:$4 sm:$0xff]  }
0x2af9   :  { %v2939_v58 = vld [vmem:[#allocation2 + $0x8] sm:$0xff] }
0x2afa   :  { %2617 = vst.msk [vmem:[#allocation2 + $0x18] sm:$0xff] %vm387_vm3, %v2616_v59  ;;  %v2620_v60 = vpack.c.bf16 %v2616_v59, %v2616_v59  ;;  %v2938_v59 = vld [vmem:[#allocation2] sm:$0xff] }
0x2afc   :  { %6610 = vmatmul.mubr.msk.bf16.vlgmr.msra.gmra.mxu0 %vm387_vm3, %v2620_v60  ;;  %v2955_v60 = vpack.c.bf16 %v2939_v58, %v2938_v59 }
0x2afd   :  { %2793 = vmatpush1.bf16.msra.mxu0 %v8652_v54  ;;  %2816 = vmatprep.mubr.bf16.mxu0 %v8024_v45 }
0x2afe   :  { %2794 = vmatprep.subr.bf16.mxu0 %v8657_v52 }
0x2b01   :  { %2795 = vmatpush1.bf16.msra.mxu0 %v8659_v9 }
0x2b02   :  { %2796 = vmatprep.subr.bf16.mxu0 %v8663_v28 }
0x2b05   :  { %2797 = vmatpush1.bf16.msra.mxu0 %v8665_v10 }
0x2b06   :  { %2798 = vmatprep.subr.bf16.mxu0 %v8670_v11 }
0x2b09   :  { %2799 = vmatpush1.bf16.msra.mxu0 %v8672_v29 }
0x2bbc   :  { %v2658_v63 = vpop.f32.mrf.mxu0 }
0x2bbd   :  { %v2665_v48 = vadd.f32 %v2658_v63, %v8739_v26  ;;  %v2941_v63 = vld [vmem:[#allocation2 + $0x18] sm:$0xff] }
0x2bbe   :  { %v2660_v21 = vpop.f32.mrf.mxu0 }
0x2bbf   :  { %v2666_v5 = vadd.f32 %v2660_v21, %v8741_v56  ;;  %v6611_v49 = vmul.f32 -1.442695, %v2665_v48  ;;  %v2940_v21 = vld [vmem:[#allocation2 + $0x10] sm:$0xff] }
0x2bc0   :  { %v2662_v7 = vpop.f32.mrf.mxu0 }
0x2bc1   :  { %7525 = vtanh.f32 %v2666_v5  ;;  %v6612_v3 = vmul.f32 -1.442695, %v2666_v5  ;;  %v2956_v5 = vpack.c.bf16 %v2941_v63, %v2940_v21 }
0x2bc2   :  { %v2663_v32 = vpop.f32.mrf.mxu0  ;;  %7527 = vpow2.f32 %v6611_v49 }
0x2bce   :  { %v7526_v47 = vpop.eup %7525 }
0x2bcf   :  { %2682 = vrot.lane.b32.xlu0 %v7526_v47, %s8018_s19  ;;  %v7528_v42 = vpop.eup %7527 }
0x2bd0   :  { %v2673_v31 = vadd.f32 1.0, %v7528_v42 }
0x2bd2   :  { %7529 = vrcp.f32 %v2673_v31 }
0x2bdf   :  { %v7530_v50 = vpop.eup %7529 }
0x2be0   :  { %v2680_v12 = vmul.f32 %v7530_v50, %v2610_v37  ;;  %v7187_v37 = vld [vmem:[%s9644_s3 + $0xe4] ss:$8 sps:$4 sm:$0xff]  }
0x2c41   :  { %v2683_v51 = vpop.permute.xlu0 %2682 }
0x2c42   :  { %v2685_v27 = vmul.f32 %v7530_v50, %v2683_v51 }
0x2c44   :  { %2687 = vrot.lane.b32.xlu1 %v2685_v27, %s8018_s19 }
0x2cb6   :  { %v2688_v56 = vpop.permute.xlu1 %2687 }
0x2cb7   :  { %v2690_v1 = vadd.f32 %v2688_v56, %v2680_v12 }
0x2cb9   :  { %7531 = vtanh.f32 %v2690_v1 }
0x2cba   :  { %7533 = vpow2.f32 %v6612_v3 }
0x2cc6   :  { %v7532_v2 = vpop.eup %7531 }
0x2cc7   :  { %2693 = vrot.lane.b32.xlu0 %v7532_v2, %s8018_s19  ;;  %v7534_v26 = vpop.eup %7533 }
0x2cc8   :  { %v2674_v4 = vadd.f32 1.0, %v7534_v26 }
0x2cca   :  { %7535 = vrcp.f32 %v2674_v4 }
0x2cd7   :  { %v7536_v6 = vpop.eup %7535 }
0x2d39   :  { %v2694_v13 = vpop.permute.xlu0 %2693 }
0x2d3a   :  { %v2696_v46 = vmul.f32 %v7536_v6, %v2694_v13  ;;  %v8846_v13 = vld [vmem:[#allocation5 + $0xf4] ss:$8 sps:$4 sm:$0xff]  }
0x2d3c   :  { %2697 = vst.msk [vmem:[#allocation2 + $0x20] sm:$0xff] %vm387_vm3, %v2696_v46  ;;  %v2700_v14 = vpack.c.bf16 %v2696_v46, %v2696_v46  ;;  %v8853_v46 = vld [vmem:[#allocation5 + $0xe4] ss:$8 sps:$4 sm:$0xff]  }
0x2d3e   :  { %6613 = vmatmul.mubr.msk.bf16.vlgmr.msra.gmra.mxu1 %vm387_vm3, %v2700_v14  ;;  %v8855_v14 = vld [vmem:[#allocation5 + $0xe0] ss:$8 sps:$4 sm:$0xff]  }
0x2d3f   :  { %2873 = vmatpush1.bf16.msra.mxu1 %v8652_v54  ;;  %2896 = vmatprep.mubr.bf16.mxu1 %v8024_v45 }
0x2d40   :  { %2874 = vmatprep.subr.bf16.mxu1 %v8657_v52 }
0x2d43   :  { %2875 = vmatpush1.bf16.msra.mxu1 %v8659_v9  ;;  %v2942_v32 = vld [vmem:[#allocation2 + $0x20] sm:$0xff] }
0x2d44   :  { %2876 = vmatprep.subr.bf16.mxu1 %v8663_v28 }
0x2d47   :  { %2877 = vmatpush1.bf16.msra.mxu1 %v8665_v10 }
0x2d48   :  { %2878 = vmatprep.subr.bf16.mxu1 %v8670_v11 }
0x2d4b   :  { %2879 = vmatpush1.bf16.msra.mxu1 %v8672_v29 }
0x2d4c   :  { %3159 = vmatprep.subr.bf16.mxu1 %v8846_v13 }
0x2dfe   :  { %v2738_v53 = vpop.f32.mrf.mxu1 }
0x2dff   :  { %v2745_v52 = vadd.f32 %v2738_v53, %v8743_v22  ;;  %v7184_v22 = vld [vmem:[%s9644_s3 + $0xf4] ss:$8 sps:$4 sm:$0xff]  }
0x2e00   :  { %v2740_v15 = vpop.f32.mrf.mxu1  ;;  %3019 = vmatprep.subr.bf16.mxu0 %v7184_v22  ;;  %v8859_v53 = vld [vmem:[#allocation5 + $0xd4] ss:$8 sps:$4 sm:$0xff]  }
0x2e01   :  { %v2746_v43 = vadd.f32 %v2740_v15, %v8745_v61  ;;  %v6614_v9 = vmul.f32 -1.442695, %v2745_v52  ;;  %v8861_v15 = vld [vmem:[#allocation5 + $0xd0] ss:$8 sps:$4 sm:$0xff]  }
0x2e02   :  { %v2742_v16 = vpop.f32.mrf.mxu1 }
0x2e03   :  { %7537 = vtanh.f32 %v2746_v43  ;;  %v6615_v19 = vmul.f32 -1.442695, %v2746_v43  ;;  %v8866_v16 = vld [vmem:[#allocation5 + $0xc4] ss:$8 sps:$4 sm:$0xff]  }
0x2e04   :  { %v2743_v54 = vpop.f32.mrf.mxu1  ;;  %7539 = vpow2.f32 %v6614_v9 }
0x2e05   :  { %v8868_v54 = vld [vmem:[#allocation5 + $0xc0] ss:$8 sps:$4 sm:$0xff]  }
0x2e10   :  { %v7538_v44 = vpop.eup %7537 }
0x2e11   :  { %2762 = vrot.lane.b32.xlu1 %v7538_v44, %s8018_s19  ;;  %v7540_v28 = vpop.eup %7539 }
0x2e12   :  { %v2753_v10 = vadd.f32 1.0, %v7540_v28 }
0x2e14   :  { %7541 = vrcp.f32 %v2753_v10 }
0x2e21   :  { %v7542_v11 = vpop.eup %7541 }
0x2e22   :  { %v2760_v24 = vmul.f32 %v7542_v11, %v2690_v1 }
0x2e83   :  { %v2763_v17 = vpop.permute.xlu1 %2762 }
0x2e84   :  { %v2765_v29 = vmul.f32 %v7542_v11, %v2763_v17 }
0x2e86   :  { %2767 = vrot.lane.b32.xlu0 %v2765_v29, %s8018_s19 }
0x2ef8   :  { %v2768_v61 = vpop.permute.xlu0 %2767 }
0x2ef9   :  { %v8801_v18 = vadd.f32 %v2768_v61, %v2760_v24 }
0x2efb   :  { %7543 = vtanh.f32 %v8801_v18 }
0x2efc   :  { %7545 = vpow2.f32 %v6615_v19 }
0x2f08   :  { %v7544_v20 = vpop.eup %7543 }
0x2f09   :  { %2773 = vrot.lane.b32.xlu1 %v7544_v20, %s8018_s19  ;;  %v7546_v0 = vpop.eup %7545 }
0x2f0a   :  { %v2754_v23 = vadd.f32 1.0, %v7546_v0 }
0x2f0c   :  { %7547 = vrcp.f32 %v2754_v23 }
0x2f19   :  { %v7548_v33 = vpop.eup %7547 }
0x2f7b   :  { %v2774_v34 = vpop.permute.xlu1 %2773 }
0x2f7c   :  { %v2776_v35 = vmul.f32 %v7548_v33, %v2774_v34 }
0x2f7e   :  { %2777 = vst.msk [vmem:[#allocation2 + $0x28] sm:$0xff] %vm387_vm3, %v2776_v35  ;;  %v2780_v36 = vpack.c.bf16 %v2776_v35, %v2776_v35 }
0x2f80   :  { %6616 = vmatmul.mubr.msk.bf16.vlgmr.msra.gmra.mxu0 %vm387_vm3, %v2780_v36 }
0x2f81   :  { %3020 = vmatpush1.bf16.msra.mxu0 %v7182_v8  ;;  %3043 = vmatprep.mubr.bf16.mxu0 %v8024_v45 }
0x2f82   :  { %3021 = vmatprep.subr.bf16.mxu0 %v7187_v37 }
0x2f85   :  { %3022 = vmatpush1.bf16.msra.mxu0 %v7185_v38  ;;  %v2943_v7 = vld [vmem:[#allocation2 + $0x28] sm:$0xff] }
0x2f86   :  { %3023 = vmatprep.subr.bf16.mxu0 %v7190_v39  ;;  %v2957_v47 = vpack.c.bf16 %v2943_v7, %v2942_v32 }
0x2f89   :  { %3024 = vmatpush1.bf16.msra.mxu0 %v7188_v40 }
0x2f8a   :  { %3025 = vmatprep.subr.bf16.mxu0 %v7193_v41 }
0x2f8d   :  { %3026 = vmatpush1.bf16.msra.mxu0 %v7191_v57 }
0x2f8e   :  { %3319 = vmatprep.subr.bf16.mxu0 %v8846_v13 }
0x2f90   :  { %6638 = vmatmul.mubr.msk.bf16.vlgmr.msra.gmra.mxu0 %vm387_vm3, %v2955_v60 }
0x2f91   :  { %3053 = vmatprep.mubr.bf16.mxu0 %v8024_v45 }
0x2f98   :  { %6639 = vmatmul.mubr.msk.bf16.gmra.mxu0 %vm387_vm3, %v2956_v5 }
0x2f99   :  { %3063 = vmatprep.mubr.bf16.mxu0 %v8024_v45 }
0x2fa0   :  { %6640 = vmatmul.mubr.msk.bf16.gmra.mxu0 %vm387_vm3, %v2957_v47 }
0x2fa1   :  { %3073 = vmatprep.mubr.bf16.mxu0 %v8024_v45 }
0x3040   :  { %v2818_v48 = vpop.f32.mrf.mxu0 }
0x3041   :  { %v2825_v27 = vadd.f32 %v2818_v48, %v8747_v62  ;;  %v8848_v62 = vld [vmem:[#allocation5 + $0xf0] ss:$8 sps:$4 sm:$0xff]  }
0x3042   :  { %v2820_v49 = vpop.f32.mrf.mxu0  ;;  %3320 = vmatpush1.bf16.msra.mxu0 %v8848_v62 }
0x3043   :  { %v2826_v42 = vadd.f32 %v2820_v49, %v8749_v55  ;;  %v6617_v12 = vmul.f32 -1.442695, %v2825_v27  ;;  %3321 = vmatprep.subr.bf16.mxu0 %v8853_v46 }
0x3044   :  { %v2822_v31 = vpop.f32.mrf.mxu0 }
0x3045   :  { %7549 = vtanh.f32 %v2826_v42  ;;  %v6618_v44 = vmul.f32 -1.442695, %v2826_v42 }
0x3046   :  { %v2823_v50 = vpop.f32.mrf.mxu0  ;;  %7551 = vpow2.f32 %v6617_v12  ;;  %3322 = vmatpush1.bf16.msra.mxu0 %v8855_v14 }
0x3047   :  { %3323 = vmatprep.subr.bf16.mxu0 %v8859_v53 }
0x304a   :  { %3324 = vmatpush1.bf16.msra.mxu0 %v8861_v15 }
0x304b   :  { %3325 = vmatprep.subr.bf16.mxu0 %v8866_v16 }
0x304e   :  { %3326 = vmatpush1.bf16.msra.mxu0 %v8868_v54 }
0x304f   :  { %3479 = vmatprep.subr.bf16.mxu0 %v8846_v13 }
0x3050   :  { %v3045_v22 = vpop.f32.mrf.mxu0 }
0x3052   :  { %v7550_v51 = vpop.eup %7549  ;;  %v3047_v0 = vpop.f32.mrf.mxu0 }
0x3053   :  { %2842 = vrot.lane.b32.xlu0 %v7550_v51, %s8018_s19  ;;  %v7552_v56 = vpop.eup %7551 }
0x3054   :  { %v2833_v1 = vadd.f32 1.0, %v7552_v56 }
0x3056   :  { %7553 = vrcp.f32 %v2833_v1 }
0x3063   :  { %v7554_v2 = vpop.eup %7553 }
0x3064   :  { %v2840_v55 = vmul.f32 %v7554_v2, %v8801_v18 }
0x30c5   :  { %v2843_v3 = vpop.permute.xlu0 %2842 }
0x30c6   :  { %v2845_v26 = vmul.f32 %v7554_v2, %v2843_v3 }
0x30c8   :  { %2847 = vrot.lane.b32.xlu1 %v2845_v26, %s8018_s19 }
0x313a   :  { %v2848_v4 = vpop.permute.xlu1 %2847 }
0x313b   :  { %v8843_v6 = vadd.f32 %v2848_v4, %v2840_v55 }
0x313d   :  { %7555 = vtanh.f32 %v8843_v6 }
0x313e   :  { %7557 = vpow2.f32 %v6618_v44 }
0x314a   :  { %v7556_v43 = vpop.eup %7555 }
0x314b   :  { %2853 = vrot.lane.b32.xlu0 %v7556_v43, %s8018_s19  ;;  %v7558_v52 = vpop.eup %7557 }
0x314c   :  { %v2834_v9 = vadd.f32 1.0, %v7558_v52 }
0x314e   :  { %7559 = vrcp.f32 %v2834_v9 }
0x315b   :  { %v7560_v28 = vpop.eup %7559 }
0x31bd   :  { %v2854_v10 = vpop.permute.xlu0 %2853 }
0x31be   :  { %v2856_v11 = vmul.f32 %v7560_v28, %v2854_v10  ;;  %v3049_v10 = vpop.f32.mrf.mxu0 }
0x31c0   :  { %2857 = vst.msk [vmem:[#allocation2 + $0x30] sm:$0xff] %vm387_vm3, %v2856_v11  ;;  %v2860_v17 = vpack.c.bf16 %v2856_v11, %v2856_v11 }
0x31c2   :  { %6619 = vmatmul.mubr.msk.bf16.vlgmr.msra.gmra.mxu1 %vm387_vm3, %v2860_v17  ;;  %v3051_v17 = vpop.f32.mrf.mxu0 }
0x31c3   :  { %3160 = vmatpush1.bf16.msra.mxu1 %v8848_v62  ;;  %3183 = vmatprep.mubr.bf16.mxu1 %v8024_v45 }
0x31c4   :  { %3161 = vmatprep.subr.bf16.mxu1 %v8853_v46 }
0x31c7   :  { %3162 = vmatpush1.bf16.msra.mxu1 %v8855_v14  ;;  %v2944_v52 = vld [vmem:[#allocation2 + $0x30] sm:$0xff] }
0x31c8   :  { %3163 = vmatprep.subr.bf16.mxu1 %v8859_v53 }
0x31cb   :  { %3164 = vmatpush1.bf16.msra.mxu1 %v8861_v15 }
0x31cc   :  { %3165 = vmatprep.subr.bf16.mxu1 %v8866_v16 }
0x31cf   :  { %3166 = vmatpush1.bf16.msra.mxu1 %v8868_v54 }
0x31d0   :  { %3239 = vmatprep.subr.bf16.mxu1 %v8846_v13 }
0x31d2   :  { %3184 = vmatmul.mubr.bf16.vlgmr.msra.gmra.mxu1 %v8024_v45 }
0x31d3   :  { %3240 = vmatpush1.bf16.msra.mxu1 %v8848_v62  ;;  %3263 = vmatprep.mubr.bf16.mxu1 %v8024_v45 }
0x31d4   :  { %3241 = vmatprep.subr.bf16.mxu1 %v8853_v46 }
0x31d7   :  { %3242 = vmatpush1.bf16.msra.mxu1 %v8855_v14 }
0x31d8   :  { %3243 = vmatprep.subr.bf16.mxu1 %v8859_v53 }
0x31db   :  { %3244 = vmatpush1.bf16.msra.mxu1 %v8861_v15 }
0x31dc   :  { %3245 = vmatprep.subr.bf16.mxu1 %v8866_v16 }
0x31df   :  { %3246 = vmatpush1.bf16.msra.mxu1 %v8868_v54 }
0x31e0   :  { %3399 = vmatprep.subr.bf16.mxu1 %v8846_v13 }
0x3282   :  { %v2898_v29 = vpop.f32.mrf.mxu1 }
0x3283   :  { %v2905_v59 = vadd.f32 %v2898_v29, %v8751_v25 }
0x3284   :  { %v2900_v24 = vpop.f32.mrf.mxu1 }
0x3285   :  { %v2906_v39 = vadd.f32 %v2900_v24, %v8753_v30  ;;  %v6620_v60 = vmul.f32 -1.442695, %v2905_v59 }
0x3286   :  { %v2902_v61 = vpop.f32.mrf.mxu1 }
0x3287   :  { %v6621_v26 = vmul.f32 -1.442695, %v2906_v39 }
0x3288   :  { %v2903_v18 = vpop.f32.mrf.mxu1 }
0x3292   :  { %v3185_v20 = vpop.f32.mrf.mxu1 }
0x3293   :  { %v3192_v8 = vadd.f32 %v3185_v20, %v3045_v22 }
0x3294   :  { %v3187_v19 = vpop.f32.mrf.mxu1 }
0x3295   :  { %v3193_v33 = vadd.f32 %v3187_v19, %v3047_v0  ;;  %v6650_v36 = vmul.f32 -1.442695, %v3192_v8 }
0x3296   :  { %v3189_v23 = vpop.f32.mrf.mxu1 }
0x3297   :  { %7561 = vtanh.f32 %v3193_v33  ;;  %v6651_v25 = vmul.f32 -1.442695, %v3193_v33 }
0x3298   :  { %v3190_v34 = vpop.f32.mrf.mxu1  ;;  %7563 = vpow2.f32 %v6650_v36 }
0x32a4   :  { %v7562_v35 = vpop.eup %7561 }
0x32a5   :  { %3209 = vrot.lane.b32.xlu1 %v7562_v35, %s8018_s19  ;;  %v7564_v37 = vpop.eup %7563 }
0x32a6   :  { %v3200_v38 = vadd.f32 1.0, %v7564_v37 }
0x32a8   :  { %7565 = vrcp.f32 %v3200_v38 }
0x32a9   :  { %7567 = vtanh.f32 %v2906_v39 }
0x32aa   :  { %7569 = vpow2.f32 %v6620_v60 }
0x32b5   :  { %v7566_v40 = vpop.eup %7565 }
0x32b6   :  { %v7568_v58 = vpop.eup %7567  ;;  %v3207_v5 = vmul.f32 0.0, %v7566_v40 }
0x32b7   :  { %v7570_v63 = vpop.eup %7569 }
0x32b8   :  { %v2913_v21 = vadd.f32 1.0, %v7570_v63  ;;  %v3055_v63 = vpop.f32.mrf.mxu0 }
0x32ba   :  { %7571 = vrcp.f32 %v2913_v21  ;;  %v3057_v21 = vpop.f32.mrf.mxu0 }
0x32c7   :  { %v7572_v30 = vpop.eup %7571 }
0x32c8   :  { %v2920_v50 = vmul.f32 %v7572_v30, %v8843_v6 }
0x3317   :  { %v3210_v41 = vpop.permute.xlu1 %3209 }
0x3318   :  { %v3212_v57 = vmul.f32 %v7566_v40, %v3210_v41 }
0x331a   :  { %3214 = vrot.lane.b32.xlu0 %v3212_v57, %s8018_s19 }
0x331e   :  { %2922 = vrot.lane.b32.xlu0 %v7568_v58, %s8018_s19 }
0x338c   :  { %v3215_v7 = vpop.permute.xlu0 %3214 }
0x338d   :  { %v8899_v32 = vadd.f32 %v3215_v7, %v3207_v5  ;;  %v3059_v5 = vpop.f32.mrf.mxu0 }
0x338f   :  { %7573 = vtanh.f32 %v8899_v32  ;;  %v3061_v7 = vpop.f32.mrf.mxu0 }
0x3390   :  { %v2923_v47 = vpop.permute.xlu0 %2922  ;;  %7575 = vpow2.f32 %v6651_v25 }
0x3391   :  { %v2925_v48 = vmul.f32 %v7572_v30, %v2923_v47 }
0x3393   :  { %2927 = vrot.lane.b32.xlu0 %v2925_v48, %s8018_s19 }
0x339c   :  { %v7574_v49 = vpop.eup %7573 }
0x339d   :  { %3220 = vrot.lane.b32.xlu1 %v7574_v49, %s8018_s19  ;;  %v7576_v42 = vpop.eup %7575 }
0x339e   :  { %v3201_v31 = vadd.f32 1.0, %v7576_v42 }
0x33a0   :  { %7577 = vrcp.f32 %v3201_v31 }
0x33ad   :  { %v7578_v12 = vpop.eup %7577 }
0x3405   :  { %v2928_v51 = vpop.permute.xlu0 %2927 }
0x3406   :  { %v2930_v27 = vadd.f32 %v2928_v51, %v2920_v50 }
0x3408   :  { %7579 = vtanh.f32 %v2930_v27 }
0x3409   :  { %7581 = vpow2.f32 %v6621_v26 }
0x340f   :  { %v3221_v56 = vpop.permute.xlu1 %3220 }
0x3410   :  { %v3223_v1 = vmul.f32 %v7578_v12, %v3221_v56 }
0x3412   :  { %3224 = vst.msk [vmem:[#allocation2] sm:$0xff] %vm387_vm3, %v3223_v1  ;;  %v3227_v2 = vpack.c.bf16 %v3223_v1, %v3223_v1 }
0x3414   :  { %6652 = vmatmul.mubr.msk.bf16.vlgmr.msra.gmra.mxu1 %vm387_vm3, %v3227_v2 }
0x3415   :  { %v7580_v3 = vpop.eup %7579  ;;  %3400 = vmatpush1.bf16.msra.mxu1 %v8848_v62  ;;  %3423 = vmatprep.mubr.bf16.mxu1 %v8024_v45 }
0x3416   :  { %2933 = vrot.lane.b32.xlu0 %v7580_v3, %s8018_s19  ;;  %3401 = vmatprep.subr.bf16.mxu1 %v8853_v46  ;;  %v7582_v55 = vpop.eup %7581 }
0x3417   :  { %v2914_v4 = vadd.f32 1.0, %v7582_v55 }
0x3419   :  { %3402 = vmatpush1.bf16.msra.mxu1 %v8855_v14  ;;  %7583 = vrcp.f32 %v2914_v4 }
0x341a   :  { %3403 = vmatprep.subr.bf16.mxu1 %v8859_v53 }
0x341d   :  { %3404 = vmatpush1.bf16.msra.mxu1 %v8861_v15 }
0x341e   :  { %3405 = vmatprep.subr.bf16.mxu1 %v8866_v16 }
0x3421   :  { %3406 = vmatpush1.bf16.msra.mxu1 %v8868_v54 }
0x3422   :  { %3559 = vmatprep.subr.bf16.mxu1 %v8846_v13 }
0x3426   :  { %v7584_v6 = vpop.eup %7583 }
0x3488   :  { %v2934_v43 = vpop.permute.xlu0 %2933 }
0x3489   :  { %v2936_v44 = vmul.f32 %v7584_v6, %v2934_v43 }
0x348b   :  { %2937 = vst.msk [vmem:[#allocation2 + $0x38] sm:$0xff] %vm387_vm3, %v2936_v44 }
0x3492   :  { %v2945_v9 = vld [vmem:[#allocation2 + $0x38] sm:$0xff] }
0x3493   :  { %v2958_v28 = vpack.c.bf16 %v2945_v9, %v2944_v52 }
0x3495   :  { %6641 = vmatmul.mubr.msk.bf16.gmra.mxu0 %vm387_vm3, %v2958_v28 }
0x3496   :  { %3343 = vmatprep.mubr.bf16.mxu0 %v8024_v45 }
0x34d4   :  { %v3265_v11 = vpop.f32.mrf.mxu1 }
0x34d5   :  { %v3272_v20 = vadd.f32 %v3265_v11, %v3049_v10 }
0x34d6   :  { %v3267_v29 = vpop.f32.mrf.mxu1 }
0x34d7   :  { %v3273_v24 = vadd.f32 %v3267_v29, %v3051_v17  ;;  %v6653_v19 = vmul.f32 -1.442695, %v3272_v20 }
0x34d8   :  { %v3269_v61 = vpop.f32.mrf.mxu1 }
0x34d9   :  { %7585 = vtanh.f32 %v3273_v24  ;;  %v6654_v39 = vmul.f32 -1.442695, %v3273_v24 }
0x34da   :  { %v3270_v18 = vpop.f32.mrf.mxu1  ;;  %7587 = vpow2.f32 %v6653_v19 }
0x34e6   :  { %v7586_v22 = vpop.eup %7585 }
0x34e7   :  { %3289 = vrot.lane.b32.xlu1 %v7586_v22, %s8018_s19  ;;  %v7588_v0 = vpop.eup %7587 }
0x34e8   :  { %v3280_v23 = vadd.f32 1.0, %v7588_v0 }
0x34ea   :  { %7589 = vrcp.f32 %v3280_v23 }
0x34f7   :  { %v7590_v33 = vpop.eup %7589 }
0x34f8   :  { %v3287_v8 = vmul.f32 %v7590_v33, %v8899_v32  ;;  %v8935_v32 = vpop.f32.mrf.mxu0 }
0x34fa   :  { %v8937_v30 = vpop.f32.mrf.mxu0 }
0x34fc   :  { %v8939_v47 = vpop.f32.mrf.mxu0 }
0x34fe   :  { %v8941_v48 = vpop.f32.mrf.mxu0 }
0x3555   :  { %v8943_v49 = vpop.f32.mrf.mxu0 }
0x3557   :  { %v8945_v25 = vpop.f32.mrf.mxu0 }
0x3559   :  { %v3290_v34 = vpop.permute.xlu1 %3289  ;;  %v8947_v42 = vpop.f32.mrf.mxu0 }
0x355a   :  { %v3292_v35 = vmul.f32 %v7590_v33, %v3290_v34 }
0x355b   :  { %v8949_v31 = vpop.f32.mrf.mxu0 }
0x355c   :  { %3294 = vrot.lane.b32.xlu1 %v3292_v35, %s8018_s19 }
0x35ce   :  { %v3295_v36 = vpop.permute.xlu1 %3294 }
0x35cf   :  { %v3297_v37 = vadd.f32 %v3295_v36, %v3287_v8 }
0x35d1   :  { %7591 = vtanh.f32 %v3297_v37 }
0x35d2   :  { %7593 = vpow2.f32 %v6654_v39 }
0x35de   :  { %v7592_v38 = vpop.eup %7591 }
0x35df   :  { %3300 = vrot.lane.b32.xlu1 %v7592_v38, %s8018_s19  ;;  %v7594_v40 = vpop.eup %7593 }
0x35e0   :  { %v3281_v41 = vadd.f32 1.0, %v7594_v40 }
0x35e2   :  { %7595 = vrcp.f32 %v3281_v41 }
0x35ef   :  { %v7596_v57 = vpop.eup %7595 }
0x3651   :  { %v3301_v58 = vpop.permute.xlu1 %3300 }
0x3652   :  { %v3303_v59 = vmul.f32 %v7596_v57, %v3301_v58 }
0x3654   :  { %3304 = vst.msk [vmem:[#allocation2 + $0x8] sm:$0xff] %vm387_vm3, %v3303_v59  ;;  %v3307_v60 = vpack.c.bf16 %v3303_v59, %v3303_v59 }
0x3656   :  { %6655 = vmatmul.mubr.msk.bf16.vlgmr.msra.gmra.mxu0 %vm387_vm3, %v3307_v60 }
0x3657   :  { %3480 = vmatpush1.bf16.msra.mxu0 %v8848_v62  ;;  %3503 = vmatprep.mubr.bf16.mxu0 %v8024_v45 }
0x3658   :  { %3481 = vmatprep.subr.bf16.mxu0 %v8853_v46 }
0x365b   :  { %3482 = vmatpush1.bf16.msra.mxu0 %v8855_v14 }
0x365c   :  { %3483 = vmatprep.subr.bf16.mxu0 %v8859_v53 }
0x365f   :  { %3484 = vmatpush1.bf16.msra.mxu0 %v8861_v15 }
0x3660   :  { %3485 = vmatprep.subr.bf16.mxu0 %v8866_v16 }
0x3663   :  { %3486 = vmatpush1.bf16.msra.mxu0 %v8868_v54 }
0x3664   :  { %3639 = vmatprep.subr.bf16.mxu0 %v8846_v13 }
0x3716   :  { %v3345_v50 = vpop.f32.mrf.mxu0 }
0x3717   :  { %v3352_v2 = vadd.f32 %v3345_v50, %v3055_v63 }
0x3718   :  { %v3347_v51 = vpop.f32.mrf.mxu0 }
0x3719   :  { %v3353_v27 = vadd.f32 %v3347_v51, %v3057_v21  ;;  %v6656_v3 = vmul.f32 -1.442695, %v3352_v2 }
0x371a   :  { %v3349_v12 = vpop.f32.mrf.mxu0 }
0x371b   :  { %7597 = vtanh.f32 %v3353_v27  ;;  %v6657_v10 = vmul.f32 -1.442695, %v3353_v27 }
0x371c   :  { %v3350_v56 = vpop.f32.mrf.mxu0  ;;  %7599 = vpow2.f32 %v6656_v3 }
0x3728   :  { %v7598_v1 = vpop.eup %7597 }
0x3729   :  { %3369 = vrot.lane.b32.xlu0 %v7598_v1, %s8018_s19  ;;  %v7600_v26 = vpop.eup %7599 }
0x372a   :  { %v3360_v55 = vadd.f32 1.0, %v7600_v26 }
0x372c   :  { %7601 = vrcp.f32 %v3360_v55 }
0x3739   :  { %v7602_v4 = vpop.eup %7601 }
0x373a   :  { %v3367_v44 = vmul.f32 %v7602_v4, %v3297_v37 }
0x379b   :  { %v3370_v6 = vpop.permute.xlu0 %3369 }
0x379c   :  { %v3372_v43 = vmul.f32 %v7602_v4, %v3370_v6 }
0x379e   :  { %3374 = vrot.lane.b32.xlu1 %v3372_v43, %s8018_s19 }
0x3810   :  { %v3375_v52 = vpop.permute.xlu1 %3374 }
0x3811   :  { %v3377_v9 = vadd.f32 %v3375_v52, %v3367_v44 }
0x3813   :  { %7603 = vtanh.f32 %v3377_v9 }
0x3814   :  { %7605 = vpow2.f32 %v6657_v10 }
0x3820   :  { %v7604_v28 = vpop.eup %7603 }
0x3821   :  { %3380 = vrot.lane.b32.xlu0 %v7604_v28, %s8018_s19  ;;  %v7606_v11 = vpop.eup %7605 }
0x3822   :  { %v3361_v17 = vadd.f32 1.0, %v7606_v11 }
0x3824   :  { %7607 = vrcp.f32 %v3361_v17 }
0x3831   :  { %v7608_v29 = vpop.eup %7607 }
0x3893   :  { %v3381_v24 = vpop.permute.xlu0 %3380 }
0x3894   :  { %v3383_v61 = vmul.f32 %v7608_v29, %v3381_v24 }
0x3896   :  { %3384 = vst.msk [vmem:[#allocation2 + $0x10] sm:$0xff] %vm387_vm3, %v3383_v61  ;;  %v3387_v18 = vpack.c.bf16 %v3383_v61, %v3383_v61 }
0x3898   :  { %6658 = vmatmul.mubr.msk.bf16.vlgmr.msra.gmra.mxu1 %vm387_vm3, %v3387_v18 }
0x3899   :  { %3560 = vmatpush1.bf16.msra.mxu1 %v8848_v62  ;;  %3583 = vmatprep.mubr.bf16.mxu1 %v8024_v45 }
0x389a   :  { %3561 = vmatprep.subr.bf16.mxu1 %v8853_v46 }
0x389d   :  { %3562 = vmatpush1.bf16.msra.mxu1 %v8855_v14 }
0x389e   :  { %3563 = vmatprep.subr.bf16.mxu1 %v8859_v53 }
0x38a1   :  { %3564 = vmatpush1.bf16.msra.mxu1 %v8861_v15 }
0x38a2   :  { %3565 = vmatprep.subr.bf16.mxu1 %v8866_v16 }
0x38a5   :  { %3566 = vmatpush1.bf16.msra.mxu1 %v8868_v54 }
0x38a6   :  { %3719 = vmatprep.subr.bf16.mxu1 %v8846_v13 }
0x3958   :  { %v3425_v22 = vpop.f32.mrf.mxu1 }
0x3959   :  { %v3432_v34 = vadd.f32 %v3425_v22, %v3059_v5 }
0x395a   :  { %v3427_v20 = vpop.f32.mrf.mxu1 }
0x395b   :  { %v3433_v19 = vadd.f32 %v3427_v20, %v3061_v7  ;;  %v6659_v35 = vmul.f32 -1.442695, %v3432_v34  ;;  %v7206_v34 = vld [vmem:[%s9646_s5 + $0x18] sm:$0xff]  }
0x395c   :  { %v3429_v0 = vpop.f32.mrf.mxu1 }
0x395d   :  { %7609 = vtanh.f32 %v3433_v19  ;;  %v6660_v58 = vmul.f32 -1.442695, %v3433_v19 }
0x395e   :  { %v3430_v23 = vpop.f32.mrf.mxu1  ;;  %7611 = vpow2.f32 %v6659_v35 }
0x396a   :  { %v7610_v33 = vpop.eup %7609 }
0x396b   :  { %3449 = vrot.lane.b32.xlu1 %v7610_v33, %s8018_s19  ;;  %v7612_v8 = vpop.eup %7611 }
0x396c   :  { %v3440_v36 = vadd.f32 1.0, %v7612_v8 }
0x396e   :  { %7613 = vrcp.f32 %v3440_v36 }
0x397b   :  { %v7614_v37 = vpop.eup %7613 }
0x397c   :  { %v3447_v13 = vmul.f32 %v7614_v37, %v3377_v9 }
0x39dd   :  { %v3450_v38 = vpop.permute.xlu1 %3449 }
0x39de   :  { %v3452_v39 = vmul.f32 %v7614_v37, %v3450_v38 }
0x39e0   :  { %3454 = vrot.lane.b32.xlu0 %v3452_v39, %s8018_s19 }
0x3a52   :  { %v3455_v40 = vpop.permute.xlu0 %3454 }
0x3a53   :  { %v3457_v41 = vadd.f32 %v3455_v40, %v3447_v13  ;;  %v9001_v13 = vld [vmem:[#allocation2 + $0x8] sm:$0xff] }
0x3a55   :  { %7615 = vtanh.f32 %v3457_v41 }
0x3a56   :  { %7617 = vpow2.f32 %v6660_v58 }
0x3a62   :  { %v7616_v57 = vpop.eup %7615 }
0x3a63   :  { %3460 = vrot.lane.b32.xlu1 %v7616_v57, %s8018_s19  ;;  %v7618_v59 = vpop.eup %7617  ;;  %v7207_v57 = vld [vmem:[%s9646_s5 + $0x10] sm:$0xff]  }
0x3a64   :  { %v3441_v60 = vadd.f32 1.0, %v7618_v59  ;;  %v7208_v59 = vld [vmem:[%s9646_s5 + $0x8] sm:$0xff]  }
0x3a66   :  { %7619 = vrcp.f32 %v3441_v60  ;;  %v7209_v60 = vld [vmem:[%s9646_s5] sm:$0xff]  }
0x3a73   :  { %v7620_v63 = vpop.eup %7619 }
0x3ad5   :  { %v3461_v21 = vpop.permute.xlu1 %3460 }
0x3ad6   :  { %v3463_v5 = vmul.f32 %v7620_v63, %v3461_v21 }
0x3ad8   :  { %3464 = vst.msk [vmem:[#allocation2 + $0x18] sm:$0xff] %vm387_vm3, %v3463_v5  ;;  %v3467_v7 = vpack.c.bf16 %v3463_v5, %v3463_v5  ;;  %v9023_v5 = vld [vmem:[#allocation2 + $0x10] sm:$0xff] }
0x3ada   :  { %6661 = vmatmul.mubr.msk.bf16.vlgmr.msra.gmra.mxu0 %vm387_vm3, %v3467_v7 }
0x3adb   :  { %3640 = vmatpush1.bf16.msra.mxu0 %v8848_v62  ;;  %3663 = vmatprep.mubr.bf16.mxu0 %v8024_v45 }
0x3adc   :  { %3641 = vmatprep.subr.bf16.mxu0 %v8853_v46 }
0x3adf   :  { %3642 = vmatpush1.bf16.msra.mxu0 %v8855_v14  ;;  %v9019_v63 = vld [vmem:[#allocation2 + $0x18] sm:$0xff] }
0x3ae0   :  { %3643 = vmatprep.subr.bf16.mxu0 %v8859_v53  ;;  %v3802_v7 = vpack.c.bf16 %v9019_v63, %v9023_v5 }
0x3ae3   :  { %3644 = vmatpush1.bf16.msra.mxu0 %v8861_v15 }
0x3ae4   :  { %3645 = vmatprep.subr.bf16.mxu0 %v8866_v16 }
0x3ae7   :  { %3646 = vmatpush1.bf16.msra.mxu0 %v8868_v54 }
0x3ae8   :  { %6922 = vmatprep.subr.bf16.mxu0 %v7206_v34 }
0x3b9a   :  { %v3505_v50 = vpop.f32.mrf.mxu0 }
0x3b9b   :  { %v3512_v2 = vadd.f32 %v3505_v50, %v8935_v32 }
0x3b9c   :  { %v3507_v51 = vpop.f32.mrf.mxu0 }
0x3b9d   :  { %v3513_v27 = vadd.f32 %v3507_v51, %v8937_v30  ;;  %v6662_v3 = vmul.f32 -1.442695, %v3512_v2 }
0x3b9e   :  { %v3509_v12 = vpop.f32.mrf.mxu0 }
0x3b9f   :  { %7621 = vtanh.f32 %v3513_v27  ;;  %v6663_v28 = vmul.f32 -1.442695, %v3513_v27 }
0x3ba0   :  { %v3510_v56 = vpop.f32.mrf.mxu0  ;;  %7623 = vpow2.f32 %v6662_v3 }
0x3bac   :  { %v7622_v1 = vpop.eup %7621 }
0x3bad   :  { %3529 = vrot.lane.b32.xlu0 %v7622_v1, %s8018_s19  ;;  %v7624_v26 = vpop.eup %7623 }
0x3bae   :  { %v3520_v55 = vadd.f32 1.0, %v7624_v26 }
0x3bb0   :  { %7625 = vrcp.f32 %v3520_v55 }
0x3bbd   :  { %v7626_v4 = vpop.eup %7625 }
0x3bbe   :  { %v3527_v44 = vmul.f32 %v7626_v4, %v3457_v41  ;;  %v9004_v41 = vld [vmem:[#allocation2] sm:$0xff] }
0x3bbf   :  { %v3801_v58 = vpack.c.bf16 %v9001_v13, %v9004_v41 }
0x3c1f   :  { %v3530_v6 = vpop.permute.xlu0 %3529 }
0x3c20   :  { %v3532_v43 = vmul.f32 %v7626_v4, %v3530_v6 }
0x3c22   :  { %3534 = vrot.lane.b32.xlu1 %v3532_v43, %s8018_s19 }
0x3c94   :  { %v3535_v30 = vpop.permute.xlu1 %3534 }
0x3c95   :  { %v3537_v52 = vadd.f32 %v3535_v30, %v3527_v44 }
0x3c97   :  { %7627 = vtanh.f32 %v3537_v52 }
0x3c98   :  { %7629 = vpow2.f32 %v6663_v28 }
0x3ca4   :  { %v7628_v9 = vpop.eup %7627 }
0x3ca5   :  { %3540 = vrot.lane.b32.xlu0 %v7628_v9, %s8018_s19  ;;  %v7630_v32 = vpop.eup %7629 }
0x3ca6   :  { %v3521_v10 = vadd.f32 1.0, %v7630_v32 }
0x3ca8   :  { %7631 = vrcp.f32 %v3521_v10 }
0x3cb5   :  { %v7632_v11 = vpop.eup %7631 }
0x3d17   :  { %v3541_v17 = vpop.permute.xlu0 %3540 }
0x3d18   :  { %v3543_v29 = vmul.f32 %v7632_v11, %v3541_v17 }
0x3d1a   :  { %3544 = vst.msk [vmem:[#allocation2 + $0x20] sm:$0xff] %vm387_vm3, %v3543_v29  ;;  %v3547_v24 = vpack.c.bf16 %v3543_v29, %v3543_v29 }
0x3d1c   :  { %6664 = vmatmul.mubr.msk.bf16.vlgmr.msra.gmra.mxu1 %vm387_vm3, %v3547_v24 }
0x3d1d   :  { %3720 = vmatpush1.bf16.msra.mxu1 %v8848_v62  ;;  %3743 = vmatprep.mubr.bf16.mxu1 %v8024_v45 }
0x3d1e   :  { %3721 = vmatprep.subr.bf16.mxu1 %v8853_v46 }
0x3d21   :  { %3722 = vmatpush1.bf16.msra.mxu1 %v8855_v14  ;;  %v9027_v50 = vld [vmem:[#allocation2 + $0x20] sm:$0xff] }
0x3d22   :  { %3723 = vmatprep.subr.bf16.mxu1 %v8859_v53 }
0x3d25   :  { %3724 = vmatpush1.bf16.msra.mxu1 %v8861_v15 }
0x3d26   :  { %3725 = vmatprep.subr.bf16.mxu1 %v8866_v16 }
0x3d29   :  { %3726 = vmatpush1.bf16.msra.mxu1 %v8868_v54 }
0x3ddc   :  { %v3585_v61 = vpop.f32.mrf.mxu1 }
0x3ddd   :  { %v3592_v46 = vadd.f32 %v3585_v61, %v8939_v47 }
0x3dde   :  { %v3587_v18 = vpop.f32.mrf.mxu1 }
0x3ddf   :  { %v3593_v22 = vadd.f32 %v3587_v18, %v8941_v48  ;;  %v6665_v14 = vmul.f32 -1.442695, %v3592_v46 }
0x3de0   :  { %v3589_v20 = vpop.f32.mrf.mxu1 }
0x3de1   :  { %7633 = vtanh.f32 %v3593_v22  ;;  %v6666_v35 = vmul.f32 -1.442695, %v3593_v22 }
0x3de2   :  { %v3590_v62 = vpop.f32.mrf.mxu1  ;;  %7635 = vpow2.f32 %v6665_v14 }
0x3dee   :  { %v7634_v19 = vpop.eup %7633 }
0x3def   :  { %3609 = vrot.lane.b32.xlu1 %v7634_v19, %s8018_s19  ;;  %v7636_v53 = vpop.eup %7635 }
0x3df0   :  { %v3600_v15 = vadd.f32 1.0, %v7636_v53 }
0x3df2   :  { %7637 = vrcp.f32 %v3600_v15 }
0x3dff   :  { %v7638_v16 = vpop.eup %7637 }
0x3e00   :  { %v3607_v23 = vmul.f32 %v7638_v16, %v3537_v52 }
0x3e61   :  { %v3610_v0 = vpop.permute.xlu1 %3609 }
0x3e62   :  { %v3612_v54 = vmul.f32 %v7638_v16, %v3610_v0 }
0x3e64   :  { %3614 = vrot.lane.b32.xlu0 %v3612_v54, %s8018_s19 }
0x3ed6   :  { %v3615_v48 = vpop.permute.xlu0 %3614 }
0x3ed7   :  { %v3617_v33 = vadd.f32 %v3615_v48, %v3607_v23 }
0x3ed9   :  { %7639 = vtanh.f32 %v3617_v33 }
0x3eda   :  { %7641 = vpow2.f32 %v6666_v35 }
0x3ee6   :  { %v7640_v47 = vpop.eup %7639 }
0x3ee7   :  { %3620 = vrot.lane.b32.xlu1 %v7640_v47, %s8018_s19  ;;  %v7642_v8 = vpop.eup %7641 }
0x3ee8   :  { %v3601_v36 = vadd.f32 1.0, %v7642_v8 }
0x3eea   :  { %7643 = vrcp.f32 %v3601_v36 }
0x3ef7   :  { %v7644_v37 = vpop.eup %7643 }
0x3f59   :  { %v3621_v38 = vpop.permute.xlu1 %3620 }
0x3f5a   :  { %v3623_v39 = vmul.f32 %v7644_v37, %v3621_v38 }
0x3f5c   :  { %3624 = vst.msk [vmem:[#allocation2 + $0x28] sm:$0xff] %vm387_vm3, %v3623_v39  ;;  %v3627_v40 = vpack.c.bf16 %v3623_v39, %v3623_v39 }
0x3f5e   :  { %6667 = vmatmul.mubr.msk.bf16.vlgmr.msra.gmra.mxu0 %vm387_vm3, %v3627_v40 }
0x3f5f   :  { %6923 = vmatpush3.bf16.msra.mxu0 %v7206_v34  ;;  %6930 = vmatprep.mubr.msk.bf16.mxu0 %vm387_vm3, %v3801_v58 }
0x3f60   :  { %6924 = vmatprep.subr.bf16.mxu0 %v7207_v57 }
0x3f63   :  { %6925 = vmatpush3.bf16.msra.mxu0 %v7207_v57  ;;  %v9021_v21 = vld [vmem:[#allocation2 + $0x28] sm:$0xff] }
0x3f64   :  { %6926 = vmatprep.subr.bf16.mxu0 %v7208_v59  ;;  %v3803_v51 = vpack.c.bf16 %v9021_v21, %v9027_v50 }
0x3f67   :  { %6927 = vmatpush3.bf16.msra.mxu0 %v7208_v59 }
0x3f68   :  { %6928 = vmatprep.subr.bf16.mxu0 %v7209_v60 }
0x3f6b   :  { %6929 = vmatpush3.bf16.msra.mxu0 %v7209_v60 }
0x3f6e   :  { %6931 = vmatmul.mubr.msk.bf16.vlgmr.msra.gmra.mxu0 %vm387_vm3, %v3802_v7 }
0x3f6f   :  { %6934 = vmatprep.mubr.msk.bf16.mxu0 %vm387_vm3, %v3803_v51 }
0x401e   :  { %v3665_v27 = vpop.f32.mrf.mxu0 }
0x401f   :  { %v3672_v26 = vadd.f32 %v3665_v27, %v8943_v49 }
0x4020   :  { %v3667_v12 = vpop.f32.mrf.mxu0 }
0x4021   :  { %v3673_v56 = vadd.f32 %v3667_v12, %v8945_v25  ;;  %v6668_v55 = vmul.f32 -1.442695, %v3672_v26 }
0x4022   :  { %v3669_v1 = vpop.f32.mrf.mxu0 }
0x4023   :  { %7645 = vtanh.f32 %v3673_v56  ;;  %v6669_v32 = vmul.f32 -1.442695, %v3673_v56 }
0x4024   :  { %v3670_v2 = vpop.f32.mrf.mxu0  ;;  %7647 = vpow2.f32 %v6668_v55 }
0x402e   :  { %v6932_v23 = vpop.f32.mrf.mxu0 }
0x402f   :  { %v3908_v34 = vmax.f32 %v6932_v23, 0.0 }
0x4030   :  { %v7646_v3 = vpop.eup %7645 }
0x4031   :  { %3689 = vrot.lane.b32.xlu0 %v7646_v3, %s8018_s19  ;;  %v7648_v4 = vpop.eup %7647 }
0x4032   :  { %v3680_v6 = vadd.f32 1.0, %v7648_v4 }
0x4034   :  { %7649 = vrcp.f32 %v3680_v6 }
0x4041   :  { %v7650_v43 = vpop.eup %7649 }
0x4042   :  { %v3687_v52 = vmul.f32 %v7650_v43, %v3617_v33  ;;  %v6681_v33 = vld [vmem:[#allocation7] ss:$0 sm:$0xff] }
0x4043   :  { %v3923_v8 = vmul.f32 %v6681_v33, %v3908_v34 }
0x4045   :  { %v3935_v38 = vsel %vm301_vm2, %v3923_v8, 0.0 }
0x40a3   :  { %v3690_v44 = vpop.permute.xlu0 %3689 }
0x40a4   :  { %v3692_v30 = vmul.f32 %v7650_v43, %v3690_v44 }
0x40a6   :  { %3694 = vrot.lane.b32.xlu1 %v3692_v30, %s8018_s19 }
0x4118   :  { %v3695_v25 = vpop.permute.xlu1 %3694 }
0x4119   :  { %v3697_v9 = vadd.f32 %v3695_v25, %v3687_v52 }
0x411b   :  { %7651 = vtanh.f32 %v3697_v9 }
0x411c   :  { %7653 = vpow2.f32 %v6669_v32 }
0x4128   :  { %v7652_v28 = vpop.eup %7651 }
0x4129   :  { %3700 = vrot.lane.b32.xlu0 %v7652_v28, %s8018_s19  ;;  %v7654_v49 = vpop.eup %7653 }
0x412a   :  { %v3681_v10 = vadd.f32 1.0, %v7654_v49 }
0x412c   :  { %7655 = vrcp.f32 %v3681_v10 }
0x4139   :  { %v7656_v11 = vpop.eup %7655 }
0x419b   :  { %v3701_v17 = vpop.permute.xlu0 %3700 }
0x419c   :  { %v3703_v29 = vmul.f32 %v7656_v11, %v3701_v17 }
0x419e   :  { %3704 = vst.msk [vmem:[#allocation2 + $0x30] sm:$0xff] %vm387_vm3, %v3703_v29  ;;  %v3707_v24 = vpack.c.bf16 %v3703_v29, %v3703_v29 }
0x41a0   :  { %6670 = vmatmul.mubr.msk.bf16.vlgmr.msra.gmra.mxu1 %vm387_vm3, %v3707_v24 }
0x41a5   :  { %v9053_v55 = vld [vmem:[#allocation2 + $0x30] sm:$0xff] }
0x4260   :  { %v3745_v61 = vpop.f32.mrf.mxu1 }
0x4261   :  { %v3752_v46 = vadd.f32 %v3745_v61, %v8947_v42 }
0x4262   :  { %v3747_v18 = vpop.f32.mrf.mxu1 }
0x4263   :  { %v3753_v22 = vadd.f32 %v3747_v18, %v8949_v31  ;;  %v6671_v14 = vmul.f32 -1.442695, %v3752_v46  ;;  %v3875_v31 = vpop.f32.mrf.mxu0 }
0x4264   :  { %v3749_v20 = vpop.f32.mrf.mxu1  ;;  %v3906_v48 = vmax.f32 %v3875_v31, 0.0 }
0x4265   :  { %7657 = vtanh.f32 %v3753_v22  ;;  %v6933_v35 = vpop.f32.mrf.mxu0  ;;  %v6672_v12 = vmul.f32 -1.442695, %v3753_v22  ;;  %v8025_v22 = vmov 1   ;;  %v3955_v20 = vlaneseq }
0x4266   :  { %v3750_v62 = vpop.f32.mrf.mxu1  ;;  %7659 = vpow2.f32 %v6671_v14  ;;  %v3921_v47 = vmul.f32 %v6681_v33, %v3906_v48  ;;  %v3909_v36 = vmax.f32 %v6933_v35, 0.0  ;;  %7085 = vset.pattern.permute.xlu0 %v8025_v22  ;;  %v3953_v14 = vld [vmem:[%s9648_s7] sm:$0xff] }
0x4267   :  { %v3878_v60 = vpop.f32.mrf.mxu0  ;;  %v9068_v62 = vshrl.u32 %v3955_v20, 7 }
0x4268   :  { %v3929_v42 = vsel %vm301_vm2, %v3921_v47, 0.0  ;;  %v3924_v37 = vmul.f32 %v6681_v33, %v3909_v36  ;;  %v3907_v7 = vmax.f32 %v3878_v60, 0.0 }
0x4269   :  { %v9074_v46 = vsub.s32 0, %v9068_v62  ;;  %v9086_v34 = vsub.s32 3, %v9068_v62  ;;  %v3981_v47 = vsub.s32 4, %v9068_v62 }
0x426a   :  { %v3938_v39 = vsel %vm301_vm2, %v3924_v37, 0.0  ;;  %v3922_v51 = vmul.f32 %v6681_v33, %v3907_v7  ;;  %v3987_v37 = vsub.s32 5, %v9068_v62 }
0x426b   :  { %v3976_v36 = vrot.slane %v3953_v14, %v9086_v34 }
0x426c   :  { %v3932_v27 = vsel %vm301_vm2, %v3922_v51, 0.0  ;;  %v3988_v7 = vrot.slane %v3953_v14, %v3987_v37  ;;  %v3999_v51 = vsub.s32 7, %v9068_v62 }
0x4272   :  { %v7658_v19 = vpop.eup %7657 }
0x4273   :  { %3769 = vrot.lane.b32.xlu1 %v7658_v19, %s8018_s19  ;;  %v7660_v53 = vpop.eup %7659  ;;  %v9071_v19 = vsub.s32 1, %v9068_v62 }
0x4274   :  { %v3760_v15 = vadd.f32 1.0, %v7660_v53 }
0x4276   :  { %7661 = vrcp.f32 %v3760_v15  ;;  %v3964_v15 = vrot.slane %v3953_v14, %v9071_v19 }
0x4283   :  { %v7662_v16 = vpop.eup %7661 }
0x4284   :  { %v3767_v40 = vmul.f32 %v7662_v16, %v3697_v9 }
0x42e5   :  { %v3770_v0 = vpop.permute.xlu1 %3769 }
0x42e6   :  { %v3772_v54 = vmul.f32 %v7662_v16, %v3770_v0  ;;  %v3958_v0 = vrot.slane %v3953_v14, %v9074_v46 }
0x42e8   :  { %3774 = vrot.lane.b32.xlu0 %v3772_v54, %s8018_s19  ;;  %v9082_v54 = vsub.s32 2, %v9068_v62 }
0x4307   :  { %3930 = vadd.xlane.f32.xlu0 %v3929_v42  ;;  %v3982_v42 = vrot.slane %v3953_v14, %v3981_v47 }
0x430b   :  { %3936 = vadd.xlane.f32.xlu0 %v3935_v38 }
0x430f   :  { %3939 = vadd.xlane.f32.xlu0 %v3938_v39 }
0x435a   :  { %v3775_v57 = vpop.permute.xlu0 %3774 }
0x435b   :  { %v9047_v58 = vadd.f32 %v3775_v57, %v3767_v40  ;;  %v3993_v40 = vsub.s32 6, %v9068_v62 }
0x435d   :  { %7663 = vtanh.f32 %v9047_v58 }
0x435e   :  { %7665 = vpow2.f32 %v6672_v12  ;;  %v3994_v12 = vrot.slane %v3953_v14, %v3993_v40 }
0x436a   :  { %v7664_v59 = vpop.eup %7663 }
0x436b   :  { %3780 = vrot.lane.b32.xlu1 %v7664_v59, %s8018_s19  ;;  %v7666_v56 = vpop.eup %7665 }
0x436c   :  { %v3761_v1 = vadd.f32 1.0, %v7666_v56 }
0x436e   :  { %7667 = vrcp.f32 %v3761_v1 }
0x437b   :  { %v7668_v2 = vpop.eup %7667 }
0x438f   :  { %3933 = vadd.xlane.f32.xlu1 %v3932_v27 }
0x4390   :  { %v3931_v53 = vpop.xlane.xlu0 %3930 }
0x4391   :  { %v3959_v48 = vmul.f32 %v3958_v0, %v3931_v53 }
0x4394   :  { %v3937_v31 = vpop.xlane.xlu0 %3936 }
0x4398   :  { %v3940_v38 = vpop.xlane.xlu0 %3939 }
0x4399   :  { %v3977_v59 = vmul.f32 %v3976_v36, %v3940_v38 }
0x43dd   :  { %v3781_v3 = vpop.permute.xlu1 %3780 }
0x43de   :  { %v3783_v26 = vmul.f32 %v7668_v2, %v3781_v3 }
0x43e0   :  { %3784 = vst.msk [vmem:[#allocation2 + $0x38] sm:$0xff] %vm387_vm3, %v3783_v26  ;;  %v4000_v26 = vrot.slane %v3953_v14, %v3999_v51 }
0x43e7   :  { %v9055_v4 = vld [vmem:[#allocation2 + $0x38] sm:$0xff] }
0x43e8   :  { %v9059_v6 = vpack.c.bf16 %v9055_v4, %v9053_v55 }
0x43ea   :  { %6935 = vmatmul.mubr.msk.bf16.gmra.mxu0 %vm387_vm3, %v9059_v6 }
0x4418   :  { %v3934_v16 = vpop.xlane.xlu1 %3933 }
0x4419   :  { %v3965_v23 = vmul.f32 %v3964_v15, %v3934_v16 }
0x441b   :  { %v3966_v35 = vadd.f32 %v3965_v23, %v3959_v48 }
0x44aa   :  { %v6936_v43 = vpop.f32.mrf.mxu0 }
0x44ab   :  { %v3912_v30 = vmax.f32 %v6936_v43, 0.0 }
0x44ac   :  { %v3891_v44 = vpop.f32.mrf.mxu0 }
0x44ad   :  { %v3910_v52 = vmax.f32 %v3891_v44, 0.0  ;;  %v3927_v32 = vmul.f32 %v6681_v33, %v3912_v30 }
0x44ae   :  { %v6937_v25 = vpop.f32.mrf.mxu0 }
0x44af   :  { %v3925_v9 = vmul.f32 %v6681_v33, %v3910_v52  ;;  %v3913_v49 = vmax.f32 %v6937_v25, 0.0  ;;  %v3947_v24 = vsel %vm301_vm2, %v3927_v32, 0.0  ;;  %v8026_v32 = vmov 2  }
0x44b0   :  { %v3894_v28 = vpop.f32.mrf.mxu0 }
0x44b1   :  { %v3911_v10 = vmax.f32 %v3894_v28, 0.0  ;;  %v3941_v11 = vsel %vm301_vm2, %v3925_v9, 0.0  ;;  %v3928_v29 = vmul.f32 %v6681_v33, %v3913_v49  ;;  %v8027_v49 = vmov 3  }
0x44b2   :  { %3942 = vadd.xlane.f32.xlu1 %v3941_v11  ;;  %v3954_v11 = vld [vmem:[%s9649_s8] sm:$0xf] }
0x44b3   :  { %v3926_v17 = vmul.f32 %v6681_v33, %v3911_v10  ;;  %v3950_v18 = vsel %vm301_vm2, %v3928_v29, 0.0  ;;  %v3970_v33 = vrot.slane %v3953_v14, %v9082_v54  ;;  %v8028_v10 = vmov 6  }
0x44b4   :  { %v4022_v29 = vrot.slane %v3954_v11, %v9071_v19  ;;  %v4042_v16 = vrot.slane %v3954_v11, %v9086_v34 }
0x44b5   :  { %v3944_v61 = vsel %vm301_vm2, %v3926_v17, 0.0  ;;  %v3971_v8 = vmul.f32 %v3970_v33, %v3937_v31 }
0x44b6   :  { %3948 = vadd.xlane.f32.xlu1 %v3947_v24  ;;  %3945 = vadd.xlane.f32.xlu0 %v3944_v61  ;;  %v4012_v24 = vrot.slane %v3954_v11, %v9074_v46 }
0x44b7   :  { %v3972_v39 = vadd.f32 %v3971_v8, %v3966_v35 }
0x44b9   :  { %v3978_v27 = vadd.f32 %v3977_v59, %v3972_v39  ;;  %v7210_v39 = vld [vmem:[#allocation9 + $0x18] sm:$0xff]   ;;  %v7212_v59 = vld [vmem:[#allocation9 + $0x10] sm:$0xff]  }
0x44ba   :  { %3951 = vadd.xlane.f32.xlu0 %v3950_v18  ;;  %v4032_v18 = vrot.slane %v3954_v11, %v9082_v54  ;;  %6938 = vmatprep.subr.bf16.mxu1 %v7210_v39 }
0x44bb   :  { %6939 = vmatpush3.bf16.msra.mxu1 %v7210_v39  ;;  %v7229_v39 = vld [vmem:[#allocation10 + $0x20] ss:$8 sps:$4 sm:$0xff]  }
0x44bc   :  { %6940 = vmatprep.subr.bf16.mxu1 %v7212_v59 }
0x44bf   :  { %6941 = vmatpush3.bf16.msra.mxu1 %v7212_v59  ;;  %v9170_v59 = vld [vmem:[#allocation12] ss:$8 sps:$4 sm:$0xff]  }
0x453b   :  { %v3943_v57 = vpop.xlane.xlu1 %3942 }
0x453c   :  { %v3983_v60 = vmul.f32 %v3982_v42, %v3943_v57  ;;  %v7211_v57 = vld [vmem:[#allocation9 + $0x38] sm:$0xff]  }
0x453d   :  { %6954 = vmatprep.subr.bf16.mxu0 %v7211_v57 }
0x453e   :  { %v3984_v2 = vadd.f32 %v3983_v60, %v3978_v27  ;;  %6955 = vmatpush3.bf16.msra.mxu0 %v7211_v57  ;;  %v7213_v60 = vld [vmem:[#allocation9 + $0x30] sm:$0xff]   ;;  %v7215_v27 = vld [vmem:[#allocation9 + $0x28] sm:$0xff]  }
0x453f   :  { %v3949_v56 = vpop.xlane.xlu1 %3948  ;;  %v3946_v1 = vpop.xlane.xlu0 %3945  ;;  %6956 = vmatprep.subr.bf16.mxu0 %v7213_v60  ;;  %v9168_v57 = vld [vmem:[#allocation12 + $0x4] ss:$8 sps:$4 sm:$0xff]  }
0x4540   :  { %v3989_v3 = vmul.f32 %v3988_v7, %v3946_v1  ;;  %v3995_v43 = vmul.f32 %v3994_v12, %v3949_v56  ;;  %v7214_v7 = vld [vmem:[#allocation9 + $0x8] sm:$0xff]   ;;  %v7216_v12 = vld [vmem:[#allocation9] sm:$0xff]   ;;  %v8029_v1 = vmov 4  }
0x4541   :  { %6942 = vmatprep.subr.bf16.mxu1 %v7214_v7  ;;  %v7217_v56 = vld [vmem:[#allocation9 + $0x20] sm:$0xff]  }
0x4542   :  { %v3990_v44 = vadd.f32 %v3989_v3, %v3984_v2  ;;  %6957 = vmatpush3.bf16.msra.mxu0 %v7213_v60  ;;  %6943 = vmatpush3.bf16.msra.mxu1 %v7214_v7  ;;  %v8030_v2 = vmov 5   ;;  %v8031_v3 = vmov 7   ;;  %v7235_v60 = vld [vmem:[#allocation10 + $0x10] ss:$8 sps:$4 sm:$0xff]   ;;  %v7237_v7 = vld [vmem:[#allocation10 + $0x14] ss:$8 sps:$4 sm:$0xff]  }
0x4543   :  { %v3952_v30 = vpop.xlane.xlu0 %3951  ;;  %6958 = vmatprep.subr.bf16.mxu0 %v7215_v27  ;;  %6944 = vmatprep.subr.bf16.mxu1 %v7216_v12 }
0x4544   :  { %v3996_v52 = vadd.f32 %v3995_v43, %v3990_v44  ;;  %v4001_v25 = vmul.f32 %v4000_v26, %v3952_v30  ;;  %v9124_v26 = vld [vmem:[#allocation12 + $0x34] ss:$8 sps:$4 sm:$0xff]  }
0x4546   :  { %v4002_v9 = vadd.f32 %v4001_v25, %v3996_v52  ;;  %6959 = vmatpush3.bf16.msra.mxu0 %v7215_v27  ;;  %6945 = vmatpush3.bf16.msra.mxu1 %v7216_v12  ;;  %v7239_v27 = vld [vmem:[#allocation10] ss:$8 sps:$4 sm:$0xff]   ;;  %v7241_v12 = vld [vmem:[#allocation10 + $0x4] ss:$8 sps:$4 sm:$0xff]  }
0x4547   :  { %6960 = vmatprep.subr.bf16.mxu0 %v7217_v56 }
0x4548   :  { %v4003_v28 = vmax.f32 %v4002_v9, 0.0 }
0x454a   :  { %4016 = vperm.xlu0 %7085, %v4003_v28   ;;  %4006 = vperm.xlu1 %7084, %v4003_v28  }
0x454b   :  { %6961 = vmatpush3.bf16.msra.mxu0 %v7217_v56 }
0x454c   :  { %4521 = vmatprep.subr.bf16.mxu0 %v9124_v26 }
0x454e   :  { %7086 = vset.pattern.permute.xlu1 %v8026_v32  ;;  %7094 = vset.pattern.permute.xlu0 %v8028_v10 }
0x454f   :  { %4026 = vperm.xlu1 %7086, %v4003_v28  }
0x4553   :  { %7087 = vset.pattern.permute.xlu1 %v8027_v49 }
0x4554   :  { %4036 = vperm.xlu1 %7087, %v4003_v28  }
0x4558   :  { %7088 = vset.pattern.permute.xlu1 %v8024_v45 }
0x45c5   :  { %v4007_v17 = vpop.permute.xlu1 %4006  ;;  %v4017_v61 = vpop.permute.xlu0 %4016 }
0x45c6   :  { %v4023_v20 = vmul.f32 %v4022_v29, %v4017_v61  ;;  %v4013_v14 = vmul.f32 %v4012_v24, %v4007_v17 }
0x45c8   :  { %v4024_v0 = vadd.f32 %v4023_v20, %v4013_v14 }
0x45ca   :  { %v4027_v53 = vpop.permute.xlu1 %4026 }
0x45cb   :  { %v4033_v15 = vmul.f32 %v4032_v18, %v4027_v53 }
0x45cd   :  { %v4034_v31 = vadd.f32 %v4033_v15, %v4024_v0 }
0x45cf   :  { %v4037_v23 = vpop.permute.xlu1 %4036 }
0x45d0   :  { %v4043_v48 = vmul.f32 %v4042_v16, %v4037_v23 }
0x45d2   :  { %v4044_v33 = vadd.f32 %v4043_v48, %v4034_v31  ;;  %v9156_v48 = vld [vmem:[#allocation12 + $0x24] ss:$8 sps:$4 sm:$0xff]  }
0x45d4   :  { %v6682_v35 = vmul.f32 -1.442695, %v4044_v33  ;;  %v9158_v33 = vld [vmem:[#allocation12 + $0x20] ss:$8 sps:$4 sm:$0xff]  }
0x45d6   :  { %7669 = vpow2.f32 %v6682_v35  ;;  %v7225_v35 = vld [vmem:[#allocation10 + $0x34] ss:$8 sps:$4 sm:$0xff]  }
0x45d7   :  { %4400 = vmatprep.subr.bf16.mxu1 %v7225_v35 }
0x45e3   :  { %v7670_v8 = vpop.eup %7669 }
0x45e4   :  { %v4048_v36 = vadd.f32 1.0, %v7670_v8  ;;  %v7223_v8 = vld [vmem:[#allocation10 + $0x30] ss:$8 sps:$4 sm:$0xff]  }
0x45e6   :  { %7671 = vrcp.f32 %v4048_v36  ;;  %v9162_v36 = vld [vmem:[#allocation12 + $0x14] ss:$8 sps:$4 sm:$0xff]  }
0x45f3   :  { %v7672_v42 = vpop.eup %7671 }
0x45f4   :  { %4052 = vst.msk [vmem:[%s9657_s16] sm:$0xff] %vm4051_vm4, %v7672_v42  ;;  %v4053_v38 = vadd.f32 1.0, %v7672_v42  ;;  %v9164_v42 = vld [vmem:[#allocation12 + $0x10] ss:$8 sps:$4 sm:$0xff]  }
0x45f6   :  { %4092 = vperm.xlu0 %7094, %v4053_v38   ;;  %4056 = vperm.xlu1 %7088, %v4053_v38  }
0x45fa   :  { %7089 = vset.pattern.permute.xlu1 %v8025_v22  ;;  %7097 = vset.pattern.permute.xlu0 %v8026_v32 }
0x45fb   :  { %4062 = vperm.xlu1 %7089, %v4053_v38  }
0x45ff   :  { %7090 = vset.pattern.permute.xlu1 %v8026_v32 }
0x4600   :  { %4068 = vperm.xlu1 %7090, %v4053_v38  }
0x4604   :  { %7091 = vset.pattern.permute.xlu1 %v8027_v49 }
0x4605   :  { %4074 = vperm.xlu1 %7091, %v4053_v38  }
0x4609   :  { %7092 = vset.pattern.permute.xlu1 %v8029_v1 }
0x460a   :  { %4080 = vperm.xlu1 %7092, %v4053_v38  }
0x460e   :  { %7093 = vset.pattern.permute.xlu1 %v8030_v2 }
0x460f   :  { %4086 = vperm.xlu1 %7093, %v4053_v38  }
0x4613   :  { %7095 = vset.pattern.permute.xlu1 %v8031_v3 }
0x4614   :  { %4098 = vperm.xlu1 %7095, %v4053_v38   ;;  %v7231_v38 = vld [vmem:[#allocation10 + $0x24] ss:$8 sps:$4 sm:$0xff]  }
0x4618   :  { %7096 = vset.pattern.permute.xlu1 %v8024_v45 }
0x4671   :  { %v4093_v43 = vpop.permute.xlu0 %4092  ;;  %v4057_v44 = vpop.permute.xlu1 %4056 }
0x4672   :  { %v4095_v30 = vmul.f32 %v4093_v43, %v9053_v55  ;;  %v4059_v52 = vmul.f32 %v4057_v44, %v9004_v41 }
0x4674   :  { %4096 = vst.msk [vmem:[#allocation4 + $0x30] sm:$0xff] %vm387_vm3, %v4095_v30  ;;  %4060 = vst.msk [vmem:[#allocation4] sm:$0xff] %vm387_vm3, %v4059_v52 }
0x4676   :  { %v4063_v25 = vpop.permute.xlu1 %4062 }
0x4677   :  { %v4065_v9 = vmul.f32 %v4063_v25, %v9001_v13 }
0x4679   :  { %4066 = vst.msk [vmem:[#allocation4 + $0x8] sm:$0xff] %vm387_vm3, %v4065_v9 }
0x467b   :  { %v4069_v28 = vpop.permute.xlu1 %4068  ;;  %v4103_v29 = vld [vmem:[#allocation4] sm:$0xff] }
0x467c   :  { %v4071_v11 = vmul.f32 %v4069_v28, %v9023_v5 }
0x467e   :  { %4072 = vst.msk [vmem:[#allocation4 + $0x10] sm:$0xff] %vm387_vm3, %v4071_v11 }
0x4680   :  { %v4075_v17 = vpop.permute.xlu1 %4074  ;;  %v4104_v24 = vld [vmem:[#allocation4 + $0x8] sm:$0xff] }
0x4681   :  { %v4077_v55 = vmul.f32 %v4075_v17, %v9019_v63  ;;  %v4119_v41 = vpack.c.bf16 %v4104_v24, %v4103_v29 }
0x4683   :  { %4078 = vst.msk [vmem:[#allocation4 + $0x18] sm:$0xff] %vm387_vm3, %v4077_v55  ;;  %6946 = vmatprep.mubr.msk.bf16.mxu1 %vm387_vm3, %v4119_v41  ;;  %6962 = vmatprep.mubr.msk.bf16.mxu0 %vm387_vm3, %v4119_v41 }
0x4685   :  { %v4081_v13 = vpop.permute.xlu1 %4080  ;;  %v4105_v18 = vld [vmem:[#allocation4 + $0x10] sm:$0xff] }
0x4686   :  { %v4083_v61 = vmul.f32 %v4081_v13, %v9027_v50 }
0x4688   :  { %4084 = vst.msk [vmem:[#allocation4 + $0x20] sm:$0xff] %vm387_vm3, %v4083_v61 }
0x468a   :  { %v4087_v5 = vpop.permute.xlu1 %4086  ;;  %v4106_v20 = vld [vmem:[#allocation4 + $0x18] sm:$0xff] }
0x468b   :  { %v4089_v14 = vmul.f32 %v4087_v5, %v9021_v21  ;;  %v4120_v53 = vpack.c.bf16 %v4106_v20, %v4105_v18  ;;  %v4109_v21 = vld [vmem:[#allocation4 + $0x30] sm:$0xff] }
0x468d   :  { %4090 = vst.msk [vmem:[#allocation4 + $0x28] sm:$0xff] %vm387_vm3, %v4089_v14  ;;  %6947 = vmatmul.mubr.msk.bf16.vlgmr.msra.gmra.mxu1 %vm387_vm3, %v4120_v53  ;;  %6963 = vmatmul.mubr.msk.bf16.vlgmr.msra.gmra.mxu0 %vm387_vm3, %v4120_v53 }
0x468e   :  { %4401 = vmatpush1.bf16.msra.mxu1 %v7223_v8 }
0x468f   :  { %v4099_v63 = vpop.permute.xlu1 %4098  ;;  %v4107_v50 = vld [vmem:[#allocation4 + $0x20] sm:$0xff]  ;;  %4402 = vmatprep.subr.bf16.mxu1 %v7231_v38 }
0x4690   :  { %v4101_v15 = vmul.f32 %v4099_v63, %v9055_v4  ;;  %v9153_v4 = vld [vmem:[#allocation12 + $0x30] ss:$8 sps:$4 sm:$0xff]  }
0x4691   :  { %4522 = vmatpush1.bf16.msra.mxu0 %v9153_v4 }
0x4692   :  { %4102 = vst.msk [vmem:[#allocation4 + $0x38] sm:$0xff] %vm387_vm3, %v4101_v15  ;;  %4523 = vmatprep.subr.bf16.mxu0 %v9156_v48  ;;  %4403 = vmatpush1.bf16.msra.mxu1 %v7229_v39 }
0x4693   :  { %4404 = vmatprep.subr.bf16.mxu1 %v7237_v7 }
0x4694   :  { %v4108_v16 = vld [vmem:[#allocation4 + $0x28] sm:$0xff] }
0x4695   :  { %v4121_v0 = vpack.c.bf16 %v4108_v16, %v4107_v50  ;;  %4524 = vmatpush1.bf16.msra.mxu0 %v9158_v33 }
0x4696   :  { %4525 = vmatprep.subr.bf16.mxu0 %v9162_v36  ;;  %4405 = vmatpush1.bf16.msra.mxu1 %v7235_v60 }
0x4697   :  { %6950 = vmatprep.mubr.msk.bf16.mxu1 %vm387_vm3, %v4121_v0  ;;  %6966 = vmatprep.mubr.msk.bf16.mxu0 %vm387_vm3, %v4121_v0 }
0x4698   :  { %4406 = vmatprep.subr.bf16.mxu1 %v7241_v12 }
0x4699   :  { %v4110_v23 = vld [vmem:[#allocation4 + $0x38] sm:$0xff]  ;;  %4526 = vmatpush1.bf16.msra.mxu0 %v9164_v42 }
0x469a   :  { %v4122_v31 = vpack.c.bf16 %v4110_v23, %v4109_v21  ;;  %4527 = vmatprep.subr.bf16.mxu0 %v9168_v57  ;;  %4407 = vmatpush1.bf16.msra.mxu1 %v7239_v27 }
0x469b   :  { %4601 = vmatprep.subr.bf16.mxu1 %v9124_v26 }
0x469c   :  { %6951 = vmatmul.mubr.msk.bf16.gmra.mxu1 %vm387_vm3, %v4122_v31  ;;  %6967 = vmatmul.mubr.msk.bf16.gmra.mxu0 %vm387_vm3, %v4122_v31 }
0x469d   :  { %4545 = vmatprep.mubr.bf16.mxu0 %v8024_v45  ;;  %4424 = vmatprep.mubr.bf16.mxu1 %v8024_v45 }
0x469e   :  { %4528 = vmatpush1.bf16.msra.mxu0 %v9170_v59 }
0x469f   :  { %4681 = vmatprep.subr.bf16.mxu0 %v9124_v26 }
0x46a4   :  { %4546 = vmatmul.mubr.bf16.vlgmr.msra.gmra.mxu0 %v8024_v45 }
0x46a5   :  { %4682 = vmatpush1.bf16.msra.mxu0 %v9153_v4  ;;  %4705 = vmatprep.mubr.bf16.mxu0 %v8024_v45 }
0x46a6   :  { %4683 = vmatprep.subr.bf16.mxu0 %v9156_v48 }
0x46a9   :  { %4684 = vmatpush1.bf16.msra.mxu0 %v9158_v33 }
0x46aa   :  { %4685 = vmatprep.subr.bf16.mxu0 %v9162_v36 }
0x46ad   :  { %4686 = vmatpush1.bf16.msra.mxu0 %v9164_v42 }
0x46ae   :  { %4687 = vmatprep.subr.bf16.mxu0 %v9168_v57 }
0x46b1   :  { %4688 = vmatpush1.bf16.msra.mxu0 %v9170_v59 }
0x46b2   :  { %4841 = vmatprep.subr.bf16.mxu0 %v9124_v26 }
0x474d   :  { %v6948_v56 = vpop.f32.mrf.mxu1  ;;  %v6964_v43 = vpop.f32.mrf.mxu0 }
0x474f   :  { %v4193_v44 = vpop.f32.mrf.mxu1  ;;  %v4287_v30 = vpop.f32.mrf.mxu0 }
0x4750   :  { %v4314_v52 = vmax.f32 %v4287_v30, 0.0 }
0x4751   :  { %v6949_v25 = vpop.f32.mrf.mxu1  ;;  %v6965_v9 = vpop.f32.mrf.mxu0 }
0x4752   :  { %4315 = vst.msk [vmem:[#allocation4] sm:$0xff] %vm387_vm3, %v4314_v52 }
0x4753   :  { %v4195_v28 = vpop.f32.mrf.mxu1  ;;  %v4290_v11 = vpop.f32.mrf.mxu0 }
0x4754   :  { %v4316_v17 = vadd.f32 %v6964_v43, %v4195_v28 }
0x4756   :  { %v4317_v29 = vmax.f32 %v4316_v17, 0.0 }
0x4758   :  { %4318 = vst.msk [vmem:[#allocation4 + $0x8] sm:$0xff] %vm387_vm3, %v4317_v29 }
0x4759   :  { %v4327_v5 = vld [vmem:[#allocation4] sm:$0xff] }
0x475c   :  { %v6952_v24 = vpop.f32.mrf.mxu1  ;;  %v6968_v55 = vpop.f32.mrf.mxu0 }
0x475e   :  { %v4207_v41 = vpop.f32.mrf.mxu1  ;;  %v4301_v13 = vpop.f32.mrf.mxu0 }
0x475f   :  { %v4319_v61 = vadd.f32 %v6949_v25, %v4301_v13  ;;  %v4328_v18 = vld [vmem:[#allocation4 + $0x8] sm:$0xff] }
0x4760   :  { %v6953_v20 = vpop.f32.mrf.mxu1  ;;  %v6969_v14 = vpop.f32.mrf.mxu0  ;;  %v4340_v53 = vpack.c.bf16 %v4328_v18, %v4327_v5 }
0x4761   :  { %v4320_v63 = vmax.f32 %v4319_v61, 0.0  ;;  %v4325_v15 = vmax.f32 %v6953_v20, 0.0 }
0x4762   :  { %v4209_v50 = vpop.f32.mrf.mxu1  ;;  %v4304_v16 = vpop.f32.mrf.mxu0  ;;  %6707 = vmatmul.mubr.msk.bf16.vlgmr.msra.gmra.mxu1 %vm387_vm3, %v4340_v53 }
0x4763   :  { %4321 = vst.msk [vmem:[#allocation4 + $0x10] sm:$0xff] %vm387_vm3, %v4320_v63  ;;  %4326 = vst.msk [vmem:[#allocation4 + $0x20] sm:$0xff] %vm387_vm3, %v4325_v15  ;;  %v4322_v0 = vadd.f32 %v6968_v55, %v4209_v50  ;;  %4434 = vmatprep.mubr.bf16.mxu1 %v8024_v45  ;;  %4602 = vmatpush1.bf16.msra.mxu1 %v9153_v4 }
0x4764   :  { %4603 = vmatprep.subr.bf16.mxu1 %v9156_v48  ;;  %v4547_v39 = vpop.f32.mrf.mxu0 }
0x4765   :  { %v4323_v21 = vmax.f32 %v4322_v0, 0.0 }
0x4766   :  { %v4549_v60 = vpop.f32.mrf.mxu0 }
0x4767   :  { %4324 = vst.msk [vmem:[#allocation4 + $0x18] sm:$0xff] %vm387_vm3, %v4323_v21  ;;  %4604 = vmatpush1.bf16.msra.mxu1 %v9158_v33 }
0x4768   :  { %4605 = vmatprep.subr.bf16.mxu1 %v9162_v36  ;;  %v4551_v7 = vpop.f32.mrf.mxu0 }
0x476a   :  { %v4329_v23 = vld [vmem:[#allocation4 + $0x10] sm:$0xff]  ;;  %v4331_v8 = vld [vmem:[#allocation4 + $0x20] sm:$0xff]  ;;  %v4552_v27 = vpop.f32.mrf.mxu0 }
0x476b   :  { %4606 = vmatpush1.bf16.msra.mxu1 %v9164_v42  ;;  %v4342_v38 = vpack.c.bf16 %v4331_v8, %v4331_v8 }
0x476c   :  { %4607 = vmatprep.subr.bf16.mxu1 %v9168_v57 }
0x476e   :  { %v4330_v31 = vld [vmem:[#allocation4 + $0x18] sm:$0xff] }
0x476f   :  { %v4341_v35 = vpack.c.bf16 %v4330_v31, %v4329_v23  ;;  %4608 = vmatpush1.bf16.msra.mxu1 %v9170_v59 }
0x4770   :  { %4761 = vmatprep.subr.bf16.mxu1 %v9124_v26 }
0x4771   :  { %6708 = vmatmul.mubr.msk.bf16.gmra.mxu1 %vm387_vm3, %v4341_v35 }
0x4772   :  { %4444 = vmatprep.mubr.bf16.mxu1 %v8024_v45 }
0x4779   :  { %6709 = vmatmul.mubr.msk.bf16.gmra.mxu1 %vm387_vm3, %v4342_v38 }
0x477a   :  { %4625 = vmatprep.mubr.bf16.mxu1 %v8024_v45 }
0x4822   :  { %v4426_v12 = vpop.f32.mrf.mxu1 }
0x4823   :  { %v4554_v55 = vadd.f32 %v4547_v39, %v4426_v12 }
0x4824   :  { %v4428_v56 = vpop.f32.mrf.mxu1 }
0x4825   :  { %v4555_v43 = vadd.f32 %v4549_v60, %v4428_v56  ;;  %v6718_v41 = vmul.f32 -1.442695, %v4554_v55 }
0x4826   :  { %v4430_v44 = vpop.f32.mrf.mxu1 }
0x4827   :  { %7673 = vtanh.f32 %v4555_v43  ;;  %v6719_v50 = vmul.f32 -1.442695, %v4555_v43 }
0x4828   :  { %v4432_v26 = vpop.f32.mrf.mxu1  ;;  %7675 = vpow2.f32 %v6718_v41 }
0x4831   :  { %v9205_v30 = vpop.f32.mrf.mxu1 }
0x4833   :  { %v9207_v52 = vpop.f32.mrf.mxu1 }
0x4834   :  { %v7674_v25 = vpop.eup %7673 }
0x4835   :  { %v9209_v9 = vpop.f32.mrf.mxu1  ;;  %4571 = vrot.lane.b32.xlu1 %v7674_v25, %s8018_s19  ;;  %v7676_v13 = vpop.eup %7675 }
0x4836   :  { %v4562_v61 = vadd.f32 1.0, %v7676_v13 }
0x4837   :  { %v9212_v28 = vpop.f32.mrf.mxu1 }
0x4838   :  { %7677 = vrcp.f32 %v4562_v61 }
0x4839   :  { %v9214_v11 = vpop.f32.mrf.mxu1 }
0x483b   :  { %v9216_v17 = vpop.f32.mrf.mxu1 }
0x483d   :  { %v4450_v29 = vpop.f32.mrf.mxu1 }
0x483f   :  { %v4451_v24 = vpop.f32.mrf.mxu1 }
0x4845   :  { %v7678_v5 = vpop.eup %7677 }
0x4846   :  { %v4569_v14 = vmul.f32 %v7678_v5, %v9047_v58 }
0x48a7   :  { %v4572_v18 = vpop.permute.xlu1 %4571 }
0x48a8   :  { %v4574_v20 = vmul.f32 %v7678_v5, %v4572_v18 }
0x48aa   :  { %4576 = vrot.lane.b32.xlu0 %v4574_v20, %s8018_s19 }
0x491c   :  { %v4577_v53 = vpop.permute.xlu0 %4576 }
0x491d   :  { %v4579_v63 = vadd.f32 %v4577_v53, %v4569_v14 }
0x491f   :  { %7679 = vtanh.f32 %v4579_v63 }
0x4920   :  { %7681 = vpow2.f32 %v6719_v50 }
0x492c   :  { %v7680_v15 = vpop.eup %7679 }
0x492d   :  { %4582 = vrot.lane.b32.xlu1 %v7680_v15, %s8018_s19  ;;  %v7682_v16 = vpop.eup %7681 }
0x492e   :  { %v4563_v0 = vadd.f32 1.0, %v7682_v16 }
0x4930   :  { %7683 = vrcp.f32 %v4563_v0 }
0x493d   :  { %v7684_v21 = vpop.eup %7683 }
0x499f   :  { %v4583_v23 = vpop.permute.xlu1 %4582 }
0x49a0   :  { %v4585_v31 = vmul.f32 %v7684_v21, %v4583_v23 }
0x49a2   :  { %4586 = vst.msk [vmem:[#allocation4] sm:$0xff] %vm387_vm3, %v4585_v31  ;;  %v4589_v35 = vpack.c.bf16 %v4585_v31, %v4585_v31 }
0x49a4   :  { %6720 = vmatmul.mubr.msk.bf16.vlgmr.msra.gmra.mxu1 %vm387_vm3, %v4589_v35 }
0x49a5   :  { %4762 = vmatpush1.bf16.msra.mxu1 %v9153_v4  ;;  %4785 = vmatprep.mubr.bf16.mxu1 %v8024_v45 }
0x49a6   :  { %4763 = vmatprep.subr.bf16.mxu1 %v9156_v48 }
0x49a9   :  { %4764 = vmatpush1.bf16.msra.mxu1 %v9158_v33 }
0x49aa   :  { %4765 = vmatprep.subr.bf16.mxu1 %v9162_v36 }
0x49ad   :  { %4766 = vmatpush1.bf16.msra.mxu1 %v9164_v42 }
0x49ae   :  { %4767 = vmatprep.subr.bf16.mxu1 %v9168_v57 }
0x49b1   :  { %4768 = vmatpush1.bf16.msra.mxu1 %v9170_v59 }
0x4a64   :  { %v4627_v8 = vpop.f32.mrf.mxu1 }
0x4a65   :  { %v4634_v12 = vadd.f32 %v4627_v8, %v4430_v44 }
0x4a66   :  { %v4629_v38 = vpop.f32.mrf.mxu1 }
0x4a67   :  { %v4635_v39 = vadd.f32 %v4629_v38, %v4432_v26  ;;  %v6721_v56 = vmul.f32 -1.442695, %v4634_v12 }
0x4a68   :  { %v4631_v60 = vpop.f32.mrf.mxu1 }
0x4a69   :  { %7685 = vtanh.f32 %v4635_v39  ;;  %v6722_v5 = vmul.f32 -1.442695, %v4635_v39 }
0x4a6a   :  { %v4632_v7 = vpop.f32.mrf.mxu1  ;;  %7687 = vpow2.f32 %v6721_v56 }
0x4a76   :  { %v7686_v27 = vpop.eup %7685 }
0x4a77   :  { %4651 = vrot.lane.b32.xlu0 %v7686_v27, %s8018_s19  ;;  %v7688_v43 = vpop.eup %7687 }
0x4a78   :  { %v4642_v25 = vadd.f32 1.0, %v7688_v43 }
0x4a7a   :  { %7689 = vrcp.f32 %v4642_v25 }
0x4a87   :  { %v7690_v29 = vpop.eup %7689 }
0x4a88   :  { %v4649_v41 = vmul.f32 %v7690_v29, %v4579_v63 }
0x4ae9   :  { %v4652_v24 = vpop.permute.xlu0 %4651 }
0x4aea   :  { %v4654_v55 = vmul.f32 %v7690_v29, %v4652_v24 }
0x4aec   :  { %4656 = vrot.lane.b32.xlu1 %v4654_v55, %s8018_s19 }
0x4b5e   :  { %v4657_v13 = vpop.permute.xlu1 %4656 }
0x4b5f   :  { %v4659_v26 = vadd.f32 %v4657_v13, %v4649_v41 }
0x4b61   :  { %7691 = vtanh.f32 %v4659_v26 }
0x4b62   :  { %7693 = vpow2.f32 %v6722_v5 }
0x4b6e   :  { %v7692_v61 = vpop.eup %7691 }
0x4b6f   :  { %4662 = vrot.lane.b32.xlu0 %v7692_v61, %s8018_s19  ;;  %v7694_v44 = vpop.eup %7693 }
0x4b70   :  { %v4643_v18 = vadd.f32 1.0, %v7694_v44 }
0x4b72   :  { %7695 = vrcp.f32 %v4643_v18 }
0x4b7f   :  { %v7696_v20 = vpop.eup %7695 }
0x4be1   :  { %v4663_v14 = vpop.permute.xlu0 %4662 }
0x4be2   :  { %v4665_v53 = vmul.f32 %v7696_v20, %v4663_v14 }
0x4be4   :  { %4666 = vst.msk [vmem:[#allocation4 + $0x8] sm:$0xff] %vm387_vm3, %v4665_v53  ;;  %v4669_v15 = vpack.c.bf16 %v4665_v53, %v4665_v53 }
0x4be6   :  { %6723 = vmatmul.mubr.msk.bf16.vlgmr.msra.gmra.mxu0 %vm387_vm3, %v4669_v15 }
0x4be7   :  { %4842 = vmatpush1.bf16.msra.mxu0 %v9153_v4  ;;  %4865 = vmatprep.mubr.bf16.mxu0 %v8024_v45 }
0x4be8   :  { %4843 = vmatprep.subr.bf16.mxu0 %v9156_v48 }
0x4beb   :  { %4844 = vmatpush1.bf16.msra.mxu0 %v9158_v33 }
0x4bec   :  { %4845 = vmatprep.subr.bf16.mxu0 %v9162_v36 }
0x4bef   :  { %4846 = vmatpush1.bf16.msra.mxu0 %v9164_v42 }
0x4bf0   :  { %4847 = vmatprep.subr.bf16.mxu0 %v9168_v57 }
0x4bf3   :  { %4848 = vmatpush1.bf16.msra.mxu0 %v9170_v59 }
0x4ca6   :  { %v4707_v63 = vpop.f32.mrf.mxu0 }
0x4ca7   :  { %v4714_v48 = vadd.f32 %v4707_v63, %v9205_v30 }
0x4ca8   :  { %v4709_v50 = vpop.f32.mrf.mxu0 }
0x4ca9   :  { %v4715_v16 = vadd.f32 %v4709_v50, %v9207_v52  ;;  %v6724_v33 = vmul.f32 -1.442695, %v4714_v48 }
0x4caa   :  { %v4711_v0 = vpop.f32.mrf.mxu0 }
0x4cab   :  { %7697 = vtanh.f32 %v4715_v16  ;;  %v6725_v38 = vmul.f32 -1.442695, %v4715_v16 }
0x4cac   :  { %v4712_v4 = vpop.f32.mrf.mxu0  ;;  %7699 = vpow2.f32 %v6724_v33  ;;  %v9265_v33 = vld [vmem:[#allocation2] sm:$0xff] }
0x4cb8   :  { %v7698_v21 = vpop.eup %7697 }
0x4cb9   :  { %4731 = vrot.lane.b32.xlu1 %v7698_v21, %s8018_s19  ;;  %v7700_v36 = vpop.eup %7699  ;;  %v9262_v21 = vld [vmem:[#allocation2 + $0x8] sm:$0xff] }
0x4cba   :  { %v4722_v42 = vadd.f32 1.0, %v7700_v36  ;;  %v7243_v36 = vld [vmem:[%s9646_s5 + $0x30] sm:$0xff]  }
0x4cbc   :  { %7701 = vrcp.f32 %v4722_v42  ;;  %v5131_v42 = vpack.c.bf16 %v9262_v21, %v9265_v33 }
0x4cc9   :  { %v7702_v57 = vpop.eup %7701 }
0x4cca   :  { %v4729_v31 = vmul.f32 %v7702_v57, %v4659_v26 }
0x4d2b   :  { %v4732_v23 = vpop.permute.xlu1 %4731 }
0x4d2c   :  { %v4734_v59 = vmul.f32 %v7702_v57, %v4732_v23  ;;  %v7244_v57 = vld [vmem:[%s9646_s5 + $0x28] sm:$0xff]   ;;  %v7245_v23 = vld [vmem:[%s9646_s5 + $0x20] sm:$0xff]  }
0x4d2e   :  { %4736 = vrot.lane.b32.xlu0 %v4734_v59, %s8018_s19  ;;  %v9280_v59 = vld [vmem:[#allocation2 + $0x18] sm:$0xff] }
0x4da0   :  { %v4737_v52 = vpop.permute.xlu0 %4736 }
0x4da1   :  { %v4739_v35 = vadd.f32 %v4737_v52, %v4729_v31  ;;  %v9282_v31 = vld [vmem:[#allocation2 + $0x28] sm:$0xff]  ;;  %v9284_v52 = vld [vmem:[#allocation2 + $0x10] sm:$0xff] }
0x4da3   :  { %7703 = vtanh.f32 %v4739_v35 }
0x4da4   :  { %7705 = vpow2.f32 %v6725_v38 }
0x4db0   :  { %v7704_v8 = vpop.eup %7703 }
0x4db1   :  { %4742 = vrot.lane.b32.xlu1 %v7704_v8, %s8018_s19  ;;  %v7706_v30 = vpop.eup %7705  ;;  %v9288_v8 = vld [vmem:[#allocation2 + $0x20] sm:$0xff] }
0x4db2   :  { %v4723_v39 = vadd.f32 1.0, %v7706_v30  ;;  %v5133_v38 = vpack.c.bf16 %v9282_v31, %v9288_v8 }
0x4db4   :  { %7707 = vrcp.f32 %v4723_v39 }
0x4dc1   :  { %v7708_v60 = vpop.eup %7707 }
0x4e23   :  { %v4743_v7 = vpop.permute.xlu1 %4742 }
0x4e24   :  { %v4745_v27 = vmul.f32 %v7708_v60, %v4743_v7 }
0x4e26   :  { %4746 = vst.msk [vmem:[#allocation4 + $0x10] sm:$0xff] %vm387_vm3, %v4745_v27  ;;  %v4749_v12 = vpack.c.bf16 %v4745_v27, %v4745_v27 }
0x4e28   :  { %6726 = vmatmul.mubr.msk.bf16.vlgmr.msra.gmra.mxu1 %vm387_vm3, %v4749_v12 }
0x4ee8   :  { %v4787_v56 = vpop.f32.mrf.mxu1 }
0x4ee9   :  { %v4794_v41 = vadd.f32 %v4787_v56, %v9209_v9  ;;  %v7242_v9 = vld [vmem:[%s9646_s5 + $0x38] sm:$0xff]   ;;  %v6758_v56 = vld [vmem:[#allocation7 + $0x1] ss:$0 sm:$0xff] }
0x4eea   :  { %v4789_v43 = vpop.f32.mrf.mxu1  ;;  %6990 = vmatprep.subr.bf16.mxu0 %v7242_v9 }
0x4eeb   :  { %v4795_v25 = vadd.f32 %v4789_v43, %v9212_v28  ;;  %v6727_v13 = vmul.f32 -1.442695, %v4794_v41 }
0x4eec   :  { %v4791_v29 = vpop.f32.mrf.mxu1 }
0x4eed   :  { %7709 = vtanh.f32 %v4795_v25  ;;  %v6728_v15 = vmul.f32 -1.442695, %v4795_v25 }
0x4eee   :  { %v4792_v24 = vpop.f32.mrf.mxu1  ;;  %7711 = vpow2.f32 %v6727_v13 }
0x4efa   :  { %v7710_v55 = vpop.eup %7709 }
0x4efb   :  { %4811 = vrot.lane.b32.xlu0 %v7710_v55, %s8018_s19  ;;  %v7712_v26 = vpop.eup %7711 }
0x4efc   :  { %v4802_v61 = vadd.f32 1.0, %v7712_v26 }
0x4efe   :  { %7713 = vrcp.f32 %v4802_v61 }
0x4f0b   :  { %v7714_v5 = vpop.eup %7713 }
0x4f0c   :  { %v4809_v20 = vmul.f32 %v7714_v5, %v4739_v35  ;;  %v5132_v35 = vpack.c.bf16 %v9280_v59, %v9284_v52 }
0x4f6d   :  { %v4812_v44 = vpop.permute.xlu0 %4811 }
0x4f6e   :  { %v4814_v18 = vmul.f32 %v7714_v5, %v4812_v44 }
0x4f70   :  { %4816 = vrot.lane.b32.xlu1 %v4814_v18, %s8018_s19 }
0x4fe2   :  { %v4817_v28 = vpop.permute.xlu1 %4816 }
0x4fe3   :  { %v9255_v14 = vadd.f32 %v4817_v28, %v4809_v20 }
0x4fe5   :  { %7715 = vtanh.f32 %v9255_v14 }
0x4fe6   :  { %7717 = vpow2.f32 %v6728_v15 }
0x4ff2   :  { %v7716_v53 = vpop.eup %7715 }
0x4ff3   :  { %4822 = vrot.lane.b32.xlu0 %v7716_v53, %s8018_s19  ;;  %v7718_v63 = vpop.eup %7717 }
0x4ff4   :  { %v4803_v50 = vadd.f32 1.0, %v7718_v63 }
0x4ff6   :  { %7719 = vrcp.f32 %v4803_v50 }
0x5003   :  { %v7720_v16 = vpop.eup %7719 }
0x5065   :  { %v4823_v0 = vpop.permute.xlu0 %4822 }
0x5066   :  { %v4825_v4 = vmul.f32 %v7720_v16, %v4823_v0 }
0x5068   :  { %4826 = vst.msk [vmem:[#allocation4 + $0x18] sm:$0xff] %vm387_vm3, %v4825_v4  ;;  %v4829_v48 = vpack.c.bf16 %v4825_v4, %v4825_v4 }
0x506a   :  { %6729 = vmatmul.mubr.msk.bf16.vlgmr.msra.gmra.mxu0 %vm387_vm3, %v4829_v48 }
0x506b   :  { %6991 = vmatpush3.bf16.msra.mxu0 %v7242_v9  ;;  %6998 = vmatprep.mubr.msk.bf16.mxu0 %vm387_vm3, %v5131_v42 }
0x506c   :  { %6992 = vmatprep.subr.bf16.mxu0 %v7243_v36 }
0x506f   :  { %6993 = vmatpush3.bf16.msra.mxu0 %v7243_v36 }
0x5070   :  { %6994 = vmatprep.subr.bf16.mxu0 %v7244_v57 }
0x5073   :  { %6995 = vmatpush3.bf16.msra.mxu0 %v7244_v57 }
0x5074   :  { %6996 = vmatprep.subr.bf16.mxu0 %v7245_v23 }
0x5077   :  { %6997 = vmatpush3.bf16.msra.mxu0 %v7245_v23  ;;  %v9305_v23 = vld [vmem:[#allocation4] sm:$0xff] }
0x507a   :  { %6999 = vmatmul.mubr.msk.bf16.vlgmr.msra.gmra.mxu0 %vm387_vm3, %v5132_v35  ;;  %v4912_v35 = vsel %vm387_vm3, %v9305_v23, 0.0 }
0x507b   :  { %7002 = vmatprep.mubr.msk.bf16.mxu0 %vm387_vm3, %v5133_v38  ;;  %v9309_v38 = vld [vmem:[#allocation4 + $0x8] sm:$0xff] }
0x5082   :  { %7003 = vmatmul.mubr.msk.bf16.gmra.mxu0 %vm387_vm3, %v9059_v6 }
0x512a   :  { %v4867_v30 = vpop.f32.mrf.mxu0 }
0x512c   :  { %v4869_v39 = vpop.f32.mrf.mxu0 }
0x512d   :  { %v9297_v60 = vadd.f32 %v4869_v39, %v9216_v17  ;;  %v4915_v39 = vsel %vm387_vm3, %v9309_v38, 0.0 }
0x512e   :  { %v4871_v7 = vpop.f32.mrf.mxu0 }
0x512f   :  { %7721 = vtanh.f32 %v9297_v60  ;;  %v9313_v7 = vld [vmem:[#allocation4 + $0x10] sm:$0xff] }
0x5130   :  { %v4872_v27 = vpop.f32.mrf.mxu0 }
0x5131   :  { %v4918_v27 = vsel %vm387_vm3, %v9313_v7, 0.0 }
0x513a   :  { %v7000_v12 = vpop.f32.mrf.mxu0 }
0x513b   :  { %v5238_v43 = vmax.f32 %v7000_v12, 0.0  ;;  %v9317_v12 = vld [vmem:[#allocation4 + $0x18] sm:$0xff] }
0x513c   :  { %v5205_v25 = vpop.f32.mrf.mxu0  ;;  %v7722_v29 = vpop.eup %7721 }
0x513d   :  { %v5254_v24 = vmul.f32 %v6758_v56, %v5238_v43  ;;  %4891 = vrot.lane.b32.xlu1 %v7722_v29, %s8018_s19  ;;  %v5236_v20 = vmax.f32 %v5205_v25, 0.0  ;;  %v4874_v43 = vadd.f32 %v4867_v30, %v9214_v11 }
0x513e   :  { %v7001_v55 = vpop.f32.mrf.mxu0 }
0x513f   :  { %v5252_v9 = vmul.f32 %v6758_v56, %v5236_v20  ;;  %v5239_v53 = vmax.f32 %v7001_v55, 0.0  ;;  %v6730_v25 = vmul.f32 -1.442695, %v4874_v43 }
0x5140   :  { %v5208_v41 = vpop.f32.mrf.mxu0 }
0x5141   :  { %v5237_v6 = vmax.f32 %v5208_v41, 0.0  ;;  %v5255_v63 = vmul.f32 %v6758_v56, %v5239_v53  ;;  %v5260_v16 = vsel %vm301_vm2, %v5252_v9, 0.0  ;;  %7723 = vpow2.f32 %v6730_v25 }
0x5142   :  { %v7004_v13 = vpop.f32.mrf.mxu0 }
0x5143   :  { %v5253_v26 = vmul.f32 %v6758_v56, %v5237_v6  ;;  %v5242_v61 = vmax.f32 %v7004_v13, 0.0  ;;  %v5269_v48 = vsel %vm301_vm2, %v5255_v63, 0.0 }
0x5144   :  { %v5221_v17 = vpop.f32.mrf.mxu0 }
0x5145   :  { %v5258_v5 = vmul.f32 %v6758_v56, %v5242_v61  ;;  %v5240_v44 = vmax.f32 %v5221_v17, 0.0  ;;  %v5263_v61 = vsel %vm301_vm2, %v5253_v26, 0.0  ;;  %v5266_v17 = vsel %vm301_vm2, %v5254_v24, 0.0  ;;  %v6759_v24 = vld [vmem:[%s9648_s7 + $0x8] sm:$0xff] }
0x5146   :  { %v7005_v28 = vpop.f32.mrf.mxu0  ;;  %v5297_v26 = vrot.slane %v6759_v24, %v9071_v19  ;;  %v5327_v25 = vrot.slane %v6759_v24, %v3993_v40 }
0x5147   :  { %v5256_v18 = vmul.f32 %v6758_v56, %v5240_v44  ;;  %v5243_v0 = vmax.f32 %v7005_v28, 0.0  ;;  %v5278_v11 = vsel %vm301_vm2, %v5258_v5, 0.0 }
0x5148   :  { %v5224_v15 = vpop.f32.mrf.mxu0 }
0x5149   :  { %v5241_v50 = vmax.f32 %v5224_v15, 0.0  ;;  %v5259_v36 = vmul.f32 %v6758_v56, %v5243_v0  ;;  %v5272_v44 = vsel %vm301_vm2, %v5256_v18, 0.0  ;;  %v5291_v18 = vrot.slane %v6759_v24, %v9074_v46 }
0x514b   :  { %v5257_v4 = vmul.f32 %v6758_v56, %v5241_v50  ;;  %v5281_v57 = vsel %vm301_vm2, %v5259_v36, 0.0  ;;  %v4921_v56 = vsel %vm387_vm3, %v9317_v12, 0.0  ;;  %v5315_v36 = vrot.slane %v6759_v24, %v3981_v47 }
0x514d   :  { %v5275_v42 = vsel %vm301_vm2, %v5257_v4, 0.0 }
0x514e   :  { %v7724_v29 = vpop.eup %7723 }
0x514f   :  { %v4882_v55 = vadd.f32 1.0, %v7724_v29 }
0x5151   :  { %7725 = vrcp.f32 %v4882_v55  ;;  %v5333_v55 = vrot.slane %v6759_v24, %v3999_v51  ;;  %v6731_v51 = vmul.f32 -1.442695, %v9297_v60 }
0x515e   :  { %v7726_v41 = vpop.eup %7725 }
0x515f   :  { %v4889_v30 = vmul.f32 %v7726_v41, %v9255_v14  ;;  %v5303_v14 = vrot.slane %v6759_v24, %v9082_v54 }
0x5161   :  { %5261 = vadd.xlane.f32.xlu1 %v5260_v16  ;;  %v5309_v16 = vrot.slane %v6759_v24, %v9086_v34 }
0x5165   :  { %5270 = vadd.xlane.f32.xlu1 %v5269_v48 }
0x5169   :  { %5276 = vadd.xlane.f32.xlu1 %v5275_v42 }
0x516d   :  { %5282 = vadd.xlane.f32.xlu1 %v5281_v57 }
0x5171   :  { %4913 = vadd.xlane.f32.xlu1 %v4912_v35  ;;  %v5321_v35 = vrot.slane %v6759_v24, %v3987_v37 }
0x5175   :  { %4916 = vadd.xlane.f32.xlu1 %v4915_v39 }
0x5179   :  { %4919 = vadd.xlane.f32.xlu1 %v4918_v27 }
0x517d   :  { %4922 = vadd.xlane.f32.xlu1 %v4921_v56 }
0x51af   :  { %v4892_v6 = vpop.permute.xlu1 %4891 }
0x51b0   :  { %v4894_v13 = vmul.f32 %v7726_v41, %v4892_v6 }
0x51b2   :  { %4896 = vrot.lane.b32.xlu0 %v4894_v13, %s8018_s19 }
0x51d1   :  { %5264 = vadd.xlane.f32.xlu0 %v5263_v61 }
0x51d5   :  { %5267 = vadd.xlane.f32.xlu0 %v5266_v17 }
0x51d9   :  { %5273 = vadd.xlane.f32.xlu0 %v5272_v44 }
0x51dd   :  { %5279 = vadd.xlane.f32.xlu0 %v5278_v11 }
0x51ea   :  { %v5262_v53 = vpop.xlane.xlu1 %5261 }
0x51eb   :  { %v5292_v50 = vmul.f32 %v5291_v18, %v5262_v53 }
0x51ee   :  { %v5271_v15 = vpop.xlane.xlu1 %5270 }
0x51ef   :  { %v5310_v57 = vmul.f32 %v5309_v16, %v5271_v15 }
0x51f2   :  { %v5277_v42 = vpop.xlane.xlu1 %5276 }
0x51f3   :  { %v5322_v29 = vmul.f32 %v5321_v35, %v5277_v42  ;;  %v7246_v35 = vld [vmem:[#allocation16 + $0x18] sm:$0xff]  }
0x51f6   :  { %v5283_v6 = vpop.xlane.xlu1 %5282 }
0x51f7   :  { %v5334_v17 = vmul.f32 %v5333_v55, %v5283_v6 }
0x51fa   :  { %v4914_v62 = vpop.xlane.xlu1 %4913 }
0x51fe   :  { %v4917_v40 = vpop.xlane.xlu1 %4916 }
0x5224   :  { %v4897_v20 = vpop.permute.xlu0 %4896 }
0x5225   :  { %v4899_v28 = vadd.f32 %v4897_v20, %v4889_v30  ;;  %v4920_v30 = vpop.xlane.xlu1 %4919  ;;  %v4928_v20 = vmul.f32 0.015625, %v4914_v62 }
0x5226   :  { %v4930_v16 = vmul.f32 0.015625, %v4920_v30 }
0x5227   :  { %7727 = vtanh.f32 %v4899_v28 }
0x5228   :  { %7729 = vpow2.f32 %v6731_v51 }
0x5229   :  { %v4923_v28 = vpop.xlane.xlu1 %4922 }
0x522a   :  { %v4931_v53 = vmul.f32 0.015625, %v4923_v28 }
0x5234   :  { %v7728_v9 = vpop.eup %7727 }
0x5235   :  { %4902 = vrot.lane.b32.xlu0 %v7728_v9, %s8018_s19  ;;  %v9349_v9 = vsub.f32 %v9305_v23, %v4928_v20  ;;  %v7730_v24 = vpop.eup %7729 }
0x5236   :  { %v4883_v18 = vadd.f32 1.0, %v7730_v24 }
0x5238   :  { %7731 = vrcp.f32 %v4883_v18 }
0x5245   :  { %v7732_v23 = vpop.eup %7731 }
0x525a   :  { %v5265_v5 = vpop.xlane.xlu0 %5264 }
0x525b   :  { %v5298_v63 = vmul.f32 %v5297_v26, %v5265_v5  ;;  %v4938_v26 = vmul.f32 %v9349_v9, %v9349_v9 }
0x525d   :  { %v5299_v4 = vadd.f32 %v5298_v63, %v5292_v50  ;;  %v4943_v15 = vsel %vm387_vm3, %v4938_v26, 0.0  ;;  %v4929_v50 = vmul.f32 0.015625, %v4917_v40 }
0x525e   :  { %v5268_v0 = vpop.xlane.xlu0 %5267 }
0x525f   :  { %v5304_v48 = vmul.f32 %v5303_v14, %v5268_v0 }
0x5261   :  { %v5305_v39 = vadd.f32 %v5304_v48, %v5299_v4  ;;  %v9367_v4 = vsub.f32 %v9313_v7, %v4930_v16  ;;  %v7247_v7 = vld [vmem:[#allocation16 + $0x10] sm:$0xff]  }
0x5262   :  { %v5274_v27 = vpop.xlane.xlu0 %5273 }
0x5263   :  { %v5311_v56 = vadd.f32 %v5310_v57, %v5305_v39  ;;  %v5316_v43 = vmul.f32 %v5315_v36, %v5274_v27  ;;  %v4940_v57 = vmul.f32 %v9367_v4, %v9367_v4  ;;  %v8032_v39 = vmov 0.0   ;;  %v7248_v27 = vld [vmem:[#allocation16 + $0x8] sm:$0xff]  }
0x5264   :  { %6970 = vmatprep.subr.bf16.mxu1 %v8032_v39  ;;  %6978 = vmatprep.mubr.msk.bf16.mxu1 %vm8033_vm5, %v8032_v39 }
0x5265   :  { %v5317_v41 = vadd.f32 %v5316_v43, %v5311_v56  ;;  %6971 = vmatpush3.bf16.msra.mxu1 %v7246_v35  ;;  %v7249_v56 = vld [vmem:[#allocation16] sm:$0xff]   ;;  %v9411_v35 = vld [vmem:[#allocation15] ss:$0 sm:$0xff] }
0x5266   :  { %v5280_v13 = vpop.xlane.xlu0 %5279  ;;  %6972 = vmatprep.subr.bf16.mxu1 %v8032_v39  ;;  %v6760_v43 = vld [vmem:[%s9649_s8 + $0x4] sm:$0xf] }
0x5267   :  { %v5323_v47 = vadd.f32 %v5322_v29, %v5317_v41  ;;  %v5328_v61 = vmul.f32 %v5327_v25, %v5280_v13  ;;  %v5345_v55 = vrot.slane %v6760_v43, %v9074_v46  ;;  %v5355_v41 = vrot.slane %v6760_v43, %v9071_v19 }
0x5268   :  { %v5365_v6 = vrot.slane %v6760_v43, %v9082_v54 }
0x5269   :  { %v5329_v44 = vadd.f32 %v5328_v61, %v5323_v47  ;;  %6973 = vmatpush3.bf16.msra.mxu1 %v7247_v7 }
0x526a   :  { %6974 = vmatprep.subr.bf16.mxu1 %v8032_v39 }
0x526b   :  { %v5335_v11 = vadd.f32 %v5334_v17, %v5329_v44  ;;  %v5375_v17 = vrot.slane %v6760_v43, %v9086_v34 }
0x526d   :  { %v5336_v37 = vmax.f32 %v5335_v11, 0.0  ;;  %6975 = vmatpush3.bf16.msra.mxu1 %v7248_v27 }
0x526e   :  { %6976 = vmatprep.subr.bf16.mxu1 %v8032_v39 }
0x526f   :  { %5359 = vperm.xlu0 %7097, %v5336_v37   ;;  %5339 = vperm.xlu1 %7096, %v5336_v37  }
0x5271   :  { %6977 = vmatpush3.bf16.msra.mxu1 %v7249_v56  ;;  %v7251_v56 = vld [vmem:[#allocation9 + $0x50] sm:$0xff]  }
0x5273   :  { %7098 = vset.pattern.permute.xlu0 %v8025_v22  ;;  %7099 = vset.pattern.permute.xlu1 %v8027_v49  ;;  %v9352_v22 = vsub.f32 %v9317_v12, %v4931_v53  ;;  %v9362_v12 = vsub.f32 %v9309_v38, %v4929_v50  ;;  %v4949_v38 = vsel %vm387_vm3, %v4940_v57, 0.0 }
0x5274   :  { %5349 = vperm.xlu0 %7098, %v5336_v37   ;;  %5369 = vperm.xlu1 %7099, %v5336_v37  }
0x5275   :  { %v4941_v60 = vmul.f32 %v9352_v22, %v9352_v22  ;;  %v4939_v36 = vmul.f32 %v9362_v12, %v9362_v12 }
0x5277   :  { %v4952_v5 = vsel %vm387_vm3, %v4941_v60, 0.0  ;;  %v4946_v42 = vsel %vm387_vm3, %v4939_v36, 0.0  ;;  %v7250_v36 = vld [vmem:[#allocation9 + $0x58] sm:$0xff]  }
0x5278   :  { %7100 = vset.pattern.permute.xlu1 %v8024_v45  ;;  %7006 = vmatprep.subr.bf16.mxu0 %v7250_v36 }
0x5279   :  { %7007 = vmatpush3.bf16.msra.mxu0 %v7250_v36 }
0x527a   :  { %7008 = vmatprep.subr.bf16.mxu0 %v7251_v56 }
0x527d   :  { %7009 = vmatpush3.bf16.msra.mxu0 %v7251_v56 }
0x5298   :  { %4944 = vadd.xlane.f32.xlu1 %v4943_v15 }
0x529c   :  { %4953 = vadd.xlane.f32.xlu1 %v4952_v5 }
0x52a7   :  { %v4903_v63 = vpop.permute.xlu0 %4902 }
0x52a8   :  { %v4905_v14 = vmul.f32 %v7732_v23, %v4903_v63 }
0x52aa   :  { %4906 = vst.msk [vmem:[#allocation4 + $0x20] sm:$0xff] %vm387_vm3, %v4905_v14 }
0x52b1   :  { %v9364_v0 = vld [vmem:[#allocation4 + $0x20] sm:$0xff] }
0x52b2   :  { %v4924_v48 = vsel %vm387_vm3, %v9364_v0, 0.0 }
0x52b3   :  { %4925 = vadd.xlane.f32.xlu0 %v4924_v48 }
0x52b7   :  { %4947 = vadd.xlane.f32.xlu0 %v4946_v42 }
0x52bb   :  { %4950 = vadd.xlane.f32.xlu0 %v4949_v38 }
0x52ea   :  { %v5360_v25 = vpop.permute.xlu0 %5359  ;;  %v5340_v29 = vpop.permute.xlu1 %5339 }
0x52eb   :  { %v5346_v47 = vmul.f32 %v5345_v55, %v5340_v29  ;;  %v5366_v11 = vmul.f32 %v5365_v6, %v5360_v25 }
0x52ef   :  { %v5350_v13 = vpop.permute.xlu0 %5349  ;;  %v5370_v44 = vpop.permute.xlu1 %5369 }
0x52f0   :  { %v5356_v61 = vmul.f32 %v5355_v41, %v5350_v13  ;;  %v5376_v40 = vmul.f32 %v5375_v17, %v5370_v44  ;;  %v7253_v41 = vld [vmem:[#allocation9 + $0x48] sm:$0xff]  }
0x52f1   :  { %7010 = vmatprep.subr.bf16.mxu0 %v7253_v41  ;;  %v7256_v44 = vld [vmem:[#allocation9 + $0x68] sm:$0xff]  }
0x52f2   :  { %v5357_v37 = vadd.f32 %v5356_v61, %v5346_v47  ;;  %7011 = vmatpush3.bf16.msra.mxu0 %v7253_v41  ;;  %v7252_v47 = vld [vmem:[#allocation9 + $0x78] sm:$0xff]   ;;  %v7254_v61 = vld [vmem:[#allocation9 + $0x70] sm:$0xff]  }
0x52f3   :  { %7022 = vmatprep.subr.bf16.mxu1 %v7252_v47 }
0x52f4   :  { %v5367_v62 = vadd.f32 %v5366_v11, %v5357_v37  ;;  %v7257_v11 = vld [vmem:[#allocation9 + $0x60] sm:$0xff]  }
0x52f6   :  { %v5377_v51 = vadd.f32 %v5376_v40, %v5367_v62 }
0x52f8   :  { %v6761_v30 = vmul.f32 -1.442695, %v5377_v51 }
0x52fa   :  { %7733 = vpow2.f32 %v6761_v30 }
0x5307   :  { %v7734_v20 = vpop.eup %7733 }
0x5308   :  { %v5381_v28 = vadd.f32 1.0, %v7734_v20 }
0x530a   :  { %7735 = vrcp.f32 %v5381_v28 }
0x5317   :  { %v7736_v46 = vpop.eup %7735 }
0x5318   :  { %6762 = vst.msk [vmem:[%s9657_s16 + $0x8] sm:$0xff] %vm4051_vm4, %v7736_v46  ;;  %v5386_v19 = vadd.f32 1.0, %v7736_v46 }
0x531a   :  { %5389 = vperm.xlu1 %7100, %v5386_v19  }
0x531e   :  { %7101 = vset.pattern.permute.xlu1 %v8026_v32 }
0x531f   :  { %5401 = vperm.xlu1 %7101, %v5386_v19  }
0x5321   :  { %v4945_v54 = vpop.xlane.xlu1 %4944 }
0x5322   :  { %v4958_v34 = vmul.f32 0.015625, %v4945_v54  ;;  %v7817_v54 = vld [vmem:[#allocation2 + $0x30] sm:$0xff] }
0x5323   :  { %7102 = vset.pattern.permute.xlu1 %v8027_v49 }
0x5324   :  { %5407 = vperm.xlu1 %7102, %v5386_v19   ;;  %v4963_v53 = vadd.f32 1e-05, %v4958_v34 }
0x5325   :  { %v4954_v32 = vpop.xlane.xlu1 %4953 }
0x5326   :  { %7737 = vrsqrt.f32 %v4963_v53  ;;  %v4961_v49 = vmul.f32 0.015625, %v4954_v32  ;;  %v7818_v53 = vld [vmem:[#allocation2 + $0x38] sm:$0xff] }
0x5328   :  { %7103 = vset.pattern.permute.xlu1 %v8029_v1  ;;  %v4966_v15 = vadd.f32 1e-05, %v4961_v49 }
0x5329   :  { %5413 = vperm.xlu1 %7103, %v5386_v19  }
0x532d   :  { %7104 = vset.pattern.permute.xlu1 %v8030_v2 }
0x532e   :  { %5419 = vperm.xlu1 %7104, %v5386_v19  }
0x5332   :  { %7105 = vset.pattern.permute.xlu1 %v8028_v10 }
0x5333   :  { %5425 = vperm.xlu1 %7105, %v5386_v19   ;;  %v7738_v50 = vpop.eup %7737 }
0x5334   :  { %v4973_v16 = vmul.f32 %v7738_v50, %v9349_v9 }
0x5337   :  { %7106 = vset.pattern.permute.xlu1 %v8031_v3 }
0x5338   :  { %5431 = vperm.xlu1 %7106, %v5386_v19  }
0x533c   :  { %v4926_v24 = vpop.xlane.xlu0 %4925 }
0x533d   :  { %v4932_v26 = vmul.f32 0.015625, %v4926_v24 }
0x533f   :  { %v9401_v1 = vsub.f32 %v9364_v0, %v4932_v26  ;;  %v9407_v0 = vld [vmem:[#allocation13] ss:$0 sm:$0xff] }
0x5340   :  { %v4948_v18 = vpop.xlane.xlu0 %4947  ;;  %v4985_v42 = vmul.f32 %v9407_v0, %v4973_v16 }
0x5341   :  { %v4959_v2 = vmul.f32 0.015625, %v4948_v18  ;;  %v4942_v10 = vmul.f32 %v9401_v1, %v9401_v1 }
0x5342   :  { %v4997_v25 = vadd.f32 %v9411_v35, %v4985_v42 }
0x5343   :  { %v4964_v60 = vadd.f32 1e-05, %v4959_v2  ;;  %v4955_v5 = vsel %vm387_vm3, %v4942_v10, 0.0 }
0x5344   :  { %4956 = vadd.xlane.f32.xlu0 %v4955_v5  ;;  %v4951_v23 = vpop.xlane.xlu0 %4950 }
0x5345   :  { %7739 = vrsqrt.f32 %v4964_v60  ;;  %v4960_v63 = vmul.f32 0.015625, %v4951_v23 }
0x5346   :  { %7741 = vrsqrt.f32 %v4966_v15 }
0x5347   :  { %v4965_v14 = vadd.f32 1e-05, %v4960_v63 }
0x5349   :  { %7743 = vrsqrt.f32 %v4965_v14 }
0x5352   :  { %v7740_v48 = vpop.eup %7739 }
0x5353   :  { %v4974_v57 = vmul.f32 %v7740_v48, %v9362_v12  ;;  %v7742_v38 = vpop.eup %7741 }
0x5354   :  { %v4976_v43 = vmul.f32 %v7742_v38, %v9352_v22 }
0x5355   :  { %v4986_v7 = vmul.f32 %v9407_v0, %v4974_v57 }
0x5356   :  { %v7744_v27 = vpop.eup %7743  ;;  %v4988_v6 = vmul.f32 %v9407_v0, %v4976_v43 }
0x5357   :  { %v4975_v9 = vmul.f32 %v7744_v27, %v9367_v4  ;;  %v4998_v29 = vadd.f32 %v9411_v35, %v4986_v7  ;;  %v7255_v4 = vld [vmem:[#allocation9 + $0x40] sm:$0xff]  }
0x5358   :  { %v5000_v13 = vadd.f32 %v9411_v35, %v4988_v6  ;;  %7012 = vmatprep.subr.bf16.mxu0 %v7255_v4  ;;  %v9474_v6 = vld [vmem:[#allocation12 + $0x70] ss:$8 sps:$4 sm:$0xff]  }
0x5359   :  { %v5010_v55 = vpack.c.bf16 %v4998_v29, %v4997_v25  ;;  %v4987_v12 = vmul.f32 %v9407_v0, %v4975_v9  ;;  %7013 = vmatpush3.bf16.msra.mxu0 %v7255_v4  ;;  %v9483_v4 = vld [vmem:[#allocation12 + $0x60] ss:$8 sps:$4 sm:$0xff]  }
0x535a   :  { %5395 = vperm.xlu0 %7098, %v5386_v19  }
0x535b   :  { %6979 = vmatmul.mubr.msk.bf16.vlgmr.msra.gmra.mxu1 %vm387_vm3, %v5010_v55  ;;  %v4999_v22 = vadd.f32 %v9411_v35, %v4987_v12  ;;  %v9472_v12 = vld [vmem:[#allocation12 + $0x74] ss:$8 sps:$4 sm:$0xff]  }
0x535c   :  { %6982 = vmatprep.mubr.msk.bf16.mxu1 %vm8033_vm5, %v8032_v39  ;;  %7023 = vmatpush3.bf16.msra.mxu1 %v7252_v47  ;;  %v7265_v47 = vld [vmem:[#allocation10 + $0x74] ss:$8 sps:$4 sm:$0xff]  }
0x535d   :  { %v5011_v17 = vpack.c.bf16 %v5000_v13, %v4999_v22  ;;  %7024 = vmatprep.subr.bf16.mxu1 %v7254_v61  ;;  %v9481_v22 = vld [vmem:[#allocation12 + $0x64] ss:$8 sps:$4 sm:$0xff]   ;;  %v7263_v13 = vld [vmem:[#allocation10 + $0x70] ss:$8 sps:$4 sm:$0xff]   ;;  %5735 = vmatprep.subr.bf16.mxu0 %v7265_v47 }
0x535e   :  { %7107 = vset.pattern.permute.xlu0 %v8031_v3 }
0x5360   :  { %7025 = vmatpush3.bf16.msra.mxu1 %v7254_v61  ;;  %v5801_v61 = vld [vmem:[#allocation12 + $0x50] sm:$0xff] }
0x5361   :  { %7026 = vmatprep.subr.bf16.mxu1 %v7256_v44 }
0x5363   :  { %6983 = vmatmul.mubr.msk.bf16.gmra.mxu1 %vm387_vm3, %v5011_v17  ;;  %v5802_v17 = vld [vmem:[#allocation12 + $0x58] sm:$0xff] }
0x5364   :  { %6986 = vmatprep.mubr.msk.bf16.mxu1 %vm8033_vm5, %v8032_v39  ;;  %7027 = vmatpush3.bf16.msra.mxu1 %v7256_v44  ;;  %v9487_v44 = vld [vmem:[#allocation12 + $0x54] ss:$8 sps:$4 sm:$0xff]  }
0x5365   :  { %7028 = vmatprep.subr.bf16.mxu1 %v7257_v11 }
0x5368   :  { %7029 = vmatpush3.bf16.msra.mxu1 %v7257_v11  ;;  %v9489_v11 = vcombine.low %v5801_v61, %v5802_v17 }
0x5369   :  { %5857 = vmatprep.subr.bf16.mxu1 %v9472_v12 }
0x5395   :  { %v5390_v3 = vpop.permute.xlu1 %5389 }
0x5396   :  { %v5392_v37 = vmul.f32 %v5390_v3, %v9265_v33  ;;  %v7271_v3 = vld [vmem:[#allocation10 + $0x64] ss:$8 sps:$4 sm:$0xff]  }
0x5398   :  { %5393 = vst.msk [vmem:[#allocation4] sm:$0xff] %vm387_vm3, %v5392_v37  ;;  %v7269_v37 = vld [vmem:[#allocation10 + $0x60] ss:$8 sps:$4 sm:$0xff]  }
0x539a   :  { %v5402_v62 = vpop.permute.xlu1 %5401 }
0x539b   :  { %v5404_v40 = vmul.f32 %v5402_v62, %v9284_v52  ;;  %v9493_v62 = vld [vmem:[#allocation12 + $0x44] ss:$8 sps:$4 sm:$0xff]  }
0x539d   :  { %5405 = vst.msk [vmem:[#allocation4 + $0x10] sm:$0xff] %vm387_vm3, %v5404_v40  ;;  %v9495_v40 = vld [vmem:[#allocation12 + $0x40] ss:$8 sps:$4 sm:$0xff]  }
0x539f   :  { %v5408_v51 = vpop.permute.xlu1 %5407  ;;  %v5436_v2 = vld [vmem:[#allocation4] sm:$0xff] }
0x53a0   :  { %v5410_v30 = vmul.f32 %v5408_v51, %v9280_v59  ;;  %v7274_v51 = vld [vmem:[#allocation10 + $0x50] ss:$8 sps:$4 sm:$0xff]  }
0x53a2   :  { %5411 = vst.msk [vmem:[#allocation4 + $0x18] sm:$0xff] %vm387_vm3, %v5410_v30  ;;  %v7276_v30 = vld [vmem:[#allocation10 + $0x54] ss:$8 sps:$4 sm:$0xff]  }
0x53a4   :  { %v5414_v20 = vpop.permute.xlu1 %5413  ;;  %v5438_v23 = vld [vmem:[#allocation4 + $0x10] sm:$0xff] }
0x53a5   :  { %v5416_v28 = vmul.f32 %v5414_v20, %v9288_v8  ;;  %v7280_v20 = vld [vmem:[#allocation10 + $0x44] ss:$8 sps:$4 sm:$0xff]  }
0x53a7   :  { %5417 = vst.msk [vmem:[#allocation4 + $0x20] sm:$0xff] %vm387_vm3, %v5416_v28  ;;  %v7278_v28 = vld [vmem:[#allocation10 + $0x40] ss:$8 sps:$4 sm:$0xff]  }
0x53a9   :  { %v5420_v46 = vpop.permute.xlu1 %5419 }
0x53aa   :  { %v5422_v33 = vmul.f32 %v5420_v46, %v9282_v31  ;;  %v5439_v31 = vld [vmem:[#allocation4 + $0x18] sm:$0xff] }
0x53ab   :  { %v5454_v63 = vpack.c.bf16 %v5439_v31, %v5438_v23 }
0x53ac   :  { %5423 = vst.msk [vmem:[#allocation4 + $0x28] sm:$0xff] %vm387_vm3, %v5422_v33 }
0x53ae   :  { %v5426_v19 = vpop.permute.xlu1 %5425  ;;  %v5440_v14 = vld [vmem:[#allocation4 + $0x20] sm:$0xff] }
0x53af   :  { %v5428_v52 = vmul.f32 %v7817_v54, %v5426_v19 }
0x53b1   :  { %5429 = vst.msk [vmem:[#allocation4 + $0x30] sm:$0xff] %vm387_vm3, %v5428_v52 }
0x53b3   :  { %v5432_v34 = vpop.permute.xlu1 %5431  ;;  %v5441_v15 = vld [vmem:[#allocation4 + $0x28] sm:$0xff] }
0x53b4   :  { %v5434_v59 = vmul.f32 %v7818_v53, %v5432_v34  ;;  %v5455_v50 = vpack.c.bf16 %v5441_v15, %v5440_v14 }
0x53b6   :  { %5435 = vst.msk [vmem:[#allocation4 + $0x38] sm:$0xff] %vm387_vm3, %v5434_v59 }
0x53bd   :  { %v5443_v36 = vld [vmem:[#allocation4 + $0x38] sm:$0xff] }
0x53cd   :  { %v4957_v32 = vpop.xlane.xlu0 %4956 }
0x53ce   :  { %v4962_v24 = vmul.f32 0.015625, %v4957_v32 }
0x53d0   :  { %v4967_v8 = vadd.f32 1e-05, %v4962_v24 }
0x53d2   :  { %7745 = vrsqrt.f32 %v4967_v8 }
0x53d5   :  { %v5396_v26 = vpop.permute.xlu0 %5395 }
0x53d6   :  { %v5398_v49 = vmul.f32 %v5396_v26, %v9262_v21 }
0x53d8   :  { %5399 = vst.msk [vmem:[#allocation4 + $0x8] sm:$0xff] %vm387_vm3, %v5398_v49 }
0x53df   :  { %v7746_v18 = vpop.eup %7745  ;;  %v5437_v10 = vld [vmem:[#allocation4 + $0x8] sm:$0xff] }
0x53e0   :  { %v4977_v60 = vmul.f32 %v7746_v18, %v9401_v1  ;;  %v5453_v5 = vpack.c.bf16 %v5437_v10, %v5436_v2  ;;  %v5442_v1 = vld [vmem:[#allocation4 + $0x30] sm:$0xff] }
0x53e1   :  { %v5456_v42 = vpack.c.bf16 %v5443_v36, %v5442_v1 }
0x53e2   :  { %7014 = vmatprep.mubr.msk.bf16.mxu0 %vm387_vm3, %v5453_v5  ;;  %v4989_v16 = vmul.f32 %v9407_v0, %v4977_v60  ;;  %v9457_v0 = vld [vmem:[#allocation18] ss:$0 sm:$0xff] }
0x53e3   :  { %7015 = vmatmul.mubr.msk.bf16.vlgmr.msra.gmra.mxu0 %vm387_vm3, %v5454_v63 }
0x53e4   :  { %7018 = vmatprep.mubr.msk.bf16.mxu0 %vm387_vm3, %v5455_v50  ;;  %v5001_v21 = vadd.f32 %v9411_v35, %v4989_v16  ;;  %5736 = vmatpush1.bf16.msra.mxu0 %v7263_v13 }
0x53e5   :  { %5737 = vmatprep.subr.bf16.mxu0 %v7271_v3 }
0x53e6   :  { %v5012_v48 = vpack.c.bf16 %v5001_v21, %v5001_v21 }
0x53e8   :  { %6987 = vmatmul.mubr.msk.bf16.gmra.mxu1 %vm387_vm3, %v5012_v48  ;;  %5738 = vmatpush1.bf16.msra.mxu0 %v7269_v37 }
0x53e9   :  { %7030 = vmatprep.mubr.msk.bf16.mxu1 %vm387_vm3, %v5453_v5  ;;  %5739 = vmatprep.subr.bf16.mxu0 %v7276_v30 }
0x53eb   :  { %7019 = vmatmul.mubr.msk.bf16.gmra.mxu0 %vm387_vm3, %v5456_v42 }
0x53ec   :  { %5759 = vmatprep.mubr.bf16.mxu0 %v8024_v45  ;;  %5740 = vmatpush1.bf16.msra.mxu0 %v7274_v51 }
0x53ed   :  { %5741 = vmatprep.subr.bf16.mxu0 %v7280_v20 }
0x53f0   :  { %7031 = vmatmul.mubr.msk.bf16.vlgmr.msra.gmra.mxu1 %vm387_vm3, %v5454_v63  ;;  %5742 = vmatpush1.bf16.msra.mxu0 %v7278_v28 }
0x53f1   :  { %7034 = vmatprep.mubr.msk.bf16.mxu1 %vm387_vm3, %v5455_v50  ;;  %5858 = vmatpush1.bf16.msra.mxu1 %v9474_v6 }
0x53f2   :  { %5859 = vmatprep.subr.bf16.mxu1 %v9481_v22  ;;  %6017 = vmatprep.subr.bf16.mxu0 %v9472_v12 }
0x53f5   :  { %5860 = vmatpush1.bf16.msra.mxu1 %v9483_v4 }
0x53f6   :  { %5861 = vmatprep.subr.bf16.mxu1 %v9487_v44 }
0x53f8   :  { %7035 = vmatmul.mubr.msk.bf16.gmra.mxu1 %vm387_vm3, %v5456_v42 }
0x53f9   :  { %5881 = vmatprep.mubr.bf16.mxu1 %v8024_v45  ;;  %5862 = vmatpush1.bf16.msra.mxu1 %v9489_v11 }
0x53fa   :  { %5863 = vmatprep.subr.bf16.mxu1 %v9493_v62 }
0x53fd   :  { %5864 = vmatpush1.bf16.msra.mxu1 %v9495_v40 }
0x53fe   :  { %5937 = vmatprep.subr.bf16.mxu1 %v9472_v12 }
0x5400   :  { %5882 = vmatmul.mubr.bf16.vlgmr.msra.gmra.mxu1 %v8024_v45 }
0x5401   :  { %5938 = vmatpush1.bf16.msra.mxu1 %v9474_v6  ;;  %5961 = vmatprep.mubr.bf16.mxu1 %v8024_v45 }
0x5402   :  { %5939 = vmatprep.subr.bf16.mxu1 %v9481_v22 }
0x5405   :  { %5940 = vmatpush1.bf16.msra.mxu1 %v9483_v4 }
0x5406   :  { %5941 = vmatprep.subr.bf16.mxu1 %v9487_v44 }
0x5409   :  { %5942 = vmatpush1.bf16.msra.mxu1 %v9489_v11 }
0x540a   :  { %5943 = vmatprep.subr.bf16.mxu1 %v9493_v62 }
0x540d   :  { %5944 = vmatpush1.bf16.msra.mxu1 %v9495_v40 }
0x540e   :  { %6097 = vmatprep.subr.bf16.mxu1 %v9472_v12 }
0x541b   :  { %v5087_v57 = vpop.f32.mrf.mxu1 }
0x541c   :  { %v5088_v38 = vadd.f32 %v9457_v0, %v5087_v57 }
0x541d   :  { %v6980_v35 = vpop.f32.mrf.mxu1 }
0x541e   :  { %5109 = vst [vmem:[%s9658_s17] sm:$0xff] %v5088_v38 }
0x541f   :  { %v5090_v7 = vpop.f32.mrf.mxu1 }
0x5420   :  { %v5091_v27 = vadd.f32 %v9457_v0, %v5090_v7 }
0x5421   :  { %v6981_v56 = vpop.f32.mrf.mxu1 }
0x5422   :  { %5110 = vst [vmem:[%s9658_s17 + $0x8] sm:$0xff] %v5091_v27 }
0x5423   :  { %v5095_v43 = vpop.f32.mrf.mxu1 }
0x5424   :  { %v5096_v9 = vadd.f32 %v9457_v0, %v5095_v43 }
0x5425   :  { %v6984_v25 = vpop.f32.mrf.mxu1 }
0x5426   :  { %5111 = vst [vmem:[%s9658_s17 + $0x10] sm:$0xff] %v5096_v9 }
0x5427   :  { %v5098_v29 = vpop.f32.mrf.mxu1 }
0x5428   :  { %v5099_v55 = vadd.f32 %v9457_v0, %v5098_v29 }
0x5429   :  { %v6985_v41 = vpop.f32.mrf.mxu1 }
0x542a   :  { %5112 = vst [vmem:[%s9658_s17 + $0x18] sm:$0xff] %v5099_v55 }
0x54a3   :  { %v7016_v46 = vpop.f32.mrf.mxu0 }
0x54a5   :  { %v5527_v33 = vpop.f32.mrf.mxu0 }
0x54a7   :  { %v7017_v19 = vpop.f32.mrf.mxu0 }
0x54a8   :  { %v5103_v54 = vpop.f32.mrf.mxu1 }
0x54a9   :  { %v5104_v52 = vadd.f32 %v9457_v0, %v5103_v54  ;;  %v5529_v34 = vpop.f32.mrf.mxu0 }
0x54aa   :  { %v6988_v53 = vpop.f32.mrf.mxu1 }
0x54ab   :  { %5113 = vst [vmem:[%s9658_s17 + $0x20] sm:$0xff] %v5104_v52  ;;  %v7020_v59 = vpop.f32.mrf.mxu0 }
0x54ac   :  { %v5106_v32 = vpop.f32.mrf.mxu1 }
0x54ad   :  { %v5541_v24 = vpop.f32.mrf.mxu0 }
0x54ae   :  { %v6989_v8 = vpop.f32.mrf.mxu1 }
0x54af   :  { %v7021_v26 = vpop.f32.mrf.mxu0 }
0x54b0   :  { %v5659_v49 = vmax.f32 %v7021_v26, 0.0  ;;  %v7032_v31 = vpop.f32.mrf.mxu1 }
0x54b1   :  { %v5650_v18 = vadd.f32 %v7032_v31, %v5529_v34  ;;  %v5543_v23 = vpop.f32.mrf.mxu0 }
0x54b2   :  { %5660 = vst.msk [vmem:[#allocation4 + $0x20] sm:$0xff] %vm387_vm3, %v5659_v49  ;;  %v5621_v2 = vpop.f32.mrf.mxu1 }
0x54b3   :  { %v5651_v10 = vmax.f32 %v5650_v18, 0.0  ;;  %v5648_v15 = vmax.f32 %v5621_v2, 0.0 }
0x54b4   :  { %v7033_v60 = vpop.f32.mrf.mxu1 }
0x54b5   :  { %5652 = vst.msk [vmem:[#allocation4 + $0x8] sm:$0xff] %vm387_vm3, %v5651_v10  ;;  %5649 = vst.msk [vmem:[#allocation4] sm:$0xff] %vm387_vm3, %v5648_v15 }
0x54b6   :  { %v5624_v5 = vpop.f32.mrf.mxu1 }
0x54b8   :  { %v7036_v63 = vpop.f32.mrf.mxu1 }
0x54b9   :  { %v5656_v14 = vadd.f32 %v7036_v63, %v5543_v23  ;;  %v5665_v27 = vld [vmem:[#allocation4 + $0x20] sm:$0xff] }
0x54ba   :  { %v5635_v50 = vpop.f32.mrf.mxu1  ;;  %v5677_v56 = vpack.c.bf16 %v5665_v27, %v5665_v27 }
0x54bb   :  { %v5657_v16 = vmax.f32 %v5656_v14, 0.0  ;;  %v5653_v21 = vadd.f32 %v7017_v19, %v5635_v50 }
0x54bc   :  { %v7037_v48 = vpop.f32.mrf.mxu1  ;;  %v5661_v36 = vld [vmem:[#allocation4] sm:$0xff]  ;;  %v5662_v1 = vld [vmem:[#allocation4 + $0x8] sm:$0xff] }
0x54bd   :  { %5658 = vst.msk [vmem:[#allocation4 + $0x18] sm:$0xff] %vm387_vm3, %v5657_v16  ;;  %v5654_v42 = vmax.f32 %v5653_v21, 0.0  ;;  %v5675_v0 = vpack.c.bf16 %v5662_v1, %v5661_v36 }
0x54be   :  { %v5638_v57 = vpop.f32.mrf.mxu1 }
0x54bf   :  { %5655 = vst.msk [vmem:[#allocation4 + $0x10] sm:$0xff] %vm387_vm3, %v5654_v42  ;;  %6787 = vmatmul.mubr.msk.bf16.vlgmr.msra.gmra.mxu0 %vm387_vm3, %v5675_v0 }
0x54c0   :  { %5769 = vmatprep.mubr.bf16.mxu0 %v8024_v45  ;;  %6018 = vmatpush1.bf16.msra.mxu0 %v9474_v6  ;;  %v5883_v43 = vpop.f32.mrf.mxu1 }
0x54c1   :  { %6019 = vmatprep.subr.bf16.mxu0 %v9481_v22 }
0x54c2   :  { %v5885_v9 = vpop.f32.mrf.mxu1 }
0x54c4   :  { %6020 = vmatpush1.bf16.msra.mxu0 %v9483_v4  ;;  %v5664_v35 = vld [vmem:[#allocation4 + $0x18] sm:$0xff]  ;;  %v5887_v25 = vpop.f32.mrf.mxu1 }
0x54c5   :  { %6021 = vmatprep.subr.bf16.mxu0 %v9487_v44 }
0x54c6   :  { %v5663_v38 = vld [vmem:[#allocation4 + $0x10] sm:$0xff]  ;;  %v5888_v29 = vpop.f32.mrf.mxu1 }
0x54c7   :  { %v5676_v7 = vpack.c.bf16 %v5664_v35, %v5663_v38 }
0x54c8   :  { %6022 = vmatpush1.bf16.msra.mxu0 %v9489_v11 }
0x54c9   :  { %6788 = vmatmul.mubr.msk.bf16.gmra.mxu0 %vm387_vm3, %v5676_v7  ;;  %6023 = vmatprep.subr.bf16.mxu0 %v9493_v62 }
0x54ca   :  { %5779 = vmatprep.mubr.bf16.mxu0 %v8024_v45 }
0x54cc   :  { %6024 = vmatpush1.bf16.msra.mxu0 %v9495_v40 }
0x54cd   :  { %6177 = vmatprep.subr.bf16.mxu0 %v9472_v12 }
0x54d1   :  { %6789 = vmatmul.mubr.msk.bf16.gmra.mxu0 %vm387_vm3, %v5677_v56 }
0x54d2   :  { %6041 = vmatprep.mubr.bf16.mxu0 %v8024_v45 }
0x557f   :  { %v5761_v55 = vpop.f32.mrf.mxu0 }
0x5580   :  { %v5890_v33 = vadd.f32 %v5883_v43, %v5761_v55 }
0x5581   :  { %v5763_v41 = vpop.f32.mrf.mxu0 }
0x5582   :  { %v5891_v13 = vadd.f32 %v5885_v9, %v5763_v41  ;;  %v6798_v19 = vmul.f32 -1.442695, %v5890_v33 }
0x5583   :  { %v5765_v47 = vpop.f32.mrf.mxu0 }
0x5584   :  { %7747 = vtanh.f32 %v5891_v13  ;;  %v6799_v49 = vmul.f32 -1.442695, %v5891_v13 }
0x5585   :  { %v5767_v61 = vpop.f32.mrf.mxu0  ;;  %7749 = vpow2.f32 %v6798_v19 }
0x5589   :  { %v9534_v17 = vpop.f32.mrf.mxu0 }
0x558b   :  { %v9536_v3 = vpop.f32.mrf.mxu0 }
0x558d   :  { %v9538_v12 = vpop.f32.mrf.mxu0 }
0x558f   :  { %v9540_v37 = vpop.f32.mrf.mxu0 }
0x5591   :  { %v9542_v51 = vpop.f32.mrf.mxu0  ;;  %v7748_v30 = vpop.eup %7747 }
0x5592   :  { %5907 = vrot.lane.b32.xlu1 %v7748_v30, %s8018_s19  ;;  %v7750_v54 = vpop.eup %7749 }
0x5593   :  { %v9545_v20 = vpop.f32.mrf.mxu0  ;;  %v5898_v52 = vadd.f32 1.0, %v7750_v54 }
0x5595   :  { %v5785_v28 = vpop.f32.mrf.mxu0  ;;  %7751 = vrcp.f32 %v5898_v52 }
0x5597   :  { %v5786_v46 = vpop.f32.mrf.mxu0 }
0x55a2   :  { %v7752_v34 = vpop.eup %7751 }
0x55a3   :  { %v5905_v32 = vmul.f32 %v7752_v34, %v9047_v58 }
0x5604   :  { %v5908_v53 = vpop.permute.xlu1 %5907 }
0x5605   :  { %v5910_v59 = vmul.f32 %v7752_v34, %v5908_v53 }
0x5607   :  { %5912 = vrot.lane.b32.xlu0 %v5910_v59, %s8018_s19 }
0x5679   :  { %v5913_v24 = vpop.permute.xlu0 %5912 }
0x567a   :  { %v5915_v8 = vadd.f32 %v5913_v24, %v5905_v32 }
0x567c   :  { %7753 = vtanh.f32 %v5915_v8 }
0x567d   :  { %7755 = vpow2.f32 %v6799_v49 }
0x5689   :  { %v7754_v26 = vpop.eup %7753 }
0x568a   :  { %5918 = vrot.lane.b32.xlu1 %v7754_v26, %s8018_s19  ;;  %v7756_v31 = vpop.eup %7755 }
0x568b   :  { %v5899_v18 = vadd.f32 1.0, %v7756_v31 }
0x568d   :  { %7757 = vrcp.f32 %v5899_v18 }
0x569a   :  { %v7758_v2 = vpop.eup %7757 }
0x56fc   :  { %v5919_v10 = vpop.permute.xlu1 %5918 }
0x56fd   :  { %v5921_v15 = vmul.f32 %v7758_v2, %v5919_v10 }
0x56ff   :  { %5922 = vst.msk [vmem:[#allocation4] sm:$0xff] %vm387_vm3, %v5921_v15  ;;  %v5925_v60 = vpack.c.bf16 %v5921_v15, %v5921_v15 }
0x5701   :  { %6800 = vmatmul.mubr.msk.bf16.vlgmr.msra.gmra.mxu1 %vm387_vm3, %v5925_v60 }
0x5702   :  { %6098 = vmatpush1.bf16.msra.mxu1 %v9474_v6  ;;  %6121 = vmatprep.mubr.bf16.mxu1 %v8024_v45 }
0x5703   :  { %6099 = vmatprep.subr.bf16.mxu1 %v9481_v22 }
0x5706   :  { %6100 = vmatpush1.bf16.msra.mxu1 %v9483_v4 }
0x5707   :  { %6101 = vmatprep.subr.bf16.mxu1 %v9487_v44 }
0x570a   :  { %6102 = vmatpush1.bf16.msra.mxu1 %v9489_v11 }
0x570b   :  { %6103 = vmatprep.subr.bf16.mxu1 %v9493_v62 }
0x570e   :  { %6104 = vmatpush1.bf16.msra.mxu1 %v9495_v40 }
0x570f   :  { %7038 = vmatprep.subr.bf16.mxu1 %v8032_v39 }
0x57c1   :  { %v5963_v58 = vpop.f32.mrf.mxu1 }
0x57c2   :  { %v5970_v16 = vadd.f32 %v5963_v58, %v5765_v47 }
0x57c3   :  { %v5965_v5 = vpop.f32.mrf.mxu1 }
0x57c4   :  { %v5971_v23 = vadd.f32 %v5965_v5, %v5767_v61  ;;  %v6801_v21 = vmul.f32 -1.442695, %v5970_v16 }
0x57c5   :  { %v5967_v63 = vpop.f32.mrf.mxu1 }
0x57c6   :  { %7759 = vtanh.f32 %v5971_v23  ;;  %v6802_v27 = vmul.f32 -1.442695, %v5971_v23 }
0x57c7   :  { %v5968_v14 = vpop.f32.mrf.mxu1  ;;  %7761 = vpow2.f32 %v6801_v21 }
0x57d3   :  { %v7760_v50 = vpop.eup %7759 }
0x57d4   :  { %5987 = vrot.lane.b32.xlu0 %v7760_v50, %s8018_s19  ;;  %v7762_v48 = vpop.eup %7761 }
0x57d5   :  { %v5978_v36 = vadd.f32 1.0, %v7762_v48 }
0x57d7   :  { %7763 = vrcp.f32 %v5978_v36 }
0x57e4   :  { %v7764_v1 = vpop.eup %7763 }
0x57e5   :  { %v5985_v57 = vmul.f32 %v7764_v1, %v5915_v8 }
0x5846   :  { %v5988_v42 = vpop.permute.xlu0 %5987 }
0x5847   :  { %v5990_v0 = vmul.f32 %v7764_v1, %v5988_v42 }
0x5849   :  { %5992 = vrot.lane.b32.xlu1 %v5990_v0, %s8018_s19 }
0x58bb   :  { %v5993_v38 = vpop.permute.xlu1 %5992 }
0x58bc   :  { %v5995_v35 = vadd.f32 %v5993_v38, %v5985_v57 }
0x58be   :  { %7765 = vtanh.f32 %v5995_v35 }
0x58bf   :  { %7767 = vpow2.f32 %v6802_v27 }
0x58cb   :  { %v7766_v7 = vpop.eup %7765 }
0x58cc   :  { %5998 = vrot.lane.b32.xlu0 %v7766_v7, %s8018_s19  ;;  %v7768_v56 = vpop.eup %7767 }
0x58cd   :  { %v5979_v43 = vadd.f32 1.0, %v7768_v56 }
0x58cf   :  { %7769 = vrcp.f32 %v5979_v43 }
0x58dc   :  { %v7770_v9 = vpop.eup %7769 }
0x593e   :  { %v5999_v25 = vpop.permute.xlu0 %5998 }
0x593f   :  { %v6001_v29 = vmul.f32 %v7770_v9, %v5999_v25 }
0x5941   :  { %6002 = vst.msk [vmem:[#allocation4 + $0x8] sm:$0xff] %vm387_vm3, %v6001_v29  ;;  %v6005_v55 = vpack.c.bf16 %v6001_v29, %v6001_v29 }
0x5943   :  { %6803 = vmatmul.mubr.msk.bf16.vlgmr.msra.gmra.mxu0 %vm387_vm3, %v6005_v55 }
0x5944   :  { %6178 = vmatpush1.bf16.msra.mxu0 %v9474_v6  ;;  %6201 = vmatprep.mubr.bf16.mxu0 %v8024_v45 }
0x5945   :  { %6179 = vmatprep.subr.bf16.mxu0 %v9481_v22 }
0x5948   :  { %6180 = vmatpush1.bf16.msra.mxu0 %v9483_v4 }
0x5949   :  { %6181 = vmatprep.subr.bf16.mxu0 %v9487_v44 }
0x594c   :  { %6182 = vmatpush1.bf16.msra.mxu0 %v9489_v11 }
0x594d   :  { %6183 = vmatprep.subr.bf16.mxu0 %v9493_v62 }
0x5950   :  { %6184 = vmatpush1.bf16.msra.mxu0 %v9495_v40 }
0x5a03   :  { %v6043_v41 = vpop.f32.mrf.mxu0 }
0x5a04   :  { %v6050_v22 = vadd.f32 %v6043_v41, %v9534_v17  ;;  %v6243_v41 = vld [vmem:[#allocation4] sm:$0xff] }
0x5a05   :  { %v6045_v13 = vpop.f32.mrf.mxu0 }
0x5a06   :  { %v6051_v47 = vadd.f32 %v6045_v13, %v9536_v3  ;;  %v6804_v4 = vmul.f32 -1.442695, %v6050_v22 }
0x5a07   :  { %v6047_v61 = vpop.f32.mrf.mxu0 }
0x5a08   :  { %7771 = vtanh.f32 %v6051_v47  ;;  %v6805_v19 = vmul.f32 -1.442695, %v6051_v47 }
0x5a09   :  { %v6048_v6 = vpop.f32.mrf.mxu0  ;;  %7773 = vpow2.f32 %v6804_v4 }
0x5a15   :  { %v7772_v45 = vpop.eup %7771 }
0x5a16   :  { %6067 = vrot.lane.b32.xlu1 %v7772_v45, %s8018_s19  ;;  %v7774_v44 = vpop.eup %7773 }
0x5a17   :  { %v6058_v11 = vadd.f32 1.0, %v7774_v44  ;;  %v6244_v44 = vld [vmem:[#allocation4 + $0x8] sm:$0xff] }
0x5a19   :  { %7775 = vrcp.f32 %v6058_v11  ;;  %v6251_v11 = vsel %vm387_vm3, %v6244_v44, 0.0 }
0x5a26   :  { %v7776_v62 = vpop.eup %7775 }
0x5a27   :  { %v6065_v28 = vmul.f32 %v7776_v62, %v5995_v35 }
0x5a88   :  { %v6068_v30 = vpop.permute.xlu1 %6067 }
0x5a89   :  { %v6070_v40 = vmul.f32 %v7776_v62, %v6068_v30 }
0x5a8b   :  { %6072 = vrot.lane.b32.xlu0 %v6070_v40, %s8018_s19 }
0x5afd   :  { %v6073_v3 = vpop.permute.xlu0 %6072 }
0x5afe   :  { %v6075_v46 = vadd.f32 %v6073_v3, %v6065_v28 }
0x5b00   :  { %7777 = vtanh.f32 %v6075_v46 }
0x5b01   :  { %7779 = vpow2.f32 %v6805_v19 }
0x5b0d   :  { %v7778_v33 = vpop.eup %7777 }
0x5b0e   :  { %6078 = vrot.lane.b32.xlu1 %v7778_v33, %s8018_s19  ;;  %v7780_v17 = vpop.eup %7779 }
0x5b0f   :  { %v6059_v54 = vadd.f32 1.0, %v7780_v17 }
0x5b11   :  { %7781 = vrcp.f32 %v6059_v54 }
0x5b1e   :  { %v7782_v52 = vpop.eup %7781 }
0x5b80   :  { %v6079_v34 = vpop.permute.xlu1 %6078 }
0x5b81   :  { %v6081_v53 = vmul.f32 %v7782_v52, %v6079_v34 }
0x5b83   :  { %6082 = vst.msk [vmem:[#allocation4 + $0x10] sm:$0xff] %vm387_vm3, %v6081_v53  ;;  %v6085_v59 = vpack.c.bf16 %v6081_v53, %v6081_v53 }
0x5b85   :  { %6806 = vmatmul.mubr.msk.bf16.vlgmr.msra.gmra.mxu1 %vm387_vm3, %v6085_v59 }
0x5b86   :  { %7046 = vmatprep.mubr.msk.bf16.mxu1 %vm8033_vm5, %v8032_v39 }
0x5b8a   :  { %v6245_v13 = vld [vmem:[#allocation4 + $0x10] sm:$0xff] }
0x5b8b   :  { %v6254_v47 = vsel %vm387_vm3, %v6245_v13, 0.0 }
0x5c45   :  { %v6123_v32 = vpop.f32.mrf.mxu1 }
0x5c46   :  { %v6130_v18 = vadd.f32 %v6123_v32, %v9538_v12 }
0x5c47   :  { %v6125_v24 = vpop.f32.mrf.mxu1 }
0x5c48   :  { %v6131_v8 = vadd.f32 %v6125_v24, %v9540_v37  ;;  %v6807_v2 = vmul.f32 -1.442695, %v6130_v18 }
0x5c49   :  { %v6127_v26 = vpop.f32.mrf.mxu1 }
0x5c4a   :  { %7783 = vtanh.f32 %v6131_v8  ;;  %v6808_v50 = vmul.f32 -1.442695, %v6131_v8 }
0x5c4b   :  { %v6128_v49 = vpop.f32.mrf.mxu1  ;;  %7785 = vpow2.f32 %v6807_v2 }
0x5c57   :  { %v7784_v31 = vpop.eup %7783 }
0x5c58   :  { %6147 = vrot.lane.b32.xlu0 %v7784_v31, %s8018_s19  ;;  %v7786_v10 = vpop.eup %7785 }
0x5c59   :  { %v6138_v15 = vadd.f32 1.0, %v7786_v10 }
0x5c5b   :  { %7787 = vrcp.f32 %v6138_v15 }
0x5c68   :  { %v7788_v60 = vpop.eup %7787 }
0x5c69   :  { %v6145_v23 = vmul.f32 %v7788_v60, %v6075_v46 }
0x5cca   :  { %v6148_v58 = vpop.permute.xlu0 %6147 }
0x5ccb   :  { %v6150_v5 = vmul.f32 %v7788_v60, %v6148_v58 }
0x5ccd   :  { %6152 = vrot.lane.b32.xlu1 %v6150_v5, %s8018_s19 }
0x5d3f   :  { %v6153_v37 = vpop.permute.xlu1 %6152 }
0x5d40   :  { %v6155_v63 = vadd.f32 %v6153_v37, %v6145_v23  ;;  %v7281_v37 = vld [vmem:[#allocation16 + $0x38] sm:$0xff]  }
0x5d41   :  { %7039 = vmatpush3.bf16.msra.mxu1 %v7281_v37 }
0x5d42   :  { %7789 = vtanh.f32 %v6155_v63  ;;  %7040 = vmatprep.subr.bf16.mxu1 %v8032_v39 }
0x5d43   :  { %7791 = vpow2.f32 %v6808_v50  ;;  %v7284_v50 = vld [vmem:[#allocation16 + $0x20] sm:$0xff]  }
0x5d4f   :  { %v7790_v14 = vpop.eup %7789 }
0x5d50   :  { %6158 = vrot.lane.b32.xlu0 %v7790_v14, %s8018_s19  ;;  %v7792_v12 = vpop.eup %7791  ;;  %v7283_v14 = vld [vmem:[#allocation16 + $0x28] sm:$0xff]  }
0x5d51   :  { %v6139_v16 = vadd.f32 1.0, %v7792_v12 }
0x5d53   :  { %7793 = vrcp.f32 %v6139_v16 }
0x5d60   :  { %v7794_v21 = vpop.eup %7793 }
0x5dc2   :  { %v6159_v48 = vpop.permute.xlu0 %6158 }
0x5dc3   :  { %v6161_v36 = vmul.f32 %v7794_v21, %v6159_v48 }
0x5dc5   :  { %6162 = vst.msk [vmem:[#allocation4 + $0x18] sm:$0xff] %vm387_vm3, %v6161_v36  ;;  %v6165_v1 = vpack.c.bf16 %v6161_v36, %v6161_v36 }
0x5dc7   :  { %6809 = vmatmul.mubr.msk.bf16.vlgmr.msra.gmra.mxu0 %vm387_vm3, %v6165_v1 }
0x5dcc   :  { %v6246_v61 = vld [vmem:[#allocation4 + $0x18] sm:$0xff] }
0x5e87   :  { %v6203_v42 = vpop.f32.mrf.mxu0 }
0x5e88   :  { %v6210_v27 = vadd.f32 %v6203_v42, %v9542_v51  ;;  %v6257_v51 = vsel %vm387_vm3, %v6246_v61, 0.0 }
0x5e89   :  { %v6205_v0 = vpop.f32.mrf.mxu0 }
0x5e8a   :  { %v6211_v57 = vadd.f32 %v6205_v0, %v9545_v20  ;;  %v6810_v56 = vmul.f32 -1.442695, %v6210_v27  ;;  %v6248_v20 = vsel %vm387_vm3, %v6243_v41, 0.0 }
0x5e8b   :  { %v6207_v38 = vpop.f32.mrf.mxu0 }
0x5e8c   :  { %7795 = vtanh.f32 %v6211_v57  ;;  %v6811_v52 = vmul.f32 -1.442695, %v6211_v57 }
0x5e8d   :  { %v6208_v35 = vpop.f32.mrf.mxu0  ;;  %7797 = vpow2.f32 %v6810_v56 }
0x5e99   :  { %v7796_v7 = vpop.eup %7795 }
0x5e9a   :  { %6227 = vrot.lane.b32.xlu1 %v7796_v7, %s8018_s19  ;;  %v7798_v43 = vpop.eup %7797 }
0x5e9b   :  { %v6218_v9 = vadd.f32 1.0, %v7798_v43 }
0x5e9d   :  { %7799 = vrcp.f32 %v6218_v9 }
0x5eaa   :  { %v7800_v25 = vpop.eup %7799 }
0x5eab   :  { %v6225_v6 = vmul.f32 %v7800_v25, %v6155_v63  ;;  %v7282_v63 = vld [vmem:[#allocation16 + $0x30] sm:$0xff]  }
0x5eac   :  { %7041 = vmatpush3.bf16.msra.mxu1 %v7282_v63 }
0x5ead   :  { %7042 = vmatprep.subr.bf16.mxu1 %v8032_v39 }
0x5eb0   :  { %7043 = vmatpush3.bf16.msra.mxu1 %v7283_v14 }
0x5eb1   :  { %7044 = vmatprep.subr.bf16.mxu1 %v8032_v39 }
0x5eb4   :  { %7045 = vmatpush3.bf16.msra.mxu1 %v7284_v50 }
0x5f0c   :  { %v6228_v29 = vpop.permute.xlu1 %6227 }
0x5f0d   :  { %v6230_v55 = vmul.f32 %v7800_v25, %v6228_v29 }
0x5f0f   :  { %6232 = vrot.lane.b32.xlu0 %v6230_v55, %s8018_s19 }
0x5f2e   :  { %6249 = vadd.xlane.f32.xlu0 %v6248_v20 }
0x5f32   :  { %6255 = vadd.xlane.f32.xlu0 %v6254_v47 }
0x5f36   :  { %6258 = vadd.xlane.f32.xlu0 %v6257_v51  ;;  %v6813_v51 = vld [vmem:[#allocation15 + $0x1] ss:$0 sm:$0xff] }
0x5f81   :  { %v6233_v45 = vpop.permute.xlu0 %6232 }
0x5f82   :  { %v6235_v22 = vadd.f32 %v6233_v45, %v6225_v6 }
0x5f84   :  { %7801 = vtanh.f32 %v6235_v22 }
0x5f85   :  { %7803 = vpow2.f32 %v6811_v52 }
0x5f91   :  { %v7802_v4 = vpop.eup %7801 }
0x5f92   :  { %6238 = vrot.lane.b32.xlu1 %v7802_v4, %s8018_s19  ;;  %v7804_v34 = vpop.eup %7803 }
0x5f93   :  { %v6219_v53 = vadd.f32 1.0, %v7804_v34 }
0x5f95   :  { %7805 = vrcp.f32 %v6219_v53 }
0x5fa2   :  { %v7806_v59 = vpop.eup %7805 }
0x5fb6   :  { %6252 = vadd.xlane.f32.xlu1 %v6251_v11 }
0x5fb7   :  { %v6250_v62 = vpop.xlane.xlu0 %6249 }
0x5fb8   :  { %v6263_v30 = vmul.f32 0.015625, %v6250_v62 }
0x5fba   :  { %v9599_v40 = vsub.f32 %v6243_v41, %v6263_v30  ;;  %v6812_v41 = vld [vmem:[#allocation13 + $0x1] ss:$0 sm:$0xff] }
0x5fbb   :  { %v6256_v28 = vpop.xlane.xlu0 %6255 }
0x5fbc   :  { %v6265_v3 = vmul.f32 0.015625, %v6256_v28  ;;  %v6273_v46 = vmul.f32 %v9599_v40, %v9599_v40 }
0x5fbe   :  { %v9603_v33 = vsub.f32 %v6245_v13, %v6265_v3  ;;  %v6278_v19 = vsel %vm387_vm3, %v6273_v46, 0.0 }
0x5fbf   :  { %6279 = vadd.xlane.f32.xlu0 %v6278_v19  ;;  %v6259_v49 = vpop.xlane.xlu0 %6258 }
0x5fc0   :  { %v6275_v17 = vmul.f32 %v9603_v33, %v9603_v33  ;;  %v6266_v31 = vmul.f32 0.015625, %v6259_v49 }
0x5fc2   :  { %v6284_v54 = vsel %vm387_vm3, %v6275_v17, 0.0  ;;  %v6271_v10 = vsub.f32 %v6246_v61, %v6266_v31 }
0x5fc3   :  { %6285 = vadd.xlane.f32.xlu0 %v6284_v54 }
0x5fc4   :  { %v6276_v5 = vmul.f32 %v6271_v10, %v6271_v10 }
0x5fc6   :  { %v6287_v23 = vsel %vm387_vm3, %v6276_v5, 0.0 }
0x6004   :  { %v6239_v32 = vpop.permute.xlu1 %6238 }
0x6005   :  { %v6241_v24 = vmul.f32 %v7806_v59, %v6239_v32  ;;  %v6814_v32 = vld [vmem:[#allocation18 + $0x1] ss:$0 sm:$0xff] }
0x6007   :  { %6242 = vst.msk [vmem:[#allocation4 + $0x20] sm:$0xff] %vm387_vm3, %v6241_v24 }
0x600e   :  { %v6247_v8 = vld [vmem:[#allocation4 + $0x20] sm:$0xff] }
0x600f   :  { %v6260_v26 = vsel %vm387_vm3, %v6247_v8, 0.0 }
0x6010   :  { %6261 = vadd.xlane.f32.xlu1 %v6260_v26 }
0x603f   :  { %v6253_v18 = vpop.xlane.xlu1 %6252 }
0x6040   :  { %v6264_v2 = vmul.f32 0.015625, %v6253_v18 }
0x6042   :  { %v6269_v15 = vsub.f32 %v6244_v44, %v6264_v2 }
0x6044   :  { %v6274_v60 = vmul.f32 %v6269_v15, %v6269_v15 }
0x6046   :  { %v6281_v58 = vsel %vm387_vm3, %v6274_v60, 0.0 }
0x6047   :  { %6282 = vadd.xlane.f32.xlu1 %v6281_v58 }
0x6048   :  { %v6280_v1 = vpop.xlane.xlu0 %6279 }
0x6049   :  { %v6293_v42 = vmul.f32 0.015625, %v6280_v1 }
0x604b   :  { %6288 = vadd.xlane.f32.xlu1 %v6287_v23  ;;  %v6298_v0 = vadd.f32 1e-05, %v6293_v42 }
0x604c   :  { %v6286_v57 = vpop.xlane.xlu0 %6285 }
0x604d   :  { %7807 = vrsqrt.f32 %v6298_v0  ;;  %v6295_v38 = vmul.f32 0.015625, %v6286_v57 }
0x604f   :  { %v6300_v27 = vadd.f32 1e-05, %v6295_v38 }
0x605a   :  { %v7808_v29 = vpop.eup %7807 }
0x605b   :  { %v6308_v55 = vmul.f32 %v7808_v29, %v9599_v40 }
0x605d   :  { %v6321_v13 = vmul.f32 %v6812_v41, %v6308_v55 }
0x605f   :  { %v6334_v44 = vadd.f32 %v6813_v51, %v6321_v13 }
0x6099   :  { %v6262_v12 = vpop.xlane.xlu1 %6261 }
0x609a   :  { %v6267_v16 = vmul.f32 0.015625, %v6262_v12 }
0x609c   :  { %v6272_v21 = vsub.f32 %v6247_v8, %v6267_v16 }
0x609e   :  { %v6277_v48 = vmul.f32 %v6272_v21, %v6272_v21 }
0x60a0   :  { %v6290_v36 = vsel %vm387_vm3, %v6277_v48, 0.0 }
0x60a1   :  { %6291 = vadd.xlane.f32.xlu0 %v6290_v36 }
0x60d0   :  { %v6283_v35 = vpop.xlane.xlu1 %6282 }
0x60d1   :  { %v6294_v7 = vmul.f32 0.015625, %v6283_v35 }
0x60d3   :  { %v6299_v56 = vadd.f32 1e-05, %v6294_v7 }
0x60d4   :  { %v6289_v43 = vpop.xlane.xlu1 %6288 }
0x60d5   :  { %7809 = vrsqrt.f32 %v6299_v56  ;;  %v6296_v9 = vmul.f32 0.015625, %v6289_v43 }
0x60d6   :  { %7811 = vrsqrt.f32 %v6300_v27 }
0x60d7   :  { %v6301_v25 = vadd.f32 1e-05, %v6296_v9 }
0x60d9   :  { %7813 = vrsqrt.f32 %v6301_v25 }
0x60e2   :  { %v7810_v20 = vpop.eup %7809 }
0x60e3   :  { %v6309_v47 = vmul.f32 %v7810_v20, %v6269_v15  ;;  %v7812_v61 = vpop.eup %7811 }
0x60e4   :  { %v6310_v22 = vmul.f32 %v7812_v61, %v9603_v33 }
0x60e5   :  { %v6322_v6 = vmul.f32 %v6812_v41, %v6309_v47 }
0x60e6   :  { %v7814_v45 = vpop.eup %7813  ;;  %v6323_v28 = vmul.f32 %v6812_v41, %v6310_v22 }
0x60e7   :  { %v6311_v4 = vmul.f32 %v7814_v45, %v6271_v10  ;;  %v6335_v11 = vadd.f32 %v6813_v51, %v6322_v6 }
0x60e8   :  { %v6336_v3 = vadd.f32 %v6813_v51, %v6323_v28 }
0x60e9   :  { %v6348_v62 = vpack.c.bf16 %v6335_v11, %v6334_v44  ;;  %v6324_v30 = vmul.f32 %v6812_v41, %v6311_v4 }
0x60eb   :  { %7047 = vmatmul.mubr.msk.bf16.vlgmr.msra.gmra.mxu1 %vm387_vm3, %v6348_v62  ;;  %v6337_v40 = vadd.f32 %v6813_v51, %v6324_v30 }
0x60ec   :  { %7050 = vmatprep.mubr.msk.bf16.mxu1 %vm8033_vm5, %v8032_v39 }
0x60ed   :  { %v6349_v46 = vpack.c.bf16 %v6337_v40, %v6336_v3 }
0x60f3   :  { %7051 = vmatmul.mubr.msk.bf16.gmra.mxu1 %vm387_vm3, %v6349_v46 }
0x60f4   :  { %7054 = vmatprep.mubr.msk.bf16.mxu1 %vm8033_vm5, %v8032_v39 }
0x612a   :  { %v6292_v33 = vpop.xlane.xlu0 %6291 }
0x612b   :  { %v6297_v19 = vmul.f32 0.015625, %v6292_v33 }
0x612d   :  { %v6302_v17 = vadd.f32 1e-05, %v6297_v19 }
0x612f   :  { %7815 = vrsqrt.f32 %v6302_v17 }
0x613c   :  { %v7816_v54 = vpop.eup %7815 }
0x613d   :  { %v6312_v52 = vmul.f32 %v7816_v54, %v6272_v21 }
0x613f   :  { %v6325_v34 = vmul.f32 %v6812_v41, %v6312_v52 }
0x6141   :  { %v6338_v53 = vadd.f32 %v6813_v51, %v6325_v34 }
0x6143   :  { %v6350_v59 = vpack.c.bf16 %v6338_v53, %v6338_v53 }
0x6145   :  { %7055 = vmatmul.mubr.msk.bf16.gmra.mxu1 %vm387_vm3, %v6350_v59 }
0x61ab   :  { %v6426_v24 = vpop.f32.mrf.mxu1 }
0x61ac   :  { %v6427_v8 = vadd.f32 %v6814_v32, %v6426_v24 }
0x61ad   :  { %v7048_v26 = vpop.f32.mrf.mxu1 }
0x61ae   :  { %6822 = vst [vmem:[%s9658_s17 + $0x28] sm:$0xff] %v6427_v8 }
0x61af   :  { %v6429_v39 = vpop.f32.mrf.mxu1 }
0x61b0   :  { %v6430_v49 = vadd.f32 %v6814_v32, %v6429_v39 }
0x61b1   :  { %v7049_v31 = vpop.f32.mrf.mxu1 }
0x61b2   :  { %6823 = vst [vmem:[%s9658_s17 + $0x30] sm:$0xff] %v6430_v49 }
0x61b3   :  { %v6434_v18 = vpop.f32.mrf.mxu1 }
0x61b4   :  { %v6435_v2 = vadd.f32 %v6814_v32, %v6434_v18 }
0x61b5   :  { %v7052_v10 = vpop.f32.mrf.mxu1 }
0x61b6   :  { %6824 = vst [vmem:[%s9658_s17 + $0x38] sm:$0xff] %v6435_v2 }
0x61b7   :  { %v6437_v15 = vpop.f32.mrf.mxu1 }
0x61b8   :  { %v6438_v60 = vadd.f32 %v6814_v32, %v6437_v15 }
0x61b9   :  { %v7053_v58 = vpop.f32.mrf.mxu1 }
0x61ba   :  { %6825 = vst [vmem:[%s9658_s17 + $0x40] sm:$0xff] %v6438_v60 }
0x6205   :  { %v6442_v5 = vpop.f32.mrf.mxu1 }
0x6206   :  { %v6443_v23 = vadd.f32 %v6814_v32, %v6442_v5 }
0x6207   :  { %v7056_v37 = vpop.f32.mrf.mxu1 }
0x6208   :  { %6826 = vst [vmem:[%s9658_s17 + $0x48] sm:$0xff] %v6443_v23 }
0x6209   :  { %v6445_v63 = vpop.f32.mrf.mxu1 }
0x620b   :  { %v7057_v14 = vpop.f32.mrf.mxu1 }
0x620c   :  { %6462 = vsyncpa [#allocation6], 1 }
0x620d   :  { %6463 = vsyncpa [#allocation8], 1 }
0x620e   :  { %6464 = vsyncpa [#allocation11], 1 }
0x620f   :  { %6465 = vsyncpa [#allocation14], 1 }
0x6210   :  { %6466 = vsyncpa [#allocation17], 1 }

</bundles_post_ra>
